<compile_context>
chip_gen: v6e
topology: v6e:2x2x1
jax: 0.10.0
libtpu: 0.0.40
codegen_flags: <defaults>
</compile_context>

<pallas_src>
import functools

import jax
import jax.numpy as jnp
import numpy as np
from jax import lax
from jax.experimental import pallas as pl
from jax.experimental.pallas import tpu as pltpu


def _round_up(x, m):
    return (x + m - 1) // m * m


# ---------------------------------------------------------------------------
# Fused kernel: embedding gather -> n_layers x LSTM -> fused FC -> log_softmax
# ---------------------------------------------------------------------------
def _make_lstm_kernel(*, n_layers, T, Tc, B_tile, Bp, Dmax, Hp, NP,
                      n_classes, wd, unroll_time, unroll_gather):
    """Kernel factory.

    Ref layout (all padded, per batch tile):
      tok_ref : SMEM (B*T,) int32               (scalar-prefetched token ids)
      emb_ref : VMEM (V, Dmax)                  (padded table, resident)
      per layer: w_ih (Dmax, 4*Hp), w_hh (Hp, 4*Hp), b (1, 4*Hp)      [VMEM]
      fc_w    : (T, Hp, NP), fc_b : (1, NP)                            [VMEM]
      out_ref : (B_tile, n_classes)
      scratch : x_buf (T*Bp, Dmax), z_buf (Tc*Bp, 4*Hp) f32,
                h_buf (Bp, Hp) f32, c_buf (Bp, Hp) f32, acc_buf (Bp, NP) f32
    """

    def kernel(*refs):
        tok_ref = refs[0]
        emb_ref = refs[1]
        w_refs = refs[2:2 + 3 * n_layers]
        fc_w_ref = refs[2 + 3 * n_layers]
        fc_b_ref = refs[3 + 3 * n_layers]
        out_ref = refs[4 + 3 * n_layers]
        x_buf, z_buf, h_buf, c_buf, acc_buf = refs[5 + 3 * n_layers:]

        base = pl.program_id(0) * B_tile

        # ---- embedding: VMEM-resident table, dynamic row reads (no DMAs) ----
        x_buf[...] = jnp.zeros_like(x_buf)       # also clears batch-pad rows
        if unroll_gather:
            for b in range(B_tile):
                for t in range(T):
                    tok = tok_ref[(base + b) * T + t]
                    x_buf[pl.ds(t * Bp + b, 1), :] = emb_ref[pl.ds(tok, 1), :]
        else:
            # TODO(synk): for very large vocabularies, dedupe token ids in the
            # wrapper and stream only unique rows from HBM instead.
            def gather_one(idx, carry):
                t = idx // B_tile
                b = idx % B_tile
                tok = tok_ref[(base + b) * T + t]
                x_buf[pl.ds(t * Bp + b, 1), :] = emb_ref[pl.ds(tok, 1), :]
                return carry
            lax.fori_loop(0, T * B_tile, gather_one, 0)

        acc_buf[...] = jnp.zeros_like(acc_buf)   # fused-FC accumulator

        # ---- LSTM stack: time-major, fused across layers in VMEM ------------
        for layer in range(n_layers):
            w_ih_ref, w_hh_ref, b_ref = w_refs[3 * layer:3 * layer + 3]
            last = layer == n_layers - 1
            w_ih = w_ih_ref[...]
            w_hh = w_hh_ref[...]
            bias = b_ref[...]
            h_buf[...] = jnp.zeros_like(h_buf)
            c_buf[...] = jnp.zeros_like(c_buf)

            for t0 in range(0, T, Tc):           # static time chunking
                tc = min(Tc, T - t0)
                rows = tc * Bp

                # Hoisted input projection for this chunk: ONE MXU matmul
                # (bias folded in here, not re-added every step).
                z_buf[pl.ds(0, rows), :] = (
                    jnp.dot(x_buf[pl.ds(t0 * Bp, rows), :], w_ih,
                            preferred_element_type=jnp.float32) + bias)

                def step(t, carry, *, _t0=t0):
                    if isinstance(t, int):
                        zrow = (t - _t0) * Bp                 # static
                        xrow = t * Bp
                    else:
                        zrow = pl.multiple_of((t - _t0) * Bp, Bp)
                        xrow = pl.multiple_of(t * Bp, Bp)
                    h = h_buf[...]
                    c = c_buf[...]
                    z = z_buf[pl.ds(zrow, Bp), :] + jnp.dot(
                        h.astype(wd), w_hh,
                        preferred_element_type=jnp.float32)
                    # PyTorch gate order: i, f, g, o — each 128-lane aligned.
                    i_g = jax.nn.sigmoid(z[:, 0 * Hp:1 * Hp])
                    f_g = jax.nn.sigmoid(z[:, 1 * Hp:2 * Hp])
                    g_g = jnp.tanh(z[:, 2 * Hp:3 * Hp])
                    o_g = jax.nn.sigmoid(z[:, 3 * Hp:4 * Hp])
                    c_new = f_g * c + i_g * g_g
                    h_new = o_g * jnp.tanh(c_new)
                    h_buf[...] = h_new
                    c_buf[...] = c_new
                    if last:
                        # FC fused into the recurrence: no writeback pass.
                        acc_buf[...] += jnp.dot(
                            h_new.astype(wd), fc_w_ref[t],
                            preferred_element_type=jnp.float32)
                    else:
                        if Dmax == Hp:
                            x_buf[pl.ds(xrow, Bp), :] = h_new.astype(wd)
                        else:
                            # lane-aligned partial store; stale cols beyond Hp
                            # meet zero weight rows in the next layer.
                            x_buf[pl.ds(xrow, Bp), 0:Hp] = h_new.astype(wd)
                    return carry

                if unroll_time:
                    for t in range(t0, t0 + tc):
                        step(t, 0)
                else:
                    lax.fori_loop(t0, t0 + tc, step, 0)

        # ---- log_softmax epilogue -------------------------------------------
        logits = (acc_buf[...][:B_tile, :n_classes]
                  + fc_b_ref[...][:, :n_classes])
        m = jnp.max(logits, axis=-1, keepdims=True)
        shifted = logits - m
        lse = jnp.log(jnp.sum(jnp.exp(shifted), axis=-1, keepdims=True))
        out_ref[...] = (shifted - lse).astype(out_ref.dtype)

    return kernel


def _full_spec(arr):
    """Whole-array VMEM BlockSpec (index map gets (grid_i, tok_prefetch_ref))."""
    nd = arr.ndim
    return pl.BlockSpec(arr.shape, lambda i, tok, _nd=nd: (0,) * _nd)


def _pick_vmem_limit_bytes():
    """Generation-aware VMEM budget: ~51 MiB on v7x, capped at 100 MiB on
    v5e/v6e, 48 MiB fallback if the query is unavailable."""
    try:
        cap = int(pltpu.get_tpu_info().vmem_capacity_bytes)
        return max(32 << 20, min(int(cap * 0.8), 100 << 20))
    except Exception:
        return 48 << 20


# ---------------------------------------------------------------------------
# Model forward (pads params into kernel layout, launches the fused kernel)
# ---------------------------------------------------------------------------
@functools.partial(jax.jit,
                   static_argnames=("batch_tile", "time_chunk", "compute_dtype"))
def lstm_model_forward(params, tokens, *, batch_tile=None, time_chunk=None,
                       compute_dtype=jnp.float32):
    emb = params["embedding"]                    # (V, E)
    layers = params["lstm"]                      # [{w_ih (Din,4H), w_hh (H,4H), b (1,4H)}]
    fc_w = params["fc_w"]                        # (T*H, n_classes)
    fc_b = params["fc_b"]                        # (1, n_classes)

    B, T = tokens.shape
    V, E = emb.shape
    H = layers[0]["w_hh"].shape[0]
    n_layers = len(layers)
    n_classes = fc_w.shape[1]

    # ---- lane/sublane-dense padded geometry (numerically exact) -------------
    Hp = _round_up(H, 128)                       # per-gate width, lane aligned
    Dmax = max(_round_up(E, 128), Hp)            # per-layer input width
    NP = _round_up(n_classes, 128)               # lane-dense FC output
    B_tile = B if batch_tile is None else int(batch_tile)   # 1 tile by default
    assert B % B_tile == 0, "batch_tile must divide batch"
    Bp = _round_up(B_tile, 8)                    # sublane-aligned row blocks

    # Time chunk for the hoisted projection's f32 buffer (VMEM budget).
    if time_chunk is None:
        z_chunk_budget = 8 << 20                 # bytes
        Tc = max(1, min(T, z_chunk_budget // max(1, Bp * 4 * Hp * 4)))
    else:
        Tc = max(1, min(int(time_chunk), T))

    unroll_time = T <= 32                        # short fixed trip count
    unroll_gather = T * B_tile <= 256

    wd = compute_dtype                           # bf16 on v6e/v7x if desired
    f32 = jnp.float32

    # ---- pad parameters into kernel layout (tiny ops, under jit) ------------
    emb_p = jnp.zeros((V, Dmax), wd).at[:, :E].set(emb.astype(wd))

    flat_w = []
    for lyr in layers:
        d_in = lyr["w_ih"].shape[0]
        w_ih = jnp.zeros((Dmax, 4 * Hp), wd)
        w_hh = jnp.zeros((Hp, 4 * Hp), wd)
        b = jnp.zeros((1, 4 * Hp), f32)
        for g in range(4):                       # scatter gates i, f, g, o
            w_ih = w_ih.at[:d_in, g * Hp:g * Hp + H].set(
                lyr["w_ih"][:, g * H:(g + 1) * H].astype(wd))
            w_hh = w_hh.at[:H, g * Hp:g * Hp + H].set(
                lyr["w_hh"][:, g * H:(g + 1) * H].astype(wd))
            b = b.at[:, g * Hp:g * Hp + H].set(
                lyr["b"][:, g * H:(g + 1) * H].astype(f32))
        flat_w += [w_ih, w_hh, b]

    fc_w_r = fc_w.reshape(T, H, n_classes)
    fc_w_p = jnp.zeros((T, Hp, NP), wd).at[:, :H, :n_classes].set(
        fc_w_r.astype(wd))
    fc_b_p = jnp.zeros((1, NP), f32).at[:, :n_classes].set(fc_b.astype(f32))

    kernel = _make_lstm_kernel(
        n_layers=n_layers, T=T, Tc=Tc, B_tile=B_tile, Bp=Bp, Dmax=Dmax,
        Hp=Hp, NP=NP, n_classes=n_classes, wd=wd,
        unroll_time=unroll_time, unroll_gather=unroll_gather)

    grid_spec = pltpu.PrefetchScalarGridSpec(
        num_scalar_prefetch=1,                   # flat token ids -> SMEM
        grid=(B // B_tile,),                     # batch tiles (parallel axis)
        in_specs=[_full_spec(emb_p)]             # table VMEM-resident
        + [_full_spec(a) for a in flat_w]
        + [_full_spec(fc_w_p), _full_spec(fc_b_p)],
        out_specs=pl.BlockSpec((B_tile, n_classes), lambda i, tok: (i, 0)),
        scratch_shapes=[
            pltpu.VMEM((T * Bp, Dmax), wd),          # time-major activations
            pltpu.VMEM((Tc * Bp, 4 * Hp), f32),      # hoisted projection chunk
            pltpu.VMEM((Bp, Hp), f32),               # h state
            pltpu.VMEM((Bp, Hp), f32),               # c state
            pltpu.VMEM((Bp, NP), f32),               # fused FC accumulator
        ],
    )

    return pl.pallas_call(
        kernel,
        out_shape=jax.ShapeDtypeStruct((B, n_classes), jnp.float32),
        grid_spec=grid_spec,
        compiler_params=pltpu.CompilerParams(
            dimension_semantics=("parallel",),   # batch tiles across TCs (v7x)
            vmem_limit_bytes=_pick_vmem_limit_bytes(),
        ),
    )(tokens.reshape(B * T).astype(jnp.int32), emb_p, *flat_w, fc_w_p, fc_b_p)


# ---------------------------------------------------------------------------
# Parameter init (PyTorch-like layout) and pure-JAX reference
# ---------------------------------------------------------------------------
def init_params(key, vocab_size, embedding_dim, hidden_dim, n_layers, seq_len):
    params = {}
    k = key
    k, sub = jax.random.split(k)
    params["embedding"] = jax.random.normal(sub, (vocab_size, embedding_dim),
                                            jnp.float32) * 0.1
    bound = 1.0 / np.sqrt(hidden_dim)
    layers = []
    for layer in range(n_layers):
        d_in = embedding_dim if layer == 0 else hidden_dim
        k, k1, k2, k3, k4 = jax.random.split(k, 5)
        # Stored transposed for right-multiplication: (D_in, 4H), (H, 4H)
        w_ih = jax.random.uniform(k1, (d_in, 4 * hidden_dim), jnp.float32,
                                  -bound, bound)
        w_hh = jax.random.uniform(k2, (hidden_dim, 4 * hidden_dim), jnp.float32,
                                  -bound, bound)
        b_ih = jax.random.uniform(k3, (4 * hidden_dim,), jnp.float32, -bound, bound)
        b_hh = jax.random.uniform(k4, (4 * hidden_dim,), jnp.float32, -bound, bound)
        layers.append({"w_ih": w_ih, "w_hh": w_hh,
                       "b": (b_ih + b_hh).reshape(1, 4 * hidden_dim)})
    params["lstm"] = layers
    k, k1, k2 = jax.random.split(k, 3)
    fc_bound = 1.0 / np.sqrt(seq_len * hidden_dim)
    params["fc_w"] = jax.random.uniform(k1, (seq_len * hidden_dim, 2), jnp.float32,
                                        -fc_bound, fc_bound)
    params["fc_b"] = jax.random.uniform(k2, (1, 2), jnp.float32,
                                        -fc_bound, fc_bound)
    return params


def reference_forward(params, tokens):
    x = params["embedding"][tokens]
    for layer in params["lstm"]:
        B, T, _ = x.shape
        H = layer["w_hh"].shape[0]
        h = jnp.zeros((B, H), jnp.float32)
        c = jnp.zeros((B, H), jnp.float32)
        outs = []
        for t in range(T):
            z = x[:, t, :] @ layer["w_ih"] + h @ layer["w_hh"] + layer["b"]
            i_g = jax.nn.sigmoid(z[:, 0 * H:1 * H])
            f_g = jax.nn.sigmoid(z[:, 1 * H:2 * H])
            g_g = jnp.tanh(z[:, 2 * H:3 * H])
            o_g = jax.nn.sigmoid(z[:, 3 * H:4 * H])
            c = f_g * c + i_g * g_g
            h = o_g * jnp.tanh(c)
            outs.append(h)
        x = jnp.stack(outs, axis=1)
    B = x.shape[0]
    logits = x.reshape(B, -1) @ params["fc_w"] + params["fc_b"]
    return jax.nn.log_softmax(logits, axis=-1)


if __name__ == "__main__":
    VOCAB, EMB, HID, LAYERS, SEQ, BATCH = 32, 16, 32, 2, 8, 2

    key = jax.random.PRNGKey(0)
    k_tok, k_param = jax.random.split(key)
    tokens = jax.random.randint(k_tok, (BATCH, SEQ), 0, VOCAB, dtype=jnp.int32)
    params = init_params(k_param, VOCAB, EMB, HID, LAYERS, SEQ)

    out = lstm_model_forward(params, tokens)
    out = jax.block_until_ready(out)

    ref = reference_forward(params, tokens)
    np.testing.assert_allclose(np.asarray(out), np.asarray(ref),
                               rtol=2e-3, atol=2e-3)
    assert out.shape == (BATCH, 2)
    print("KERNEL_OK")
</pallas_src>

<mosaic_0001>
module attributes {stable_mosaic.version = 11 : i64} {
  func.func @kernel(%arg0: i32, %arg1: memref<16xi32, #tpu.memory_space<smem>>, %arg2: memref<32x128xf32, #tpu.memory_space<vmem>>, %arg3: memref<128x512xf32, #tpu.memory_space<vmem>>, %arg4: memref<128x512xf32, #tpu.memory_space<vmem>>, %arg5: memref<1x512xf32, #tpu.memory_space<vmem>>, %arg6: memref<128x512xf32, #tpu.memory_space<vmem>>, %arg7: memref<128x512xf32, #tpu.memory_space<vmem>>, %arg8: memref<1x512xf32, #tpu.memory_space<vmem>>, %arg9: memref<8x128x128xf32, #tpu.memory_space<vmem>>, %arg10: memref<1x128xf32, #tpu.memory_space<vmem>>, %arg11: memref<2x2xf32, #tpu.memory_space<vmem>>, %arg12: memref<64x128xf32, #tpu.memory_space<vmem>>, %arg13: memref<64x512xf32, #tpu.memory_space<vmem>>, %arg14: memref<8x128xf32, #tpu.memory_space<vmem>>, %arg15: memref<8x128xf32, #tpu.memory_space<vmem>>, %arg16: memref<8x128xf32, #tpu.memory_space<vmem>>) attributes {dimension_semantics = [#tpu.dimension_semantics<parallel>], iteration_bounds = array<i64: 1>, scalar_prefetch = 1 : i64, scratch_operands = 5 : i64, tpu.core_type = #tpu.core_type<tc>, window_params = [{pipeline_mode = #tpu.pipeline_mode<synchronous>, transform_indices = @transform_0, window_bounds = array<i64: 32, 128>}, {pipeline_mode = #tpu.pipeline_mode<synchronous>, transform_indices = @transform_1, window_bounds = array<i64: 128, 512>}, {pipeline_mode = #tpu.pipeline_mode<synchronous>, transform_indices = @transform_2, window_bounds = array<i64: 128, 512>}, {pipeline_mode = #tpu.pipeline_mode<synchronous>, transform_indices = @transform_3, window_bounds = array<i64: 1, 512>}, {pipeline_mode = #tpu.pipeline_mode<synchronous>, transform_indices = @transform_4, window_bounds = array<i64: 128, 512>}, {pipeline_mode = #tpu.pipeline_mode<synchronous>, transform_indices = @transform_5, window_bounds = array<i64: 128, 512>}, {pipeline_mode = #tpu.pipeline_mode<synchronous>, transform_indices = @transform_6, window_bounds = array<i64: 1, 512>}, {pipeline_mode = #tpu.pipeline_mode<synchronous>, transform_indices = @transform_7, window_bounds = array<i64: 8, 128, 128>}, {pipeline_mode = #tpu.pipeline_mode<synchronous>, transform_indices = @transform_8, window_bounds = array<i64: 1, 128>}, {transform_indices = @transform_9, window_bounds = array<i64: 2, 2>}]} {
    %c2_i32 = arith.constant 2 : i32
    %0 = arith.muli %arg0, %c2_i32 : i32
    %cst = arith.constant 0.000000e+00 : f32
    %1 = vector.broadcast %cst : f32 to vector<64x128xf32>
    %c0 = arith.constant 0 : index
    %c0_0 = arith.constant 0 : index
    %2 = vector.load %arg12[%c0, %c0_0] : memref<64x128xf32, #tpu.memory_space<vmem>>, vector<64x128xf32>
    tpu.vector_store %arg12[%c0, %c0_0], %1 {strides = array<i32>} : memref<64x128xf32, #tpu.memory_space<vmem>>, vector<64x128xf32>,
    %c0_i32 = arith.constant 0 : i32
    %3 = arith.addi %0, %c0_i32 : i32
    %c8_i32 = arith.constant 8 : i32
    %4 = arith.muli %3, %c8_i32 : i32
    %c0_i32_1 = arith.constant 0 : i32
    %5 = arith.addi %4, %c0_i32_1 : i32
    %6 = arith.index_cast %5 : i32 to index
    %7 = memref.load %arg1[%6] : memref<16xi32, #tpu.memory_space<smem>>
    %8 = arith.index_cast %7 : i32 to index
    %c0_2 = arith.constant 0 : index
    %9 = vector.load %arg2[%8, %c0_2] : memref<32x128xf32, #tpu.memory_space<vmem>>, vector<1x128xf32>
    %c0_3 = arith.constant 0 : index
    %c0_4 = arith.constant 0 : index
    %10 = vector.load %arg12[%c0_3, %c0_4] : memref<64x128xf32, #tpu.memory_space<vmem>>, vector<1x128xf32>
    tpu.vector_store %arg12[%c0_3, %c0_4], %9 {strides = array<i32>} : memref<64x128xf32, #tpu.memory_space<vmem>>, vector<1x128xf32>,
    %c0_i32_5 = arith.constant 0 : i32
    %11 = arith.addi %0, %c0_i32_5 : i32
    %c8_i32_6 = arith.constant 8 : i32
    %12 = arith.muli %11, %c8_i32_6 : i32
    %c1_i32 = arith.constant 1 : i32
    %13 = arith.addi %12, %c1_i32 : i32
    %14 = arith.index_cast %13 : i32 to index
    %15 = memref.load %arg1[%14] : memref<16xi32, #tpu.memory_space<smem>>
    %16 = arith.index_cast %15 : i32 to index
    %c0_7 = arith.constant 0 : index
    %17 = vector.load %arg2[%16, %c0_7] : memref<32x128xf32, #tpu.memory_space<vmem>>, vector<1x128xf32>
    %c8 = arith.constant 8 : index
    %c0_8 = arith.constant 0 : index
    %18 = vector.load %arg12[%c8, %c0_8] : memref<64x128xf32, #tpu.memory_space<vmem>>, vector<1x128xf32>
    tpu.vector_store %arg12[%c8, %c0_8], %17 {strides = array<i32>} : memref<64x128xf32, #tpu.memory_space<vmem>>, vector<1x128xf32>,
    %c0_i32_9 = arith.constant 0 : i32
    %19 = arith.addi %0, %c0_i32_9 : i32
    %c8_i32_10 = arith.constant 8 : i32
    %20 = arith.muli %19, %c8_i32_10 : i32
    %c2_i32_11 = arith.constant 2 : i32
    %21 = arith.addi %20, %c2_i32_11 : i32
    %22 = arith.index_cast %21 : i32 to index
    %23 = memref.load %arg1[%22] : memref<16xi32, #tpu.memory_space<smem>>
    %24 = arith.index_cast %23 : i32 to index
    %c0_12 = arith.constant 0 : index
    %25 = vector.load %arg2[%24, %c0_12] : memref<32x128xf32, #tpu.memory_space<vmem>>, vector<1x128xf32>
    %c16 = arith.constant 16 : index
    %c0_13 = arith.constant 0 : index
    %26 = vector.load %arg12[%c16, %c0_13] : memref<64x128xf32, #tpu.memory_space<vmem>>, vector<1x128xf32>
    tpu.vector_store %arg12[%c16, %c0_13], %25 {strides = array<i32>} : memref<64x128xf32, #tpu.memory_space<vmem>>, vector<1x128xf32>,
    %c0_i32_14 = arith.constant 0 : i32
    %27 = arith.addi %0, %c0_i32_14 : i32
    %c8_i32_15 = arith.constant 8 : i32
    %28 = arith.muli %27, %c8_i32_15 : i32
    %c3_i32 = arith.constant 3 : i32
    %29 = arith.addi %28, %c3_i32 : i32
    %30 = arith.index_cast %29 : i32 to index
    %31 = memref.load %arg1[%30] : memref<16xi32, #tpu.memory_space<smem>>
    %32 = arith.index_cast %31 : i32 to index
    %c0_16 = arith.constant 0 : index
    %33 = vector.load %arg2[%32, %c0_16] : memref<32x128xf32, #tpu.memory_space<vmem>>, vector<1x128xf32>
    %c24 = arith.constant 24 : index
    %c0_17 = arith.constant 0 : index
    %34 = vector.load %arg12[%c24, %c0_17] : memref<64x128xf32, #tpu.memory_space<vmem>>, vector<1x128xf32>
    tpu.vector_store %arg12[%c24, %c0_17], %33 {strides = array<i32>} : memref<64x128xf32, #tpu.memory_space<vmem>>, vector<1x128xf32>,
    %c0_i32_18 = arith.constant 0 : i32
    %35 = arith.addi %0, %c0_i32_18 : i32
    %c8_i32_19 = arith.constant 8 : i32
    %36 = arith.muli %35, %c8_i32_19 : i32
    %c4_i32 = arith.constant 4 : i32
    %37 = arith.addi %36, %c4_i32 : i32
    %38 = arith.index_cast %37 : i32 to index
    %39 = memref.load %arg1[%38] : memref<16xi32, #tpu.memory_space<smem>>
    %40 = arith.index_cast %39 : i32 to index
    %c0_20 = arith.constant 0 : index
    %41 = vector.load %arg2[%40, %c0_20] : memref<32x128xf32, #tpu.memory_space<vmem>>, vector<1x128xf32>
    %c32 = arith.constant 32 : index
    %c0_21 = arith.constant 0 : index
    %42 = vector.load %arg12[%c32, %c0_21] : memref<64x128xf32, #tpu.memory_space<vmem>>, vector<1x128xf32>
    tpu.vector_store %arg12[%c32, %c0_21], %41 {strides = array<i32>} : memref<64x128xf32, #tpu.memory_space<vmem>>, vector<1x128xf32>,
    %c0_i32_22 = arith.constant 0 : i32
    %43 = arith.addi %0, %c0_i32_22 : i32
    %c8_i32_23 = arith.constant 8 : i32
    %44 = arith.muli %43, %c8_i32_23 : i32
    %c5_i32 = arith.constant 5 : i32
    %45 = arith.addi %44, %c5_i32 : i32
    %46 = arith.index_cast %45 : i32 to index
    %47 = memref.load %arg1[%46] : memref<16xi32, #tpu.memory_space<smem>>
    %48 = arith.index_cast %47 : i32 to index
    %c0_24 = arith.constant 0 : index
    %49 = vector.load %arg2[%48, %c0_24] : memref<32x128xf32, #tpu.memory_space<vmem>>, vector<1x128xf32>
    %c40 = arith.constant 40 : index
    %c0_25 = arith.constant 0 : index
    %50 = vector.load %arg12[%c40, %c0_25] : memref<64x128xf32, #tpu.memory_space<vmem>>, vector<1x128xf32>
    tpu.vector_store %arg12[%c40, %c0_25], %49 {strides = array<i32>} : memref<64x128xf32, #tpu.memory_space<vmem>>, vector<1x128xf32>,
    %c0_i32_26 = arith.constant 0 : i32
    %51 = arith.addi %0, %c0_i32_26 : i32
    %c8_i32_27 = arith.constant 8 : i32
    %52 = arith.muli %51, %c8_i32_27 : i32
    %c6_i32 = arith.constant 6 : i32
    %53 = arith.addi %52, %c6_i32 : i32
    %54 = arith.index_cast %53 : i32 to index
    %55 = memref.load %arg1[%54] : memref<16xi32, #tpu.memory_space<smem>>
    %56 = arith.index_cast %55 : i32 to index
    %c0_28 = arith.constant 0 : index
    %57 = vector.load %arg2[%56, %c0_28] : memref<32x128xf32, #tpu.memory_space<vmem>>, vector<1x128xf32>
    %c48 = arith.constant 48 : index
    %c0_29 = arith.constant 0 : index
    %58 = vector.load %arg12[%c48, %c0_29] : memref<64x128xf32, #tpu.memory_space<vmem>>, vector<1x128xf32>
    tpu.vector_store %arg12[%c48, %c0_29], %57 {strides = array<i32>} : memref<64x128xf32, #tpu.memory_space<vmem>>, vector<1x128xf32>,
    %c0_i32_30 = arith.constant 0 : i32
    %59 = arith.addi %0, %c0_i32_30 : i32
    %c8_i32_31 = arith.constant 8 : i32
    %60 = arith.muli %59, %c8_i32_31 : i32
    %c7_i32 = arith.constant 7 : i32
    %61 = arith.addi %60, %c7_i32 : i32
    %62 = arith.index_cast %61 : i32 to index
    %63 = memref.load %arg1[%62] : memref<16xi32, #tpu.memory_space<smem>>
    %64 = arith.index_cast %63 : i32 to index
    %c0_32 = arith.constant 0 : index
    %65 = vector.load %arg2[%64, %c0_32] : memref<32x128xf32, #tpu.memory_space<vmem>>, vector<1x128xf32>
    %c56 = arith.constant 56 : index
    %c0_33 = arith.constant 0 : index
    %66 = vector.load %arg12[%c56, %c0_33] : memref<64x128xf32, #tpu.memory_space<vmem>>, vector<1x128xf32>
    tpu.vector_store %arg12[%c56, %c0_33], %65 {strides = array<i32>} : memref<64x128xf32, #tpu.memory_space<vmem>>, vector<1x128xf32>,
    %c1_i32_34 = arith.constant 1 : i32
    %67 = arith.addi %0, %c1_i32_34 : i32
    %c8_i32_35 = arith.constant 8 : i32
    %68 = arith.muli %67, %c8_i32_35 : i32
    %c0_i32_36 = arith.constant 0 : i32
    %69 = arith.addi %68, %c0_i32_36 : i32
    %70 = arith.index_cast %69 : i32 to index
    %71 = memref.load %arg1[%70] : memref<16xi32, #tpu.memory_space<smem>>
    %72 = arith.index_cast %71 : i32 to index
    %c0_37 = arith.constant 0 : index
    %73 = vector.load %arg2[%72, %c0_37] : memref<32x128xf32, #tpu.memory_space<vmem>>, vector<1x128xf32>
    %c1 = arith.constant 1 : index
    %c0_38 = arith.constant 0 : index
    %74 = vector.load %arg12[%c1, %c0_38] : memref<64x128xf32, #tpu.memory_space<vmem>>, vector<1x128xf32>
    tpu.vector_store %arg12[%c1, %c0_38], %73 {strides = array<i32>} : memref<64x128xf32, #tpu.memory_space<vmem>>, vector<1x128xf32>,
    %c1_i32_39 = arith.constant 1 : i32
    %75 = arith.addi %0, %c1_i32_39 : i32
    %c8_i32_40 = arith.constant 8 : i32
    %76 = arith.muli %75, %c8_i32_40 : i32
    %c1_i32_41 = arith.constant 1 : i32
    %77 = arith.addi %76, %c1_i32_41 : i32
    %78 = arith.index_cast %77 : i32 to index
    %79 = memref.load %arg1[%78] : memref<16xi32, #tpu.memory_space<smem>>
    %80 = arith.index_cast %79 : i32 to index
    %c0_42 = arith.constant 0 : index
    %81 = vector.load %arg2[%80, %c0_42] : memref<32x128xf32, #tpu.memory_space<vmem>>, vector<1x128xf32>
    %c9 = arith.constant 9 : index
    %c0_43 = arith.constant 0 : index
    %82 = vector.load %arg12[%c9, %c0_43] : memref<64x128xf32, #tpu.memory_space<vmem>>, vector<1x128xf32>
    tpu.vector_store %arg12[%c9, %c0_43], %81 {strides = array<i32>} : memref<64x128xf32, #tpu.memory_space<vmem>>, vector<1x128xf32>,
    %c1_i32_44 = arith.constant 1 : i32
    %83 = arith.addi %0, %c1_i32_44 : i32
    %c8_i32_45 = arith.constant 8 : i32
    %84 = arith.muli %83, %c8_i32_45 : i32
    %c2_i32_46 = arith.constant 2 : i32
    %85 = arith.addi %84, %c2_i32_46 : i32
    %86 = arith.index_cast %85 : i32 to index
    %87 = memref.load %arg1[%86] : memref<16xi32, #tpu.memory_space<smem>>
    %88 = arith.index_cast %87 : i32 to index
    %c0_47 = arith.constant 0 : index
    %89 = vector.load %arg2[%88, %c0_47] : memref<32x128xf32, #tpu.memory_space<vmem>>, vector<1x128xf32>
    %c17 = arith.constant 17 : index
    %c0_48 = arith.constant 0 : index
    %90 = vector.load %arg12[%c17, %c0_48] : memref<64x128xf32, #tpu.memory_space<vmem>>, vector<1x128xf32>
    tpu.vector_store %arg12[%c17, %c0_48], %89 {strides = array<i32>} : memref<64x128xf32, #tpu.memory_space<vmem>>, vector<1x128xf32>,
    %c1_i32_49 = arith.constant 1 : i32
    %91 = arith.addi %0, %c1_i32_49 : i32
    %c8_i32_50 = arith.constant 8 : i32
    %92 = arith.muli %91, %c8_i32_50 : i32
    %c3_i32_51 = arith.constant 3 : i32
    %93 = arith.addi %92, %c3_i32_51 : i32
    %94 = arith.index_cast %93 : i32 to index
    %95 = memref.load %arg1[%94] : memref<16xi32, #tpu.memory_space<smem>>
    %96 = arith.index_cast %95 : i32 to index
    %c0_52 = arith.constant 0 : index
    %97 = vector.load %arg2[%96, %c0_52] : memref<32x128xf32, #tpu.memory_space<vmem>>, vector<1x128xf32>
    %c25 = arith.constant 25 : index
    %c0_53 = arith.constant 0 : index
    %98 = vector.load %arg12[%c25, %c0_53] : memref<64x128xf32, #tpu.memory_space<vmem>>, vector<1x128xf32>
    tpu.vector_store %arg12[%c25, %c0_53], %97 {strides = array<i32>} : memref<64x128xf32, #tpu.memory_space<vmem>>, vector<1x128xf32>,
    %c1_i32_54 = arith.constant 1 : i32
    %99 = arith.addi %0, %c1_i32_54 : i32
    %c8_i32_55 = arith.constant 8 : i32
    %100 = arith.muli %99, %c8_i32_55 : i32
    %c4_i32_56 = arith.constant 4 : i32
    %101 = arith.addi %100, %c4_i32_56 : i32
    %102 = arith.index_cast %101 : i32 to index
    %103 = memref.load %arg1[%102] : memref<16xi32, #tpu.memory_space<smem>>
    %104 = arith.index_cast %103 : i32 to index
    %c0_57 = arith.constant 0 : index
    %105 = vector.load %arg2[%104, %c0_57] : memref<32x128xf32, #tpu.memory_space<vmem>>, vector<1x128xf32>
    %c33 = arith.constant 33 : index
    %c0_58 = arith.constant 0 : index
    %106 = vector.load %arg12[%c33, %c0_58] : memref<64x128xf32, #tpu.memory_space<vmem>>, vector<1x128xf32>
    tpu.vector_store %arg12[%c33, %c0_58], %105 {strides = array<i32>} : memref<64x128xf32, #tpu.memory_space<vmem>>, vector<1x128xf32>,
    %c1_i32_59 = arith.constant 1 : i32
    %107 = arith.addi %0, %c1_i32_59 : i32
    %c8_i32_60 = arith.constant 8 : i32
    %108 = arith.muli %107, %c8_i32_60 : i32
    %c5_i32_61 = arith.constant 5 : i32
    %109 = arith.addi %108, %c5_i32_61 : i32
    %110 = arith.index_cast %109 : i32 to index
    %111 = memref.load %arg1[%110] : memref<16xi32, #tpu.memory_space<smem>>
    %112 = arith.index_cast %111 : i32 to index
    %c0_62 = arith.constant 0 : index
    %113 = vector.load %arg2[%112, %c0_62] : memref<32x128xf32, #tpu.memory_space<vmem>>, vector<1x128xf32>
    %c41 = arith.constant 41 : index
    %c0_63 = arith.constant 0 : index
    %114 = vector.load %arg12[%c41, %c0_63] : memref<64x128xf32, #tpu.memory_space<vmem>>, vector<1x128xf32>
    tpu.vector_store %arg12[%c41, %c0_63], %113 {strides = array<i32>} : memref<64x128xf32, #tpu.memory_space<vmem>>, vector<1x128xf32>,
    %c1_i32_64 = arith.constant 1 : i32
    %115 = arith.addi %0, %c1_i32_64 : i32
    %c8_i32_65 = arith.constant 8 : i32
    %116 = arith.muli %115, %c8_i32_65 : i32
    %c6_i32_66 = arith.constant 6 : i32
    %117 = arith.addi %116, %c6_i32_66 : i32
    %118 = arith.index_cast %117 : i32 to index
    %119 = memref.load %arg1[%118] : memref<16xi32, #tpu.memory_space<smem>>
    %120 = arith.index_cast %119 : i32 to index
    %c0_67 = arith.constant 0 : index
    %121 = vector.load %arg2[%120, %c0_67] : memref<32x128xf32, #tpu.memory_space<vmem>>, vector<1x128xf32>
    %c49 = arith.constant 49 : index
    %c0_68 = arith.constant 0 : index
    %122 = vector.load %arg12[%c49, %c0_68] : memref<64x128xf32, #tpu.memory_space<vmem>>, vector<1x128xf32>
    tpu.vector_store %arg12[%c49, %c0_68], %121 {strides = array<i32>} : memref<64x128xf32, #tpu.memory_space<vmem>>, vector<1x128xf32>,
    %c1_i32_69 = arith.constant 1 : i32
    %123 = arith.addi %0, %c1_i32_69 : i32
    %c8_i32_70 = arith.constant 8 : i32
    %124 = arith.muli %123, %c8_i32_70 : i32
    %c7_i32_71 = arith.constant 7 : i32
    %125 = arith.addi %124, %c7_i32_71 : i32
    %126 = arith.index_cast %125 : i32 to index
    %127 = memref.load %arg1[%126] : memref<16xi32, #tpu.memory_space<smem>>
    %128 = arith.index_cast %127 : i32 to index
    %c0_72 = arith.constant 0 : index
    %129 = vector.load %arg2[%128, %c0_72] : memref<32x128xf32, #tpu.memory_space<vmem>>, vector<1x128xf32>
    %c57 = arith.constant 57 : index
    %c0_73 = arith.constant 0 : index
    %130 = vector.load %arg12[%c57, %c0_73] : memref<64x128xf32, #tpu.memory_space<vmem>>, vector<1x128xf32>
    tpu.vector_store %arg12[%c57, %c0_73], %129 {strides = array<i32>} : memref<64x128xf32, #tpu.memory_space<vmem>>, vector<1x128xf32>,
    %cst_74 = arith.constant 0.000000e+00 : f32
    %131 = vector.broadcast %cst_74 : f32 to vector<8x128xf32>
    %c0_75 = arith.constant 0 : index
    %c0_76 = arith.constant 0 : index
    %132 = vector.load %arg16[%c0_75, %c0_76] : memref<8x128xf32, #tpu.memory_space<vmem>>, vector<8x128xf32>
    tpu.vector_store %arg16[%c0_75, %c0_76], %131 {strides = array<i32>} : memref<8x128xf32, #tpu.memory_space<vmem>>, vector<8x128xf32>,
    %c0_77 = arith.constant 0 : index
    %c0_78 = arith.constant 0 : index
    %133 = vector.load %arg3[%c0_77, %c0_78] : memref<128x512xf32, #tpu.memory_space<vmem>>, vector<128x512xf32>
    %c0_79 = arith.constant 0 : index
    %c0_80 = arith.constant 0 : index
    %134 = vector.load %arg4[%c0_79, %c0_80] : memref<128x512xf32, #tpu.memory_space<vmem>>, vector<128x512xf32>
    %c0_81 = arith.constant 0 : index
    %c0_82 = arith.constant 0 : index
    %135 = vector.load %arg5[%c0_81, %c0_82] : memref<1x512xf32, #tpu.memory_space<vmem>>, vector<1x512xf32>
    %cst_83 = arith.constant 0.000000e+00 : f32
    %136 = vector.broadcast %cst_83 : f32 to vector<8x128xf32>
    %c0_84 = arith.constant 0 : index
    %c0_85 = arith.constant 0 : index
    %137 = vector.load %arg14[%c0_84, %c0_85] : memref<8x128xf32, #tpu.memory_space<vmem>>, vector<8x128xf32>
    tpu.vector_store %arg14[%c0_84, %c0_85], %136 {strides = array<i32>} : memref<8x128xf32, #tpu.memory_space<vmem>>, vector<8x128xf32>,
    %cst_86 = arith.constant 0.000000e+00 : f32
    %138 = vector.broadcast %cst_86 : f32 to vector<8x128xf32>
    %c0_87 = arith.constant 0 : index
    %c0_88 = arith.constant 0 : index
    %139 = vector.load %arg15[%c0_87, %c0_88] : memref<8x128xf32, #tpu.memory_space<vmem>>, vector<8x128xf32>
    tpu.vector_store %arg15[%c0_87, %c0_88], %138 {strides = array<i32>} : memref<8x128xf32, #tpu.memory_space<vmem>>, vector<8x128xf32>,
    %c0_89 = arith.constant 0 : index
    %c0_90 = arith.constant 0 : index
    %140 = vector.load %arg12[%c0_89, %c0_90] : memref<64x128xf32, #tpu.memory_space<vmem>>, vector<64x128xf32>
    %cst_91 = arith.constant dense<0.000000e+00> : vector<64x512xf32>
    %141 = tpu.matmul %140, %133, %cst_91 {dimension_numbers = #tpu.dot_dimension_numbers<[1], [0], [0], [1], [0, 0, 1, 1], [], []>} : vector<64x128xf32>, vector<128x512xf32>, vector<64x512xf32> -> vector<64x512xf32>
    %142 = vector.broadcast %135 : vector<1x512xf32> to vector<64x512xf32>
    %143 = arith.addf %141, %142 : vector<64x512xf32>
    %c0_92 = arith.constant 0 : index
    %c0_93 = arith.constant 0 : index
    %144 = vector.load %arg13[%c0_92, %c0_93] : memref<64x512xf32, #tpu.memory_space<vmem>>, vector<64x512xf32>
    tpu.vector_store %arg13[%c0_92, %c0_93], %143 {strides = array<i32>} : memref<64x512xf32, #tpu.memory_space<vmem>>, vector<64x512xf32>,
    %c0_94 = arith.constant 0 : index
    %c0_95 = arith.constant 0 : index
    %145 = vector.load %arg14[%c0_94, %c0_95] : memref<8x128xf32, #tpu.memory_space<vmem>>, vector<8x128xf32>
    %c0_96 = arith.constant 0 : index
    %c0_97 = arith.constant 0 : index
    %146 = vector.load %arg15[%c0_96, %c0_97] : memref<8x128xf32, #tpu.memory_space<vmem>>, vector<8x128xf32>
    %c0_98 = arith.constant 0 : index
    %c0_99 = arith.constant 0 : index
    %147 = vector.load %arg13[%c0_98, %c0_99] : memref<64x512xf32, #tpu.memory_space<vmem>>, vector<8x512xf32>
    %cst_100 = arith.constant dense<0.000000e+00> : vector<8x512xf32>
    %148 = tpu.matmul %145, %134, %cst_100 {dimension_numbers = #tpu.dot_dimension_numbers<[1], [0], [0], [1], [0, 0, 1, 1], [], []>} : vector<8x128xf32>, vector<128x512xf32>, vector<8x512xf32> -> vector<8x512xf32>
    %149 = arith.addf %147, %148 : vector<8x512xf32>
    %150 = vector.extract_strided_slice %149 {offsets = [0, 0], sizes = [8, 128], strides = [1, 1]} : vector<8x512xf32> to vector<8x128xf32>
    %151 = arith.negf %150 : vector<8x128xf32>
    %152 = math.exp %151 : vector<8x128xf32>
    %cst_101 = arith.constant 1.000000e+00 : f32
    %153 = vector.broadcast %cst_101 : f32 to vector<8x128xf32>
    %154 = arith.addf %153, %152 : vector<8x128xf32>
    %155 = arith.divf %153, %154 : vector<8x128xf32>
    %156 = vector.extract_strided_slice %149 {offsets = [0, 128], sizes = [8, 128], strides = [1, 1]} : vector<8x512xf32> to vector<8x128xf32>
    %157 = arith.negf %156 : vector<8x128xf32>
    %158 = math.exp %157 : vector<8x128xf32>
    %cst_102 = arith.constant 1.000000e+00 : f32
    %159 = vector.broadcast %cst_102 : f32 to vector<8x128xf32>
    %160 = arith.addf %159, %158 : vector<8x128xf32>
    %161 = arith.divf %159, %160 : vector<8x128xf32>
    %162 = vector.extract_strided_slice %149 {offsets = [0, 256], sizes = [8, 128], strides = [1, 1]} : vector<8x512xf32> to vector<8x128xf32>
    %163 = math.tanh %162 : vector<8x128xf32>
    %164 = vector.extract_strided_slice %149 {offsets = [0, 384], sizes = [8, 128], strides = [1, 1]} : vector<8x512xf32> to vector<8x128xf32>
    %165 = arith.negf %164 : vector<8x128xf32>
    %166 = math.exp %165 : vector<8x128xf32>
    %cst_103 = arith.constant 1.000000e+00 : f32
    %167 = vector.broadcast %cst_103 : f32 to vector<8x128xf32>
    %168 = arith.addf %167, %166 : vector<8x128xf32>
    %169 = arith.divf %167, %168 : vector<8x128xf32>
    %170 = arith.mulf %161, %146 : vector<8x128xf32>
    %171 = arith.mulf %155, %163 : vector<8x128xf32>
    %172 = arith.addf %170, %171 : vector<8x128xf32>
    %173 = math.tanh %172 : vector<8x128xf32>
    %174 = arith.mulf %169, %173 : vector<8x128xf32>
    %c0_104 = arith.constant 0 : index
    %c0_105 = arith.constant 0 : index
    %175 = vector.load %arg14[%c0_104, %c0_105] : memref<8x128xf32, #tpu.memory_space<vmem>>, vector<8x128xf32>
    tpu.vector_store %arg14[%c0_104, %c0_105], %174 {strides = array<i32>} : memref<8x128xf32, #tpu.memory_space<vmem>>, vector<8x128xf32>,
    %c0_106 = arith.constant 0 : index
    %c0_107 = arith.constant 0 : index
    %176 = vector.load %arg15[%c0_106, %c0_107] : memref<8x128xf32, #tpu.memory_space<vmem>>, vector<8x128xf32>
    tpu.vector_store %arg15[%c0_106, %c0_107], %172 {strides = array<i32>} : memref<8x128xf32, #tpu.memory_space<vmem>>, vector<8x128xf32>,
    %c0_108 = arith.constant 0 : index
    %c0_109 = arith.constant 0 : index
    %177 = vector.load %arg12[%c0_108, %c0_109] : memref<64x128xf32, #tpu.memory_space<vmem>>, vector<8x128xf32>
    tpu.vector_store %arg12[%c0_108, %c0_109], %174 {strides = array<i32>} : memref<64x128xf32, #tpu.memory_space<vmem>>, vector<8x128xf32>,
    %c0_110 = arith.constant 0 : index
    %c0_111 = arith.constant 0 : index
    %178 = vector.load %arg14[%c0_110, %c0_111] : memref<8x128xf32, #tpu.memory_space<vmem>>, vector<8x128xf32>
    %c0_112 = arith.constant 0 : index
    %c0_113 = arith.constant 0 : index
    %179 = vector.load %arg15[%c0_112, %c0_113] : memref<8x128xf32, #tpu.memory_space<vmem>>, vector<8x128xf32>
    %c8_114 = arith.constant 8 : index
    %c0_115 = arith.constant 0 : index
    %180 = vector.load %arg13[%c8_114, %c0_115] : memref<64x512xf32, #tpu.memory_space<vmem>>, vector<8x512xf32>
    %cst_116 = arith.constant dense<0.000000e+00> : vector<8x512xf32>
    %181 = tpu.matmul %178, %134, %cst_116 {dimension_numbers = #tpu.dot_dimension_numbers<[1], [0], [0], [1], [0, 0, 1, 1], [], []>} : vector<8x128xf32>, vector<128x512xf32>, vector<8x512xf32> -> vector<8x512xf32>
    %182 = arith.addf %180, %181 : vector<8x512xf32>
    %183 = vector.extract_strided_slice %182 {offsets = [0, 0], sizes = [8, 128], strides = [1, 1]} : vector<8x512xf32> to vector<8x128xf32>
    %184 = arith.negf %183 : vector<8x128xf32>
    %185 = math.exp %184 : vector<8x128xf32>
    %cst_117 = arith.constant 1.000000e+00 : f32
    %186 = vector.broadcast %cst_117 : f32 to vector<8x128xf32>
    %187 = arith.addf %186, %185 : vector<8x128xf32>
    %188 = arith.divf %186, %187 : vector<8x128xf32>
    %189 = vector.extract_strided_slice %182 {offsets = [0, 128], sizes = [8, 128], strides = [1, 1]} : vector<8x512xf32> to vector<8x128xf32>
    %190 = arith.negf %189 : vector<8x128xf32>
    %191 = math.exp %190 : vector<8x128xf32>
    %cst_118 = arith.constant 1.000000e+00 : f32
    %192 = vector.broadcast %cst_118 : f32 to vector<8x128xf32>
    %193 = arith.addf %192, %191 : vector<8x128xf32>
    %194 = arith.divf %192, %193 : vector<8x128xf32>
    %195 = vector.extract_strided_slice %182 {offsets = [0, 256], sizes = [8, 128], strides = [1, 1]} : vector<8x512xf32> to vector<8x128xf32>
    %196 = math.tanh %195 : vector<8x128xf32>
    %197 = vector.extract_strided_slice %182 {offsets = [0, 384], sizes = [8, 128], strides = [1, 1]} : vector<8x512xf32> to vector<8x128xf32>
    %198 = arith.negf %197 : vector<8x128xf32>
    %199 = math.exp %198 : vector<8x128xf32>
    %cst_119 = arith.constant 1.000000e+00 : f32
    %200 = vector.broadcast %cst_119 : f32 to vector<8x128xf32>
    %201 = arith.addf %200, %199 : vector<8x128xf32>
    %202 = arith.divf %200, %201 : vector<8x128xf32>
    %203 = arith.mulf %194, %179 : vector<8x128xf32>
    %204 = arith.mulf %188, %196 : vector<8x128xf32>
    %205 = arith.addf %203, %204 : vector<8x128xf32>
    %206 = math.tanh %205 : vector<8x128xf32>
    %207 = arith.mulf %202, %206 : vector<8x128xf32>
    %c0_120 = arith.constant 0 : index
    %c0_121 = arith.constant 0 : index
    %208 = vector.load %arg14[%c0_120, %c0_121] : memref<8x128xf32, #tpu.memory_space<vmem>>, vector<8x128xf32>
    tpu.vector_store %arg14[%c0_120, %c0_121], %207 {strides = array<i32>} : memref<8x128xf32, #tpu.memory_space<vmem>>, vector<8x128xf32>,
    %c0_122 = arith.constant 0 : index
    %c0_123 = arith.constant 0 : index
    %209 = vector.load %arg15[%c0_122, %c0_123] : memref<8x128xf32, #tpu.memory_space<vmem>>, vector<8x128xf32>
    tpu.vector_store %arg15[%c0_122, %c0_123], %205 {strides = array<i32>} : memref<8x128xf32, #tpu.memory_space<vmem>>, vector<8x128xf32>,
    %c8_124 = arith.constant 8 : index
    %c0_125 = arith.constant 0 : index
    %210 = vector.load %arg12[%c8_124, %c0_125] : memref<64x128xf32, #tpu.memory_space<vmem>>, vector<8x128xf32>
    tpu.vector_store %arg12[%c8_124, %c0_125], %207 {strides = array<i32>} : memref<64x128xf32, #tpu.memory_space<vmem>>, vector<8x128xf32>,
    %c0_126 = arith.constant 0 : index
    %c0_127 = arith.constant 0 : index
    %211 = vector.load %arg14[%c0_126, %c0_127] : memref<8x128xf32, #tpu.memory_space<vmem>>, vector<8x128xf32>
    %c0_128 = arith.constant 0 : index
    %c0_129 = arith.constant 0 : index
    %212 = vector.load %arg15[%c0_128, %c0_129] : memref<8x128xf32, #tpu.memory_space<vmem>>, vector<8x128xf32>
    %c16_130 = arith.constant 16 : index
    %c0_131 = arith.constant 0 : index
    %213 = vector.load %arg13[%c16_130, %c0_131] : memref<64x512xf32, #tpu.memory_space<vmem>>, vector<8x512xf32>
    %cst_132 = arith.constant dense<0.000000e+00> : vector<8x512xf32>
    %214 = tpu.matmul %211, %134, %cst_132 {dimension_numbers = #tpu.dot_dimension_numbers<[1], [0], [0], [1], [0, 0, 1, 1], [], []>} : vector<8x128xf32>, vector<128x512xf32>, vector<8x512xf32> -> vector<8x512xf32>
    %215 = arith.addf %213, %214 : vector<8x512xf32>
    %216 = vector.extract_strided_slice %215 {offsets = [0, 0], sizes = [8, 128], strides = [1, 1]} : vector<8x512xf32> to vector<8x128xf32>
    %217 = arith.negf %216 : vector<8x128xf32>
    %218 = math.exp %217 : vector<8x128xf32>
    %cst_133 = arith.constant 1.000000e+00 : f32
    %219 = vector.broadcast %cst_133 : f32 to vector<8x128xf32>
    %220 = arith.addf %219, %218 : vector<8x128xf32>
    %221 = arith.divf %219, %220 : vector<8x128xf32>
    %222 = vector.extract_strided_slice %215 {offsets = [0, 128], sizes = [8, 128], strides = [1, 1]} : vector<8x512xf32> to vector<8x128xf32>
    %223 = arith.negf %222 : vector<8x128xf32>
    %224 = math.exp %223 : vector<8x128xf32>
    %cst_134 = arith.constant 1.000000e+00 : f32
    %225 = vector.broadcast %cst_134 : f32 to vector<8x128xf32>
    %226 = arith.addf %225, %224 : vector<8x128xf32>
    %227 = arith.divf %225, %226 : vector<8x128xf32>
    %228 = vector.extract_strided_slice %215 {offsets = [0, 256], sizes = [8, 128], strides = [1, 1]} : vector<8x512xf32> to vector<8x128xf32>
    %229 = math.tanh %228 : vector<8x128xf32>
    %230 = vector.extract_strided_slice %215 {offsets = [0, 384], sizes = [8, 128], strides = [1, 1]} : vector<8x512xf32> to vector<8x128xf32>
    %231 = arith.negf %230 : vector<8x128xf32>
    %232 = math.exp %231 : vector<8x128xf32>
    %cst_135 = arith.constant 1.000000e+00 : f32
    %233 = vector.broadcast %cst_135 : f32 to vector<8x128xf32>
    %234 = arith.addf %233, %232 : vector<8x128xf32>
    %235 = arith.divf %233, %234 : vector<8x128xf32>
    %236 = arith.mulf %227, %212 : vector<8x128xf32>
    %237 = arith.mulf %221, %229 : vector<8x128xf32>
    %238 = arith.addf %236, %237 : vector<8x128xf32>
    %239 = math.tanh %238 : vector<8x128xf32>
    %240 = arith.mulf %235, %239 : vector<8x128xf32>
    %c0_136 = arith.constant 0 : index
    %c0_137 = arith.constant 0 : index
    %241 = vector.load %arg14[%c0_136, %c0_137] : memref<8x128xf32, #tpu.memory_space<vmem>>, vector<8x128xf32>
    tpu.vector_store %arg14[%c0_136, %c0_137], %240 {strides = array<i32>} : memref<8x128xf32, #tpu.memory_space<vmem>>, vector<8x128xf32>,
    %c0_138 = arith.constant 0 : index
    %c0_139 = arith.constant 0 : index
    %242 = vector.load %arg15[%c0_138, %c0_139] : memref<8x128xf32, #tpu.memory_space<vmem>>, vector<8x128xf32>
    tpu.vector_store %arg15[%c0_138, %c0_139], %238 {strides = array<i32>} : memref<8x128xf32, #tpu.memory_space<vmem>>, vector<8x128xf32>,
    %c16_140 = arith.constant 16 : index
    %c0_141 = arith.constant 0 : index
    %243 = vector.load %arg12[%c16_140, %c0_141] : memref<64x128xf32, #tpu.memory_space<vmem>>, vector<8x128xf32>
    tpu.vector_store %arg12[%c16_140, %c0_141], %240 {strides = array<i32>} : memref<64x128xf32, #tpu.memory_space<vmem>>, vector<8x128xf32>,
    %c0_142 = arith.constant 0 : index
    %c0_143 = arith.constant 0 : index
    %244 = vector.load %arg14[%c0_142, %c0_143] : memref<8x128xf32, #tpu.memory_space<vmem>>, vector<8x128xf32>
    %c0_144 = arith.constant 0 : index
    %c0_145 = arith.constant 0 : index
    %245 = vector.load %arg15[%c0_144, %c0_145] : memref<8x128xf32, #tpu.memory_space<vmem>>, vector<8x128xf32>
    %c24_146 = arith.constant 24 : index
    %c0_147 = arith.constant 0 : index
    %246 = vector.load %arg13[%c24_146, %c0_147] : memref<64x512xf32, #tpu.memory_space<vmem>>, vector<8x512xf32>
    %cst_148 = arith.constant dense<0.000000e+00> : vector<8x512xf32>
    %247 = tpu.matmul %244, %134, %cst_148 {dimension_numbers = #tpu.dot_dimension_numbers<[1], [0], [0], [1], [0, 0, 1, 1], [], []>} : vector<8x128xf32>, vector<128x512xf32>, vector<8x512xf32> -> vector<8x512xf32>
    %248 = arith.addf %246, %247 : vector<8x512xf32>
    %249 = vector.extract_strided_slice %248 {offsets = [0, 0], sizes = [8, 128], strides = [1, 1]} : vector<8x512xf32> to vector<8x128xf32>
    %250 = arith.negf %249 : vector<8x128xf32>
    %251 = math.exp %250 : vector<8x128xf32>
    %cst_149 = arith.constant 1.000000e+00 : f32
    %252 = vector.broadcast %cst_149 : f32 to vector<8x128xf32>
    %253 = arith.addf %252, %251 : vector<8x128xf32>
    %254 = arith.divf %252, %253 : vector<8x128xf32>
    %255 = vector.extract_strided_slice %248 {offsets = [0, 128], sizes = [8, 128], strides = [1, 1]} : vector<8x512xf32> to vector<8x128xf32>
    %256 = arith.negf %255 : vector<8x128xf32>
    %257 = math.exp %256 : vector<8x128xf32>
    %cst_150 = arith.constant 1.000000e+00 : f32
    %258 = vector.broadcast %cst_150 : f32 to vector<8x128xf32>
    %259 = arith.addf %258, %257 : vector<8x128xf32>
    %260 = arith.divf %258, %259 : vector<8x128xf32>
    %261 = vector.extract_strided_slice %248 {offsets = [0, 256], sizes = [8, 128], strides = [1, 1]} : vector<8x512xf32> to vector<8x128xf32>
    %262 = math.tanh %261 : vector<8x128xf32>
    %263 = vector.extract_strided_slice %248 {offsets = [0, 384], sizes = [8, 128], strides = [1, 1]} : vector<8x512xf32> to vector<8x128xf32>
    %264 = arith.negf %263 : vector<8x128xf32>
    %265 = math.exp %264 : vector<8x128xf32>
    %cst_151 = arith.constant 1.000000e+00 : f32
    %266 = vector.broadcast %cst_151 : f32 to vector<8x128xf32>
    %267 = arith.addf %266, %265 : vector<8x128xf32>
    %268 = arith.divf %266, %267 : vector<8x128xf32>
    %269 = arith.mulf %260, %245 : vector<8x128xf32>
    %270 = arith.mulf %254, %262 : vector<8x128xf32>
    %271 = arith.addf %269, %270 : vector<8x128xf32>
    %272 = math.tanh %271 : vector<8x128xf32>
    %273 = arith.mulf %268, %272 : vector<8x128xf32>
    %c0_152 = arith.constant 0 : index
    %c0_153 = arith.constant 0 : index
    %274 = vector.load %arg14[%c0_152, %c0_153] : memref<8x128xf32, #tpu.memory_space<vmem>>, vector<8x128xf32>
    tpu.vector_store %arg14[%c0_152, %c0_153], %273 {strides = array<i32>} : memref<8x128xf32, #tpu.memory_space<vmem>>, vector<8x128xf32>,
    %c0_154 = arith.constant 0 : index
    %c0_155 = arith.constant 0 : index
    %275 = vector.load %arg15[%c0_154, %c0_155] : memref<8x128xf32, #tpu.memory_space<vmem>>, vector<8x128xf32>
    tpu.vector_store %arg15[%c0_154, %c0_155], %271 {strides = array<i32>} : memref<8x128xf32, #tpu.memory_space<vmem>>, vector<8x128xf32>,
    %c24_156 = arith.constant 24 : index
    %c0_157 = arith.constant 0 : index
    %276 = vector.load %arg12[%c24_156, %c0_157] : memref<64x128xf32, #tpu.memory_space<vmem>>, vector<8x128xf32>
    tpu.vector_store %arg12[%c24_156, %c0_157], %273 {strides = array<i32>} : memref<64x128xf32, #tpu.memory_space<vmem>>, vector<8x128xf32>,
    %c0_158 = arith.constant 0 : index
    %c0_159 = arith.constant 0 : index
    %277 = vector.load %arg14[%c0_158, %c0_159] : memref<8x128xf32, #tpu.memory_space<vmem>>, vector<8x128xf32>
    %c0_160 = arith.constant 0 : index
    %c0_161 = arith.constant 0 : index
    %278 = vector.load %arg15[%c0_160, %c0_161] : memref<8x128xf32, #tpu.memory_space<vmem>>, vector<8x128xf32>
    %c32_162 = arith.constant 32 : index
    %c0_163 = arith.constant 0 : index
    %279 = vector.load %arg13[%c32_162, %c0_163] : memref<64x512xf32, #tpu.memory_space<vmem>>, vector<8x512xf32>
    %cst_164 = arith.constant dense<0.000000e+00> : vector<8x512xf32>
    %280 = tpu.matmul %277, %134, %cst_164 {dimension_numbers = #tpu.dot_dimension_numbers<[1], [0], [0], [1], [0, 0, 1, 1], [], []>} : vector<8x128xf32>, vector<128x512xf32>, vector<8x512xf32> -> vector<8x512xf32>
    %281 = arith.addf %279, %280 : vector<8x512xf32>
    %282 = vector.extract_strided_slice %281 {offsets = [0, 0], sizes = [8, 128], strides = [1, 1]} : vector<8x512xf32> to vector<8x128xf32>
    %283 = arith.negf %282 : vector<8x128xf32>
    %284 = math.exp %283 : vector<8x128xf32>
    %cst_165 = arith.constant 1.000000e+00 : f32
    %285 = vector.broadcast %cst_165 : f32 to vector<8x128xf32>
    %286 = arith.addf %285, %284 : vector<8x128xf32>
    %287 = arith.divf %285, %286 : vector<8x128xf32>
    %288 = vector.extract_strided_slice %281 {offsets = [0, 128], sizes = [8, 128], strides = [1, 1]} : vector<8x512xf32> to vector<8x128xf32>
    %289 = arith.negf %288 : vector<8x128xf32>
    %290 = math.exp %289 : vector<8x128xf32>
    %cst_166 = arith.constant 1.000000e+00 : f32
    %291 = vector.broadcast %cst_166 : f32 to vector<8x128xf32>
    %292 = arith.addf %291, %290 : vector<8x128xf32>
    %293 = arith.divf %291, %292 : vector<8x128xf32>
    %294 = vector.extract_strided_slice %281 {offsets = [0, 256], sizes = [8, 128], strides = [1, 1]} : vector<8x512xf32> to vector<8x128xf32>
    %295 = math.tanh %294 : vector<8x128xf32>
    %296 = vector.extract_strided_slice %281 {offsets = [0, 384], sizes = [8, 128], strides = [1, 1]} : vector<8x512xf32> to vector<8x128xf32>
    %297 = arith.negf %296 : vector<8x128xf32>
    %298 = math.exp %297 : vector<8x128xf32>
    %cst_167 = arith.constant 1.000000e+00 : f32
    %299 = vector.broadcast %cst_167 : f32 to vector<8x128xf32>
    %300 = arith.addf %299, %298 : vector<8x128xf32>
    %301 = arith.divf %299, %300 : vector<8x128xf32>
    %302 = arith.mulf %293, %278 : vector<8x128xf32>
    %303 = arith.mulf %287, %295 : vector<8x128xf32>
    %304 = arith.addf %302, %303 : vector<8x128xf32>
    %305 = math.tanh %304 : vector<8x128xf32>
    %306 = arith.mulf %301, %305 : vector<8x128xf32>
    %c0_168 = arith.constant 0 : index
    %c0_169 = arith.constant 0 : index
    %307 = vector.load %arg14[%c0_168, %c0_169] : memref<8x128xf32, #tpu.memory_space<vmem>>, vector<8x128xf32>
    tpu.vector_store %arg14[%c0_168, %c0_169], %306 {strides = array<i32>} : memref<8x128xf32, #tpu.memory_space<vmem>>, vector<8x128xf32>,
    %c0_170 = arith.constant 0 : index
    %c0_171 = arith.constant 0 : index
    %308 = vector.load %arg15[%c0_170, %c0_171] : memref<8x128xf32, #tpu.memory_space<vmem>>, vector<8x128xf32>
    tpu.vector_store %arg15[%c0_170, %c0_171], %304 {strides = array<i32>} : memref<8x128xf32, #tpu.memory_space<vmem>>, vector<8x128xf32>,
    %c32_172 = arith.constant 32 : index
    %c0_173 = arith.constant 0 : index
    %309 = vector.load %arg12[%c32_172, %c0_173] : memref<64x128xf32, #tpu.memory_space<vmem>>, vector<8x128xf32>
    tpu.vector_store %arg12[%c32_172, %c0_173], %306 {strides = array<i32>} : memref<64x128xf32, #tpu.memory_space<vmem>>, vector<8x128xf32>,
    %c0_174 = arith.constant 0 : index
    %c0_175 = arith.constant 0 : index
    %310 = vector.load %arg14[%c0_174, %c0_175] : memref<8x128xf32, #tpu.memory_space<vmem>>, vector<8x128xf32>
    %c0_176 = arith.constant 0 : index
    %c0_177 = arith.constant 0 : index
    %311 = vector.load %arg15[%c0_176, %c0_177] : memref<8x128xf32, #tpu.memory_space<vmem>>, vector<8x128xf32>
    %c40_178 = arith.constant 40 : index
    %c0_179 = arith.constant 0 : index
    %312 = vector.load %arg13[%c40_178, %c0_179] : memref<64x512xf32, #tpu.memory_space<vmem>>, vector<8x512xf32>
    %cst_180 = arith.constant dense<0.000000e+00> : vector<8x512xf32>
    %313 = tpu.matmul %310, %134, %cst_180 {dimension_numbers = #tpu.dot_dimension_numbers<[1], [0], [0], [1], [0, 0, 1, 1], [], []>} : vector<8x128xf32>, vector<128x512xf32>, vector<8x512xf32> -> vector<8x512xf32>
    %314 = arith.addf %312, %313 : vector<8x512xf32>
    %315 = vector.extract_strided_slice %314 {offsets = [0, 0], sizes = [8, 128], strides = [1, 1]} : vector<8x512xf32> to vector<8x128xf32>
    %316 = arith.negf %315 : vector<8x128xf32>
    %317 = math.exp %316 : vector<8x128xf32>
    %cst_181 = arith.constant 1.000000e+00 : f32
    %318 = vector.broadcast %cst_181 : f32 to vector<8x128xf32>
    %319 = arith.addf %318, %317 : vector<8x128xf32>
    %320 = arith.divf %318, %319 : vector<8x128xf32>
    %321 = vector.extract_strided_slice %314 {offsets = [0, 128], sizes = [8, 128], strides = [1, 1]} : vector<8x512xf32> to vector<8x128xf32>
    %322 = arith.negf %321 : vector<8x128xf32>
    %323 = math.exp %322 : vector<8x128xf32>
    %cst_182 = arith.constant 1.000000e+00 : f32
    %324 = vector.broadcast %cst_182 : f32 to vector<8x128xf32>
    %325 = arith.addf %324, %323 : vector<8x128xf32>
    %326 = arith.divf %324, %325 : vector<8x128xf32>
    %327 = vector.extract_strided_slice %314 {offsets = [0, 256], sizes = [8, 128], strides = [1, 1]} : vector<8x512xf32> to vector<8x128xf32>
    %328 = math.tanh %327 : vector<8x128xf32>
    %329 = vector.extract_strided_slice %314 {offsets = [0, 384], sizes = [8, 128], strides = [1, 1]} : vector<8x512xf32> to vector<8x128xf32>
    %330 = arith.negf %329 : vector<8x128xf32>
    %331 = math.exp %330 : vector<8x128xf32>
    %cst_183 = arith.constant 1.000000e+00 : f32
    %332 = vector.broadcast %cst_183 : f32 to vector<8x128xf32>
    %333 = arith.addf %332, %331 : vector<8x128xf32>
    %334 = arith.divf %332, %333 : vector<8x128xf32>
    %335 = arith.mulf %326, %311 : vector<8x128xf32>
    %336 = arith.mulf %320, %328 : vector<8x128xf32>
    %337 = arith.addf %335, %336 : vector<8x128xf32>
    %338 = math.tanh %337 : vector<8x128xf32>
    %339 = arith.mulf %334, %338 : vector<8x128xf32>
    %c0_184 = arith.constant 0 : index
    %c0_185 = arith.constant 0 : index
    %340 = vector.load %arg14[%c0_184, %c0_185] : memref<8x128xf32, #tpu.memory_space<vmem>>, vector<8x128xf32>
    tpu.vector_store %arg14[%c0_184, %c0_185], %339 {strides = array<i32>} : memref<8x128xf32, #tpu.memory_space<vmem>>, vector<8x128xf32>,
    %c0_186 = arith.constant 0 : index
    %c0_187 = arith.constant 0 : index
    %341 = vector.load %arg15[%c0_186, %c0_187] : memref<8x128xf32, #tpu.memory_space<vmem>>, vector<8x128xf32>
    tpu.vector_store %arg15[%c0_186, %c0_187], %337 {strides = array<i32>} : memref<8x128xf32, #tpu.memory_space<vmem>>, vector<8x128xf32>,
    %c40_188 = arith.constant 40 : index
    %c0_189 = arith.constant 0 : index
    %342 = vector.load %arg12[%c40_188, %c0_189] : memref<64x128xf32, #tpu.memory_space<vmem>>, vector<8x128xf32>
    tpu.vector_store %arg12[%c40_188, %c0_189], %339 {strides = array<i32>} : memref<64x128xf32, #tpu.memory_space<vmem>>, vector<8x128xf32>,
    %c0_190 = arith.constant 0 : index
    %c0_191 = arith.constant 0 : index
    %343 = vector.load %arg14[%c0_190, %c0_191] : memref<8x128xf32, #tpu.memory_space<vmem>>, vector<8x128xf32>
    %c0_192 = arith.constant 0 : index
    %c0_193 = arith.constant 0 : index
    %344 = vector.load %arg15[%c0_192, %c0_193] : memref<8x128xf32, #tpu.memory_space<vmem>>, vector<8x128xf32>
    %c48_194 = arith.constant 48 : index
    %c0_195 = arith.constant 0 : index
    %345 = vector.load %arg13[%c48_194, %c0_195] : memref<64x512xf32, #tpu.memory_space<vmem>>, vector<8x512xf32>
    %cst_196 = arith.constant dense<0.000000e+00> : vector<8x512xf32>
    %346 = tpu.matmul %343, %134, %cst_196 {dimension_numbers = #tpu.dot_dimension_numbers<[1], [0], [0], [1], [0, 0, 1, 1], [], []>} : vector<8x128xf32>, vector<128x512xf32>, vector<8x512xf32> -> vector<8x512xf32>
    %347 = arith.addf %345, %346 : vector<8x512xf32>
    %348 = vector.extract_strided_slice %347 {offsets = [0, 0], sizes = [8, 128], strides = [1, 1]} : vector<8x512xf32> to vector<8x128xf32>
    %349 = arith.negf %348 : vector<8x128xf32>
    %350 = math.exp %349 : vector<8x128xf32>
    %cst_197 = arith.constant 1.000000e+00 : f32
    %351 = vector.broadcast %cst_197 : f32 to vector<8x128xf32>
    %352 = arith.addf %351, %350 : vector<8x128xf32>
    %353 = arith.divf %351, %352 : vector<8x128xf32>
    %354 = vector.extract_strided_slice %347 {offsets = [0, 128], sizes = [8, 128], strides = [1, 1]} : vector<8x512xf32> to vector<8x128xf32>
    %355 = arith.negf %354 : vector<8x128xf32>
    %356 = math.exp %355 : vector<8x128xf32>
    %cst_198 = arith.constant 1.000000e+00 : f32
    %357 = vector.broadcast %cst_198 : f32 to vector<8x128xf32>
    %358 = arith.addf %357, %356 : vector<8x128xf32>
    %359 = arith.divf %357, %358 : vector<8x128xf32>
    %360 = vector.extract_strided_slice %347 {offsets = [0, 256], sizes = [8, 128], strides = [1, 1]} : vector<8x512xf32> to vector<8x128xf32>
    %361 = math.tanh %360 : vector<8x128xf32>
    %362 = vector.extract_strided_slice %347 {offsets = [0, 384], sizes = [8, 128], strides = [1, 1]} : vector<8x512xf32> to vector<8x128xf32>
    %363 = arith.negf %362 : vector<8x128xf32>
    %364 = math.exp %363 : vector<8x128xf32>
    %cst_199 = arith.constant 1.000000e+00 : f32
    %365 = vector.broadcast %cst_199 : f32 to vector<8x128xf32>
    %366 = arith.addf %365, %364 : vector<8x128xf32>
    %367 = arith.divf %365, %366 : vector<8x128xf32>
    %368 = arith.mulf %359, %344 : vector<8x128xf32>
    %369 = arith.mulf %353, %361 : vector<8x128xf32>
    %370 = arith.addf %368, %369 : vector<8x128xf32>
    %371 = math.tanh %370 : vector<8x128xf32>
    %372 = arith.mulf %367, %371 : vector<8x128xf32>
    %c0_200 = arith.constant 0 : index
    %c0_201 = arith.constant 0 : index
    %373 = vector.load %arg14[%c0_200, %c0_201] : memref<8x128xf32, #tpu.memory_space<vmem>>, vector<8x128xf32>
    tpu.vector_store %arg14[%c0_200, %c0_201], %372 {strides = array<i32>} : memref<8x128xf32, #tpu.memory_space<vmem>>, vector<8x128xf32>,
    %c0_202 = arith.constant 0 : index
    %c0_203 = arith.constant 0 : index
    %374 = vector.load %arg15[%c0_202, %c0_203] : memref<8x128xf32, #tpu.memory_space<vmem>>, vector<8x128xf32>
    tpu.vector_store %arg15[%c0_202, %c0_203], %370 {strides = array<i32>} : memref<8x128xf32, #tpu.memory_space<vmem>>, vector<8x128xf32>,
    %c48_204 = arith.constant 48 : index
    %c0_205 = arith.constant 0 : index
    %375 = vector.load %arg12[%c48_204, %c0_205] : memref<64x128xf32, #tpu.memory_space<vmem>>, vector<8x128xf32>
    tpu.vector_store %arg12[%c48_204, %c0_205], %372 {strides = array<i32>} : memref<64x128xf32, #tpu.memory_space<vmem>>, vector<8x128xf32>,
    %c0_206 = arith.constant 0 : index
    %c0_207 = arith.constant 0 : index
    %376 = vector.load %arg14[%c0_206, %c0_207] : memref<8x128xf32, #tpu.memory_space<vmem>>, vector<8x128xf32>
    %c0_208 = arith.constant 0 : index
    %c0_209 = arith.constant 0 : index
    %377 = vector.load %arg15[%c0_208, %c0_209] : memref<8x128xf32, #tpu.memory_space<vmem>>, vector<8x128xf32>
    %c56_210 = arith.constant 56 : index
    %c0_211 = arith.constant 0 : index
    %378 = vector.load %arg13[%c56_210, %c0_211] : memref<64x512xf32, #tpu.memory_space<vmem>>, vector<8x512xf32>
    %cst_212 = arith.constant dense<0.000000e+00> : vector<8x512xf32>
    %379 = tpu.matmul %376, %134, %cst_212 {dimension_numbers = #tpu.dot_dimension_numbers<[1], [0], [0], [1], [0, 0, 1, 1], [], []>} : vector<8x128xf32>, vector<128x512xf32>, vector<8x512xf32> -> vector<8x512xf32>
    %380 = arith.addf %378, %379 : vector<8x512xf32>
    %381 = vector.extract_strided_slice %380 {offsets = [0, 0], sizes = [8, 128], strides = [1, 1]} : vector<8x512xf32> to vector<8x128xf32>
    %382 = arith.negf %381 : vector<8x128xf32>
    %383 = math.exp %382 : vector<8x128xf32>
    %cst_213 = arith.constant 1.000000e+00 : f32
    %384 = vector.broadcast %cst_213 : f32 to vector<8x128xf32>
    %385 = arith.addf %384, %383 : vector<8x128xf32>
    %386 = arith.divf %384, %385 : vector<8x128xf32>
    %387 = vector.extract_strided_slice %380 {offsets = [0, 128], sizes = [8, 128], strides = [1, 1]} : vector<8x512xf32> to vector<8x128xf32>
    %388 = arith.negf %387 : vector<8x128xf32>
    %389 = math.exp %388 : vector<8x128xf32>
    %cst_214 = arith.constant 1.000000e+00 : f32
    %390 = vector.broadcast %cst_214 : f32 to vector<8x128xf32>
    %391 = arith.addf %390, %389 : vector<8x128xf32>
    %392 = arith.divf %390, %391 : vector<8x128xf32>
    %393 = vector.extract_strided_slice %380 {offsets = [0, 256], sizes = [8, 128], strides = [1, 1]} : vector<8x512xf32> to vector<8x128xf32>
    %394 = math.tanh %393 : vector<8x128xf32>
    %395 = vector.extract_strided_slice %380 {offsets = [0, 384], sizes = [8, 128], strides = [1, 1]} : vector<8x512xf32> to vector<8x128xf32>
    %396 = arith.negf %395 : vector<8x128xf32>
    %397 = math.exp %396 : vector<8x128xf32>
    %cst_215 = arith.constant 1.000000e+00 : f32
    %398 = vector.broadcast %cst_215 : f32 to vector<8x128xf32>
    %399 = arith.addf %398, %397 : vector<8x128xf32>
    %400 = arith.divf %398, %399 : vector<8x128xf32>
    %401 = arith.mulf %392, %377 : vector<8x128xf32>
    %402 = arith.mulf %386, %394 : vector<8x128xf32>
    %403 = arith.addf %401, %402 : vector<8x128xf32>
    %404 = math.tanh %403 : vector<8x128xf32>
    %405 = arith.mulf %400, %404 : vector<8x128xf32>
    %c0_216 = arith.constant 0 : index
    %c0_217 = arith.constant 0 : index
    %406 = vector.load %arg14[%c0_216, %c0_217] : memref<8x128xf32, #tpu.memory_space<vmem>>, vector<8x128xf32>
    tpu.vector_store %arg14[%c0_216, %c0_217], %405 {strides = array<i32>} : memref<8x128xf32, #tpu.memory_space<vmem>>, vector<8x128xf32>,
    %c0_218 = arith.constant 0 : index
    %c0_219 = arith.constant 0 : index
    %407 = vector.load %arg15[%c0_218, %c0_219] : memref<8x128xf32, #tpu.memory_space<vmem>>, vector<8x128xf32>
    tpu.vector_store %arg15[%c0_218, %c0_219], %403 {strides = array<i32>} : memref<8x128xf32, #tpu.memory_space<vmem>>, vector<8x128xf32>,
    %c56_220 = arith.constant 56 : index
    %c0_221 = arith.constant 0 : index
    %408 = vector.load %arg12[%c56_220, %c0_221] : memref<64x128xf32, #tpu.memory_space<vmem>>, vector<8x128xf32>
    tpu.vector_store %arg12[%c56_220, %c0_221], %405 {strides = array<i32>} : memref<64x128xf32, #tpu.memory_space<vmem>>, vector<8x128xf32>,
    %c0_222 = arith.constant 0 : index
    %c0_223 = arith.constant 0 : index
    %409 = vector.load %arg6[%c0_222, %c0_223] : memref<128x512xf32, #tpu.memory_space<vmem>>, vector<128x512xf32>
    %c0_224 = arith.constant 0 : index
    %c0_225 = arith.constant 0 : index
    %410 = vector.load %arg7[%c0_224, %c0_225] : memref<128x512xf32, #tpu.memory_space<vmem>>, vector<128x512xf32>
    %c0_226 = arith.constant 0 : index
    %c0_227 = arith.constant 0 : index
    %411 = vector.load %arg8[%c0_226, %c0_227] : memref<1x512xf32, #tpu.memory_space<vmem>>, vector<1x512xf32>
    %cst_228 = arith.constant 0.000000e+00 : f32
    %412 = vector.broadcast %cst_228 : f32 to vector<8x128xf32>
    %c0_229 = arith.constant 0 : index
    %c0_230 = arith.constant 0 : index
    %413 = vector.load %arg14[%c0_229, %c0_230] : memref<8x128xf32, #tpu.memory_space<vmem>>, vector<8x128xf32>
    tpu.vector_store %arg14[%c0_229, %c0_230], %412 {strides = array<i32>} : memref<8x128xf32, #tpu.memory_space<vmem>>, vector<8x128xf32>,
    %cst_231 = arith.constant 0.000000e+00 : f32
    %414 = vector.broadcast %cst_231 : f32 to vector<8x128xf32>
    %c0_232 = arith.constant 0 : index
    %c0_233 = arith.constant 0 : index
    %415 = vector.load %arg15[%c0_232, %c0_233] : memref<8x128xf32, #tpu.memory_space<vmem>>, vector<8x128xf32>
    tpu.vector_store %arg15[%c0_232, %c0_233], %414 {strides = array<i32>} : memref<8x128xf32, #tpu.memory_space<vmem>>, vector<8x128xf32>,
    %c0_234 = arith.constant 0 : index
    %c0_235 = arith.constant 0 : index
    %416 = vector.load %arg12[%c0_234, %c0_235] : memref<64x128xf32, #tpu.memory_space<vmem>>, vector<64x128xf32>
    %cst_236 = arith.constant dense<0.000000e+00> : vector<64x512xf32>
    %417 = tpu.matmul %416, %409, %cst_236 {dimension_numbers = #tpu.dot_dimension_numbers<[1], [0], [0], [1], [0, 0, 1, 1], [], []>} : vector<64x128xf32>, vector<128x512xf32>, vector<64x512xf32> -> vector<64x512xf32>
    %418 = vector.broadcast %411 : vector<1x512xf32> to vector<64x512xf32>
    %419 = arith.addf %417, %418 : vector<64x512xf32>
    %c0_237 = arith.constant 0 : index
    %c0_238 = arith.constant 0 : index
    %420 = vector.load %arg13[%c0_237, %c0_238] : memref<64x512xf32, #tpu.memory_space<vmem>>, vector<64x512xf32>
    tpu.vector_store %arg13[%c0_237, %c0_238], %419 {strides = array<i32>} : memref<64x512xf32, #tpu.memory_space<vmem>>, vector<64x512xf32>,
    %c0_239 = arith.constant 0 : index
    %c0_240 = arith.constant 0 : index
    %421 = vector.load %arg14[%c0_239, %c0_240] : memref<8x128xf32, #tpu.memory_space<vmem>>, vector<8x128xf32>
    %c0_241 = arith.constant 0 : index
    %c0_242 = arith.constant 0 : index
    %422 = vector.load %arg15[%c0_241, %c0_242] : memref<8x128xf32, #tpu.memory_space<vmem>>, vector<8x128xf32>
    %c0_243 = arith.constant 0 : index
    %c0_244 = arith.constant 0 : index
    %423 = vector.load %arg13[%c0_243, %c0_244] : memref<64x512xf32, #tpu.memory_space<vmem>>, vector<8x512xf32>
    %cst_245 = arith.constant dense<0.000000e+00> : vector<8x512xf32>
    %424 = tpu.matmul %421, %410, %cst_245 {dimension_numbers = #tpu.dot_dimension_numbers<[1], [0], [0], [1], [0, 0, 1, 1], [], []>} : vector<8x128xf32>, vector<128x512xf32>, vector<8x512xf32> -> vector<8x512xf32>
    %425 = arith.addf %423, %424 : vector<8x512xf32>
    %426 = vector.extract_strided_slice %425 {offsets = [0, 0], sizes = [8, 128], strides = [1, 1]} : vector<8x512xf32> to vector<8x128xf32>
    %427 = arith.negf %426 : vector<8x128xf32>
    %428 = math.exp %427 : vector<8x128xf32>
    %cst_246 = arith.constant 1.000000e+00 : f32
    %429 = vector.broadcast %cst_246 : f32 to vector<8x128xf32>
    %430 = arith.addf %429, %428 : vector<8x128xf32>
    %431 = arith.divf %429, %430 : vector<8x128xf32>
    %432 = vector.extract_strided_slice %425 {offsets = [0, 128], sizes = [8, 128], strides = [1, 1]} : vector<8x512xf32> to vector<8x128xf32>
    %433 = arith.negf %432 : vector<8x128xf32>
    %434 = math.exp %433 : vector<8x128xf32>
    %cst_247 = arith.constant 1.000000e+00 : f32
    %435 = vector.broadcast %cst_247 : f32 to vector<8x128xf32>
    %436 = arith.addf %435, %434 : vector<8x128xf32>
    %437 = arith.divf %435, %436 : vector<8x128xf32>
    %438 = vector.extract_strided_slice %425 {offsets = [0, 256], sizes = [8, 128], strides = [1, 1]} : vector<8x512xf32> to vector<8x128xf32>
    %439 = math.tanh %438 : vector<8x128xf32>
    %440 = vector.extract_strided_slice %425 {offsets = [0, 384], sizes = [8, 128], strides = [1, 1]} : vector<8x512xf32> to vector<8x128xf32>
    %441 = arith.negf %440 : vector<8x128xf32>
    %442 = math.exp %441 : vector<8x128xf32>
    %cst_248 = arith.constant 1.000000e+00 : f32
    %443 = vector.broadcast %cst_248 : f32 to vector<8x128xf32>
    %444 = arith.addf %443, %442 : vector<8x128xf32>
    %445 = arith.divf %443, %444 : vector<8x128xf32>
    %446 = arith.mulf %437, %422 : vector<8x128xf32>
    %447 = arith.mulf %431, %439 : vector<8x128xf32>
    %448 = arith.addf %446, %447 : vector<8x128xf32>
    %449 = math.tanh %448 : vector<8x128xf32>
    %450 = arith.mulf %445, %449 : vector<8x128xf32>
    %c0_249 = arith.constant 0 : index
    %c0_250 = arith.constant 0 : index
    %451 = vector.load %arg14[%c0_249, %c0_250] : memref<8x128xf32, #tpu.memory_space<vmem>>, vector<8x128xf32>
    tpu.vector_store %arg14[%c0_249, %c0_250], %450 {strides = array<i32>} : memref<8x128xf32, #tpu.memory_space<vmem>>, vector<8x128xf32>,
    %c0_251 = arith.constant 0 : index
    %c0_252 = arith.constant 0 : index
    %452 = vector.load %arg15[%c0_251, %c0_252] : memref<8x128xf32, #tpu.memory_space<vmem>>, vector<8x128xf32>
    tpu.vector_store %arg15[%c0_251, %c0_252], %448 {strides = array<i32>} : memref<8x128xf32, #tpu.memory_space<vmem>>, vector<8x128xf32>,
    %c0_253 = arith.constant 0 : index
    %c0_254 = arith.constant 0 : index
    %453 = vector.load %arg16[%c0_253, %c0_254] : memref<8x128xf32, #tpu.memory_space<vmem>>, vector<8x128xf32>
    %c0_255 = arith.constant 0 : index
    %c0_256 = arith.constant 0 : index
    %c0_257 = arith.constant 0 : index
    %454 = vector.load %arg9[%c0_255, %c0_256, %c0_257] : memref<8x128x128xf32, #tpu.memory_space<vmem>>, vector<1x128x128xf32>
    %455 = vector.shape_cast %454 : vector<1x128x128xf32> to vector<128x128xf32>
    %cst_258 = arith.constant dense<0.000000e+00> : vector<8x128xf32>
    %456 = tpu.matmul %450, %455, %cst_258 {dimension_numbers = #tpu.dot_dimension_numbers<[1], [0], [0], [1], [0, 0, 1, 1], [], []>} : vector<8x128xf32>, vector<128x128xf32>, vector<8x128xf32> -> vector<8x128xf32>
    %457 = arith.addf %453, %456 : vector<8x128xf32>
    %c0_259 = arith.constant 0 : index
    %c0_260 = arith.constant 0 : index
    %458 = vector.load %arg16[%c0_259, %c0_260] : memref<8x128xf32, #tpu.memory_space<vmem>>, vector<8x128xf32>
    tpu.vector_store %arg16[%c0_259, %c0_260], %457 {strides = array<i32>} : memref<8x128xf32, #tpu.memory_space<vmem>>, vector<8x128xf32>,
    %c0_261 = arith.constant 0 : index
    %c0_262 = arith.constant 0 : index
    %459 = vector.load %arg14[%c0_261, %c0_262] : memref<8x128xf32, #tpu.memory_space<vmem>>, vector<8x128xf32>
    %c0_263 = arith.constant 0 : index
    %c0_264 = arith.constant 0 : index
    %460 = vector.load %arg15[%c0_263, %c0_264] : memref<8x128xf32, #tpu.memory_space<vmem>>, vector<8x128xf32>
    %c8_265 = arith.constant 8 : index
    %c0_266 = arith.constant 0 : index
    %461 = vector.load %arg13[%c8_265, %c0_266] : memref<64x512xf32, #tpu.memory_space<vmem>>, vector<8x512xf32>
    %cst_267 = arith.constant dense<0.000000e+00> : vector<8x512xf32>
    %462 = tpu.matmul %459, %410, %cst_267 {dimension_numbers = #tpu.dot_dimension_numbers<[1], [0], [0], [1], [0, 0, 1, 1], [], []>} : vector<8x128xf32>, vector<128x512xf32>, vector<8x512xf32> -> vector<8x512xf32>
    %463 = arith.addf %461, %462 : vector<8x512xf32>
    %464 = vector.extract_strided_slice %463 {offsets = [0, 0], sizes = [8, 128], strides = [1, 1]} : vector<8x512xf32> to vector<8x128xf32>
    %465 = arith.negf %464 : vector<8x128xf32>
    %466 = math.exp %465 : vector<8x128xf32>
    %cst_268 = arith.constant 1.000000e+00 : f32
    %467 = vector.broadcast %cst_268 : f32 to vector<8x128xf32>
    %468 = arith.addf %467, %466 : vector<8x128xf32>
    %469 = arith.divf %467, %468 : vector<8x128xf32>
    %470 = vector.extract_strided_slice %463 {offsets = [0, 128], sizes = [8, 128], strides = [1, 1]} : vector<8x512xf32> to vector<8x128xf32>
    %471 = arith.negf %470 : vector<8x128xf32>
    %472 = math.exp %471 : vector<8x128xf32>
    %cst_269 = arith.constant 1.000000e+00 : f32
    %473 = vector.broadcast %cst_269 : f32 to vector<8x128xf32>
    %474 = arith.addf %473, %472 : vector<8x128xf32>
    %475 = arith.divf %473, %474 : vector<8x128xf32>
    %476 = vector.extract_strided_slice %463 {offsets = [0, 256], sizes = [8, 128], strides = [1, 1]} : vector<8x512xf32> to vector<8x128xf32>
    %477 = math.tanh %476 : vector<8x128xf32>
    %478 = vector.extract_strided_slice %463 {offsets = [0, 384], sizes = [8, 128], strides = [1, 1]} : vector<8x512xf32> to vector<8x128xf32>
    %479 = arith.negf %478 : vector<8x128xf32>
    %480 = math.exp %479 : vector<8x128xf32>
    %cst_270 = arith.constant 1.000000e+00 : f32
    %481 = vector.broadcast %cst_270 : f32 to vector<8x128xf32>
    %482 = arith.addf %481, %480 : vector<8x128xf32>
    %483 = arith.divf %481, %482 : vector<8x128xf32>
    %484 = arith.mulf %475, %460 : vector<8x128xf32>
    %485 = arith.mulf %469, %477 : vector<8x128xf32>
    %486 = arith.addf %484, %485 : vector<8x128xf32>
    %487 = math.tanh %486 : vector<8x128xf32>
    %488 = arith.mulf %483, %487 : vector<8x128xf32>
    %c0_271 = arith.constant 0 : index
    %c0_272 = arith.constant 0 : index
    %489 = vector.load %arg14[%c0_271, %c0_272] : memref<8x128xf32, #tpu.memory_space<vmem>>, vector<8x128xf32>
    tpu.vector_store %arg14[%c0_271, %c0_272], %488 {strides = array<i32>} : memref<8x128xf32, #tpu.memory_space<vmem>>, vector<8x128xf32>,
    %c0_273 = arith.constant 0 : index
    %c0_274 = arith.constant 0 : index
    %490 = vector.load %arg15[%c0_273, %c0_274] : memref<8x128xf32, #tpu.memory_space<vmem>>, vector<8x128xf32>
    tpu.vector_store %arg15[%c0_273, %c0_274], %486 {strides = array<i32>} : memref<8x128xf32, #tpu.memory_space<vmem>>, vector<8x128xf32>,
    %c0_275 = arith.constant 0 : index
    %c0_276 = arith.constant 0 : index
    %491 = vector.load %arg16[%c0_275, %c0_276] : memref<8x128xf32, #tpu.memory_space<vmem>>, vector<8x128xf32>
    %c1_277 = arith.constant 1 : index
    %c0_278 = arith.constant 0 : index
    %c0_279 = arith.constant 0 : index
    %492 = vector.load %arg9[%c1_277, %c0_278, %c0_279] : memref<8x128x128xf32, #tpu.memory_space<vmem>>, vector<1x128x128xf32>
    %493 = vector.shape_cast %492 : vector<1x128x128xf32> to vector<128x128xf32>
    %cst_280 = arith.constant dense<0.000000e+00> : vector<8x128xf32>
    %494 = tpu.matmul %488, %493, %cst_280 {dimension_numbers = #tpu.dot_dimension_numbers<[1], [0], [0], [1], [0, 0, 1, 1], [], []>} : vector<8x128xf32>, vector<128x128xf32>, vector<8x128xf32> -> vector<8x128xf32>
    %495 = arith.addf %491, %494 : vector<8x128xf32>
    %c0_281 = arith.constant 0 : index
    %c0_282 = arith.constant 0 : index
    %496 = vector.load %arg16[%c0_281, %c0_282] : memref<8x128xf32, #tpu.memory_space<vmem>>, vector<8x128xf32>
    tpu.vector_store %arg16[%c0_281, %c0_282], %495 {strides = array<i32>} : memref<8x128xf32, #tpu.memory_space<vmem>>, vector<8x128xf32>,
    %c0_283 = arith.constant 0 : index
    %c0_284 = arith.constant 0 : index
    %497 = vector.load %arg14[%c0_283, %c0_284] : memref<8x128xf32, #tpu.memory_space<vmem>>, vector<8x128xf32>
    %c0_285 = arith.constant 0 : index
    %c0_286 = arith.constant 0 : index
    %498 = vector.load %arg15[%c0_285, %c0_286] : memref<8x128xf32, #tpu.memory_space<vmem>>, vector<8x128xf32>
    %c16_287 = arith.constant 16 : index
    %c0_288 = arith.constant 0 : index
    %499 = vector.load %arg13[%c16_287, %c0_288] : memref<64x512xf32, #tpu.memory_space<vmem>>, vector<8x512xf32>
    %cst_289 = arith.constant dense<0.000000e+00> : vector<8x512xf32>
    %500 = tpu.matmul %497, %410, %cst_289 {dimension_numbers = #tpu.dot_dimension_numbers<[1], [0], [0], [1], [0, 0, 1, 1], [], []>} : vector<8x128xf32>, vector<128x512xf32>, vector<8x512xf32> -> vector<8x512xf32>
    %501 = arith.addf %499, %500 : vector<8x512xf32>
    %502 = vector.extract_strided_slice %501 {offsets = [0, 0], sizes = [8, 128], strides = [1, 1]} : vector<8x512xf32> to vector<8x128xf32>
    %503 = arith.negf %502 : vector<8x128xf32>
    %504 = math.exp %503 : vector<8x128xf32>
    %cst_290 = arith.constant 1.000000e+00 : f32
    %505 = vector.broadcast %cst_290 : f32 to vector<8x128xf32>
    %506 = arith.addf %505, %504 : vector<8x128xf32>
    %507 = arith.divf %505, %506 : vector<8x128xf32>
    %508 = vector.extract_strided_slice %501 {offsets = [0, 128], sizes = [8, 128], strides = [1, 1]} : vector<8x512xf32> to vector<8x128xf32>
    %509 = arith.negf %508 : vector<8x128xf32>
    %510 = math.exp %509 : vector<8x128xf32>
    %cst_291 = arith.constant 1.000000e+00 : f32
    %511 = vector.broadcast %cst_291 : f32 to vector<8x128xf32>
    %512 = arith.addf %511, %510 : vector<8x128xf32>
    %513 = arith.divf %511, %512 : vector<8x128xf32>
    %514 = vector.extract_strided_slice %501 {offsets = [0, 256], sizes = [8, 128], strides = [1, 1]} : vector<8x512xf32> to vector<8x128xf32>
    %515 = math.tanh %514 : vector<8x128xf32>
    %516 = vector.extract_strided_slice %501 {offsets = [0, 384], sizes = [8, 128], strides = [1, 1]} : vector<8x512xf32> to vector<8x128xf32>
    %517 = arith.negf %516 : vector<8x128xf32>
    %518 = math.exp %517 : vector<8x128xf32>
    %cst_292 = arith.constant 1.000000e+00 : f32
    %519 = vector.broadcast %cst_292 : f32 to vector<8x128xf32>
    %520 = arith.addf %519, %518 : vector<8x128xf32>
    %521 = arith.divf %519, %520 : vector<8x128xf32>
    %522 = arith.mulf %513, %498 : vector<8x128xf32>
    %523 = arith.mulf %507, %515 : vector<8x128xf32>
    %524 = arith.addf %522, %523 : vector<8x128xf32>
    %525 = math.tanh %524 : vector<8x128xf32>
    %526 = arith.mulf %521, %525 : vector<8x128xf32>
    %c0_293 = arith.constant 0 : index
    %c0_294 = arith.constant 0 : index
    %527 = vector.load %arg14[%c0_293, %c0_294] : memref<8x128xf32, #tpu.memory_space<vmem>>, vector<8x128xf32>
    tpu.vector_store %arg14[%c0_293, %c0_294], %526 {strides = array<i32>} : memref<8x128xf32, #tpu.memory_space<vmem>>, vector<8x128xf32>,
    %c0_295 = arith.constant 0 : index
    %c0_296 = arith.constant 0 : index
    %528 = vector.load %arg15[%c0_295, %c0_296] : memref<8x128xf32, #tpu.memory_space<vmem>>, vector<8x128xf32>
    tpu.vector_store %arg15[%c0_295, %c0_296], %524 {strides = array<i32>} : memref<8x128xf32, #tpu.memory_space<vmem>>, vector<8x128xf32>,
    %c0_297 = arith.constant 0 : index
    %c0_298 = arith.constant 0 : index
    %529 = vector.load %arg16[%c0_297, %c0_298] : memref<8x128xf32, #tpu.memory_space<vmem>>, vector<8x128xf32>
    %c2 = arith.constant 2 : index
    %c0_299 = arith.constant 0 : index
    %c0_300 = arith.constant 0 : index
    %530 = vector.load %arg9[%c2, %c0_299, %c0_300] : memref<8x128x128xf32, #tpu.memory_space<vmem>>, vector<1x128x128xf32>
    %531 = vector.shape_cast %530 : vector<1x128x128xf32> to vector<128x128xf32>
    %cst_301 = arith.constant dense<0.000000e+00> : vector<8x128xf32>
    %532 = tpu.matmul %526, %531, %cst_301 {dimension_numbers = #tpu.dot_dimension_numbers<[1], [0], [0], [1], [0, 0, 1, 1], [], []>} : vector<8x128xf32>, vector<128x128xf32>, vector<8x128xf32> -> vector<8x128xf32>
    %533 = arith.addf %529, %532 : vector<8x128xf32>
    %c0_302 = arith.constant 0 : index
    %c0_303 = arith.constant 0 : index
    %534 = vector.load %arg16[%c0_302, %c0_303] : memref<8x128xf32, #tpu.memory_space<vmem>>, vector<8x128xf32>
    tpu.vector_store %arg16[%c0_302, %c0_303], %533 {strides = array<i32>} : memref<8x128xf32, #tpu.memory_space<vmem>>, vector<8x128xf32>,
    %c0_304 = arith.constant 0 : index
    %c0_305 = arith.constant 0 : index
    %535 = vector.load %arg14[%c0_304, %c0_305] : memref<8x128xf32, #tpu.memory_space<vmem>>, vector<8x128xf32>
    %c0_306 = arith.constant 0 : index
    %c0_307 = arith.constant 0 : index
    %536 = vector.load %arg15[%c0_306, %c0_307] : memref<8x128xf32, #tpu.memory_space<vmem>>, vector<8x128xf32>
    %c24_308 = arith.constant 24 : index
    %c0_309 = arith.constant 0 : index
    %537 = vector.load %arg13[%c24_308, %c0_309] : memref<64x512xf32, #tpu.memory_space<vmem>>, vector<8x512xf32>
    %cst_310 = arith.constant dense<0.000000e+00> : vector<8x512xf32>
    %538 = tpu.matmul %535, %410, %cst_310 {dimension_numbers = #tpu.dot_dimension_numbers<[1], [0], [0], [1], [0, 0, 1, 1], [], []>} : vector<8x128xf32>, vector<128x512xf32>, vector<8x512xf32> -> vector<8x512xf32>
    %539 = arith.addf %537, %538 : vector<8x512xf32>
    %540 = vector.extract_strided_slice %539 {offsets = [0, 0], sizes = [8, 128], strides = [1, 1]} : vector<8x512xf32> to vector<8x128xf32>
    %541 = arith.negf %540 : vector<8x128xf32>
    %542 = math.exp %541 : vector<8x128xf32>
    %cst_311 = arith.constant 1.000000e+00 : f32
    %543 = vector.broadcast %cst_311 : f32 to vector<8x128xf32>
    %544 = arith.addf %543, %542 : vector<8x128xf32>
    %545 = arith.divf %543, %544 : vector<8x128xf32>
    %546 = vector.extract_strided_slice %539 {offsets = [0, 128], sizes = [8, 128], strides = [1, 1]} : vector<8x512xf32> to vector<8x128xf32>
    %547 = arith.negf %546 : vector<8x128xf32>
    %548 = math.exp %547 : vector<8x128xf32>
    %cst_312 = arith.constant 1.000000e+00 : f32
    %549 = vector.broadcast %cst_312 : f32 to vector<8x128xf32>
    %550 = arith.addf %549, %548 : vector<8x128xf32>
    %551 = arith.divf %549, %550 : vector<8x128xf32>
    %552 = vector.extract_strided_slice %539 {offsets = [0, 256], sizes = [8, 128], strides = [1, 1]} : vector<8x512xf32> to vector<8x128xf32>
    %553 = math.tanh %552 : vector<8x128xf32>
    %554 = vector.extract_strided_slice %539 {offsets = [0, 384], sizes = [8, 128], strides = [1, 1]} : vector<8x512xf32> to vector<8x128xf32>
    %555 = arith.negf %554 : vector<8x128xf32>
    %556 = math.exp %555 : vector<8x128xf32>
    %cst_313 = arith.constant 1.000000e+00 : f32
    %557 = vector.broadcast %cst_313 : f32 to vector<8x128xf32>
    %558 = arith.addf %557, %556 : vector<8x128xf32>
    %559 = arith.divf %557, %558 : vector<8x128xf32>
    %560 = arith.mulf %551, %536 : vector<8x128xf32>
    %561 = arith.mulf %545, %553 : vector<8x128xf32>
    %562 = arith.addf %560, %561 : vector<8x128xf32>
    %563 = math.tanh %562 : vector<8x128xf32>
    %564 = arith.mulf %559, %563 : vector<8x128xf32>
    %c0_314 = arith.constant 0 : index
    %c0_315 = arith.constant 0 : index
    %565 = vector.load %arg14[%c0_314, %c0_315] : memref<8x128xf32, #tpu.memory_space<vmem>>, vector<8x128xf32>
    tpu.vector_store %arg14[%c0_314, %c0_315], %564 {strides = array<i32>} : memref<8x128xf32, #tpu.memory_space<vmem>>, vector<8x128xf32>,
    %c0_316 = arith.constant 0 : index
    %c0_317 = arith.constant 0 : index
    %566 = vector.load %arg15[%c0_316, %c0_317] : memref<8x128xf32, #tpu.memory_space<vmem>>, vector<8x128xf32>
    tpu.vector_store %arg15[%c0_316, %c0_317], %562 {strides = array<i32>} : memref<8x128xf32, #tpu.memory_space<vmem>>, vector<8x128xf32>,
    %c0_318 = arith.constant 0 : index
    %c0_319 = arith.constant 0 : index
    %567 = vector.load %arg16[%c0_318, %c0_319] : memref<8x128xf32, #tpu.memory_space<vmem>>, vector<8x128xf32>
    %c3 = arith.constant 3 : index
    %c0_320 = arith.constant 0 : index
    %c0_321 = arith.constant 0 : index
    %568 = vector.load %arg9[%c3, %c0_320, %c0_321] : memref<8x128x128xf32, #tpu.memory_space<vmem>>, vector<1x128x128xf32>
    %569 = vector.shape_cast %568 : vector<1x128x128xf32> to vector<128x128xf32>
    %cst_322 = arith.constant dense<0.000000e+00> : vector<8x128xf32>
    %570 = tpu.matmul %564, %569, %cst_322 {dimension_numbers = #tpu.dot_dimension_numbers<[1], [0], [0], [1], [0, 0, 1, 1], [], []>} : vector<8x128xf32>, vector<128x128xf32>, vector<8x128xf32> -> vector<8x128xf32>
    %571 = arith.addf %567, %570 : vector<8x128xf32>
    %c0_323 = arith.constant 0 : index
    %c0_324 = arith.constant 0 : index
    %572 = vector.load %arg16[%c0_323, %c0_324] : memref<8x128xf32, #tpu.memory_space<vmem>>, vector<8x128xf32>
    tpu.vector_store %arg16[%c0_323, %c0_324], %571 {strides = array<i32>} : memref<8x128xf32, #tpu.memory_space<vmem>>, vector<8x128xf32>,
    %c0_325 = arith.constant 0 : index
    %c0_326 = arith.constant 0 : index
    %573 = vector.load %arg14[%c0_325, %c0_326] : memref<8x128xf32, #tpu.memory_space<vmem>>, vector<8x128xf32>
    %c0_327 = arith.constant 0 : index
    %c0_328 = arith.constant 0 : index
    %574 = vector.load %arg15[%c0_327, %c0_328] : memref<8x128xf32, #tpu.memory_space<vmem>>, vector<8x128xf32>
    %c32_329 = arith.constant 32 : index
    %c0_330 = arith.constant 0 : index
    %575 = vector.load %arg13[%c32_329, %c0_330] : memref<64x512xf32, #tpu.memory_space<vmem>>, vector<8x512xf32>
    %cst_331 = arith.constant dense<0.000000e+00> : vector<8x512xf32>
    %576 = tpu.matmul %573, %410, %cst_331 {dimension_numbers = #tpu.dot_dimension_numbers<[1], [0], [0], [1], [0, 0, 1, 1], [], []>} : vector<8x128xf32>, vector<128x512xf32>, vector<8x512xf32> -> vector<8x512xf32>
    %577 = arith.addf %575, %576 : vector<8x512xf32>
    %578 = vector.extract_strided_slice %577 {offsets = [0, 0], sizes = [8, 128], strides = [1, 1]} : vector<8x512xf32> to vector<8x128xf32>
    %579 = arith.negf %578 : vector<8x128xf32>
    %580 = math.exp %579 : vector<8x128xf32>
    %cst_332 = arith.constant 1.000000e+00 : f32
    %581 = vector.broadcast %cst_332 : f32 to vector<8x128xf32>
    %582 = arith.addf %581, %580 : vector<8x128xf32>
    %583 = arith.divf %581, %582 : vector<8x128xf32>
    %584 = vector.extract_strided_slice %577 {offsets = [0, 128], sizes = [8, 128], strides = [1, 1]} : vector<8x512xf32> to vector<8x128xf32>
    %585 = arith.negf %584 : vector<8x128xf32>
    %586 = math.exp %585 : vector<8x128xf32>
    %cst_333 = arith.constant 1.000000e+00 : f32
    %587 = vector.broadcast %cst_333 : f32 to vector<8x128xf32>
    %588 = arith.addf %587, %586 : vector<8x128xf32>
    %589 = arith.divf %587, %588 : vector<8x128xf32>
    %590 = vector.extract_strided_slice %577 {offsets = [0, 256], sizes = [8, 128], strides = [1, 1]} : vector<8x512xf32> to vector<8x128xf32>
    %591 = math.tanh %590 : vector<8x128xf32>
    %592 = vector.extract_strided_slice %577 {offsets = [0, 384], sizes = [8, 128], strides = [1, 1]} : vector<8x512xf32> to vector<8x128xf32>
    %593 = arith.negf %592 : vector<8x128xf32>
    %594 = math.exp %593 : vector<8x128xf32>
    %cst_334 = arith.constant 1.000000e+00 : f32
    %595 = vector.broadcast %cst_334 : f32 to vector<8x128xf32>
    %596 = arith.addf %595, %594 : vector<8x128xf32>
    %597 = arith.divf %595, %596 : vector<8x128xf32>
    %598 = arith.mulf %589, %574 : vector<8x128xf32>
    %599 = arith.mulf %583, %591 : vector<8x128xf32>
    %600 = arith.addf %598, %599 : vector<8x128xf32>
    %601 = math.tanh %600 : vector<8x128xf32>
    %602 = arith.mulf %597, %601 : vector<8x128xf32>
    %c0_335 = arith.constant 0 : index
    %c0_336 = arith.constant 0 : index
    %603 = vector.load %arg14[%c0_335, %c0_336] : memref<8x128xf32, #tpu.memory_space<vmem>>, vector<8x128xf32>
    tpu.vector_store %arg14[%c0_335, %c0_336], %602 {strides = array<i32>} : memref<8x128xf32, #tpu.memory_space<vmem>>, vector<8x128xf32>,
    %c0_337 = arith.constant 0 : index
    %c0_338 = arith.constant 0 : index
    %604 = vector.load %arg15[%c0_337, %c0_338] : memref<8x128xf32, #tpu.memory_space<vmem>>, vector<8x128xf32>
    tpu.vector_store %arg15[%c0_337, %c0_338], %600 {strides = array<i32>} : memref<8x128xf32, #tpu.memory_space<vmem>>, vector<8x128xf32>,
    %c0_339 = arith.constant 0 : index
    %c0_340 = arith.constant 0 : index
    %605 = vector.load %arg16[%c0_339, %c0_340] : memref<8x128xf32, #tpu.memory_space<vmem>>, vector<8x128xf32>
    %c4 = arith.constant 4 : index
    %c0_341 = arith.constant 0 : index
    %c0_342 = arith.constant 0 : index
    %606 = vector.load %arg9[%c4, %c0_341, %c0_342] : memref<8x128x128xf32, #tpu.memory_space<vmem>>, vector<1x128x128xf32>
    %607 = vector.shape_cast %606 : vector<1x128x128xf32> to vector<128x128xf32>
    %cst_343 = arith.constant dense<0.000000e+00> : vector<8x128xf32>
    %608 = tpu.matmul %602, %607, %cst_343 {dimension_numbers = #tpu.dot_dimension_numbers<[1], [0], [0], [1], [0, 0, 1, 1], [], []>} : vector<8x128xf32>, vector<128x128xf32>, vector<8x128xf32> -> vector<8x128xf32>
    %609 = arith.addf %605, %608 : vector<8x128xf32>
    %c0_344 = arith.constant 0 : index
    %c0_345 = arith.constant 0 : index
    %610 = vector.load %arg16[%c0_344, %c0_345] : memref<8x128xf32, #tpu.memory_space<vmem>>, vector<8x128xf32>
    tpu.vector_store %arg16[%c0_344, %c0_345], %609 {strides = array<i32>} : memref<8x128xf32, #tpu.memory_space<vmem>>, vector<8x128xf32>,
    %c0_346 = arith.constant 0 : index
    %c0_347 = arith.constant 0 : index
    %611 = vector.load %arg14[%c0_346, %c0_347] : memref<8x128xf32, #tpu.memory_space<vmem>>, vector<8x128xf32>
    %c0_348 = arith.constant 0 : index
    %c0_349 = arith.constant 0 : index
    %612 = vector.load %arg15[%c0_348, %c0_349] : memref<8x128xf32, #tpu.memory_space<vmem>>, vector<8x128xf32>
    %c40_350 = arith.constant 40 : index
    %c0_351 = arith.constant 0 : index
    %613 = vector.load %arg13[%c40_350, %c0_351] : memref<64x512xf32, #tpu.memory_space<vmem>>, vector<8x512xf32>
    %cst_352 = arith.constant dense<0.000000e+00> : vector<8x512xf32>
    %614 = tpu.matmul %611, %410, %cst_352 {dimension_numbers = #tpu.dot_dimension_numbers<[1], [0], [0], [1], [0, 0, 1, 1], [], []>} : vector<8x128xf32>, vector<128x512xf32>, vector<8x512xf32> -> vector<8x512xf32>
    %615 = arith.addf %613, %614 : vector<8x512xf32>
    %616 = vector.extract_strided_slice %615 {offsets = [0, 0], sizes = [8, 128], strides = [1, 1]} : vector<8x512xf32> to vector<8x128xf32>
    %617 = arith.negf %616 : vector<8x128xf32>
    %618 = math.exp %617 : vector<8x128xf32>
    %cst_353 = arith.constant 1.000000e+00 : f32
    %619 = vector.broadcast %cst_353 : f32 to vector<8x128xf32>
    %620 = arith.addf %619, %618 : vector<8x128xf32>
    %621 = arith.divf %619, %620 : vector<8x128xf32>
    %622 = vector.extract_strided_slice %615 {offsets = [0, 128], sizes = [8, 128], strides = [1, 1]} : vector<8x512xf32> to vector<8x128xf32>
    %623 = arith.negf %622 : vector<8x128xf32>
    %624 = math.exp %623 : vector<8x128xf32>
    %cst_354 = arith.constant 1.000000e+00 : f32
    %625 = vector.broadcast %cst_354 : f32 to vector<8x128xf32>
    %626 = arith.addf %625, %624 : vector<8x128xf32>
    %627 = arith.divf %625, %626 : vector<8x128xf32>
    %628 = vector.extract_strided_slice %615 {offsets = [0, 256], sizes = [8, 128], strides = [1, 1]} : vector<8x512xf32> to vector<8x128xf32>
    %629 = math.tanh %628 : vector<8x128xf32>
    %630 = vector.extract_strided_slice %615 {offsets = [0, 384], sizes = [8, 128], strides = [1, 1]} : vector<8x512xf32> to vector<8x128xf32>
    %631 = arith.negf %630 : vector<8x128xf32>
    %632 = math.exp %631 : vector<8x128xf32>
    %cst_355 = arith.constant 1.000000e+00 : f32
    %633 = vector.broadcast %cst_355 : f32 to vector<8x128xf32>
    %634 = arith.addf %633, %632 : vector<8x128xf32>
    %635 = arith.divf %633, %634 : vector<8x128xf32>
    %636 = arith.mulf %627, %612 : vector<8x128xf32>
    %637 = arith.mulf %621, %629 : vector<8x128xf32>
    %638 = arith.addf %636, %637 : vector<8x128xf32>
    %639 = math.tanh %638 : vector<8x128xf32>
    %640 = arith.mulf %635, %639 : vector<8x128xf32>
    %c0_356 = arith.constant 0 : index
    %c0_357 = arith.constant 0 : index
    %641 = vector.load %arg14[%c0_356, %c0_357] : memref<8x128xf32, #tpu.memory_space<vmem>>, vector<8x128xf32>
    tpu.vector_store %arg14[%c0_356, %c0_357], %640 {strides = array<i32>} : memref<8x128xf32, #tpu.memory_space<vmem>>, vector<8x128xf32>,
    %c0_358 = arith.constant 0 : index
    %c0_359 = arith.constant 0 : index
    %642 = vector.load %arg15[%c0_358, %c0_359] : memref<8x128xf32, #tpu.memory_space<vmem>>, vector<8x128xf32>
    tpu.vector_store %arg15[%c0_358, %c0_359], %638 {strides = array<i32>} : memref<8x128xf32, #tpu.memory_space<vmem>>, vector<8x128xf32>,
    %c0_360 = arith.constant 0 : index
    %c0_361 = arith.constant 0 : index
    %643 = vector.load %arg16[%c0_360, %c0_361] : memref<8x128xf32, #tpu.memory_space<vmem>>, vector<8x128xf32>
    %c5 = arith.constant 5 : index
    %c0_362 = arith.constant 0 : index
    %c0_363 = arith.constant 0 : index
    %644 = vector.load %arg9[%c5, %c0_362, %c0_363] : memref<8x128x128xf32, #tpu.memory_space<vmem>>, vector<1x128x128xf32>
    %645 = vector.shape_cast %644 : vector<1x128x128xf32> to vector<128x128xf32>
    %cst_364 = arith.constant dense<0.000000e+00> : vector<8x128xf32>
    %646 = tpu.matmul %640, %645, %cst_364 {dimension_numbers = #tpu.dot_dimension_numbers<[1], [0], [0], [1], [0, 0, 1, 1], [], []>} : vector<8x128xf32>, vector<128x128xf32>, vector<8x128xf32> -> vector<8x128xf32>
    %647 = arith.addf %643, %646 : vector<8x128xf32>
    %c0_365 = arith.constant 0 : index
    %c0_366 = arith.constant 0 : index
    %648 = vector.load %arg16[%c0_365, %c0_366] : memref<8x128xf32, #tpu.memory_space<vmem>>, vector<8x128xf32>
    tpu.vector_store %arg16[%c0_365, %c0_366], %647 {strides = array<i32>} : memref<8x128xf32, #tpu.memory_space<vmem>>, vector<8x128xf32>,
    %c0_367 = arith.constant 0 : index
    %c0_368 = arith.constant 0 : index
    %649 = vector.load %arg14[%c0_367, %c0_368] : memref<8x128xf32, #tpu.memory_space<vmem>>, vector<8x128xf32>
    %c0_369 = arith.constant 0 : index
    %c0_370 = arith.constant 0 : index
    %650 = vector.load %arg15[%c0_369, %c0_370] : memref<8x128xf32, #tpu.memory_space<vmem>>, vector<8x128xf32>
    %c48_371 = arith.constant 48 : index
    %c0_372 = arith.constant 0 : index
    %651 = vector.load %arg13[%c48_371, %c0_372] : memref<64x512xf32, #tpu.memory_space<vmem>>, vector<8x512xf32>
    %cst_373 = arith.constant dense<0.000000e+00> : vector<8x512xf32>
    %652 = tpu.matmul %649, %410, %cst_373 {dimension_numbers = #tpu.dot_dimension_numbers<[1], [0], [0], [1], [0, 0, 1, 1], [], []>} : vector<8x128xf32>, vector<128x512xf32>, vector<8x512xf32> -> vector<8x512xf32>
    %653 = arith.addf %651, %652 : vector<8x512xf32>
    %654 = vector.extract_strided_slice %653 {offsets = [0, 0], sizes = [8, 128], strides = [1, 1]} : vector<8x512xf32> to vector<8x128xf32>
    %655 = arith.negf %654 : vector<8x128xf32>
    %656 = math.exp %655 : vector<8x128xf32>
    %cst_374 = arith.constant 1.000000e+00 : f32
    %657 = vector.broadcast %cst_374 : f32 to vector<8x128xf32>
    %658 = arith.addf %657, %656 : vector<8x128xf32>
    %659 = arith.divf %657, %658 : vector<8x128xf32>
    %660 = vector.extract_strided_slice %653 {offsets = [0, 128], sizes = [8, 128], strides = [1, 1]} : vector<8x512xf32> to vector<8x128xf32>
    %661 = arith.negf %660 : vector<8x128xf32>
    %662 = math.exp %661 : vector<8x128xf32>
    %cst_375 = arith.constant 1.000000e+00 : f32
    %663 = vector.broadcast %cst_375 : f32 to vector<8x128xf32>
    %664 = arith.addf %663, %662 : vector<8x128xf32>
    %665 = arith.divf %663, %664 : vector<8x128xf32>
    %666 = vector.extract_strided_slice %653 {offsets = [0, 256], sizes = [8, 128], strides = [1, 1]} : vector<8x512xf32> to vector<8x128xf32>
    %667 = math.tanh %666 : vector<8x128xf32>
    %668 = vector.extract_strided_slice %653 {offsets = [0, 384], sizes = [8, 128], strides = [1, 1]} : vector<8x512xf32> to vector<8x128xf32>
    %669 = arith.negf %668 : vector<8x128xf32>
    %670 = math.exp %669 : vector<8x128xf32>
    %cst_376 = arith.constant 1.000000e+00 : f32
    %671 = vector.broadcast %cst_376 : f32 to vector<8x128xf32>
    %672 = arith.addf %671, %670 : vector<8x128xf32>
    %673 = arith.divf %671, %672 : vector<8x128xf32>
    %674 = arith.mulf %665, %650 : vector<8x128xf32>
    %675 = arith.mulf %659, %667 : vector<8x128xf32>
    %676 = arith.addf %674, %675 : vector<8x128xf32>
    %677 = math.tanh %676 : vector<8x128xf32>
    %678 = arith.mulf %673, %677 : vector<8x128xf32>
    %c0_377 = arith.constant 0 : index
    %c0_378 = arith.constant 0 : index
    %679 = vector.load %arg14[%c0_377, %c0_378] : memref<8x128xf32, #tpu.memory_space<vmem>>, vector<8x128xf32>
    tpu.vector_store %arg14[%c0_377, %c0_378], %678 {strides = array<i32>} : memref<8x128xf32, #tpu.memory_space<vmem>>, vector<8x128xf32>,
    %c0_379 = arith.constant 0 : index
    %c0_380 = arith.constant 0 : index
    %680 = vector.load %arg15[%c0_379, %c0_380] : memref<8x128xf32, #tpu.memory_space<vmem>>, vector<8x128xf32>
    tpu.vector_store %arg15[%c0_379, %c0_380], %676 {strides = array<i32>} : memref<8x128xf32, #tpu.memory_space<vmem>>, vector<8x128xf32>,
    %c0_381 = arith.constant 0 : index
    %c0_382 = arith.constant 0 : index
    %681 = vector.load %arg16[%c0_381, %c0_382] : memref<8x128xf32, #tpu.memory_space<vmem>>, vector<8x128xf32>
    %c6 = arith.constant 6 : index
    %c0_383 = arith.constant 0 : index
    %c0_384 = arith.constant 0 : index
    %682 = vector.load %arg9[%c6, %c0_383, %c0_384] : memref<8x128x128xf32, #tpu.memory_space<vmem>>, vector<1x128x128xf32>
    %683 = vector.shape_cast %682 : vector<1x128x128xf32> to vector<128x128xf32>
    %cst_385 = arith.constant dense<0.000000e+00> : vector<8x128xf32>
    %684 = tpu.matmul %678, %683, %cst_385 {dimension_numbers = #tpu.dot_dimension_numbers<[1], [0], [0], [1], [0, 0, 1, 1], [], []>} : vector<8x128xf32>, vector<128x128xf32>, vector<8x128xf32> -> vector<8x128xf32>
    %685 = arith.addf %681, %684 : vector<8x128xf32>
    %c0_386 = arith.constant 0 : index
    %c0_387 = arith.constant 0 : index
    %686 = vector.load %arg16[%c0_386, %c0_387] : memref<8x128xf32, #tpu.memory_space<vmem>>, vector<8x128xf32>
    tpu.vector_store %arg16[%c0_386, %c0_387], %685 {strides = array<i32>} : memref<8x128xf32, #tpu.memory_space<vmem>>, vector<8x128xf32>,
    %c0_388 = arith.constant 0 : index
    %c0_389 = arith.constant 0 : index
    %687 = vector.load %arg14[%c0_388, %c0_389] : memref<8x128xf32, #tpu.memory_space<vmem>>, vector<8x128xf32>
    %c0_390 = arith.constant 0 : index
    %c0_391 = arith.constant 0 : index
    %688 = vector.load %arg15[%c0_390, %c0_391] : memref<8x128xf32, #tpu.memory_space<vmem>>, vector<8x128xf32>
    %c56_392 = arith.constant 56 : index
    %c0_393 = arith.constant 0 : index
    %689 = vector.load %arg13[%c56_392, %c0_393] : memref<64x512xf32, #tpu.memory_space<vmem>>, vector<8x512xf32>
    %cst_394 = arith.constant dense<0.000000e+00> : vector<8x512xf32>
    %690 = tpu.matmul %687, %410, %cst_394 {dimension_numbers = #tpu.dot_dimension_numbers<[1], [0], [0], [1], [0, 0, 1, 1], [], []>} : vector<8x128xf32>, vector<128x512xf32>, vector<8x512xf32> -> vector<8x512xf32>
    %691 = arith.addf %689, %690 : vector<8x512xf32>
    %692 = vector.extract_strided_slice %691 {offsets = [0, 0], sizes = [8, 128], strides = [1, 1]} : vector<8x512xf32> to vector<8x128xf32>
    %693 = arith.negf %692 : vector<8x128xf32>
    %694 = math.exp %693 : vector<8x128xf32>
    %cst_395 = arith.constant 1.000000e+00 : f32
    %695 = vector.broadcast %cst_395 : f32 to vector<8x128xf32>
    %696 = arith.addf %695, %694 : vector<8x128xf32>
    %697 = arith.divf %695, %696 : vector<8x128xf32>
    %698 = vector.extract_strided_slice %691 {offsets = [0, 128], sizes = [8, 128], strides = [1, 1]} : vector<8x512xf32> to vector<8x128xf32>
    %699 = arith.negf %698 : vector<8x128xf32>
    %700 = math.exp %699 : vector<8x128xf32>
    %cst_396 = arith.constant 1.000000e+00 : f32
    %701 = vector.broadcast %cst_396 : f32 to vector<8x128xf32>
    %702 = arith.addf %701, %700 : vector<8x128xf32>
    %703 = arith.divf %701, %702 : vector<8x128xf32>
    %704 = vector.extract_strided_slice %691 {offsets = [0, 256], sizes = [8, 128], strides = [1, 1]} : vector<8x512xf32> to vector<8x128xf32>
    %705 = math.tanh %704 : vector<8x128xf32>
    %706 = vector.extract_strided_slice %691 {offsets = [0, 384], sizes = [8, 128], strides = [1, 1]} : vector<8x512xf32> to vector<8x128xf32>
    %707 = arith.negf %706 : vector<8x128xf32>
    %708 = math.exp %707 : vector<8x128xf32>
    %cst_397 = arith.constant 1.000000e+00 : f32
    %709 = vector.broadcast %cst_397 : f32 to vector<8x128xf32>
    %710 = arith.addf %709, %708 : vector<8x128xf32>
    %711 = arith.divf %709, %710 : vector<8x128xf32>
    %712 = arith.mulf %703, %688 : vector<8x128xf32>
    %713 = arith.mulf %697, %705 : vector<8x128xf32>
    %714 = arith.addf %712, %713 : vector<8x128xf32>
    %715 = math.tanh %714 : vector<8x128xf32>
    %716 = arith.mulf %711, %715 : vector<8x128xf32>
    %c0_398 = arith.constant 0 : index
    %c0_399 = arith.constant 0 : index
    %717 = vector.load %arg14[%c0_398, %c0_399] : memref<8x128xf32, #tpu.memory_space<vmem>>, vector<8x128xf32>
    tpu.vector_store %arg14[%c0_398, %c0_399], %716 {strides = array<i32>} : memref<8x128xf32, #tpu.memory_space<vmem>>, vector<8x128xf32>,
    %c0_400 = arith.constant 0 : index
    %c0_401 = arith.constant 0 : index
    %718 = vector.load %arg15[%c0_400, %c0_401] : memref<8x128xf32, #tpu.memory_space<vmem>>, vector<8x128xf32>
    tpu.vector_store %arg15[%c0_400, %c0_401], %714 {strides = array<i32>} : memref<8x128xf32, #tpu.memory_space<vmem>>, vector<8x128xf32>,
    %c0_402 = arith.constant 0 : index
    %c0_403 = arith.constant 0 : index
    %719 = vector.load %arg16[%c0_402, %c0_403] : memref<8x128xf32, #tpu.memory_space<vmem>>, vector<8x128xf32>
    %c7 = arith.constant 7 : index
    %c0_404 = arith.constant 0 : index
    %c0_405 = arith.constant 0 : index
    %720 = vector.load %arg9[%c7, %c0_404, %c0_405] : memref<8x128x128xf32, #tpu.memory_space<vmem>>, vector<1x128x128xf32>
    %721 = vector.shape_cast %720 : vector<1x128x128xf32> to vector<128x128xf32>
    %cst_406 = arith.constant dense<0.000000e+00> : vector<8x128xf32>
    %722 = tpu.matmul %716, %721, %cst_406 {dimension_numbers = #tpu.dot_dimension_numbers<[1], [0], [0], [1], [0, 0, 1, 1], [], []>} : vector<8x128xf32>, vector<128x128xf32>, vector<8x128xf32> -> vector<8x128xf32>
    %723 = arith.addf %719, %722 : vector<8x128xf32>
    %c0_407 = arith.constant 0 : index
    %c0_408 = arith.constant 0 : index
    %724 = vector.load %arg16[%c0_407, %c0_408] : memref<8x128xf32, #tpu.memory_space<vmem>>, vector<8x128xf32>
    tpu.vector_store %arg16[%c0_407, %c0_408], %723 {strides = array<i32>} : memref<8x128xf32, #tpu.memory_space<vmem>>, vector<8x128xf32>,
    %c0_409 = arith.constant 0 : index
    %c0_410 = arith.constant 0 : index
    %725 = vector.load %arg16[%c0_409, %c0_410] : memref<8x128xf32, #tpu.memory_space<vmem>>, vector<8x128xf32>
    %726 = vector.extract_strided_slice %725 {offsets = [0, 0], sizes = [2, 2], strides = [1, 1]} : vector<8x128xf32> to vector<2x2xf32>
    %c0_411 = arith.constant 0 : index
    %c0_412 = arith.constant 0 : index
    %727 = vector.load %arg10[%c0_411, %c0_412] : memref<1x128xf32, #tpu.memory_space<vmem>>, vector<1x128xf32>
    %728 = vector.extract_strided_slice %727 {offsets = [0, 0], sizes = [1, 2], strides = [1, 1]} : vector<1x128xf32> to vector<1x2xf32>
    %729 = vector.broadcast %728 : vector<1x2xf32> to vector<2x2xf32>
    %730 = arith.addf %726, %729 : vector<2x2xf32>
    %cst_413 = arith.constant dense<0xFF800000> : vector<2xf32>
    %731 = vector.multi_reduction <maximumf>, %730, %cst_413 [1] : vector<2x2xf32> to vector<2xf32>
    %732 = vector.shape_cast %731 : vector<2xf32> to vector<2x1xf32>
    %733 = vector.broadcast %732 : vector<2x1xf32> to vector<2x2xf32>
    %734 = arith.subf %730, %733 : vector<2x2xf32>
    %735 = math.exp %734 : vector<2x2xf32>
    %cst_414 = arith.constant dense<0.000000e+00> : vector<2xf32>
    %736 = vector.multi_reduction <add>, %735, %cst_414 [1] : vector<2x2xf32> to vector<2xf32>
    %737 = vector.shape_cast %736 : vector<2xf32> to vector<2x1xf32>
    %738 = math.log %737 : vector<2x1xf32>
    %739 = vector.broadcast %738 : vector<2x1xf32> to vector<2x2xf32>
    %740 = arith.subf %734, %739 : vector<2x2xf32>
    %c0_415 = arith.constant 0 : index
    %c0_416 = arith.constant 0 : index
    %741 = vector.load %arg11[%c0_415, %c0_416] : memref<2x2xf32, #tpu.memory_space<vmem>>, vector<2x2xf32>
    tpu.vector_store %arg11[%c0_415, %c0_416], %740 {strides = array<i32>} : memref<2x2xf32, #tpu.memory_space<vmem>>, vector<2x2xf32>,
    return
  }
  func.func @transform_0(%arg0: i32, %arg1: memref<16xi32, #tpu.memory_space<smem>>) -> (i32, i32) {
    %c0_i32 = arith.constant 0 : i32
    %c0_i32_0 = arith.constant 0 : i32
    %c0_i32_1 = arith.constant 0 : i32
    return %c0_i32, %c0_i32_0 : i32, i32
  }
  func.func @transform_1(%arg0: i32, %arg1: memref<16xi32, #tpu.memory_space<smem>>) -> (i32, i32) {
    %c0_i32 = arith.constant 0 : i32
    %c0_i32_0 = arith.constant 0 : i32
    %c0_i32_1 = arith.constant 0 : i32
    return %c0_i32, %c0_i32_0 : i32, i32
  }
  func.func @transform_2(%arg0: i32, %arg1: memref<16xi32, #tpu.memory_space<smem>>) -> (i32, i32) {
    %c0_i32 = arith.constant 0 : i32
    %c0_i32_0 = arith.constant 0 : i32
    %c0_i32_1 = arith.constant 0 : i32
    return %c0_i32, %c0_i32_0 : i32, i32
  }
  func.func @transform_3(%arg0: i32, %arg1: memref<16xi32, #tpu.memory_space<smem>>) -> (i32, i32) {
    %c0_i32 = arith.constant 0 : i32
    %c0_i32_0 = arith.constant 0 : i32
    %c0_i32_1 = arith.constant 0 : i32
    return %c0_i32, %c0_i32_0 : i32, i32
  }
  func.func @transform_4(%arg0: i32, %arg1: memref<16xi32, #tpu.memory_space<smem>>) -> (i32, i32) {
    %c0_i32 = arith.constant 0 : i32
    %c0_i32_0 = arith.constant 0 : i32
    %c0_i32_1 = arith.constant 0 : i32
    return %c0_i32, %c0_i32_0 : i32, i32
  }
  func.func @transform_5(%arg0: i32, %arg1: memref<16xi32, #tpu.memory_space<smem>>) -> (i32, i32) {
    %c0_i32 = arith.constant 0 : i32
    %c0_i32_0 = arith.constant 0 : i32
    %c0_i32_1 = arith.constant 0 : i32
    return %c0_i32, %c0_i32_0 : i32, i32
  }
  func.func @transform_6(%arg0: i32, %arg1: memref<16xi32, #tpu.memory_space<smem>>) -> (i32, i32) {
    %c0_i32 = arith.constant 0 : i32
    %c0_i32_0 = arith.constant 0 : i32
    %c0_i32_1 = arith.constant 0 : i32
    return %c0_i32, %c0_i32_0 : i32, i32
  }
  func.func @transform_7(%arg0: i32, %arg1: memref<16xi32, #tpu.memory_space<smem>>) -> (i32, i32, i32) {
    %c0_i32 = arith.constant 0 : i32
    %c0_i32_0 = arith.constant 0 : i32
    %c0_i32_1 = arith.constant 0 : i32
    %c0_i32_2 = arith.constant 0 : i32
    return %c0_i32, %c0_i32_0, %c0_i32_1 : i32, i32, i32
  }
  func.func @transform_8(%arg0: i32, %arg1: memref<16xi32, #tpu.memory_space<smem>>) -> (i32, i32) {
    %c0_i32 = arith.constant 0 : i32
    %c0_i32_0 = arith.constant 0 : i32
    %c0_i32_1 = arith.constant 0 : i32
    return %c0_i32, %c0_i32_0 : i32, i32
  }
  func.func @transform_9(%arg0: i32, %arg1: memref<16xi32, #tpu.memory_space<smem>>) -> (i32, i32) {
    %c0_i32 = arith.constant 0 : i32
    %c0_i32_0 = arith.constant 0 : i32
    return %arg0, %c0_i32 : i32, i32
  }
}

</mosaic_0001>

<bundles_post_ra>
// kernel: lstm_model_forward.1
= control target key start
LH: loop header
LB: loop body
LE: loop exit
PB: predicated region body
PF: predicated region fallthrough
CT: control target
= control target key end

     0   :  { %s9565_s0 = inlined_call_operand.vmem [shape: s32[16], index: 0, kind: input, shape index: {}]   ;;  %s9566_s1 = inlined_call_operand.vmem [shape: f32[32,128], index: 1, kind: input, shape index: {}]   ;;  %s9567_s2 = inlined_call_operand.vmem [shape: f32[128,512], index: 2, kind: input, shape index: {}]   ;;  %s9568_s3 = inlined_call_operand.vmem [shape: f32[128,512], index: 3, kind: input, shape index: {}]   ;;  %s9569_s4 = inlined_call_operand.vmem [shape: f32[1,512], index: 4, kind: input, shape index: {}]   ;;  %s9570_s5 = inlined_call_operand.vmem [shape: f32[128,512], index: 5, kind: input, shape index: {}]   ;;  %s9571_s6 = inlined_call_operand.vmem [shape: f32[128,512], index: 6, kind: input, shape index: {}]   ;;  %s9572_s7 = inlined_call_operand.vmem [shape: f32[1,512], index: 7, kind: input, shape index: {}]   ;;  %s9573_s8 = inlined_call_operand.vmem [shape: f32[8,128,128], index: 8, kind: input, shape index: {}]   ;;  %s9574_s9 = inlined_call_operand.vmem [shape: f32[1,128], index: 9, kind: input, shape index: {}]   ;;  %s9575_s10 = inlined_call_operand.hbm [shape: f32[2,2], index: 10, kind: output, shape index: {}]  }
   0x1   :  { %s15_s15 = sshll.u32 %s9565_s0, 4  ;;  %s16_s15 = int_to_ptr.vmem [resolvable:$true] %s15_s15 }
   0x2   :  { %s5616_s16 = scalar_lea.vmem %s16_s15, 16  ;;  %p5621_p1 = scmp.lt.s32.totalorder %s16_s15, %s16_s15 }
   0x3   :  { %p5617_p0 = scmp.ne.s32.totalorder %s16_s15, %s5616_s16  ;;  %p5622_p2 = scmp.lt.s32.totalorder %s5616_s16, %s5616_s16 }
   0x5   :  { %p5623_p3 = por %p5622_p2, %p5621_p1 }
   0x7   :  { %p5624_p4 = pnand %p5623_p3, %p5617_p0 }
   0x9   :  { %5627 = shalt.err (!%p5624_p4)  }
   0xa   :  { %s5652_s17 = smov [#allocation8]  }
   0xb   :  { %18 = dma.vmem_to_smem %s16_s15, 16, %s5652_s17, [#allocation7] }
   0xc   :  { %5648 = dma.done.wait [#allocation7], 16 }
   0xd   :  { %5649 = vsyncadd [#allocation7], 4294967280 }
   0xe   :  { %20 = sfence }
   0xf   :  { %v192_v0 = vld [vmem:[%s9567_s2 + $0x1e8] sm:$0xff]  ;;  %v194_v1 = vld [vmem:[%s9567_s2 + $0x1f8] sm:$0xff]  ;;  %v191_v2 = vld [vmem:[%s9567_s2 + $0x1e0] sm:$0xff]  ;;  %v9576_v6 = vmov 0.0   ;;  %s5794_s23 = sld [smem:[#allocation8]] }
  0x10   :  { %291 = vmatprep.subr.mxu0 %v192_v0  ;;  %404 = vmatprep.subr.mxu1 %v194_v1  ;;  %v193_v3 = vld [vmem:[%s9567_s2 + $0x1f0] sm:$0xff]  ;;  %v188_v4 = vld [vmem:[%s9567_s2 + $0x1c8] sm:$0xff]  ;;  %v190_v5 = vld [vmem:[%s9567_s2 + $0x1d8] sm:$0xff]  ;;  %41 = vst [vmem:[#allocation2] sm:$0xff] %v9576_v6  ;;  %s5802_s28 = sld [smem:[#allocation8 + $0x8]] }
  0x11   :  { %42 = vst [vmem:[#allocation2 + $0x8] sm:$0xff] %v9576_v6  ;;  %43 = vst [vmem:[#allocation2 + $0x10] sm:$0xff] %v9576_v6  ;;  %292 = vmatpush1.msra.mxu0 %v191_v2  ;;  %405 = vmatpush1.msra.mxu1 %v193_v3  ;;  %v187_v7 = vld [vmem:[%s9567_s2 + $0x1c0] sm:$0xff]  ;;  %v189_v8 = vld [vmem:[%s9567_s2 + $0x1d0] sm:$0xff]  ;;  %s5822_s21 = sld [smem:[#allocation8 + $0x1]] }
  0x12   :  { %44 = vst [vmem:[#allocation2 + $0x18] sm:$0xff] %v9576_v6  ;;  %45 = vst [vmem:[#allocation2 + $0x20] sm:$0xff] %v9576_v6  ;;  %v184_v9 = vld [vmem:[%s9567_s2 + $0x1a8] sm:$0xff]  ;;  %293 = vmatprep.subr.mxu0 %v188_v4  ;;  %406 = vmatprep.subr.mxu1 %v190_v5  ;;  %v186_v10 = vld [vmem:[%s9567_s2 + $0x1b8] sm:$0xff]  ;;  %s5830_s26 = sld [smem:[#allocation8 + $0x9]] }
  0x13   :  { %46 = vst [vmem:[#allocation2 + $0x28] sm:$0xff] %v9576_v6  ;;  %47 = vst [vmem:[#allocation2 + $0x30] sm:$0xff] %v9576_v6  ;;  %v183_v11 = vld [vmem:[%s9567_s2 + $0x1a0] sm:$0xff]  ;;  %v185_v12 = vld [vmem:[%s9567_s2 + $0x1b0] sm:$0xff]  ;;  %294 = vmatpush1.msra.mxu0 %v187_v7  ;;  %407 = vmatpush1.msra.mxu1 %v189_v8  ;;  %s5844_s16 = sld [smem:[#allocation8 + $0x2]] }
  0x14   :  { %48 = vst [vmem:[#allocation2 + $0x38] sm:$0xff] %v9576_v6  ;;  %v180_v13 = vld [vmem:[%s9567_s2 + $0x188] sm:$0xff]  ;;  %v182_v14 = vld [vmem:[%s9567_s2 + $0x198] sm:$0xff]  ;;  %295 = vmatprep.subr.mxu0 %v184_v9  ;;  %408 = vmatprep.subr.mxu1 %v186_v10  ;;  %v179_v15 = vld [vmem:[%s9567_s2 + $0x180] sm:$0xff]  ;;  %s5852_s0 = sld [smem:[#allocation8 + $0xa]] }
  0x15   :  { %v181_v16 = vld [vmem:[%s9567_s2 + $0x190] sm:$0xff]  ;;  %296 = vmatpush1.msra.mxu0 %v183_v11  ;;  %409 = vmatpush1.msra.mxu1 %v185_v12  ;;  %v176_v17 = vld [vmem:[%s9567_s2 + $0x168] sm:$0xff]  ;;  %v178_v18 = vld [vmem:[%s9567_s2 + $0x178] sm:$0xff]  ;;  %s51_s11 = scalar_lea.vmem %s9566_s1, %s5794_s23  ;;  %s5874_s20 = sld [smem:[#allocation8 + $0x3]] }
  0x16   :  { %297 = vmatprep.subr.mxu0 %v180_v13  ;;  %410 = vmatprep.subr.mxu1 %v182_v14  ;;  %v175_v19 = vld [vmem:[%s9567_s2 + $0x160] sm:$0xff]  ;;  %v177_v20 = vld [vmem:[%s9567_s2 + $0x170] sm:$0xff]  ;;  %v172_v21 = vld [vmem:[%s9567_s2 + $0x148] sm:$0xff]  ;;  %s92_s14 = scalar_lea.vmem %s9566_s1, %s5802_s28  ;;  %s5885_s29 = sld [smem:[#allocation8 + $0xb]] }
  0x17   :  { %298 = vmatpush1.msra.mxu0 %v179_v15  ;;  %411 = vmatpush1.msra.mxu1 %v181_v16  ;;  %v174_v22 = vld [vmem:[%s9567_s2 + $0x158] sm:$0xff]  ;;  %v171_v23 = vld [vmem:[%s9567_s2 + $0x140] sm:$0xff]  ;;  %v173_v24 = vld [vmem:[%s9567_s2 + $0x150] sm:$0xff]  ;;  %s56_s17 = scalar_lea.vmem %s9566_s1, %s5822_s21  ;;  %s5910_s30 = sld [smem:[#allocation8 + $0x4]] }
  0x18   :  { %299 = vmatprep.subr.mxu0 %v176_v17  ;;  %412 = vmatprep.subr.mxu1 %v178_v18  ;;  %v168_v25 = vld [vmem:[%s9567_s2 + $0x128] sm:$0xff]  ;;  %v170_v26 = vld [vmem:[%s9567_s2 + $0x138] sm:$0xff]  ;;  %v167_v27 = vld [vmem:[%s9567_s2 + $0x120] sm:$0xff]  ;;  %s5918_s18 = sld [smem:[#allocation8 + $0xc]] }
  0x19   :  { %300 = vmatpush1.msra.mxu0 %v175_v19  ;;  %413 = vmatpush1.msra.mxu1 %v177_v20  ;;  %v169_v28 = vld [vmem:[%s9567_s2 + $0x130] sm:$0xff]  ;;  %v164_v29 = vld [vmem:[%s9567_s2 + $0x108] sm:$0xff]  ;;  %v166_v30 = vld [vmem:[%s9567_s2 + $0x118] sm:$0xff]  ;;  %s61_s21 = scalar_lea.vmem %s9566_s1, %s5844_s16  ;;  %s5951_s24 = sld [smem:[#allocation8 + $0xd]] }
  0x1a   :  { %301 = vmatprep.subr.mxu0 %v172_v21  ;;  %414 = vmatprep.subr.mxu1 %v174_v22  ;;  %v163_v31 = vld [vmem:[%s9567_s2 + $0x100] sm:$0xff]  ;;  %v165_v32 = vld [vmem:[%s9567_s2 + $0x110] sm:$0xff]  ;;  %v160_v33 = vld [vmem:[%s9567_s2 + $0xe8] sm:$0xff]  ;;  %s102_s27 = scalar_lea.vmem %s9566_s1, %s5852_s0  ;;  %s5972_s23 = sld [smem:[#allocation8 + $0xe]] }
  0x1b   :  { %302 = vmatpush1.msra.mxu0 %v171_v23  ;;  %415 = vmatpush1.msra.mxu1 %v173_v24  ;;  %v162_v34 = vld [vmem:[%s9567_s2 + $0xf8] sm:$0xff]  ;;  %v159_v35 = vld [vmem:[%s9567_s2 + $0xe0] sm:$0xff]  ;;  %v161_v36 = vld [vmem:[%s9567_s2 + $0xf0] sm:$0xff]  ;;  %s66_s13 = scalar_lea.vmem %s9566_s1, %s5874_s20  ;;  %s5970_s20 = sld [smem:[#allocation8 + $0x6]] }
  0x1c   :  { %303 = vmatprep.subr.mxu0 %v168_v25  ;;  %416 = vmatprep.subr.mxu1 %v170_v26  ;;  %v156_v37 = vld [vmem:[%s9567_s2 + $0xc8] sm:$0xff]  ;;  %v158_v38 = vld [vmem:[%s9567_s2 + $0xd8] sm:$0xff]  ;;  %v155_v39 = vld [vmem:[%s9567_s2 + $0xc0] sm:$0xff]  ;;  %s107_s0 = scalar_lea.vmem %s9566_s1, %s5885_s29  ;;  %s6014_s29 = sld [smem:[#allocation8 + $0x7]] }
  0x1d   :  { %304 = vmatpush1.msra.mxu0 %v167_v27  ;;  %417 = vmatpush1.msra.mxu1 %v169_v28  ;;  %v157_v40 = vld [vmem:[%s9567_s2 + $0xd0] sm:$0xff]  ;;  %v152_v41 = vld [vmem:[%s9567_s2 + $0xa8] sm:$0xff]  ;;  %v154_v42 = vld [vmem:[%s9567_s2 + $0xb8] sm:$0xff]  ;;  %s6018_s22 = sld [smem:[#allocation8 + $0xf]] }
  0x1e   :  { %305 = vmatprep.subr.mxu0 %v164_v29  ;;  %418 = vmatprep.subr.mxu1 %v166_v30  ;;  %v151_v43 = vld [vmem:[%s9567_s2 + $0xa0] sm:$0xff]  ;;  %v153_v44 = vld [vmem:[%s9567_s2 + $0xb0] sm:$0xff]  ;;  %v148_v45 = vld [vmem:[%s9567_s2 + $0x88] sm:$0xff] }
  0x1f   :  { %306 = vmatpush1.msra.mxu0 %v163_v31  ;;  %419 = vmatpush1.msra.mxu1 %v165_v32  ;;  %v150_v46 = vld [vmem:[%s9567_s2 + $0x98] sm:$0xff]  ;;  %v147_v47 = vld [vmem:[%s9567_s2 + $0x80] sm:$0xff]  ;;  %v149_v48 = vld [vmem:[%s9567_s2 + $0x90] sm:$0xff]  ;;  %s117_s16 = scalar_lea.vmem %s9566_s1, %s5951_s24 }
  0x20   :  { %307 = vmatprep.subr.mxu0 %v160_v33  ;;  %420 = vmatprep.subr.mxu1 %v162_v34  ;;  %v52_v49 = vld [vmem:[%s51_s11] sm:$0x1]  ;;  %v144_v51 = vld [vmem:[%s9567_s2 + $0x68] sm:$0xff]  ;;  %v146_v52 = vld [vmem:[%s9567_s2 + $0x78] sm:$0xff]  ;;  %s97_s11 = scalar_lea.vmem %s9566_s1, %s5830_s26  ;;  %s112_s26 = scalar_lea.vmem %s9566_s1, %s5918_s18 }
  0x21   :  { %308 = vmatpush1.msra.mxu0 %v159_v35  ;;  %421 = vmatpush1.msra.mxu1 %v161_v36  ;;  %v93_v50 = vld [vmem:[%s92_s14] sm:$0x1]  ;;  %53 = vst [vmem:[#allocation2] sm:$0x1] %v52_v49  ;;  %v145_v54 = vld [vmem:[%s9567_s2 + $0x70] sm:$0xff]  ;;  %v140_v55 = vld [vmem:[%s9567_s2 + $0x48] sm:$0xff] }
  0x22   :  { %309 = vmatprep.subr.mxu0 %v156_v37  ;;  %422 = vmatprep.subr.mxu1 %v158_v38  ;;  %94 = vst [vmem:[#allocation2 + $0x1] sm:$0x1] %v93_v50  ;;  %v143_v53 = vld [vmem:[%s9567_s2 + $0x60] sm:$0xff]  ;;  %v142_v56 = vld [vmem:[%s9567_s2 + $0x58] sm:$0xff]  ;;  %v141_v59 = vld [vmem:[%s9567_s2 + $0x50] sm:$0xff]  ;;  %s86_s24 = scalar_lea.vmem %s9566_s1, %s6014_s29 }
  0x23   :  { %310 = vmatpush1.msra.mxu0 %v155_v39  ;;  %423 = vmatpush1.msra.mxu1 %v157_v40  ;;  %v57_v57 = vld [vmem:[%s56_s17] sm:$0x1]  ;;  %v136_v61 = vld [vmem:[%s9567_s2 + $0x28] sm:$0xff]  ;;  %v138_v62 = vld [vmem:[%s9567_s2 + $0x38] sm:$0xff]  ;;  %s71_s17 = scalar_lea.vmem %s9566_s1, %s5910_s30 }
  0x24   :  { %311 = vmatprep.subr.mxu0 %v152_v41  ;;  %424 = vmatprep.subr.mxu1 %v154_v42  ;;  %v139_v58 = vld [vmem:[%s9567_s2 + $0x40] sm:$0xff]  ;;  %58 = vst [vmem:[#allocation2 + $0x8] sm:$0x1] %v57_v57  ;;  %v137_v0 = vld [vmem:[%s9567_s2 + $0x30] sm:$0xff]  ;;  %v132_v1 = vld [vmem:[%s9567_s2 + $0x8] sm:$0xff] }
  0x25   :  { %312 = vmatpush1.msra.mxu0 %v151_v43  ;;  %425 = vmatpush1.msra.mxu1 %v153_v44  ;;  %v98_v60 = vld [vmem:[%s97_s11] sm:$0x1]  ;;  %s5940_s11 = sld [smem:[#allocation8 + $0x5]]  ;;  %v134_v2 = vld [vmem:[%s9567_s2 + $0x18] sm:$0xff]  ;;  %v133_v7 = vld [vmem:[%s9567_s2 + $0x10] sm:$0xff] }
  0x26   :  { %313 = vmatprep.subr.mxu0 %v148_v45  ;;  %426 = vmatprep.subr.mxu1 %v150_v46  ;;  %99 = vst [vmem:[#allocation2 + $0x9] sm:$0x1] %v98_v60  ;;  %v135_v63 = vld [vmem:[%s9567_s2 + $0x20] sm:$0xff]  ;;  %v5978_v10 = vld [vmem:[%s9568_s3 + $0x1e8] sm:$0xff]  ;;  %v5983_v11 = vld [vmem:[%s9568_s3 + $0x1f8] sm:$0xff] }
  0x27   :  { %314 = vmatpush1.msra.mxu0 %v147_v47  ;;  %427 = vmatpush1.msra.mxu1 %v149_v48  ;;  %v62_v3 = vld [vmem:[%s61_s21] sm:$0x1]  ;;  %9786 = vst [vmem:[#allocation13_spill] sm:$0xff] %v5978_v10  ;;  %9787 = vst [vmem:[#allocation14_spill] sm:$0xff] %v5983_v11  ;;  %v6002_v14 = vld [vmem:[%s9568_s3 + $0x1f0] sm:$0xff] }
  0x28   :  { %315 = vmatprep.subr.mxu0 %v144_v51  ;;  %428 = vmatprep.subr.mxu1 %v146_v52  ;;  %v103_v4 = vld [vmem:[%s102_s27] sm:$0x1]  ;;  %63 = vst [vmem:[#allocation2 + $0x10] sm:$0x1] %v62_v3  ;;  %v6007_v15 = vld [vmem:[%s9568_s3 + $0x1c8] sm:$0xff]  ;;  %v6012_v16 = vld [vmem:[%s9568_s3 + $0x1d8] sm:$0xff]  ;;  %s127_s27 = scalar_lea.vmem %s9566_s1, %s6018_s22 }
  0x29   :  { %316 = vmatpush1.msra.mxu0 %v143_v53  ;;  %429 = vmatpush1.msra.mxu1 %v145_v54  ;;  %v131_v5 = vld [vmem:[%s9567_s2] sm:$0xff]  ;;  %104 = vst [vmem:[#allocation2 + $0x11] sm:$0x1] %v103_v4  ;;  %v6030_v20 = vld [vmem:[%s9568_s3 + $0x1d0] sm:$0xff]  ;;  %v6047_v22 = vld [vmem:[%s9568_s3 + $0x1a8] sm:$0xff]  ;;  %s81_s2 = scalar_lea.vmem %s9566_s1, %s5970_s20  ;;  %s122_s20 = scalar_lea.vmem %s9566_s1, %s5972_s23 }
  0x2a   :  { %317 = vmatprep.subr.mxu0 %v140_v55  ;;  %430 = vmatprep.subr.mxu1 %v142_v56  ;;  %v262_v8 = vld [vmem:[#allocation2] sm:$0xff]  ;;  %v6052_v23 = vld [vmem:[%s9568_s3 + $0x1b8] sm:$0xff]  ;;  %v6064_v25 = vld [vmem:[%s9568_s3 + $0x1b0] sm:$0xff] }
  0x2b   :  { %318 = vmatpush1.msra.mxu0 %v139_v58  ;;  %431 = vmatpush1.msra.mxu1 %v141_v59  ;;  %v67_v9 = vld [vmem:[%s66_s13] sm:$0x1]  ;;  %s76_s13 = scalar_lea.vmem %s9566_s1, %s5940_s11  ;;  %v6073_v28 = vld [vmem:[%s9568_s3 + $0x188] sm:$0xff]  ;;  %v6078_v29 = vld [vmem:[%s9568_s3 + $0x198] sm:$0xff] }
  0x2c   :  { %319 = vmatprep.subr.mxu0 %v136_v61  ;;  %432 = vmatprep.subr.mxu1 %v138_v62  ;;  %68 = vst [vmem:[#allocation2 + $0x18] sm:$0x1] %v67_v9  ;;  %v108_v12 = vld [vmem:[%s107_s0] sm:$0x1]  ;;  %v6096_v31 = vld [vmem:[%s9568_s3 + $0x190] sm:$0xff]  ;;  %v6113_v35 = vld [vmem:[%s9568_s3 + $0x168] sm:$0xff] }
  0x2d   :  { %320 = vmatpush1.msra.mxu0 %v135_v63  ;;  %433 = vmatpush1.msra.mxu1 %v137_v0  ;;  %v5997_v13 = vld [vmem:[%s9568_s3 + $0x1e0] sm:$0xff]  ;;  %109 = vst [vmem:[#allocation2 + $0x19] sm:$0x1] %v108_v12  ;;  %v263_v21 = vld [vmem:[#allocation2 + $0x8] sm:$0xff]  ;;  %v6118_v36 = vld [vmem:[%s9568_s3 + $0x178] sm:$0xff] }
  0x2e   :  { %321 = vmatprep.subr.mxu0 %v132_v1  ;;  %434 = vmatprep.subr.mxu1 %v134_v2  ;;  %v72_v17 = vld [vmem:[%s71_s17] sm:$0x1]  ;;  %v6130_v38 = vld [vmem:[%s9568_s3 + $0x170] sm:$0xff]  ;;  %v6135_v39 = vld [vmem:[%s9568_s3 + $0x148] sm:$0xff] }
  0x2f   :  { %322 = vmatpush1.msra.mxu0 %v131_v5  ;;  %355 = vmatprep.mubr.f32.mxu0 %v9576_v6  ;;  %v113_v18 = vld [vmem:[%s112_s26] sm:$0x1]  ;;  %73 = vst [vmem:[#allocation2 + $0x20] sm:$0x1] %v72_v17  ;;  %v6140_v40 = vld [vmem:[%s9568_s3 + $0x158] sm:$0xff]  ;;  %v6154_v44 = vld [vmem:[%s9568_s3 + $0x150] sm:$0xff] }
  0x30   :  { %435 = vmatpush1.msra.mxu1 %v133_v7  ;;  %468 = vmatprep.mubr.f32.mxu1 %v9576_v6  ;;  %v6025_v19 = vld [vmem:[%s9568_s3 + $0x1c0] sm:$0xff]  ;;  %114 = vst [vmem:[#allocation2 + $0x21] sm:$0x1] %v113_v18  ;;  %v264_v33 = vld [vmem:[#allocation2 + $0x10] sm:$0xff]  ;;  %v6163_v46 = vld [vmem:[%s9568_s3 + $0x128] sm:$0xff] }
  0x31   :  { %356 = vmatmul.mubr.f32.vlgmr.msra.gmra.mxu0 %v262_v8  ;;  %469 = vmatmul.mubr.f32.vlgmr.msra.gmra.mxu1 %v262_v8  ;;  %v6057_v24 = vld [vmem:[%s9568_s3 + $0x1a0] sm:$0xff]  ;;  %v6168_v47 = vld [vmem:[%s9568_s3 + $0x138] sm:$0xff] }
  0x32   :  { %555 = vmatprep.subr.mxu0 %v5978_v10  ;;  %626 = vmatprep.subr.mxu1 %v5983_v11  ;;  %v77_v26 = vld [vmem:[%s76_s13] sm:$0x1] }
  0x33   :  { %556 = vmatpush1.msra.mxu0 %v5997_v13  ;;  %627 = vmatpush1.msra.mxu1 %v6002_v14  ;;  %v118_v27 = vld [vmem:[%s117_s16] sm:$0x1]  ;;  %78 = vst [vmem:[#allocation2 + $0x28] sm:$0x1] %v77_v26 }
  0x34   :  { %557 = vmatprep.subr.mxu0 %v6007_v15  ;;  %628 = vmatprep.subr.mxu1 %v6012_v16  ;;  %119 = vst [vmem:[#allocation2 + $0x29] sm:$0x1] %v118_v27  ;;  %v6091_v30 = vld [vmem:[%s9568_s3 + $0x180] sm:$0xff]  ;;  %v265_v45 = vld [vmem:[#allocation2 + $0x18] sm:$0xff] }
  0x35   :  { %361 = vmatprep.mubr.f32.mxu0 %v9576_v6  ;;  %474 = vmatprep.mubr.f32.mxu1 %v9576_v6  ;;  %v82_v32 = vld [vmem:[%s81_s2] sm:$0x1] }
  0x36   :  { %558 = vmatpush1.msra.mxu0 %v6025_v19  ;;  %629 = vmatpush1.msra.mxu1 %v6030_v20  ;;  %83 = vst [vmem:[#allocation2 + $0x30] sm:$0x1] %v82_v32  ;;  %v123_v34 = vld [vmem:[%s122_s20] sm:$0x1] }
  0x37   :  { %362 = vmatmul.mubr.f32.gmra.mxu0 %v263_v21  ;;  %475 = vmatmul.mubr.f32.gmra.mxu1 %v263_v21  ;;  %124 = vst [vmem:[#allocation2 + $0x31] sm:$0x1] %v123_v34  ;;  %v6125_v37 = vld [vmem:[%s9568_s3 + $0x160] sm:$0xff] }
  0x38   :  { %559 = vmatprep.subr.mxu0 %v6047_v22  ;;  %630 = vmatprep.subr.mxu1 %v6052_v23  ;;  %v87_v41 = vld [vmem:[%s86_s24] sm:$0x1] }
  0x39   :  { %560 = vmatpush1.msra.mxu0 %v6057_v24  ;;  %631 = vmatpush1.msra.mxu1 %v6064_v25  ;;  %v128_v42 = vld [vmem:[%s127_s27] sm:$0x1]  ;;  %88 = vst [vmem:[#allocation2 + $0x38] sm:$0x1] %v87_v41 }
  0x3a   :  { %561 = vmatprep.subr.mxu0 %v6073_v28  ;;  %632 = vmatprep.subr.mxu1 %v6078_v29  ;;  %129 = vst [vmem:[#allocation2 + $0x39] sm:$0x1] %v128_v42  ;;  %v6149_v43 = vld [vmem:[%s9568_s3 + $0x140] sm:$0xff] }
  0x3b   :  { %367 = vmatprep.mubr.f32.mxu0 %v9576_v6  ;;  %480 = vmatprep.mubr.f32.mxu1 %v9576_v6 }
  0x3c   :  { %562 = vmatpush1.msra.mxu0 %v6091_v30  ;;  %633 = vmatpush1.msra.mxu1 %v6096_v31 }
  0x3d   :  { %368 = vmatmul.mubr.f32.gmra.mxu0 %v264_v33  ;;  %481 = vmatmul.mubr.f32.gmra.mxu1 %v264_v33 }
  0x3e   :  { %563 = vmatprep.subr.mxu0 %v6113_v35  ;;  %634 = vmatprep.subr.mxu1 %v6118_v36 }
  0x3f   :  { %564 = vmatpush1.msra.mxu0 %v6125_v37  ;;  %635 = vmatpush1.msra.mxu1 %v6130_v38 }
  0x40   :  { %565 = vmatprep.subr.mxu0 %v6135_v39  ;;  %636 = vmatprep.subr.mxu1 %v6140_v40 }
  0x41   :  { %373 = vmatprep.mubr.f32.mxu0 %v9576_v6  ;;  %486 = vmatprep.mubr.f32.mxu1 %v9576_v6 }
  0x42   :  { %21 = vsyncpa [#allocation10], 0  ;;  %566 = vmatpush1.msra.mxu0 %v6149_v43  ;;  %637 = vmatpush1.msra.mxu1 %v6154_v44  ;;  %v6175_v48 = vld [vmem:[%s9568_s3 + $0x120] sm:$0xff]  ;;  %v6180_v49 = vld [vmem:[%s9568_s3 + $0x130] sm:$0xff]  ;;  %vm5654_vm0 = vmmov 0   ;;  %vm4551_vm1 = vcmask 9216  }
  0x43   :  { %374 = vmatmul.mubr.f32.gmra.mxu0 %v265_v45  ;;  %487 = vmatmul.mubr.f32.gmra.mxu1 %v265_v45  ;;  %v6185_v50 = vld [vmem:[%s9568_s3 + $0x108] sm:$0xff]  ;;  %v6190_v51 = vld [vmem:[%s9568_s3 + $0x118] sm:$0xff]  ;;  %v6199_v52 = vld [vmem:[%s9568_s3 + $0x100] sm:$0xff] }
  0x44   :  { %567 = vmatprep.subr.mxu0 %v6163_v46  ;;  %638 = vmatprep.subr.mxu1 %v6168_v47  ;;  %v6204_v53 = vld [vmem:[%s9568_s3 + $0x110] sm:$0xff]  ;;  %v266_v54 = vld [vmem:[#allocation2 + $0x20] sm:$0xff]  ;;  %v6213_v55 = vld [vmem:[%s9568_s3 + $0xe8] sm:$0xff] }
  0x45   :  { %568 = vmatpush1.msra.mxu0 %v6175_v48  ;;  %639 = vmatpush1.msra.mxu1 %v6180_v49  ;;  %v6218_v56 = vld [vmem:[%s9568_s3 + $0xf8] sm:$0xff]  ;;  %v6225_v57 = vld [vmem:[%s9568_s3 + $0xe0] sm:$0xff]  ;;  %v6230_v58 = vld [vmem:[%s9568_s3 + $0xf0] sm:$0xff] }
  0x46   :  { %569 = vmatprep.subr.mxu0 %v6185_v50  ;;  %640 = vmatprep.subr.mxu1 %v6190_v51  ;;  %v6235_v59 = vld [vmem:[%s9568_s3 + $0xc8] sm:$0xff]  ;;  %v6240_v60 = vld [vmem:[%s9568_s3 + $0xd8] sm:$0xff]  ;;  %v6249_v61 = vld [vmem:[%s9568_s3 + $0xc0] sm:$0xff] }
  0x47   :  { %379 = vmatprep.mubr.f32.mxu0 %v9576_v6  ;;  %492 = vmatprep.mubr.f32.mxu1 %v9576_v6  ;;  %v6254_v62 = vld [vmem:[%s9568_s3 + $0xd0] sm:$0xff]  ;;  %v267_v63 = vld [vmem:[#allocation2 + $0x28] sm:$0xff]  ;;  %v6268_v1 = vld [vmem:[%s9568_s3 + $0xb8] sm:$0xff] }
  0x48   :  { %570 = vmatpush1.msra.mxu0 %v6199_v52  ;;  %641 = vmatpush1.msra.mxu1 %v6204_v53  ;;  %v6263_v0 = vld [vmem:[%s9568_s3 + $0xa8] sm:$0xff]  ;;  %v6275_v2 = vld [vmem:[%s9568_s3 + $0xa0] sm:$0xff]  ;;  %v6280_v3 = vld [vmem:[%s9568_s3 + $0xb0] sm:$0xff] }
  0x49   :  { %380 = vmatmul.mubr.f32.gmra.mxu0 %v266_v54  ;;  %493 = vmatmul.mubr.f32.gmra.mxu1 %v266_v54  ;;  %9788 = vst [vmem:[#allocation15_spill] sm:$0xff] %v6280_v3  ;;  %v6285_v4 = vld [vmem:[%s9568_s3 + $0x88] sm:$0xff]  ;;  %v6290_v5 = vld [vmem:[%s9568_s3 + $0x98] sm:$0xff]  ;;  %v6299_v7 = vld [vmem:[%s9568_s3 + $0x80] sm:$0xff] }
  0x4a   :  { %571 = vmatprep.subr.mxu0 %v6213_v55  ;;  %642 = vmatprep.subr.mxu1 %v6218_v56  ;;  %9789 = vst [vmem:[#allocation16_spill] sm:$0xff] %v6285_v4  ;;  %9790 = vst [vmem:[#allocation17_spill] sm:$0xff] %v6290_v5  ;;  %v6304_v8 = vld [vmem:[%s9568_s3 + $0x90] sm:$0xff]  ;;  %v6313_v12 = vld [vmem:[%s9568_s3 + $0x68] sm:$0xff] }
  0x4b   :  { %572 = vmatpush1.msra.mxu0 %v6225_v57  ;;  %643 = vmatpush1.msra.mxu1 %v6230_v58  ;;  %9791 = vst [vmem:[#allocation18_spill] sm:$0xff] %v6299_v7  ;;  %9792 = vst [vmem:[#allocation19_spill] sm:$0xff] %v6304_v8  ;;  %v268_v9 = vld [vmem:[#allocation2 + $0x30] sm:$0xff]  ;;  %v6318_v17 = vld [vmem:[%s9568_s3 + $0x78] sm:$0xff] }
  0x4c   :  { %573 = vmatprep.subr.mxu0 %v6235_v59  ;;  %644 = vmatprep.subr.mxu1 %v6240_v60  ;;  %9793 = vst [vmem:[#allocation20_spill] sm:$0xff] %v6313_v12  ;;  %9794 = vst [vmem:[#allocation21_spill] sm:$0xff] %v6318_v17  ;;  %v6325_v18 = vld [vmem:[%s9568_s3 + $0x60] sm:$0xff]  ;;  %v6330_v21 = vld [vmem:[%s9568_s3 + $0x70] sm:$0xff] }
  0x4d   :  { %385 = vmatprep.mubr.f32.mxu0 %v9576_v6  ;;  %498 = vmatprep.mubr.f32.mxu1 %v9576_v6  ;;  %9795 = vst [vmem:[#allocation22_spill] sm:$0xff] %v6325_v18  ;;  %9796 = vst [vmem:[#allocation23_spill] sm:$0xff] %v6330_v21  ;;  %v6335_v26 = vld [vmem:[%s9568_s3 + $0x48] sm:$0xff]  ;;  %v6340_v27 = vld [vmem:[%s9568_s3 + $0x58] sm:$0xff] }
  0x4e   :  { %574 = vmatpush1.msra.mxu0 %v6249_v61  ;;  %645 = vmatpush1.msra.mxu1 %v6254_v62  ;;  %9797 = vst [vmem:[#allocation24_spill] sm:$0xff] %v6335_v26  ;;  %9798 = vst [vmem:[#allocation25_spill] sm:$0xff] %v6340_v27  ;;  %v6349_v32 = vld [vmem:[%s9568_s3 + $0x40] sm:$0xff]  ;;  %v6354_v33 = vld [vmem:[%s9568_s3 + $0x50] sm:$0xff] }
  0x4f   :  { %386 = vmatmul.mubr.f32.gmra.mxu0 %v267_v63  ;;  %499 = vmatmul.mubr.f32.gmra.mxu1 %v267_v63  ;;  %9799 = vst [vmem:[#allocation26_spill] sm:$0xff] %v6349_v32  ;;  %9800 = vst [vmem:[#allocation27_spill] sm:$0xff] %v6354_v33  ;;  %v269_v34 = vld [vmem:[#allocation2 + $0x38] sm:$0xff]  ;;  %v6363_v41 = vld [vmem:[%s9568_s3 + $0x28] sm:$0xff] }
  0x50   :  { %575 = vmatprep.subr.mxu0 %v6263_v0  ;;  %646 = vmatprep.subr.mxu1 %v6268_v1  ;;  %9801 = vst [vmem:[#allocation28_spill] sm:$0xff] %v6363_v41  ;;  %v6368_v42 = vld [vmem:[%s9568_s3 + $0x38] sm:$0xff]  ;;  %v6375_v45 = vld [vmem:[%s9568_s3 + $0x20] sm:$0xff]  ;;  %v6380_v54 = vld [vmem:[%s9568_s3 + $0x30] sm:$0xff] }
  0x51   :  { %576 = vmatpush1.msra.mxu0 %v6275_v2  ;;  %647 = vmatpush1.msra.mxu1 %v6280_v3  ;;  %9802 = vst [vmem:[#allocation29_spill] sm:$0xff] %v6368_v42  ;;  %9803 = vst [vmem:[#allocation30_spill] sm:$0xff] %v6375_v45  ;;  %v6385_v63 = vld [vmem:[%s9568_s3 + $0x8] sm:$0xff] }
  0x52   :  { %577 = vmatprep.subr.mxu0 %v6285_v4  ;;  %648 = vmatprep.subr.mxu1 %v6290_v5  ;;  %9804 = vst [vmem:[#allocation31_spill] sm:$0xff] %v6380_v54  ;;  %9805 = vst [vmem:[#allocation32_spill] sm:$0xff] %v6385_v63 }
  0x53   :  { %391 = vmatprep.mubr.f32.mxu0 %v9576_v6  ;;  %504 = vmatprep.mubr.f32.mxu1 %v9576_v6 }
  0x54   :  { %578 = vmatpush1.msra.mxu0 %v6299_v7  ;;  %649 = vmatpush1.msra.mxu1 %v6304_v8 }
  0x55   :  { %392 = vmatmul.mubr.f32.gmra.mxu0 %v268_v9  ;;  %505 = vmatmul.mubr.f32.gmra.mxu1 %v268_v9  ;;  %v6390_v9 = vld [vmem:[%s9568_s3 + $0x18] sm:$0xff] }
  0x56   :  { %579 = vmatprep.subr.mxu0 %v6313_v12  ;;  %650 = vmatprep.subr.mxu1 %v6318_v17  ;;  %9806 = vst [vmem:[#allocation33_spill] sm:$0xff] %v6390_v9 }
  0x57   :  { %580 = vmatpush1.msra.mxu0 %v6325_v18  ;;  %651 = vmatpush1.msra.mxu1 %v6330_v21 }
  0x58   :  { %581 = vmatprep.subr.mxu0 %v6335_v26  ;;  %652 = vmatprep.subr.mxu1 %v6340_v27 }
  0x59   :  { %397 = vmatprep.mubr.f32.mxu0 %v9576_v6  ;;  %510 = vmatprep.mubr.f32.mxu1 %v9576_v6  ;;  %v6397_v6 = vld [vmem:[%s9568_s3] sm:$0xff] }
  0x5a   :  { %582 = vmatpush1.msra.mxu0 %v6349_v32  ;;  %653 = vmatpush1.msra.mxu1 %v6354_v33  ;;  %9807 = vst [vmem:[#allocation34_spill] sm:$0xff] %v6397_v6 }
  0x5b   :  { %398 = vmatmul.mubr.f32.gmra.mxu0 %v269_v34  ;;  %511 = vmatmul.mubr.f32.gmra.mxu1 %v269_v34  ;;  %v6404_v34 = vld [vmem:[%s9568_s3 + $0x10] sm:$0xff] }
  0x5c   :  { %583 = vmatprep.subr.mxu0 %v6363_v41  ;;  %654 = vmatprep.subr.mxu1 %v6368_v42  ;;  %9808 = vst [vmem:[#allocation35_spill] sm:$0xff] %v6404_v34  ;;  %v9809_v42 = vmov 0.0  }
  0x5d   :  { %584 = vmatpush1.msra.mxu0 %v6375_v45  ;;  %655 = vmatpush1.msra.mxu1 %v6380_v54 }
  0x5e   :  { %585 = vmatprep.subr.mxu0 %v6385_v63  ;;  %656 = vmatprep.subr.mxu1 %v6390_v9 }
  0x5f   :  { %586 = vmatpush1.msra.mxu0 %v6397_v6  ;;  %619 = vmatprep.mubr.f32.mxu0 %v9809_v42 }
  0x60   :  { %657 = vmatpush1.msra.mxu1 %v6404_v34  ;;  %690 = vmatprep.mubr.f32.mxu1 %v9809_v42 }
  0x61   :  { %620 = vmatmul.mubr.f32.vlgmr.msra.gmra.mxu0 %v9809_v42  ;;  %691 = vmatmul.mubr.f32.vlgmr.msra.gmra.mxu1 %v9809_v42 }
  0x62   :  { %734 = vmatprep.subr.mxu0 %v5978_v10  ;;  %805 = vmatprep.subr.mxu1 %v5983_v11 }
  0x63   :  { %735 = vmatpush1.msra.mxu0 %v5997_v13  ;;  %806 = vmatpush1.msra.mxu1 %v6002_v14 }
  0x64   :  { %736 = vmatprep.subr.mxu0 %v6007_v15  ;;  %807 = vmatprep.subr.mxu1 %v6012_v16 }
  0x65   :  { %737 = vmatpush1.msra.mxu0 %v6025_v19  ;;  %808 = vmatpush1.msra.mxu1 %v6030_v20 }
  0x66   :  { %738 = vmatprep.subr.mxu0 %v6047_v22  ;;  %809 = vmatprep.subr.mxu1 %v6052_v23 }
  0x67   :  { %739 = vmatpush1.msra.mxu0 %v6057_v24  ;;  %810 = vmatpush1.msra.mxu1 %v6064_v25 }
  0x68   :  { %740 = vmatprep.subr.mxu0 %v6073_v28  ;;  %811 = vmatprep.subr.mxu1 %v6078_v29 }
  0x69   :  { %741 = vmatpush1.msra.mxu0 %v6091_v30  ;;  %812 = vmatpush1.msra.mxu1 %v6096_v31 }
  0x6a   :  { %742 = vmatprep.subr.mxu0 %v6113_v35  ;;  %813 = vmatprep.subr.mxu1 %v6118_v36 }
  0x6b   :  { %743 = vmatpush1.msra.mxu0 %v6125_v37  ;;  %814 = vmatpush1.msra.mxu1 %v6130_v38 }
  0x6c   :  { %744 = vmatprep.subr.mxu0 %v6135_v39  ;;  %815 = vmatprep.subr.mxu1 %v6140_v40 }
  0x6d   :  { %745 = vmatpush1.msra.mxu0 %v6149_v43  ;;  %816 = vmatpush1.msra.mxu1 %v6154_v44 }
  0x6e   :  { %746 = vmatprep.subr.mxu0 %v6163_v46  ;;  %817 = vmatprep.subr.mxu1 %v6168_v47 }
  0x6f   :  { %747 = vmatpush1.msra.mxu0 %v6175_v48  ;;  %818 = vmatpush1.msra.mxu1 %v6180_v49 }
  0x70   :  { %748 = vmatprep.subr.mxu0 %v6185_v50  ;;  %819 = vmatprep.subr.mxu1 %v6190_v51 }
  0x71   :  { %749 = vmatpush1.msra.mxu0 %v6199_v52  ;;  %820 = vmatpush1.msra.mxu1 %v6204_v53 }
  0x72   :  { %750 = vmatprep.subr.mxu0 %v6213_v55  ;;  %821 = vmatprep.subr.mxu1 %v6218_v56 }
  0x73   :  { %751 = vmatpush1.msra.mxu0 %v6225_v57  ;;  %822 = vmatpush1.msra.mxu1 %v6230_v58 }
  0x74   :  { %752 = vmatprep.subr.mxu0 %v6235_v59  ;;  %823 = vmatprep.subr.mxu1 %v6240_v60 }
  0x75   :  { %753 = vmatpush1.msra.mxu0 %v6249_v61  ;;  %824 = vmatpush1.msra.mxu1 %v6254_v62 }
  0x76   :  { %754 = vmatprep.subr.mxu0 %v6263_v0  ;;  %825 = vmatprep.subr.mxu1 %v6268_v1 }
  0x77   :  { %755 = vmatpush1.msra.mxu0 %v6275_v2  ;;  %826 = vmatpush1.msra.mxu1 %v6280_v3 }
  0x78   :  { %756 = vmatprep.subr.mxu0 %v6285_v4  ;;  %827 = vmatprep.subr.mxu1 %v6290_v5 }
  0x79   :  { %757 = vmatpush1.msra.mxu0 %v6299_v7  ;;  %828 = vmatpush1.msra.mxu1 %v6304_v8  ;;  %v9810_v7 = vld [vmem:[#allocation29_spill] sm:$0xff] }
  0x7a   :  { %758 = vmatprep.subr.mxu0 %v6313_v12  ;;  %829 = vmatprep.subr.mxu1 %v6318_v17 }
  0x7b   :  { %759 = vmatpush1.msra.mxu0 %v6325_v18  ;;  %830 = vmatpush1.msra.mxu1 %v6330_v21 }
  0x7c   :  { %760 = vmatprep.subr.mxu0 %v6335_v26  ;;  %831 = vmatprep.subr.mxu1 %v6340_v27 }
  0x7d   :  { %761 = vmatpush1.msra.mxu0 %v6349_v32  ;;  %832 = vmatpush1.msra.mxu1 %v6354_v33 }
  0x7e   :  { %762 = vmatprep.subr.mxu0 %v6363_v41  ;;  %833 = vmatprep.subr.mxu1 %v9810_v7  ;;  %v271_v7 = vlaneseq }
  0x7f   :  { %763 = vmatpush1.msra.mxu0 %v6375_v45  ;;  %834 = vmatpush1.msra.mxu1 %v6380_v54 }
  0x80   :  { %764 = vmatprep.subr.mxu0 %v6385_v63  ;;  %835 = vmatprep.subr.mxu1 %v6390_v9  ;;  %v6482_v45 = vshrl.u32 %v271_v7, 7 }
  0x81   :  { %765 = vmatpush1.msra.mxu0 %v6397_v6  ;;  %798 = vmatprep.mubr.f32.mxu0 %v9809_v42 }
  0x82   :  { %836 = vmatpush1.msra.mxu1 %v6404_v34  ;;  %869 = vmatprep.mubr.f32.mxu1 %v9809_v42  ;;  %9811 = vst [vmem:[#allocation36_spill] sm:$0xff] %v6482_v45  ;;  %v9615_v9 = vsub.s32 0, %v6482_v45  ;;  %v9618_v6 = vsub.s32 2, %v6482_v45  ;;  %v259_v34 = vld [vmem:[%s9569_s4] sm:$0xf]  ;;  %v9626_v7 = vsub.s32 3, %v6482_v45 }
  0x83   :  { %913 = vmatprep.subr.mxu0 %v5978_v10  ;;  %984 = vmatprep.subr.mxu1 %v5983_v11  ;;  %v9625_v11 = vsub.s32 1, %v6482_v45 }
  0x84   :  { %v274_v41 = vrot.slane %v259_v34, %v9615_v9  ;;  %v6503_v33 = vrot.slane %v259_v34, %v9618_v6  ;;  %v6509_v21 = vrot.slane %v259_v34, %v9626_v7 }
  0x85   :  { %v278_v26 = vrot.slane %v259_v34, %v9625_v11 }
  0xf1   :  { %v6484_v54 = vpop.f32.mrf.mxu0  ;;  %v6486_v63 = vpop.f32.mrf.mxu1 }
  0xf3   :  { %v6493_v42 = vpop.f32.mrf.mxu0  ;;  %v6495_v10 = vpop.f32.mrf.mxu1 }
  0xf7   :  { %v363_v32 = vpop.f32.mrf.mxu0  ;;  %v476_v27 = vpop.f32.mrf.mxu1 }
  0xf8   :  { %v6511_v18 = vadd.f32 %v363_v32, %v274_v41  ;;  %v6514_v17 = vadd.f32 %v476_v27, %v6503_v33 }
  0xf9   :  { %v365_v12 = vpop.f32.mrf.mxu0  ;;  %v478_v9 = vpop.f32.mrf.mxu1 }
  0xfa   :  { %9812 = vst [vmem:[#allocation37_spill] sm:$0xff] %v6514_v17  ;;  %v6516_v8 = vadd.f32 %v365_v12, %v278_v26  ;;  %v6519_v6 = vadd.f32 %v478_v9, %v6509_v21 }
  0xfc   :  { %9813 = vst [vmem:[#allocation38_spill] sm:$0xff] %v6516_v8  ;;  %9814 = vst [vmem:[#allocation39_spill] sm:$0xff] %v6519_v6 }
  0xfd   :  { %v369_v5 = vpop.f32.mrf.mxu0  ;;  %v482_v4 = vpop.f32.mrf.mxu1 }
  0xfe   :  { %v6521_v3 = vadd.f32 %v369_v5, %v274_v41  ;;  %v6524_v11 = vadd.f32 %v482_v4, %v6503_v33 }
  0xff   :  { %v371_v34 = vpop.f32.mrf.mxu0  ;;  %v484_v32 = vpop.f32.mrf.mxu1 }
 0x100   :  { %9815 = vst [vmem:[#allocation40_spill] sm:$0xff] %v6521_v3  ;;  %9816 = vst [vmem:[#allocation41_spill] sm:$0xff] %v6524_v11  ;;  %v6526_v7 = vadd.f32 %v371_v34, %v278_v26  ;;  %v6529_v27 = vadd.f32 %v484_v32, %v6509_v21 }
 0x102   :  { %9817 = vst [vmem:[#allocation42_spill] sm:$0xff] %v6526_v7  ;;  %9818 = vst [vmem:[#allocation43_spill] sm:$0xff] %v6529_v27 }
 0x103   :  { %v375_v45 = vpop.f32.mrf.mxu0  ;;  %v488_v12 = vpop.f32.mrf.mxu1 }
 0x104   :  { %v6531_v17 = vadd.f32 %v375_v45, %v274_v41  ;;  %v6534_v9 = vadd.f32 %v488_v12, %v6503_v33 }
 0x105   :  { %v377_v6 = vpop.f32.mrf.mxu0  ;;  %v490_v5 = vpop.f32.mrf.mxu1 }
 0x106   :  { %9819 = vst [vmem:[#allocation44_spill] sm:$0xff] %v6531_v17  ;;  %9820 = vst [vmem:[#allocation45_spill] sm:$0xff] %v6534_v9  ;;  %v6536_v3 = vadd.f32 %v377_v6, %v278_v26  ;;  %v6539_v4 = vadd.f32 %v490_v5, %v6509_v21 }
 0x108   :  { %9821 = vst [vmem:[#allocation46_spill] sm:$0xff] %v6536_v3  ;;  %9822 = vst [vmem:[#allocation47_spill] sm:$0xff] %v6539_v4 }
 0x109   :  { %v381_v11 = vpop.f32.mrf.mxu0  ;;  %v494_v34 = vpop.f32.mrf.mxu1 }
 0x10a   :  { %v6541_v7 = vadd.f32 %v381_v11, %v274_v41  ;;  %v6544_v32 = vadd.f32 %v494_v34, %v6503_v33 }
 0x10b   :  { %v383_v27 = vpop.f32.mrf.mxu0  ;;  %v496_v45 = vpop.f32.mrf.mxu1 }
 0x10c   :  { %9823 = vst [vmem:[#allocation48_spill] sm:$0xff] %v6541_v7  ;;  %9824 = vst [vmem:[#allocation49_spill] sm:$0xff] %v6544_v32  ;;  %v6546_v17 = vadd.f32 %v383_v27, %v278_v26  ;;  %v6549_v12 = vadd.f32 %v496_v45, %v6509_v21 }
 0x10e   :  { %9825 = vst [vmem:[#allocation50_spill] sm:$0xff] %v6546_v17  ;;  %9826 = vst [vmem:[#allocation51_spill] sm:$0xff] %v6549_v12 }
 0x10f   :  { %v387_v9 = vpop.f32.mrf.mxu0  ;;  %v500_v6 = vpop.f32.mrf.mxu1 }
 0x110   :  { %v6551_v3 = vadd.f32 %v387_v9, %v274_v41  ;;  %v6554_v5 = vadd.f32 %v500_v6, %v6503_v33 }
 0x111   :  { %v389_v4 = vpop.f32.mrf.mxu0  ;;  %v502_v11 = vpop.f32.mrf.mxu1 }
 0x112   :  { %9827 = vst [vmem:[#allocation52_spill] sm:$0xff] %v6551_v3  ;;  %9828 = vst [vmem:[#allocation53_spill] sm:$0xff] %v6554_v5  ;;  %v6556_v7 = vadd.f32 %v389_v4, %v278_v26  ;;  %v6559_v34 = vadd.f32 %v502_v11, %v6509_v21 }
 0x114   :  { %9829 = vst [vmem:[#allocation54_spill] sm:$0xff] %v6556_v7  ;;  %9830 = vst [vmem:[#allocation55_spill] sm:$0xff] %v6559_v34 }
 0x115   :  { %v393_v32 = vpop.f32.mrf.mxu0  ;;  %v506_v27 = vpop.f32.mrf.mxu1 }
 0x116   :  { %v6561_v17 = vadd.f32 %v393_v32, %v274_v41  ;;  %v6564_v45 = vadd.f32 %v506_v27, %v6503_v33 }
 0x117   :  { %v395_v12 = vpop.f32.mrf.mxu0  ;;  %v508_v9 = vpop.f32.mrf.mxu1 }
 0x118   :  { %9831 = vst [vmem:[#allocation56_spill] sm:$0xff] %v6561_v17  ;;  %9832 = vst [vmem:[#allocation57_spill] sm:$0xff] %v6564_v45  ;;  %v6566_v3 = vadd.f32 %v395_v12, %v278_v26  ;;  %v6569_v6 = vadd.f32 %v508_v9, %v6509_v21  ;;  %v358_v12 = vadd.f32 %v6484_v54, %v274_v41 }
 0x119   :  { %v360_v9 = vadd.f32 %v6493_v42, %v278_v26 }
 0x11a   :  { %9833 = vst [vmem:[#allocation58_spill] sm:$0xff] %v6566_v3  ;;  %9834 = vst [vmem:[#allocation59_spill] sm:$0xff] %v6569_v6 }
 0x11b   :  { %v399_v5 = vpop.f32.mrf.mxu0  ;;  %v512_v4 = vpop.f32.mrf.mxu1 }
 0x11c   :  { %v6571_v7 = vadd.f32 %v399_v5, %v274_v41  ;;  %v6574_v11 = vadd.f32 %v512_v4, %v6503_v33 }
 0x11d   :  { %v401_v34 = vpop.f32.mrf.mxu0  ;;  %v514_v32 = vpop.f32.mrf.mxu1 }
 0x11e   :  { %9835 = vst [vmem:[#allocation60_spill] sm:$0xff] %v6571_v7  ;;  %9836 = vst [vmem:[#allocation61_spill] sm:$0xff] %v6574_v11  ;;  %v6576_v17 = vadd.f32 %v401_v34, %v278_v26  ;;  %v6579_v27 = vadd.f32 %v514_v32, %v6509_v21  ;;  %v473_v34 = vadd.f32 %v6495_v10, %v6509_v21 }
 0x11f   :  { %v471_v32 = vadd.f32 %v6486_v63, %v6503_v33 }
 0x120   :  { %9837 = vst [vmem:[#allocation62_spill] sm:$0xff] %v6576_v17  ;;  %9838 = vst [vmem:[#allocation63_spill] sm:$0xff] %v6579_v27 }
 0x121   :  { %v621_v45 = vpop.f32.mrf.mxu0  ;;  %v692_v7 = vpop.f32.mrf.mxu1 }
 0x122   :  { %v697_v6 = vadd.f32 %v621_v45, %v358_v12  ;;  %v699_v27 = vadd.f32 %v692_v7, %v471_v32  ;;  %v9839_v7 = vld [vmem:[#allocation15_spill] sm:$0xff]  ;;  %v9844_v32 = vld [vmem:[#allocation20_spill] sm:$0xff] }
 0x123   :  { %v623_v3 = vpop.f32.mrf.mxu0  ;;  %v694_v11 = vpop.f32.mrf.mxu1 }
 0x124   :  { %v4610_v8 = vmul.f32 -1.442695, %v697_v6  ;;  %v698_v5 = vadd.f32 %v623_v3, %v360_v9  ;;  %v700_v17 = vadd.f32 %v694_v11, %v473_v34  ;;  %v9843_v34 = vld [vmem:[#allocation19_spill] sm:$0xff] }
 0x126   :  { %5191 = vpow2.f32 %v4610_v8  ;;  %v4611_v4 = vmul.f32 -1.442695, %v698_v5  ;;  %v4612_v41 = vmul.f32 -1.442695, %v700_v17  ;;  %v9841_v5 = vld [vmem:[#allocation17_spill] sm:$0xff] }
 0x128   :  { %5193 = vpow2.f32 %v4611_v4  ;;  %v9842_v4 = vld [vmem:[#allocation18_spill] sm:$0xff] }
 0x129   :  { %5195 = vpow2.f32 %v4612_v41  ;;  %v9845_v41 = vld [vmem:[#allocation21_spill] sm:$0xff] }
 0x133   :  { %v5192_v54 = vpop.eup %5191 }
 0x134   :  { %v704_v26 = vadd.f32 1.0, %v5192_v54  ;;  %v9846_v54 = vld [vmem:[#allocation22_spill] sm:$0xff] }
 0x135   :  { %v5194_v42 = vpop.eup %5193 }
 0x136   :  { %5197 = vrcp.f32 %v704_v26  ;;  %v710_v3 = vadd.f32 1.0, %v5194_v42  ;;  %v5196_v8 = vpop.eup %5195  ;;  %v9847_v26 = vld [vmem:[#allocation23_spill] sm:$0xff]  ;;  %v9848_v42 = vld [vmem:[#allocation24_spill] sm:$0xff] }
 0x137   :  { %5199 = vtanh.f32 %v699_v27  ;;  %v717_v9 = vadd.f32 1.0, %v5196_v8  ;;  %v9840_v27 = vld [vmem:[#allocation16_spill] sm:$0xff]  ;;  %v9850_v8 = vld [vmem:[#allocation26_spill] sm:$0xff] }
 0x138   :  { %5201 = vrcp.f32 %v710_v3  ;;  %v9849_v3 = vld [vmem:[#allocation25_spill] sm:$0xff] }
 0x139   :  { %5203 = vrcp.f32 %v717_v9  ;;  %v9854_v9 = vld [vmem:[#allocation30_spill] sm:$0xff] }
 0x143   :  { %v5198_v45 = vpop.eup %5197 }
 0x144   :  { %v5200_v6 = vpop.eup %5199 }
 0x145   :  { %v5202_v12 = vpop.eup %5201  ;;  %v721_v21 = vmul.f32 %v5200_v6, %v5198_v45  ;;  %v9851_v45 = vld [vmem:[#allocation27_spill] sm:$0xff]  ;;  %v9852_v6 = vld [vmem:[#allocation28_spill] sm:$0xff] }
 0x146   :  { %v720_v10 = vmul.f32 0.0, %v5202_v12  ;;  %v5204_v17 = vpop.eup %5203  ;;  %v9853_v12 = vld [vmem:[#allocation29_spill] sm:$0xff] }
 0x148   :  { %v6587_v11 = vadd.f32 %v721_v21, %v720_v10  ;;  %v9855_v10 = vld [vmem:[#allocation31_spill] sm:$0xff]  ;;  %v9856_v21 = vld [vmem:[#allocation32_spill] sm:$0xff] }
 0x14a   :  { %5205 = vtanh.f32 %v6587_v11 }
 0x157   :  { %v5206_v33 = vpop.eup %5205 }
 0x158   :  { %v724_v63 = vmul.f32 %v5206_v33, %v5204_v17  ;;  %v9857_v17 = vld [vmem:[#allocation33_spill] sm:$0xff]  ;;  %v9858_v33 = vld [vmem:[#allocation34_spill] sm:$0xff] }
 0x15a   :  { %727 = vst [vmem:[#allocation2] sm:$0xff] %v724_v63  ;;  %799 = vmatmul.mubr.f32.vlgmr.msra.gmra.mxu0 %v724_v63  ;;  %870 = vmatmul.mubr.f32.vlgmr.msra.gmra.mxu1 %v724_v63  ;;  %v9859_v63 = vmov 0.0  }
 0x15b   :  { %914 = vmatpush1.msra.mxu0 %v5997_v13  ;;  %985 = vmatpush1.msra.mxu1 %v6002_v14 }
 0x15c   :  { %915 = vmatprep.subr.mxu0 %v6007_v15  ;;  %986 = vmatprep.subr.mxu1 %v6012_v16 }
 0x15d   :  { %916 = vmatpush1.msra.mxu0 %v6025_v19  ;;  %987 = vmatpush1.msra.mxu1 %v6030_v20 }
 0x15e   :  { %917 = vmatprep.subr.mxu0 %v6047_v22  ;;  %988 = vmatprep.subr.mxu1 %v6052_v23 }
 0x15f   :  { %918 = vmatpush1.msra.mxu0 %v6057_v24  ;;  %989 = vmatpush1.msra.mxu1 %v6064_v25 }
 0x160   :  { %919 = vmatprep.subr.mxu0 %v6073_v28  ;;  %990 = vmatprep.subr.mxu1 %v6078_v29 }
 0x161   :  { %920 = vmatpush1.msra.mxu0 %v6091_v30  ;;  %991 = vmatpush1.msra.mxu1 %v6096_v31 }
 0x162   :  { %921 = vmatprep.subr.mxu0 %v6113_v35  ;;  %992 = vmatprep.subr.mxu1 %v6118_v36 }
 0x163   :  { %922 = vmatpush1.msra.mxu0 %v6125_v37  ;;  %993 = vmatpush1.msra.mxu1 %v6130_v38 }
 0x164   :  { %923 = vmatprep.subr.mxu0 %v6135_v39  ;;  %994 = vmatprep.subr.mxu1 %v6140_v40 }
 0x165   :  { %924 = vmatpush1.msra.mxu0 %v6149_v43  ;;  %995 = vmatpush1.msra.mxu1 %v6154_v44 }
 0x166   :  { %925 = vmatprep.subr.mxu0 %v6163_v46  ;;  %996 = vmatprep.subr.mxu1 %v6168_v47 }
 0x167   :  { %926 = vmatpush1.msra.mxu0 %v6175_v48  ;;  %997 = vmatpush1.msra.mxu1 %v6180_v49 }
 0x168   :  { %927 = vmatprep.subr.mxu0 %v6185_v50  ;;  %998 = vmatprep.subr.mxu1 %v6190_v51 }
 0x169   :  { %928 = vmatpush1.msra.mxu0 %v6199_v52  ;;  %999 = vmatpush1.msra.mxu1 %v6204_v53 }
 0x16a   :  { %929 = vmatprep.subr.mxu0 %v6213_v55  ;;  %1000 = vmatprep.subr.mxu1 %v6218_v56 }
 0x16b   :  { %930 = vmatpush1.msra.mxu0 %v6225_v57  ;;  %1001 = vmatpush1.msra.mxu1 %v6230_v58 }
 0x16c   :  { %931 = vmatprep.subr.mxu0 %v6235_v59  ;;  %1002 = vmatprep.subr.mxu1 %v6240_v60 }
 0x16d   :  { %932 = vmatpush1.msra.mxu0 %v6249_v61  ;;  %1003 = vmatpush1.msra.mxu1 %v6254_v62 }
 0x16e   :  { %933 = vmatprep.subr.mxu0 %v6263_v0  ;;  %1004 = vmatprep.subr.mxu1 %v6268_v1 }
 0x16f   :  { %934 = vmatpush1.msra.mxu0 %v6275_v2  ;;  %1005 = vmatpush1.msra.mxu1 %v9839_v7 }
 0x170   :  { %935 = vmatprep.subr.mxu0 %v9840_v27  ;;  %1006 = vmatprep.subr.mxu1 %v9841_v5 }
 0x171   :  { %936 = vmatpush1.msra.mxu0 %v9842_v4  ;;  %1007 = vmatpush1.msra.mxu1 %v9843_v34 }
 0x172   :  { %937 = vmatprep.subr.mxu0 %v9844_v32  ;;  %1008 = vmatprep.subr.mxu1 %v9845_v41  ;;  %v9865_v41 = vld [vmem:[#allocation37_spill] sm:$0xff] }
 0x173   :  { %938 = vmatpush1.msra.mxu0 %v9846_v54  ;;  %1009 = vmatpush1.msra.mxu1 %v9847_v26  ;;  %v9864_v54 = vld [vmem:[#allocation39_spill] sm:$0xff] }
 0x174   :  { %939 = vmatprep.subr.mxu0 %v9848_v42  ;;  %1010 = vmatprep.subr.mxu1 %v9849_v3  ;;  %v9860_v3 = vld [vmem:[#allocation35_spill] sm:$0xff] }
 0x175   :  { %940 = vmatpush1.msra.mxu0 %v9850_v8  ;;  %1011 = vmatpush1.msra.mxu1 %v9851_v45  ;;  %v9861_v45 = vld [vmem:[#allocation13_spill] sm:$0xff] }
 0x176   :  { %941 = vmatprep.subr.mxu0 %v9852_v6  ;;  %1012 = vmatprep.subr.mxu1 %v9853_v12  ;;  %v9862_v6 = vld [vmem:[#allocation14_spill] sm:$0xff] }
 0x177   :  { %942 = vmatpush1.msra.mxu0 %v9854_v9  ;;  %1013 = vmatpush1.msra.mxu1 %v9855_v10 }
 0x178   :  { %943 = vmatprep.subr.mxu0 %v9856_v21  ;;  %1014 = vmatprep.subr.mxu1 %v9857_v17  ;;  %v9863_v21 = vld [vmem:[#allocation38_spill] sm:$0xff] }
 0x179   :  { %944 = vmatpush1.msra.mxu0 %v9858_v33  ;;  %977 = vmatprep.mubr.f32.mxu0 %v9859_v63 }
 0x17a   :  { %1015 = vmatpush1.msra.mxu1 %v9860_v3  ;;  %1048 = vmatprep.mubr.f32.mxu1 %v9859_v63 }
 0x17b   :  { %1092 = vmatprep.subr.mxu0 %v9861_v45  ;;  %1163 = vmatprep.subr.mxu1 %v9862_v6 }
 0x21a   :  { %v800_v12 = vpop.f32.mrf.mxu0  ;;  %v871_v17 = vpop.f32.mrf.mxu1 }
 0x21b   :  { %v876_v9 = vadd.f32 %v800_v12, %v6511_v18  ;;  %v878_v63 = vadd.f32 %v871_v17, %v9865_v41 }
 0x21c   :  { %v802_v10 = vpop.f32.mrf.mxu0  ;;  %v873_v26 = vpop.f32.mrf.mxu1 }
 0x21d   :  { %v4613_v8 = vmul.f32 -1.442695, %v876_v9  ;;  %v877_v42 = vadd.f32 %v802_v10, %v9863_v21  ;;  %v879_v3 = vadd.f32 %v873_v26, %v9864_v54 }
 0x21f   :  { %5207 = vpow2.f32 %v4613_v8  ;;  %v4614_v33 = vmul.f32 -1.442695, %v877_v42  ;;  %v4615_v32 = vmul.f32 -1.442695, %v879_v3 }
 0x221   :  { %5209 = vpow2.f32 %v4614_v33 }
 0x222   :  { %5211 = vtanh.f32 %v878_v63  ;;  %v9889_v63 = vld [vmem:[#allocation41_spill] sm:$0xff] }
 0x223   :  { %5213 = vpow2.f32 %v4615_v32  ;;  %v9888_v32 = vld [vmem:[#allocation43_spill] sm:$0xff] }
 0x22c   :  { %v5208_v45 = vpop.eup %5207 }
 0x22d   :  { %v883_v34 = vadd.f32 1.0, %v5208_v45 }
 0x22e   :  { %v5210_v6 = vpop.eup %5209 }
 0x22f   :  { %5215 = vrcp.f32 %v883_v34  ;;  %v889_v18 = vadd.f32 1.0, %v5210_v6  ;;  %v5212_v12 = vpop.eup %5211 }
 0x230   :  { %v5214_v9 = vpop.eup %5213 }
 0x231   :  { %5217 = vrcp.f32 %v889_v18  ;;  %v896_v21 = vadd.f32 1.0, %v5214_v9 }
 0x233   :  { %5219 = vrcp.f32 %v896_v21 }
 0x23c   :  { %v5216_v8 = vpop.eup %5215 }
 0x23d   :  { %v900_v10 = vmul.f32 %v5216_v8, %v5212_v12 }
 0x23e   :  { %v5218_v42 = vpop.eup %5217 }
 0x23f   :  { %v899_v33 = vmul.f32 %v5218_v42, %v6587_v11 }
 0x240   :  { %v5220_v41 = vpop.eup %5219 }
 0x241   :  { %v6661_v54 = vadd.f32 %v900_v10, %v899_v33 }
 0x243   :  { %5221 = vtanh.f32 %v6661_v54 }
 0x250   :  { %v5222_v26 = vpop.eup %5221 }
 0x251   :  { %v903_v3 = vmul.f32 %v5222_v26, %v5220_v41 }
 0x253   :  { %906 = vst [vmem:[#allocation2 + $0x8] sm:$0xff] %v903_v3  ;;  %978 = vmatmul.mubr.f32.vlgmr.msra.gmra.mxu0 %v903_v3  ;;  %1049 = vmatmul.mubr.f32.vlgmr.msra.gmra.mxu1 %v903_v3 }
 0x254   :  { %1093 = vmatpush1.msra.mxu0 %v5997_v13  ;;  %1164 = vmatpush1.msra.mxu1 %v6002_v14  ;;  %v9866_v13 = vld [vmem:[#allocation19_spill] sm:$0xff]  ;;  %v9867_v14 = vld [vmem:[#allocation20_spill] sm:$0xff] }
 0x255   :  { %1094 = vmatprep.subr.mxu0 %v6007_v15  ;;  %1165 = vmatprep.subr.mxu1 %v6012_v16  ;;  %v9868_v15 = vld [vmem:[#allocation21_spill] sm:$0xff]  ;;  %v9869_v16 = vld [vmem:[#allocation22_spill] sm:$0xff] }
 0x256   :  { %1095 = vmatpush1.msra.mxu0 %v6025_v19  ;;  %1166 = vmatpush1.msra.mxu1 %v6030_v20  ;;  %v9870_v19 = vld [vmem:[#allocation23_spill] sm:$0xff]  ;;  %v9871_v20 = vld [vmem:[#allocation24_spill] sm:$0xff] }
 0x257   :  { %1096 = vmatprep.subr.mxu0 %v6047_v22  ;;  %1167 = vmatprep.subr.mxu1 %v6052_v23  ;;  %v9872_v22 = vld [vmem:[#allocation25_spill] sm:$0xff]  ;;  %v9873_v23 = vld [vmem:[#allocation26_spill] sm:$0xff] }
 0x258   :  { %1097 = vmatpush1.msra.mxu0 %v6057_v24  ;;  %1168 = vmatpush1.msra.mxu1 %v6064_v25  ;;  %v9874_v24 = vld [vmem:[#allocation27_spill] sm:$0xff]  ;;  %v9875_v25 = vld [vmem:[#allocation28_spill] sm:$0xff] }
 0x259   :  { %1098 = vmatprep.subr.mxu0 %v6073_v28  ;;  %1169 = vmatprep.subr.mxu1 %v6078_v29  ;;  %v9876_v28 = vld [vmem:[#allocation29_spill] sm:$0xff]  ;;  %v9877_v29 = vld [vmem:[#allocation30_spill] sm:$0xff] }
 0x25a   :  { %1099 = vmatpush1.msra.mxu0 %v6091_v30  ;;  %1170 = vmatpush1.msra.mxu1 %v6096_v31  ;;  %v9878_v30 = vld [vmem:[#allocation31_spill] sm:$0xff]  ;;  %v9879_v31 = vld [vmem:[#allocation32_spill] sm:$0xff] }
 0x25b   :  { %1100 = vmatprep.subr.mxu0 %v6113_v35  ;;  %1171 = vmatprep.subr.mxu1 %v6118_v36  ;;  %v9880_v35 = vld [vmem:[#allocation33_spill] sm:$0xff]  ;;  %v9881_v36 = vld [vmem:[#allocation34_spill] sm:$0xff] }
 0x25c   :  { %1101 = vmatpush1.msra.mxu0 %v6125_v37  ;;  %1172 = vmatpush1.msra.mxu1 %v6130_v38  ;;  %v9882_v37 = vmov 0.0   ;;  %v9883_v38 = vld [vmem:[#allocation35_spill] sm:$0xff] }
 0x25d   :  { %1102 = vmatprep.subr.mxu0 %v6135_v39  ;;  %1173 = vmatprep.subr.mxu1 %v6140_v40  ;;  %v6731_v39 = vld [vmem:[%s9568_s3 + $0x1e8] sm:$0xff]  ;;  %v6737_v40 = vld [vmem:[%s9568_s3 + $0x1f8] sm:$0xff] }
 0x25e   :  { %1103 = vmatpush1.msra.mxu0 %v6149_v43  ;;  %1174 = vmatpush1.msra.mxu1 %v6154_v44  ;;  %9884 = vst [vmem:[#allocation15_spill] sm:$0xff] %v6731_v39  ;;  %9885 = vst [vmem:[#allocation16_spill] sm:$0xff] %v6737_v40  ;;  %v9886_v44 = vld [vmem:[#allocation40_spill] sm:$0xff] }
 0x25f   :  { %1104 = vmatprep.subr.mxu0 %v6163_v46  ;;  %1175 = vmatprep.subr.mxu1 %v6168_v47 }
 0x260   :  { %1105 = vmatpush1.msra.mxu0 %v6175_v48  ;;  %1176 = vmatpush1.msra.mxu1 %v6180_v49  ;;  %v9887_v49 = vld [vmem:[#allocation42_spill] sm:$0xff] }
 0x261   :  { %1106 = vmatprep.subr.mxu0 %v6185_v50  ;;  %1177 = vmatprep.subr.mxu1 %v6190_v51 }
 0x262   :  { %1107 = vmatpush1.msra.mxu0 %v6199_v52  ;;  %1178 = vmatpush1.msra.mxu1 %v6204_v53 }
 0x263   :  { %1108 = vmatprep.subr.mxu0 %v6213_v55  ;;  %1179 = vmatprep.subr.mxu1 %v6218_v56 }
 0x264   :  { %1109 = vmatpush1.msra.mxu0 %v6225_v57  ;;  %1180 = vmatpush1.msra.mxu1 %v6230_v58 }
 0x265   :  { %1110 = vmatprep.subr.mxu0 %v6235_v59  ;;  %1181 = vmatprep.subr.mxu1 %v6240_v60 }
 0x266   :  { %1111 = vmatpush1.msra.mxu0 %v6249_v61  ;;  %1182 = vmatpush1.msra.mxu1 %v6254_v62 }
 0x267   :  { %1112 = vmatprep.subr.mxu0 %v6263_v0  ;;  %1183 = vmatprep.subr.mxu1 %v6268_v1 }
 0x268   :  { %1113 = vmatpush1.msra.mxu0 %v6275_v2  ;;  %1184 = vmatpush1.msra.mxu1 %v9839_v7 }
 0x269   :  { %1114 = vmatprep.subr.mxu0 %v9840_v27  ;;  %1185 = vmatprep.subr.mxu1 %v9841_v5 }
 0x26a   :  { %1115 = vmatpush1.msra.mxu0 %v9842_v4  ;;  %1186 = vmatpush1.msra.mxu1 %v9866_v13 }
 0x26b   :  { %1116 = vmatprep.subr.mxu0 %v9867_v14  ;;  %1187 = vmatprep.subr.mxu1 %v9868_v15 }
 0x26c   :  { %1117 = vmatpush1.msra.mxu0 %v9869_v16  ;;  %1188 = vmatpush1.msra.mxu1 %v9870_v19 }
 0x26d   :  { %1118 = vmatprep.subr.mxu0 %v9871_v20  ;;  %1189 = vmatprep.subr.mxu1 %v9872_v22 }
 0x26e   :  { %1119 = vmatpush1.msra.mxu0 %v9873_v23  ;;  %1190 = vmatpush1.msra.mxu1 %v9874_v24 }
 0x26f   :  { %1120 = vmatprep.subr.mxu0 %v9875_v25  ;;  %1191 = vmatprep.subr.mxu1 %v9876_v28 }
 0x270   :  { %1121 = vmatpush1.msra.mxu0 %v9877_v29  ;;  %1192 = vmatpush1.msra.mxu1 %v9878_v30 }
 0x271   :  { %1122 = vmatprep.subr.mxu0 %v9879_v31  ;;  %1193 = vmatprep.subr.mxu1 %v9880_v35 }
 0x272   :  { %1123 = vmatpush1.msra.mxu0 %v9881_v36  ;;  %1156 = vmatprep.mubr.f32.mxu0 %v9882_v37 }
 0x273   :  { %1194 = vmatpush1.msra.mxu1 %v9883_v38  ;;  %1227 = vmatprep.mubr.f32.mxu1 %v9882_v37 }
 0x274   :  { %1271 = vmatprep.subr.mxu0 %v6731_v39  ;;  %1342 = vmatprep.subr.mxu1 %v6737_v40 }
 0x313   :  { %v979_v43 = vpop.f32.mrf.mxu0  ;;  %v1050_v51 = vpop.f32.mrf.mxu1 }
 0x314   :  { %v1055_v46 = vadd.f32 %v979_v43, %v9886_v44  ;;  %v1057_v45 = vadd.f32 %v1050_v51, %v9889_v63  ;;  %v6775_v51 = vld [vmem:[%s9568_s3 + $0x1c0] sm:$0xff]  ;;  %v6805_v63 = vld [vmem:[%s9568_s3 + $0x1b0] sm:$0xff] }
 0x315   :  { %v981_v47 = vpop.f32.mrf.mxu0  ;;  %v1052_v34 = vpop.f32.mrf.mxu1 }
 0x316   :  { %v4616_v48 = vmul.f32 -1.442695, %v1055_v46  ;;  %v1056_v50 = vadd.f32 %v981_v47, %v9887_v49  ;;  %v1058_v17 = vadd.f32 %v1052_v34, %v9888_v32  ;;  %v6763_v49 = vld [vmem:[%s9568_s3 + $0x1c8] sm:$0xff]  ;;  %v6793_v32 = vld [vmem:[%s9568_s3 + $0x1b8] sm:$0xff] }
 0x317   :  { %v6787_v34 = vld [vmem:[%s9568_s3 + $0x1a8] sm:$0xff] }
 0x318   :  { %5223 = vpow2.f32 %v4616_v48  ;;  %v4617_v11 = vmul.f32 -1.442695, %v1056_v50  ;;  %v4618_v6 = vmul.f32 -1.442695, %v1058_v17  ;;  %v6751_v48 = vld [vmem:[%s9568_s3 + $0x1e0] sm:$0xff]  ;;  %v6769_v50 = vld [vmem:[%s9568_s3 + $0x1d8] sm:$0xff] }
 0x319   :  { %v6799_v17 = vld [vmem:[%s9568_s3 + $0x1a0] sm:$0xff] }
 0x31a   :  { %5225 = vpow2.f32 %v4617_v11  ;;  %v6781_v11 = vld [vmem:[%s9568_s3 + $0x1d0] sm:$0xff] }
 0x31b   :  { %5227 = vtanh.f32 %v1057_v45  ;;  %v6811_v45 = vld [vmem:[%s9568_s3 + $0x188] sm:$0xff] }
 0x31c   :  { %5229 = vpow2.f32 %v4618_v6  ;;  %v6817_v6 = vld [vmem:[%s9568_s3 + $0x198] sm:$0xff] }
 0x325   :  { %v5224_v18 = vpop.eup %5223 }
 0x326   :  { %v1062_v12 = vadd.f32 1.0, %v5224_v18  ;;  %v6823_v18 = vld [vmem:[%s9568_s3 + $0x180] sm:$0xff] }
 0x327   :  { %v5226_v9 = vpop.eup %5225 }
 0x328   :  { %5231 = vrcp.f32 %v1062_v12  ;;  %v1068_v8 = vadd.f32 1.0, %v5226_v9  ;;  %v5228_v10 = vpop.eup %5227  ;;  %v6829_v12 = vld [vmem:[%s9568_s3 + $0x190] sm:$0xff]  ;;  %v6835_v9 = vld [vmem:[%s9568_s3 + $0x168] sm:$0xff] }
 0x329   :  { %v5230_v42 = vpop.eup %5229 }
 0x32a   :  { %5233 = vrcp.f32 %v1068_v8  ;;  %v1075_v26 = vadd.f32 1.0, %v5230_v42  ;;  %v6841_v8 = vld [vmem:[%s9568_s3 + $0x178] sm:$0xff]  ;;  %v6853_v42 = vld [vmem:[%s9568_s3 + $0x170] sm:$0xff] }
 0x32c   :  { %5235 = vrcp.f32 %v1075_v26  ;;  %v6877_v26 = vld [vmem:[%s9568_s3 + $0x150] sm:$0xff] }
 0x335   :  { %v5232_v21 = vpop.eup %5231 }
 0x336   :  { %v1079_v33 = vmul.f32 %v5232_v21, %v5228_v10  ;;  %v6847_v10 = vld [vmem:[%s9568_s3 + $0x160] sm:$0xff]  ;;  %v6859_v21 = vld [vmem:[%s9568_s3 + $0x148] sm:$0xff] }
 0x337   :  { %v5234_v41 = vpop.eup %5233 }
 0x338   :  { %v1078_v3 = vmul.f32 %v5234_v41, %v6661_v54  ;;  %v6757_v54 = vld [vmem:[%s9568_s3 + $0x1f0] sm:$0xff]  ;;  %v6871_v41 = vld [vmem:[%s9568_s3 + $0x140] sm:$0xff] }
 0x339   :  { %v5236_v44 = vpop.eup %5235 }
 0x33a   :  { %v6745_v43 = vadd.f32 %v1079_v33, %v1078_v3  ;;  %v6865_v33 = vld [vmem:[%s9568_s3 + $0x158] sm:$0xff]  ;;  %v6883_v3 = vld [vmem:[%s9568_s3 + $0x128] sm:$0xff] }
 0x33b   :  { %9890 = vst [vmem:[#allocation17_spill] sm:$0xff] %v6883_v3 }
 0x33c   :  { %5237 = vtanh.f32 %v6745_v43 }
 0x349   :  { %v5238_v46 = vpop.eup %5237 }
 0x34a   :  { %v1082_v47 = vmul.f32 %v5238_v46, %v5236_v44  ;;  %v6889_v44 = vld [vmem:[%s9568_s3 + $0x138] sm:$0xff]  ;;  %v6895_v46 = vld [vmem:[%s9568_s3 + $0x120] sm:$0xff] }
 0x34b   :  { %9891 = vst [vmem:[#allocation18_spill] sm:$0xff] %v6889_v44 }
 0x34c   :  { %1085 = vst [vmem:[#allocation2 + $0x10] sm:$0xff] %v1082_v47  ;;  %1157 = vmatmul.mubr.f32.vlgmr.msra.gmra.mxu0 %v1082_v47  ;;  %1228 = vmatmul.mubr.f32.vlgmr.msra.gmra.mxu1 %v1082_v47  ;;  %v6901_v47 = vld [vmem:[%s9568_s3 + $0x130] sm:$0xff] }
 0x34d   :  { %1272 = vmatpush1.msra.mxu0 %v6751_v48  ;;  %1343 = vmatpush1.msra.mxu1 %v6757_v54 }
 0x34e   :  { %1273 = vmatprep.subr.mxu0 %v6763_v49  ;;  %1344 = vmatprep.subr.mxu1 %v6769_v50 }
 0x34f   :  { %1274 = vmatpush1.msra.mxu0 %v6775_v51  ;;  %1345 = vmatpush1.msra.mxu1 %v6781_v11 }
 0x350   :  { %1275 = vmatprep.subr.mxu0 %v6787_v34  ;;  %1346 = vmatprep.subr.mxu1 %v6793_v32 }
 0x351   :  { %1276 = vmatpush1.msra.mxu0 %v6799_v17  ;;  %1347 = vmatpush1.msra.mxu1 %v6805_v63 }
 0x352   :  { %1277 = vmatprep.subr.mxu0 %v6811_v45  ;;  %1348 = vmatprep.subr.mxu1 %v6817_v6 }
 0x353   :  { %1278 = vmatpush1.msra.mxu0 %v6823_v18  ;;  %1349 = vmatpush1.msra.mxu1 %v6829_v12 }
 0x354   :  { %1279 = vmatprep.subr.mxu0 %v6835_v9  ;;  %1350 = vmatprep.subr.mxu1 %v6841_v8 }
 0x355   :  { %1280 = vmatpush1.msra.mxu0 %v6847_v10  ;;  %1351 = vmatpush1.msra.mxu1 %v6853_v42 }
 0x356   :  { %1281 = vmatprep.subr.mxu0 %v6859_v21  ;;  %1352 = vmatprep.subr.mxu1 %v6865_v33 }
 0x357   :  { %1282 = vmatpush1.msra.mxu0 %v6871_v41  ;;  %1353 = vmatpush1.msra.mxu1 %v6877_v26 }
 0x358   :  { %1283 = vmatprep.subr.mxu0 %v6883_v3  ;;  %1354 = vmatprep.subr.mxu1 %v6889_v44  ;;  %v6907_v3 = vld [vmem:[%s9568_s3 + $0x108] sm:$0xff]  ;;  %v6913_v44 = vld [vmem:[%s9568_s3 + $0x118] sm:$0xff] }
 0x359   :  { %1284 = vmatpush1.msra.mxu0 %v6895_v46  ;;  %1355 = vmatpush1.msra.mxu1 %v6901_v47 }
 0x35a   :  { %1285 = vmatprep.subr.mxu0 %v6907_v3  ;;  %1356 = vmatprep.subr.mxu1 %v6913_v44 }
 0x35b   :  { %1286 = vmatpush1.msra.mxu0 %v6199_v52  ;;  %1357 = vmatpush1.msra.mxu1 %v6204_v53  ;;  %v9892_v53 = vld [vmem:[#allocation44_spill] sm:$0xff] }
 0x35c   :  { %1287 = vmatprep.subr.mxu0 %v6213_v55  ;;  %1358 = vmatprep.subr.mxu1 %v6218_v56 }
 0x35d   :  { %1288 = vmatpush1.msra.mxu0 %v6225_v57  ;;  %1359 = vmatpush1.msra.mxu1 %v6230_v58  ;;  %v9893_v58 = vld [vmem:[#allocation46_spill] sm:$0xff] }
 0x35e   :  { %1289 = vmatprep.subr.mxu0 %v6235_v59  ;;  %1360 = vmatprep.subr.mxu1 %v6240_v60 }
 0x35f   :  { %1290 = vmatpush1.msra.mxu0 %v6249_v61  ;;  %1361 = vmatpush1.msra.mxu1 %v6254_v62 }
 0x360   :  { %1291 = vmatprep.subr.mxu0 %v6263_v0  ;;  %1362 = vmatprep.subr.mxu1 %v6268_v1  ;;  %v9894_v0 = vld [vmem:[#allocation47_spill] sm:$0xff] }
 0x361   :  { %1292 = vmatpush1.msra.mxu0 %v6275_v2  ;;  %1363 = vmatpush1.msra.mxu1 %v9839_v7  ;;  %v9895_v2 = vld [vmem:[#allocation45_spill] sm:$0xff] }
 0x362   :  { %1293 = vmatprep.subr.mxu0 %v9840_v27  ;;  %1364 = vmatprep.subr.mxu1 %v9841_v5 }
 0x363   :  { %1294 = vmatpush1.msra.mxu0 %v9842_v4  ;;  %1365 = vmatpush1.msra.mxu1 %v9866_v13 }
 0x364   :  { %1295 = vmatprep.subr.mxu0 %v9867_v14  ;;  %1366 = vmatprep.subr.mxu1 %v9868_v15 }
 0x365   :  { %1296 = vmatpush1.msra.mxu0 %v9869_v16  ;;  %1367 = vmatpush1.msra.mxu1 %v9870_v19 }
 0x366   :  { %1297 = vmatprep.subr.mxu0 %v9871_v20  ;;  %1368 = vmatprep.subr.mxu1 %v9872_v22 }
 0x367   :  { %1298 = vmatpush1.msra.mxu0 %v9873_v23  ;;  %1369 = vmatpush1.msra.mxu1 %v9874_v24 }
 0x368   :  { %1299 = vmatprep.subr.mxu0 %v9875_v25  ;;  %1370 = vmatprep.subr.mxu1 %v9876_v28 }
 0x369   :  { %1300 = vmatpush1.msra.mxu0 %v9877_v29  ;;  %1371 = vmatpush1.msra.mxu1 %v9878_v30 }
 0x36a   :  { %1301 = vmatprep.subr.mxu0 %v9879_v31  ;;  %1372 = vmatprep.subr.mxu1 %v9880_v35  ;;  %v9897_v31 = vld [vmem:[#allocation17_spill] sm:$0xff]  ;;  %v9898_v35 = vld [vmem:[#allocation18_spill] sm:$0xff] }
 0x36b   :  { %1302 = vmatpush1.msra.mxu0 %v9881_v36  ;;  %1335 = vmatprep.mubr.f32.mxu0 %v9882_v37  ;;  %v6998_v36 = vld [vmem:[%s9568_s3 + $0x100] sm:$0xff] }
 0x36c   :  { %1373 = vmatpush1.msra.mxu1 %v9883_v38  ;;  %1406 = vmatprep.mubr.f32.mxu1 %v9882_v37  ;;  %v7004_v38 = vld [vmem:[%s9568_s3 + $0x110] sm:$0xff] }
 0x36d   :  { %1450 = vmatprep.subr.mxu0 %v6731_v39  ;;  %1521 = vmatprep.subr.mxu1 %v6737_v40 }
 0x40c   :  { %v1158_v52 = vpop.f32.mrf.mxu0  ;;  %v1229_v60 = vpop.f32.mrf.mxu1 }
 0x40d   :  { %v1234_v55 = vadd.f32 %v1158_v52, %v9892_v53  ;;  %v1236_v7 = vadd.f32 %v1229_v60, %v9895_v2  ;;  %v7016_v52 = vld [vmem:[%s9568_s3 + $0xf8] sm:$0xff]  ;;  %v7022_v53 = vld [vmem:[%s9568_s3 + $0xe0] sm:$0xff]  ;;  %v7058_v60 = vld [vmem:[%s9568_s3 + $0xa8] sm:$0xff] }
 0x40e   :  { %v1160_v56 = vpop.f32.mrf.mxu0  ;;  %v1231_v62 = vpop.f32.mrf.mxu1  ;;  %v7088_v2 = vld [vmem:[%s9568_s3 + $0x98] sm:$0xff] }
 0x40f   :  { %v4619_v57 = vmul.f32 -1.442695, %v1234_v55  ;;  %v1235_v59 = vadd.f32 %v1160_v56, %v9893_v58  ;;  %v1237_v1 = vadd.f32 %v1231_v62, %v9894_v0  ;;  %v7028_v55 = vld [vmem:[%s9568_s3 + $0xf0] sm:$0xff]  ;;  %v7034_v56 = vld [vmem:[%s9568_s3 + $0xc8] sm:$0xff]  ;;  %v7046_v58 = vld [vmem:[%s9568_s3 + $0xc0] sm:$0xff] }
 0x410   :  { %v7070_v62 = vld [vmem:[%s9568_s3 + $0xa0] sm:$0xff]  ;;  %v7076_v0 = vld [vmem:[%s9568_s3 + $0xb0] sm:$0xff] }
 0x411   :  { %5239 = vpow2.f32 %v4619_v57  ;;  %v4620_v61 = vmul.f32 -1.442695, %v1235_v59  ;;  %v4621_v27 = vmul.f32 -1.442695, %v1237_v1  ;;  %v7040_v57 = vld [vmem:[%s9568_s3 + $0xd8] sm:$0xff]  ;;  %v7052_v59 = vld [vmem:[%s9568_s3 + $0xd0] sm:$0xff] }
 0x412   :  { %v7082_v1 = vld [vmem:[%s9568_s3 + $0x88] sm:$0xff] }
 0x413   :  { %5241 = vpow2.f32 %v4620_v61  ;;  %v7064_v61 = vld [vmem:[%s9568_s3 + $0xb8] sm:$0xff] }
 0x414   :  { %5243 = vtanh.f32 %v1236_v7  ;;  %v7094_v7 = vld [vmem:[%s9568_s3 + $0x80] sm:$0xff] }
 0x415   :  { %5245 = vpow2.f32 %v4621_v27  ;;  %v7100_v27 = vld [vmem:[%s9568_s3 + $0x90] sm:$0xff] }
 0x416   :  { %9899 = vst [vmem:[#allocation14_spill] sm:$0xff] %v7100_v27 }
 0x41e   :  { %v5240_v5 = vpop.eup %5239 }
 0x41f   :  { %v1241_v4 = vadd.f32 1.0, %v5240_v5  ;;  %v7106_v5 = vld [vmem:[%s9568_s3 + $0x68] sm:$0xff] }
 0x420   :  { %v5242_v13 = vpop.eup %5241  ;;  %9900 = vst [vmem:[#allocation38_spill] sm:$0xff] %v7106_v5 }
 0x421   :  { %5247 = vrcp.f32 %v1241_v4  ;;  %v1247_v14 = vadd.f32 1.0, %v5242_v13  ;;  %v5244_v15 = vpop.eup %5243  ;;  %v7112_v4 = vld [vmem:[%s9568_s3 + $0x78] sm:$0xff]  ;;  %v7118_v13 = vld [vmem:[%s9568_s3 + $0x60] sm:$0xff] }
 0x422   :  { %v5246_v16 = vpop.eup %5245  ;;  %9901 = vst [vmem:[#allocation39_spill] sm:$0xff] %v7112_v4  ;;  %9902 = vst [vmem:[#allocation37_spill] sm:$0xff] %v7118_v13 }
 0x423   :  { %5249 = vrcp.f32 %v1247_v14  ;;  %v1254_v23 = vadd.f32 1.0, %v5246_v16  ;;  %v7124_v14 = vld [vmem:[%s9568_s3 + $0x70] sm:$0xff]  ;;  %v7136_v16 = vld [vmem:[%s9568_s3 + $0x58] sm:$0xff] }
 0x424   :  { %9903 = vst [vmem:[#allocation19_spill] sm:$0xff] %v7124_v14  ;;  %9905 = vst [vmem:[#allocation21_spill] sm:$0xff] %v7136_v16 }
 0x425   :  { %5251 = vrcp.f32 %v1254_v23  ;;  %v7160_v23 = vld [vmem:[%s9568_s3 + $0x38] sm:$0xff] }
 0x426   :  { %9909 = vst [vmem:[#allocation25_spill] sm:$0xff] %v7160_v23 }
 0x42e   :  { %v5248_v19 = vpop.eup %5247 }
 0x42f   :  { %v1258_v20 = vmul.f32 %v5248_v19, %v5244_v15  ;;  %v7130_v15 = vld [vmem:[%s9568_s3 + $0x48] sm:$0xff]  ;;  %v7142_v19 = vld [vmem:[%s9568_s3 + $0x40] sm:$0xff] }
 0x430   :  { %v5250_v22 = vpop.eup %5249  ;;  %9904 = vst [vmem:[#allocation20_spill] sm:$0xff] %v7130_v15  ;;  %9906 = vst [vmem:[#allocation22_spill] sm:$0xff] %v7142_v19 }
 0x431   :  { %v1257_v24 = vmul.f32 %v5250_v22, %v6745_v43  ;;  %v7010_v43 = vld [vmem:[%s9568_s3 + $0xe8] sm:$0xff] }
 0x432   :  { %v5252_v28 = vpop.eup %5251  ;;  %v7154_v22 = vld [vmem:[%s9568_s3 + $0x28] sm:$0xff] }
 0x433   :  { %v6959_v25 = vadd.f32 %v1258_v20, %v1257_v24  ;;  %v7148_v20 = vld [vmem:[%s9568_s3 + $0x50] sm:$0xff]  ;;  %9908 = vst [vmem:[#allocation24_spill] sm:$0xff] %v7154_v22  ;;  %v7166_v24 = vld [vmem:[%s9568_s3 + $0x20] sm:$0xff] }
 0x434   :  { %9907 = vst [vmem:[#allocation23_spill] sm:$0xff] %v7148_v20  ;;  %9910 = vst [vmem:[#allocation26_spill] sm:$0xff] %v7166_v24 }
 0x435   :  { %5253 = vtanh.f32 %v6959_v25 }
 0x442   :  { %v5254_v29 = vpop.eup %5253 }
 0x443   :  { %v6962_v30 = vmul.f32 %v5254_v29, %v5252_v28  ;;  %v7172_v28 = vld [vmem:[%s9568_s3 + $0x30] sm:$0xff]  ;;  %v7178_v29 = vld [vmem:[%s9568_s3 + $0x8] sm:$0xff] }
 0x444   :  { %9911 = vst [vmem:[#allocation27_spill] sm:$0xff] %v7172_v28  ;;  %9912 = vst [vmem:[#allocation28_spill] sm:$0xff] %v7178_v29 }
 0x445   :  { %9896 = vst [vmem:[#allocation13_spill] sm:$0xff] %v6962_v30  ;;  %1264 = vst [vmem:[#allocation2 + $0x18] sm:$0xff] %v6962_v30  ;;  %1336 = vmatmul.mubr.f32.vlgmr.msra.gmra.mxu0 %v6962_v30  ;;  %1407 = vmatmul.mubr.f32.vlgmr.msra.gmra.mxu1 %v6962_v30  ;;  %v7184_v30 = vld [vmem:[%s9568_s3 + $0x18] sm:$0xff] }
 0x446   :  { %1451 = vmatpush1.msra.mxu0 %v6751_v48  ;;  %1522 = vmatpush1.msra.mxu1 %v6757_v54  ;;  %9913 = vst [vmem:[#allocation29_spill] sm:$0xff] %v7184_v30 }
 0x447   :  { %1452 = vmatprep.subr.mxu0 %v6763_v49  ;;  %1523 = vmatprep.subr.mxu1 %v6769_v50 }
 0x448   :  { %1453 = vmatpush1.msra.mxu0 %v6775_v51  ;;  %1524 = vmatpush1.msra.mxu1 %v6781_v11 }
 0x449   :  { %1454 = vmatprep.subr.mxu0 %v6787_v34  ;;  %1525 = vmatprep.subr.mxu1 %v6793_v32 }
 0x44a   :  { %1455 = vmatpush1.msra.mxu0 %v6799_v17  ;;  %1526 = vmatpush1.msra.mxu1 %v6805_v63 }
 0x44b   :  { %1456 = vmatprep.subr.mxu0 %v6811_v45  ;;  %1527 = vmatprep.subr.mxu1 %v6817_v6 }
 0x44c   :  { %1457 = vmatpush1.msra.mxu0 %v6823_v18  ;;  %1528 = vmatpush1.msra.mxu1 %v6829_v12 }
 0x44d   :  { %1458 = vmatprep.subr.mxu0 %v6835_v9  ;;  %1529 = vmatprep.subr.mxu1 %v6841_v8 }
 0x44e   :  { %1459 = vmatpush1.msra.mxu0 %v6847_v10  ;;  %1530 = vmatpush1.msra.mxu1 %v6853_v42 }
 0x44f   :  { %1460 = vmatprep.subr.mxu0 %v6859_v21  ;;  %1531 = vmatprep.subr.mxu1 %v6865_v33 }
 0x450   :  { %1461 = vmatpush1.msra.mxu0 %v6871_v41  ;;  %1532 = vmatpush1.msra.mxu1 %v6877_v26 }
 0x451   :  { %1462 = vmatprep.subr.mxu0 %v9897_v31  ;;  %1533 = vmatprep.subr.mxu1 %v9898_v35 }
 0x452   :  { %1463 = vmatpush1.msra.mxu0 %v6895_v46  ;;  %1534 = vmatpush1.msra.mxu1 %v6901_v47 }
 0x453   :  { %1464 = vmatprep.subr.mxu0 %v6907_v3  ;;  %1535 = vmatprep.subr.mxu1 %v6913_v44 }
 0x454   :  { %1465 = vmatpush1.msra.mxu0 %v6998_v36  ;;  %1536 = vmatpush1.msra.mxu1 %v7004_v38 }
 0x455   :  { %1466 = vmatprep.subr.mxu0 %v7010_v43  ;;  %1537 = vmatprep.subr.mxu1 %v7016_v52 }
 0x456   :  { %1467 = vmatpush1.msra.mxu0 %v7022_v53  ;;  %1538 = vmatpush1.msra.mxu1 %v7028_v55 }
 0x457   :  { %1468 = vmatprep.subr.mxu0 %v7034_v56  ;;  %1539 = vmatprep.subr.mxu1 %v7040_v57 }
 0x458   :  { %1469 = vmatpush1.msra.mxu0 %v7046_v58  ;;  %1540 = vmatpush1.msra.mxu1 %v7052_v59 }
 0x459   :  { %1470 = vmatprep.subr.mxu0 %v7058_v60  ;;  %1541 = vmatprep.subr.mxu1 %v7064_v61 }
 0x45a   :  { %1471 = vmatpush1.msra.mxu0 %v7070_v62  ;;  %1542 = vmatpush1.msra.mxu1 %v7076_v0 }
 0x45b   :  { %1472 = vmatprep.subr.mxu0 %v7082_v1  ;;  %1543 = vmatprep.subr.mxu1 %v7088_v2 }
 0x45c   :  { %1473 = vmatpush1.msra.mxu0 %v7094_v7  ;;  %1544 = vmatpush1.msra.mxu1 %v7100_v27 }
 0x45d   :  { %1474 = vmatprep.subr.mxu0 %v7106_v5  ;;  %1545 = vmatprep.subr.mxu1 %v7112_v4  ;;  %v9919_v4 = vld [vmem:[#allocation49_spill] sm:$0xff] }
 0x45e   :  { %1475 = vmatpush1.msra.mxu0 %v7118_v13  ;;  %1546 = vmatpush1.msra.mxu1 %v7124_v14  ;;  %v9918_v13 = vld [vmem:[#allocation51_spill] sm:$0xff] }
 0x45f   :  { %1476 = vmatprep.subr.mxu0 %v7130_v15  ;;  %1547 = vmatprep.subr.mxu1 %v7136_v16 }
 0x460   :  { %1477 = vmatpush1.msra.mxu0 %v7142_v19  ;;  %1548 = vmatpush1.msra.mxu1 %v7148_v20  ;;  %v9917_v20 = vld [vmem:[#allocation50_spill] sm:$0xff] }
 0x461   :  { %1478 = vmatprep.subr.mxu0 %v7154_v22  ;;  %1549 = vmatprep.subr.mxu1 %v7160_v23 }
 0x462   :  { %1479 = vmatpush1.msra.mxu0 %v7166_v24  ;;  %1550 = vmatpush1.msra.mxu1 %v7172_v28  ;;  %v7190_v24 = vld [vmem:[%s9568_s3] sm:$0xff] }
 0x463   :  { %1480 = vmatprep.subr.mxu0 %v7178_v29  ;;  %1551 = vmatprep.subr.mxu1 %v7184_v30  ;;  %9914 = vst [vmem:[#allocation30_spill] sm:$0xff] %v7190_v24  ;;  %v7197_v29 = vld [vmem:[%s9568_s3 + $0x10] sm:$0xff]  ;;  %v9916_v28 = vld [vmem:[#allocation48_spill] sm:$0xff] }
 0x464   :  { %1481 = vmatpush1.msra.mxu0 %v7190_v24  ;;  %1514 = vmatprep.mubr.f32.mxu0 %v9882_v37  ;;  %9915 = vst [vmem:[#allocation31_spill] sm:$0xff] %v7197_v29 }
 0x465   :  { %1552 = vmatpush1.msra.mxu1 %v7197_v29  ;;  %1585 = vmatprep.mubr.f32.mxu1 %v9882_v37 }
 0x466   :  { %1629 = vmatprep.subr.mxu0 %v6731_v39  ;;  %1700 = vmatprep.subr.mxu1 %v6737_v40 }
 0x505   :  { %v1337_v30 = vpop.f32.mrf.mxu0  ;;  %v1408_v16 = vpop.f32.mrf.mxu1 }
 0x506   :  { %v1413_v23 = vadd.f32 %v1337_v30, %v9916_v28  ;;  %v1415_v37 = vadd.f32 %v1408_v16, %v9919_v4  ;;  %v9926_v16 = vld [vmem:[#allocation20_spill] sm:$0xff] }
 0x507   :  { %v1339_v22 = vpop.f32.mrf.mxu0  ;;  %v1410_v14 = vpop.f32.mrf.mxu1 }
 0x508   :  { %v4622_v24 = vmul.f32 -1.442695, %v1413_v23  ;;  %v1414_v19 = vadd.f32 %v1339_v22, %v9917_v20  ;;  %v1416_v29 = vadd.f32 %v1410_v14, %v9918_v13  ;;  %v9925_v14 = vld [vmem:[#allocation19_spill] sm:$0xff] }
 0x50a   :  { %5255 = vpow2.f32 %v4622_v24  ;;  %v4623_v15 = vmul.f32 -1.442695, %v1414_v19  ;;  %v4624_v5 = vmul.f32 -1.442695, %v1416_v29  ;;  %v9927_v29 = vld [vmem:[#allocation21_spill] sm:$0xff] }
 0x50c   :  { %5257 = vpow2.f32 %v4623_v15 }
 0x50d   :  { %5259 = vtanh.f32 %v1415_v37 }
 0x50e   :  { %5261 = vpow2.f32 %v4624_v5  ;;  %v9924_v5 = vld [vmem:[#allocation37_spill] sm:$0xff] }
 0x517   :  { %v5256_v39 = vpop.eup %5255 }
 0x518   :  { %v1420_v27 = vadd.f32 1.0, %v5256_v39 }
 0x519   :  { %v5258_v40 = vpop.eup %5257 }
 0x51a   :  { %5263 = vrcp.f32 %v1420_v27  ;;  %v1426_v30 = vadd.f32 1.0, %v5258_v40  ;;  %v5260_v23 = vpop.eup %5259  ;;  %v9921_v40 = vld [vmem:[#allocation14_spill] sm:$0xff]  ;;  %v9923_v27 = vld [vmem:[#allocation39_spill] sm:$0xff] }
 0x51b   :  { %v5262_v20 = vpop.eup %5261 }
 0x51c   :  { %5265 = vrcp.f32 %v1426_v30  ;;  %v1433_v15 = vadd.f32 1.0, %v5262_v20  ;;  %v9928_v30 = vld [vmem:[#allocation22_spill] sm:$0xff]  ;;  %v9930_v20 = vld [vmem:[#allocation24_spill] sm:$0xff] }
 0x51e   :  { %5267 = vrcp.f32 %v1433_v15  ;;  %v9934_v15 = vld [vmem:[#allocation28_spill] sm:$0xff] }
 0x527   :  { %v5264_v22 = vpop.eup %5263 }
 0x528   :  { %v1437_v24 = vmul.f32 %v5264_v22, %v5260_v23  ;;  %v9929_v23 = vld [vmem:[#allocation23_spill] sm:$0xff]  ;;  %v9931_v22 = vld [vmem:[#allocation25_spill] sm:$0xff] }
 0x529   :  { %v5266_v19 = vpop.eup %5265 }
 0x52a   :  { %v1436_v28 = vmul.f32 %v5266_v19, %v6959_v25  ;;  %v9922_v25 = vld [vmem:[#allocation38_spill] sm:$0xff]  ;;  %v9933_v19 = vld [vmem:[#allocation27_spill] sm:$0xff] }
 0x52b   :  { %v5268_v39 = vpop.eup %5267 }
 0x52c   :  { %v7208_v13 = vadd.f32 %v1437_v24, %v1436_v28  ;;  %v9932_v24 = vld [vmem:[#allocation26_spill] sm:$0xff]  ;;  %v9935_v28 = vld [vmem:[#allocation29_spill] sm:$0xff] }
 0x52e   :  { %5269 = vtanh.f32 %v7208_v13 }
 0x53b   :  { %v5270_v37 = vpop.eup %5269 }
 0x53c   :  { %v7211_v4 = vmul.f32 %v5270_v37, %v5268_v39  ;;  %v9936_v39 = vld [vmem:[#allocation30_spill] sm:$0xff]  ;;  %v9937_v37 = vmov 0.0  }
 0x53e   :  { %9920 = vst [vmem:[#allocation32_spill] sm:$0xff] %v7211_v4  ;;  %1443 = vst [vmem:[#allocation2 + $0x20] sm:$0xff] %v7211_v4  ;;  %1515 = vmatmul.mubr.f32.vlgmr.msra.gmra.mxu0 %v7211_v4  ;;  %1586 = vmatmul.mubr.f32.vlgmr.msra.gmra.mxu1 %v7211_v4  ;;  %v9938_v4 = vld [vmem:[#allocation31_spill] sm:$0xff] }
 0x53f   :  { %1630 = vmatpush1.msra.mxu0 %v6751_v48  ;;  %1701 = vmatpush1.msra.mxu1 %v6757_v54 }
 0x540   :  { %1631 = vmatprep.subr.mxu0 %v6763_v49  ;;  %1702 = vmatprep.subr.mxu1 %v6769_v50 }
 0x541   :  { %1632 = vmatpush1.msra.mxu0 %v6775_v51  ;;  %1703 = vmatpush1.msra.mxu1 %v6781_v11 }
 0x542   :  { %1633 = vmatprep.subr.mxu0 %v6787_v34  ;;  %1704 = vmatprep.subr.mxu1 %v6793_v32 }
 0x543   :  { %1634 = vmatpush1.msra.mxu0 %v6799_v17  ;;  %1705 = vmatpush1.msra.mxu1 %v6805_v63 }
 0x544   :  { %1635 = vmatprep.subr.mxu0 %v6811_v45  ;;  %1706 = vmatprep.subr.mxu1 %v6817_v6 }
 0x545   :  { %1636 = vmatpush1.msra.mxu0 %v6823_v18  ;;  %1707 = vmatpush1.msra.mxu1 %v6829_v12 }
 0x546   :  { %1637 = vmatprep.subr.mxu0 %v6835_v9  ;;  %1708 = vmatprep.subr.mxu1 %v6841_v8 }
 0x547   :  { %1638 = vmatpush1.msra.mxu0 %v6847_v10  ;;  %1709 = vmatpush1.msra.mxu1 %v6853_v42 }
 0x548   :  { %1639 = vmatprep.subr.mxu0 %v6859_v21  ;;  %1710 = vmatprep.subr.mxu1 %v6865_v33 }
 0x549   :  { %1640 = vmatpush1.msra.mxu0 %v6871_v41  ;;  %1711 = vmatpush1.msra.mxu1 %v6877_v26 }
 0x54a   :  { %1641 = vmatprep.subr.mxu0 %v9897_v31  ;;  %1712 = vmatprep.subr.mxu1 %v9898_v35 }
 0x54b   :  { %1642 = vmatpush1.msra.mxu0 %v6895_v46  ;;  %1713 = vmatpush1.msra.mxu1 %v6901_v47 }
 0x54c   :  { %1643 = vmatprep.subr.mxu0 %v6907_v3  ;;  %1714 = vmatprep.subr.mxu1 %v6913_v44 }
 0x54d   :  { %1644 = vmatpush1.msra.mxu0 %v6998_v36  ;;  %1715 = vmatpush1.msra.mxu1 %v7004_v38 }
 0x54e   :  { %1645 = vmatprep.subr.mxu0 %v7010_v43  ;;  %1716 = vmatprep.subr.mxu1 %v7016_v52 }
 0x54f   :  { %1646 = vmatpush1.msra.mxu0 %v7022_v53  ;;  %1717 = vmatpush1.msra.mxu1 %v7028_v55 }
 0x550   :  { %1647 = vmatprep.subr.mxu0 %v7034_v56  ;;  %1718 = vmatprep.subr.mxu1 %v7040_v57 }
 0x551   :  { %1648 = vmatpush1.msra.mxu0 %v7046_v58  ;;  %1719 = vmatpush1.msra.mxu1 %v7052_v59 }
 0x552   :  { %1649 = vmatprep.subr.mxu0 %v7058_v60  ;;  %1720 = vmatprep.subr.mxu1 %v7064_v61 }
 0x553   :  { %1650 = vmatpush1.msra.mxu0 %v7070_v62  ;;  %1721 = vmatpush1.msra.mxu1 %v7076_v0 }
 0x554   :  { %1651 = vmatprep.subr.mxu0 %v7082_v1  ;;  %1722 = vmatprep.subr.mxu1 %v7088_v2 }
 0x555   :  { %1652 = vmatpush1.msra.mxu0 %v7094_v7  ;;  %1723 = vmatpush1.msra.mxu1 %v9921_v40 }
 0x556   :  { %1653 = vmatprep.subr.mxu0 %v9922_v25  ;;  %1724 = vmatprep.subr.mxu1 %v9923_v27  ;;  %v9944_v27 = vld [vmem:[#allocation53_spill] sm:$0xff] }
 0x557   :  { %1654 = vmatpush1.msra.mxu0 %v9924_v5  ;;  %1725 = vmatpush1.msra.mxu1 %v9925_v14  ;;  %v9943_v5 = vld [vmem:[#allocation55_spill] sm:$0xff] }
 0x558   :  { %1655 = vmatprep.subr.mxu0 %v9926_v16  ;;  %1726 = vmatprep.subr.mxu1 %v9927_v29 }
 0x559   :  { %1656 = vmatpush1.msra.mxu0 %v9928_v30  ;;  %1727 = vmatpush1.msra.mxu1 %v9929_v23  ;;  %v9939_v23 = vld [vmem:[#allocation15_spill] sm:$0xff] }
 0x55a   :  { %1657 = vmatprep.subr.mxu0 %v9930_v20  ;;  %1728 = vmatprep.subr.mxu1 %v9931_v22  ;;  %v9940_v20 = vld [vmem:[#allocation16_spill] sm:$0xff] }
 0x55b   :  { %1658 = vmatpush1.msra.mxu0 %v9932_v24  ;;  %1729 = vmatpush1.msra.mxu1 %v9933_v19  ;;  %v9941_v24 = vld [vmem:[#allocation52_spill] sm:$0xff] }
 0x55c   :  { %1659 = vmatprep.subr.mxu0 %v9934_v15  ;;  %1730 = vmatprep.subr.mxu1 %v9935_v28  ;;  %v9942_v15 = vld [vmem:[#allocation54_spill] sm:$0xff] }
 0x55d   :  { %1660 = vmatpush1.msra.mxu0 %v9936_v39  ;;  %1693 = vmatprep.mubr.f32.mxu0 %v9937_v37 }
 0x55e   :  { %1731 = vmatpush1.msra.mxu1 %v9938_v4  ;;  %1764 = vmatprep.mubr.f32.mxu1 %v9937_v37 }
 0x55f   :  { %1808 = vmatprep.subr.mxu0 %v9939_v23  ;;  %1879 = vmatprep.subr.mxu1 %v9940_v20 }
 0x5fe   :  { %v1516_v22 = vpop.f32.mrf.mxu0  ;;  %v1587_v28 = vpop.f32.mrf.mxu1 }
 0x5ff   :  { %v1592_v30 = vadd.f32 %v1516_v22, %v9941_v24  ;;  %v1594_v37 = vadd.f32 %v1587_v28, %v9944_v27 }
 0x600   :  { %v1518_v19 = vpop.f32.mrf.mxu0  ;;  %v1589_v14 = vpop.f32.mrf.mxu1 }
 0x601   :  { %v4625_v29 = vmul.f32 -1.442695, %v1592_v30  ;;  %v1593_v16 = vadd.f32 %v1518_v19, %v9942_v15  ;;  %v1595_v4 = vadd.f32 %v1589_v14, %v9943_v5 }
 0x603   :  { %5271 = vpow2.f32 %v4625_v29  ;;  %v4626_v39 = vmul.f32 -1.442695, %v1593_v16  ;;  %v4627_v25 = vmul.f32 -1.442695, %v1595_v4 }
 0x605   :  { %5273 = vpow2.f32 %v4626_v39 }
 0x606   :  { %5275 = vtanh.f32 %v1594_v37 }
 0x607   :  { %5277 = vpow2.f32 %v4627_v25 }
 0x610   :  { %v5272_v23 = vpop.eup %5271 }
 0x611   :  { %v1599_v40 = vadd.f32 1.0, %v5272_v23  ;;  %v2041_v23 = vld [vmem:[%s9570_s5 + $0x1e0] sm:$0xff] }
 0x612   :  { %v5274_v20 = vpop.eup %5273 }
 0x613   :  { %5279 = vrcp.f32 %v1599_v40  ;;  %v1605_v22 = vadd.f32 1.0, %v5274_v20  ;;  %v5276_v30 = vpop.eup %5275  ;;  %v2043_v20 = vld [vmem:[%s9570_s5 + $0x1f0] sm:$0xff] }
 0x614   :  { %v5278_v24 = vpop.eup %5277 }
 0x615   :  { %5281 = vrcp.f32 %v1605_v22  ;;  %v1612_v15 = vadd.f32 1.0, %v5278_v24  ;;  %v2038_v22 = vld [vmem:[%s9570_s5 + $0x1c8] sm:$0xff]  ;;  %v2037_v24 = vld [vmem:[%s9570_s5 + $0x1c0] sm:$0xff] }
 0x617   :  { %5283 = vrcp.f32 %v1612_v15  ;;  %v2033_v15 = vld [vmem:[%s9570_s5 + $0x1a0] sm:$0xff] }
 0x620   :  { %v5280_v29 = vpop.eup %5279 }
 0x621   :  { %v1616_v19 = vmul.f32 %v5280_v29, %v5276_v30  ;;  %v2040_v30 = vld [vmem:[%s9570_s5 + $0x1d8] sm:$0xff]  ;;  %v2039_v29 = vld [vmem:[%s9570_s5 + $0x1d0] sm:$0xff] }
 0x622   :  { %v5282_v16 = vpop.eup %5281 }
 0x623   :  { %v1615_v39 = vmul.f32 %v5282_v16, %v7208_v13  ;;  %v2036_v16 = vld [vmem:[%s9570_s5 + $0x1b8] sm:$0xff] }
 0x624   :  { %v5284_v4 = vpop.eup %5283 }
 0x625   :  { %v7287_v5 = vadd.f32 %v1616_v19, %v1615_v39  ;;  %v2034_v19 = vld [vmem:[%s9570_s5 + $0x1a8] sm:$0xff]  ;;  %v2035_v39 = vld [vmem:[%s9570_s5 + $0x1b0] sm:$0xff] }
 0x627   :  { %5285 = vtanh.f32 %v7287_v5 }
 0x634   :  { %v5286_v27 = vpop.eup %5285 }
 0x635   :  { %v7290_v14 = vmul.f32 %v5286_v27, %v5284_v4  ;;  %v2032_v4 = vld [vmem:[%s9570_s5 + $0x198] sm:$0xff]  ;;  %v2029_v27 = vld [vmem:[%s9570_s5 + $0x180] sm:$0xff] }
 0x637   :  { %1622 = vst [vmem:[#allocation2 + $0x28] sm:$0xff] %v7290_v14  ;;  %1694 = vmatmul.mubr.f32.vlgmr.msra.gmra.mxu0 %v7290_v14  ;;  %1765 = vmatmul.mubr.f32.vlgmr.msra.gmra.mxu1 %v7290_v14 }
 0x638   :  { %1809 = vmatpush1.msra.mxu0 %v6751_v48  ;;  %1880 = vmatpush1.msra.mxu1 %v6757_v54  ;;  %v9945_v48 = vld [vmem:[#allocation14_spill] sm:$0xff] }
 0x639   :  { %1810 = vmatprep.subr.mxu0 %v6763_v49  ;;  %1881 = vmatprep.subr.mxu1 %v6769_v50  ;;  %v9946_v54 = vld [vmem:[#allocation38_spill] sm:$0xff]  ;;  %v9947_v49 = vld [vmem:[#allocation39_spill] sm:$0xff]  ;;  %v9948_v50 = vld [vmem:[#allocation37_spill] sm:$0xff] }
 0x63a   :  { %1811 = vmatpush1.msra.mxu0 %v6775_v51  ;;  %1882 = vmatpush1.msra.mxu1 %v6781_v11  ;;  %v9949_v51 = vld [vmem:[#allocation19_spill] sm:$0xff]  ;;  %v9950_v11 = vld [vmem:[#allocation20_spill] sm:$0xff] }
 0x63b   :  { %1812 = vmatprep.subr.mxu0 %v6787_v34  ;;  %1883 = vmatprep.subr.mxu1 %v6793_v32  ;;  %v9951_v34 = vld [vmem:[#allocation21_spill] sm:$0xff]  ;;  %v9952_v32 = vld [vmem:[#allocation22_spill] sm:$0xff] }
 0x63c   :  { %1813 = vmatpush1.msra.mxu0 %v6799_v17  ;;  %1884 = vmatpush1.msra.mxu1 %v6805_v63  ;;  %v9953_v17 = vld [vmem:[#allocation23_spill] sm:$0xff]  ;;  %v9954_v63 = vld [vmem:[#allocation24_spill] sm:$0xff] }
 0x63d   :  { %1814 = vmatprep.subr.mxu0 %v6811_v45  ;;  %1885 = vmatprep.subr.mxu1 %v6817_v6  ;;  %v9955_v45 = vld [vmem:[#allocation25_spill] sm:$0xff]  ;;  %v9956_v6 = vld [vmem:[#allocation26_spill] sm:$0xff] }
 0x63e   :  { %1815 = vmatpush1.msra.mxu0 %v6823_v18  ;;  %1886 = vmatpush1.msra.mxu1 %v6829_v12  ;;  %v9957_v18 = vld [vmem:[#allocation27_spill] sm:$0xff]  ;;  %v9958_v12 = vld [vmem:[#allocation28_spill] sm:$0xff] }
 0x63f   :  { %1816 = vmatprep.subr.mxu0 %v6835_v9  ;;  %1887 = vmatprep.subr.mxu1 %v6841_v8  ;;  %v9959_v9 = vld [vmem:[#allocation29_spill] sm:$0xff]  ;;  %v9960_v8 = vld [vmem:[#allocation30_spill] sm:$0xff] }
 0x640   :  { %1817 = vmatpush1.msra.mxu0 %v6847_v10  ;;  %1888 = vmatpush1.msra.mxu1 %v6853_v42  ;;  %v9961_v10 = vld [vmem:[#allocation31_spill] sm:$0xff]  ;;  %v9962_v42 = vmov 0.0  }
 0x641   :  { %1818 = vmatprep.subr.mxu0 %v6859_v21  ;;  %1889 = vmatprep.subr.mxu1 %v6865_v33  ;;  %v2042_v21 = vld [vmem:[%s9570_s5 + $0x1e8] sm:$0xff]  ;;  %v2044_v33 = vld [vmem:[%s9570_s5 + $0x1f8] sm:$0xff] }
 0x642   :  { %1819 = vmatpush1.msra.mxu0 %v6871_v41  ;;  %1890 = vmatpush1.msra.mxu1 %v6877_v26  ;;  %v9963_v26 = vld [vmem:[#allocation56_spill] sm:$0xff] }
 0x643   :  { %1820 = vmatprep.subr.mxu0 %v9897_v31  ;;  %1891 = vmatprep.subr.mxu1 %v9898_v35 }
 0x644   :  { %1821 = vmatpush1.msra.mxu0 %v6895_v46  ;;  %1892 = vmatpush1.msra.mxu1 %v6901_v47  ;;  %v9964_v47 = vld [vmem:[#allocation58_spill] sm:$0xff] }
 0x645   :  { %1822 = vmatprep.subr.mxu0 %v6907_v3  ;;  %1893 = vmatprep.subr.mxu1 %v6913_v44 }
 0x646   :  { %1823 = vmatpush1.msra.mxu0 %v6998_v36  ;;  %1894 = vmatpush1.msra.mxu1 %v7004_v38 }
 0x647   :  { %1824 = vmatprep.subr.mxu0 %v7010_v43  ;;  %1895 = vmatprep.subr.mxu1 %v7016_v52  ;;  %v9965_v43 = vld [vmem:[#allocation59_spill] sm:$0xff] }
 0x648   :  { %1825 = vmatpush1.msra.mxu0 %v7022_v53  ;;  %1896 = vmatpush1.msra.mxu1 %v7028_v55  ;;  %v9966_v53 = vld [vmem:[#allocation57_spill] sm:$0xff] }
 0x649   :  { %1826 = vmatprep.subr.mxu0 %v7034_v56  ;;  %1897 = vmatprep.subr.mxu1 %v7040_v57 }
 0x64a   :  { %1827 = vmatpush1.msra.mxu0 %v7046_v58  ;;  %1898 = vmatpush1.msra.mxu1 %v7052_v59 }
 0x64b   :  { %1828 = vmatprep.subr.mxu0 %v7058_v60  ;;  %1899 = vmatprep.subr.mxu1 %v7064_v61 }
 0x64c   :  { %1829 = vmatpush1.msra.mxu0 %v7070_v62  ;;  %1900 = vmatpush1.msra.mxu1 %v7076_v0 }
 0x64d   :  { %1830 = vmatprep.subr.mxu0 %v7082_v1  ;;  %1901 = vmatprep.subr.mxu1 %v7088_v2 }
 0x64e   :  { %1831 = vmatpush1.msra.mxu0 %v7094_v7  ;;  %1902 = vmatpush1.msra.mxu1 %v9945_v48  ;;  %v2031_v48 = vld [vmem:[%s9570_s5 + $0x190] sm:$0xff] }
 0x64f   :  { %1832 = vmatprep.subr.mxu0 %v9946_v54  ;;  %1903 = vmatprep.subr.mxu1 %v9947_v49  ;;  %v2026_v54 = vld [vmem:[%s9570_s5 + $0x168] sm:$0xff]  ;;  %v2028_v49 = vld [vmem:[%s9570_s5 + $0x178] sm:$0xff] }
 0x650   :  { %1833 = vmatpush1.msra.mxu0 %v9948_v50  ;;  %1904 = vmatpush1.msra.mxu1 %v9949_v51  ;;  %v2025_v50 = vld [vmem:[%s9570_s5 + $0x160] sm:$0xff]  ;;  %v2027_v51 = vld [vmem:[%s9570_s5 + $0x170] sm:$0xff] }
 0x651   :  { %1834 = vmatprep.subr.mxu0 %v9950_v11  ;;  %1905 = vmatprep.subr.mxu1 %v9951_v34  ;;  %v2022_v11 = vld [vmem:[%s9570_s5 + $0x148] sm:$0xff]  ;;  %v2024_v34 = vld [vmem:[%s9570_s5 + $0x158] sm:$0xff] }
 0x652   :  { %1835 = vmatpush1.msra.mxu0 %v9952_v32  ;;  %1906 = vmatpush1.msra.mxu1 %v9953_v17  ;;  %v2021_v32 = vld [vmem:[%s9570_s5 + $0x140] sm:$0xff]  ;;  %v2023_v17 = vld [vmem:[%s9570_s5 + $0x150] sm:$0xff] }
 0x653   :  { %1836 = vmatprep.subr.mxu0 %v9954_v63  ;;  %1907 = vmatprep.subr.mxu1 %v9955_v45  ;;  %v2018_v63 = vld [vmem:[%s9570_s5 + $0x128] sm:$0xff]  ;;  %v2020_v45 = vld [vmem:[%s9570_s5 + $0x138] sm:$0xff] }
 0x654   :  { %1837 = vmatpush1.msra.mxu0 %v9956_v6  ;;  %1908 = vmatpush1.msra.mxu1 %v9957_v18  ;;  %v2017_v6 = vld [vmem:[%s9570_s5 + $0x120] sm:$0xff]  ;;  %v2019_v18 = vld [vmem:[%s9570_s5 + $0x130] sm:$0xff] }
 0x655   :  { %1838 = vmatprep.subr.mxu0 %v9958_v12  ;;  %1909 = vmatprep.subr.mxu1 %v9959_v9  ;;  %v2014_v12 = vld [vmem:[%s9570_s5 + $0x108] sm:$0xff]  ;;  %v2016_v9 = vld [vmem:[%s9570_s5 + $0x118] sm:$0xff] }
 0x656   :  { %1839 = vmatpush1.msra.mxu0 %v9960_v8  ;;  %1910 = vmatpush1.msra.mxu1 %v9961_v10  ;;  %v2013_v8 = vld [vmem:[%s9570_s5 + $0x100] sm:$0xff]  ;;  %v2015_v10 = vld [vmem:[%s9570_s5 + $0x110] sm:$0xff] }
 0x657   :  { %1872 = vmatprep.mubr.f32.mxu0 %v9962_v42  ;;  %1943 = vmatprep.mubr.f32.mxu1 %v9962_v42 }
 0x658   :  { %2141 = vmatprep.subr.mxu0 %v2042_v21  ;;  %2254 = vmatprep.subr.mxu1 %v2044_v33  ;;  %v2010_v21 = vld [vmem:[%s9570_s5 + $0xe8] sm:$0xff]  ;;  %v2012_v33 = vld [vmem:[%s9570_s5 + $0xf8] sm:$0xff] }
 0x6f7   :  { %v1695_v41 = vpop.f32.mrf.mxu0  ;;  %v1766_v35 = vpop.f32.mrf.mxu1 }
 0x6f8   :  { %v1771_v3 = vadd.f32 %v1695_v41, %v9963_v26  ;;  %v1773_v55 = vadd.f32 %v1766_v35, %v9966_v53  ;;  %v2009_v41 = vld [vmem:[%s9570_s5 + $0xe0] sm:$0xff]  ;;  %v2011_v26 = vld [vmem:[%s9570_s5 + $0xf0] sm:$0xff]  ;;  %v2004_v35 = vld [vmem:[%s9570_s5 + $0xb8] sm:$0xff] }
 0x6f9   :  { %v1697_v44 = vpop.f32.mrf.mxu0  ;;  %v1768_v38 = vpop.f32.mrf.mxu1  ;;  %v1997_v53 = vld [vmem:[%s9570_s5 + $0x80] sm:$0xff] }
 0x6fa   :  { %v4628_v46 = vmul.f32 -1.442695, %v1771_v3  ;;  %v1772_v31 = vadd.f32 %v1697_v44, %v9964_v47  ;;  %v1774_v52 = vadd.f32 %v1768_v38, %v9965_v43  ;;  %v2006_v3 = vld [vmem:[%s9570_s5 + $0xc8] sm:$0xff]  ;;  %v2008_v44 = vld [vmem:[%s9570_s5 + $0xd8] sm:$0xff]  ;;  %v2007_v47 = vld [vmem:[%s9570_s5 + $0xd0] sm:$0xff] }
 0x6fb   :  { %v2003_v38 = vld [vmem:[%s9570_s5 + $0xb0] sm:$0xff]  ;;  %v1998_v43 = vld [vmem:[%s9570_s5 + $0x88] sm:$0xff] }
 0x6fc   :  { %5287 = vpow2.f32 %v4628_v46  ;;  %v4629_v36 = vmul.f32 -1.442695, %v1772_v31  ;;  %v4630_v56 = vmul.f32 -1.442695, %v1774_v52  ;;  %v2005_v46 = vld [vmem:[%s9570_s5 + $0xc0] sm:$0xff]  ;;  %v2002_v31 = vld [vmem:[%s9570_s5 + $0xa8] sm:$0xff] }
 0x6fd   :  { %v2000_v52 = vld [vmem:[%s9570_s5 + $0x98] sm:$0xff] }
 0x6fe   :  { %5289 = vpow2.f32 %v4629_v36  ;;  %v2001_v36 = vld [vmem:[%s9570_s5 + $0xa0] sm:$0xff] }
 0x6ff   :  { %5291 = vtanh.f32 %v1773_v55  ;;  %v1999_v55 = vld [vmem:[%s9570_s5 + $0x90] sm:$0xff] }
 0x700   :  { %5293 = vpow2.f32 %v4630_v56  ;;  %v1994_v56 = vld [vmem:[%s9570_s5 + $0x68] sm:$0xff] }
 0x709   :  { %v5288_v57 = vpop.eup %5287 }
 0x70a   :  { %v1778_v58 = vadd.f32 1.0, %v5288_v57  ;;  %v1996_v57 = vld [vmem:[%s9570_s5 + $0x78] sm:$0xff] }
 0x70b   :  { %v5290_v59 = vpop.eup %5289 }
 0x70c   :  { %5295 = vrcp.f32 %v1778_v58  ;;  %v1784_v60 = vadd.f32 1.0, %v5290_v59  ;;  %v5292_v61 = vpop.eup %5291  ;;  %v1993_v58 = vld [vmem:[%s9570_s5 + $0x60] sm:$0xff]  ;;  %v1995_v59 = vld [vmem:[%s9570_s5 + $0x70] sm:$0xff] }
 0x70d   :  { %v5294_v62 = vpop.eup %5293 }
 0x70e   :  { %5297 = vrcp.f32 %v1784_v60  ;;  %v1791_v7 = vadd.f32 1.0, %v5294_v62  ;;  %v1990_v60 = vld [vmem:[%s9570_s5 + $0x48] sm:$0xff]  ;;  %v1989_v62 = vld [vmem:[%s9570_s5 + $0x40] sm:$0xff] }
 0x710   :  { %5299 = vrcp.f32 %v1791_v7  ;;  %v1985_v7 = vld [vmem:[%s9570_s5 + $0x20] sm:$0xff] }
 0x719   :  { %v5296_v0 = vpop.eup %5295 }
 0x71a   :  { %v1795_v1 = vmul.f32 %v5296_v0, %v5292_v61  ;;  %v1992_v61 = vld [vmem:[%s9570_s5 + $0x58] sm:$0xff]  ;;  %v1991_v0 = vld [vmem:[%s9570_s5 + $0x50] sm:$0xff] }
 0x71b   :  { %v5298_v2 = vpop.eup %5297 }
 0x71c   :  { %v1794_v13 = vmul.f32 %v5298_v2, %v7287_v5  ;;  %v2030_v5 = vld [vmem:[%s9570_s5 + $0x188] sm:$0xff]  ;;  %v1988_v2 = vld [vmem:[%s9570_s5 + $0x38] sm:$0xff] }
 0x71d   :  { %v5300_v25 = vpop.eup %5299 }
 0x71e   :  { %v7370_v40 = vadd.f32 %v1795_v1, %v1794_v13  ;;  %v1986_v1 = vld [vmem:[%s9570_s5 + $0x28] sm:$0xff]  ;;  %v1987_v13 = vld [vmem:[%s9570_s5 + $0x30] sm:$0xff] }
 0x720   :  { %5301 = vtanh.f32 %v7370_v40 }
 0x72d   :  { %v5302_v28 = vpop.eup %5301 }
 0x72e   :  { %v7373_v37 = vmul.f32 %v5302_v28, %v5300_v25  ;;  %v1982_v25 = vld [vmem:[%s9570_s5 + $0x8] sm:$0xff]  ;;  %v1984_v28 = vld [vmem:[%s9570_s5 + $0x18] sm:$0xff] }
 0x730   :  { %1801 = vst [vmem:[#allocation2 + $0x30] sm:$0xff] %v7373_v37  ;;  %1873 = vmatmul.mubr.f32.vlgmr.msra.gmra.mxu0 %v7373_v37  ;;  %1944 = vmatmul.mubr.f32.vlgmr.msra.gmra.mxu1 %v7373_v37 }
 0x731   :  { %2142 = vmatpush1.msra.mxu0 %v2041_v23  ;;  %2255 = vmatpush1.msra.mxu1 %v2043_v20  ;;  %v1981_v23 = vld [vmem:[%s9570_s5] sm:$0xff]  ;;  %v1983_v20 = vld [vmem:[%s9570_s5 + $0x10] sm:$0xff]  ;;  %s5655_s5 = smov [#allocation9]  }
 0x732   :  { %2143 = vmatprep.subr.mxu0 %v2038_v22  ;;  %2256 = vmatprep.subr.mxu1 %v2040_v30  ;;  %v2112_v22 = vld [vmem:[#allocation2] sm:$0xff]  ;;  %v2113_v30 = vld [vmem:[#allocation2 + $0x8] sm:$0xff] }
 0x733   :  { %2144 = vmatpush1.msra.mxu0 %v2037_v24  ;;  %2257 = vmatpush1.msra.mxu1 %v2039_v29  ;;  %v2114_v24 = vld [vmem:[#allocation2 + $0x10] sm:$0xff]  ;;  %v9967_v29 = vld [vmem:[#allocation13_spill] sm:$0xff] }
 0x734   :  { %2145 = vmatprep.subr.mxu0 %v2034_v19  ;;  %2258 = vmatprep.subr.mxu1 %v2036_v16  ;;  %v9968_v19 = vld [vmem:[#allocation32_spill] sm:$0xff]  ;;  %v7591_v16 = vld [vmem:[%s9571_s6 + $0x1e8] sm:$0xff] }
 0x735   :  { %2146 = vmatpush1.msra.mxu0 %v2033_v15  ;;  %2259 = vmatpush1.msra.mxu1 %v2035_v39  ;;  %9969 = vst [vmem:[#allocation33_spill] sm:$0xff] %v7591_v16  ;;  %v7608_v15 = vld [vmem:[%s9571_s6 + $0x1f0] sm:$0xff]  ;;  %v7615_v39 = vld [vmem:[%s9571_s6 + $0x1c8] sm:$0xff] }
 0x736   :  { %2147 = vmatprep.subr.mxu0 %v2030_v5  ;;  %2260 = vmatprep.subr.mxu1 %v2032_v4  ;;  %v7620_v5 = vld [vmem:[%s9571_s6 + $0x1d8] sm:$0xff]  ;;  %v7627_v4 = vld [vmem:[%s9571_s6 + $0x1c0] sm:$0xff] }
 0x737   :  { %2148 = vmatpush1.msra.mxu0 %v2029_v27  ;;  %2261 = vmatpush1.msra.mxu1 %v2031_v48  ;;  %v7632_v27 = vld [vmem:[%s9571_s6 + $0x1d0] sm:$0xff]  ;;  %v7639_v48 = vld [vmem:[%s9571_s6 + $0x1a8] sm:$0xff] }
 0x738   :  { %2149 = vmatprep.subr.mxu0 %v2026_v54  ;;  %2262 = vmatprep.subr.mxu1 %v2028_v49  ;;  %v7644_v54 = vld [vmem:[%s9571_s6 + $0x1b8] sm:$0xff]  ;;  %v7651_v49 = vld [vmem:[%s9571_s6 + $0x1a0] sm:$0xff] }
 0x739   :  { %2150 = vmatpush1.msra.mxu0 %v2025_v50  ;;  %2263 = vmatpush1.msra.mxu1 %v2027_v51  ;;  %v7656_v50 = vld [vmem:[%s9571_s6 + $0x1b0] sm:$0xff]  ;;  %v7663_v51 = vld [vmem:[%s9571_s6 + $0x188] sm:$0xff] }
 0x73a   :  { %2151 = vmatprep.subr.mxu0 %v2022_v11  ;;  %2264 = vmatprep.subr.mxu1 %v2024_v34  ;;  %v7668_v11 = vld [vmem:[%s9571_s6 + $0x198] sm:$0xff]  ;;  %v7675_v34 = vld [vmem:[%s9571_s6 + $0x180] sm:$0xff] }
 0x73b   :  { %2152 = vmatpush1.msra.mxu0 %v2021_v32  ;;  %2265 = vmatpush1.msra.mxu1 %v2023_v17  ;;  %v7680_v32 = vld [vmem:[%s9571_s6 + $0x190] sm:$0xff]  ;;  %v7687_v17 = vld [vmem:[%s9571_s6 + $0x168] sm:$0xff] }
 0x73c   :  { %2153 = vmatprep.subr.mxu0 %v2018_v63  ;;  %2266 = vmatprep.subr.mxu1 %v2020_v45  ;;  %v7692_v63 = vld [vmem:[%s9571_s6 + $0x178] sm:$0xff]  ;;  %v7699_v45 = vld [vmem:[%s9571_s6 + $0x160] sm:$0xff] }
 0x73d   :  { %2154 = vmatpush1.msra.mxu0 %v2017_v6  ;;  %2267 = vmatpush1.msra.mxu1 %v2019_v18  ;;  %v7704_v6 = vld [vmem:[%s9571_s6 + $0x170] sm:$0xff]  ;;  %v7711_v18 = vld [vmem:[%s9571_s6 + $0x148] sm:$0xff] }
 0x73e   :  { %2155 = vmatprep.subr.mxu0 %v2014_v12  ;;  %2268 = vmatprep.subr.mxu1 %v2016_v9  ;;  %v7716_v12 = vld [vmem:[%s9571_s6 + $0x158] sm:$0xff]  ;;  %v7723_v9 = vld [vmem:[%s9571_s6 + $0x140] sm:$0xff] }
 0x73f   :  { %2156 = vmatpush1.msra.mxu0 %v2013_v8  ;;  %2269 = vmatpush1.msra.mxu1 %v2015_v10  ;;  %v7728_v8 = vld [vmem:[%s9571_s6 + $0x150] sm:$0xff]  ;;  %v7735_v10 = vld [vmem:[%s9571_s6 + $0x128] sm:$0xff] }
 0x740   :  { %2157 = vmatprep.subr.mxu0 %v2010_v21  ;;  %2270 = vmatprep.subr.mxu1 %v2012_v33  ;;  %v7740_v21 = vld [vmem:[%s9571_s6 + $0x138] sm:$0xff]  ;;  %v7747_v33 = vld [vmem:[%s9571_s6 + $0x120] sm:$0xff] }
 0x741   :  { %2158 = vmatpush1.msra.mxu0 %v2009_v41  ;;  %2271 = vmatpush1.msra.mxu1 %v2011_v26  ;;  %v7752_v41 = vld [vmem:[%s9571_s6 + $0x130] sm:$0xff]  ;;  %v7759_v26 = vld [vmem:[%s9571_s6 + $0x108] sm:$0xff] }
 0x742   :  { %2159 = vmatprep.subr.mxu0 %v2006_v3  ;;  %2272 = vmatprep.subr.mxu1 %v2008_v44  ;;  %9971 = vst [vmem:[#allocation35_spill] sm:$0xff] %v7752_v41  ;;  %v7764_v3 = vld [vmem:[%s9571_s6 + $0x118] sm:$0xff]  ;;  %v7771_v44 = vld [vmem:[%s9571_s6 + $0x100] sm:$0xff] }
 0x743   :  { %2160 = vmatpush1.msra.mxu0 %v2005_v46  ;;  %2273 = vmatpush1.msra.mxu1 %v2007_v47  ;;  %9972 = vst [vmem:[#allocation40_spill] sm:$0xff] %v7764_v3  ;;  %v7776_v46 = vld [vmem:[%s9571_s6 + $0x110] sm:$0xff]  ;;  %v7783_v47 = vld [vmem:[%s9571_s6 + $0xe8] sm:$0xff] }
 0x744   :  { %2161 = vmatprep.subr.mxu0 %v2002_v31  ;;  %2274 = vmatprep.subr.mxu1 %v2004_v35  ;;  %9973 = vst [vmem:[#allocation42_spill] sm:$0xff] %v7776_v46  ;;  %v7788_v31 = vld [vmem:[%s9571_s6 + $0xf8] sm:$0xff]  ;;  %v7795_v35 = vld [vmem:[%s9571_s6 + $0xe0] sm:$0xff] }
 0x745   :  { %2162 = vmatpush1.msra.mxu0 %v2001_v36  ;;  %2275 = vmatpush1.msra.mxu1 %v2003_v38  ;;  %9974 = vst [vmem:[#allocation43_spill] sm:$0xff] %v7788_v31  ;;  %9975 = vst [vmem:[#allocation41_spill] sm:$0xff] %v7795_v35  ;;  %v7800_v36 = vld [vmem:[%s9571_s6 + $0xf0] sm:$0xff]  ;;  %v7807_v38 = vld [vmem:[%s9571_s6 + $0xc8] sm:$0xff] }
 0x746   :  { %2163 = vmatprep.subr.mxu0 %v1998_v43  ;;  %2276 = vmatprep.subr.mxu1 %v2000_v52  ;;  %9976 = vst [vmem:[#allocation44_spill] sm:$0xff] %v7800_v36  ;;  %9977 = vst [vmem:[#allocation46_spill] sm:$0xff] %v7807_v38  ;;  %v7812_v43 = vld [vmem:[%s9571_s6 + $0xd8] sm:$0xff]  ;;  %v7819_v52 = vld [vmem:[%s9571_s6 + $0xc0] sm:$0xff] }
 0x747   :  { %2164 = vmatpush1.msra.mxu0 %v1997_v53  ;;  %2277 = vmatpush1.msra.mxu1 %v1999_v55  ;;  %9978 = vst [vmem:[#allocation47_spill] sm:$0xff] %v7812_v43  ;;  %9979 = vst [vmem:[#allocation45_spill] sm:$0xff] %v7819_v52  ;;  %v7824_v53 = vld [vmem:[%s9571_s6 + $0xd0] sm:$0xff]  ;;  %v7831_v55 = vld [vmem:[%s9571_s6 + $0xa8] sm:$0xff] }
 0x748   :  { %2165 = vmatprep.subr.mxu0 %v1994_v56  ;;  %2278 = vmatprep.subr.mxu1 %v1996_v57  ;;  %9980 = vst [vmem:[#allocation17_spill] sm:$0xff] %v7824_v53  ;;  %9981 = vst [vmem:[#allocation18_spill] sm:$0xff] %v7831_v55  ;;  %v7836_v56 = vld [vmem:[%s9571_s6 + $0xb8] sm:$0xff]  ;;  %v7843_v57 = vld [vmem:[%s9571_s6 + $0xa0] sm:$0xff] }
 0x749   :  { %2166 = vmatpush1.msra.mxu0 %v1993_v58  ;;  %2279 = vmatpush1.msra.mxu1 %v1995_v59  ;;  %9982 = vst [vmem:[#allocation48_spill] sm:$0xff] %v7836_v56  ;;  %9983 = vst [vmem:[#allocation50_spill] sm:$0xff] %v7843_v57  ;;  %v7848_v58 = vld [vmem:[%s9571_s6 + $0xb0] sm:$0xff]  ;;  %v7855_v59 = vld [vmem:[%s9571_s6 + $0x88] sm:$0xff] }
 0x74a   :  { %2167 = vmatprep.subr.mxu0 %v1990_v60  ;;  %2280 = vmatprep.subr.mxu1 %v1992_v61  ;;  %9984 = vst [vmem:[#allocation51_spill] sm:$0xff] %v7848_v58  ;;  %9985 = vst [vmem:[#allocation49_spill] sm:$0xff] %v7855_v59  ;;  %v7860_v60 = vld [vmem:[%s9571_s6 + $0x98] sm:$0xff]  ;;  %v7867_v61 = vld [vmem:[%s9571_s6 + $0x80] sm:$0xff] }
 0x74b   :  { %2168 = vmatpush1.msra.mxu0 %v1989_v62  ;;  %2281 = vmatpush1.msra.mxu1 %v1991_v0  ;;  %9986 = vst [vmem:[#allocation15_spill] sm:$0xff] %v7860_v60  ;;  %9987 = vst [vmem:[#allocation16_spill] sm:$0xff] %v7867_v61  ;;  %v7872_v62 = vld [vmem:[%s9571_s6 + $0x90] sm:$0xff]  ;;  %v7879_v0 = vld [vmem:[%s9571_s6 + $0x68] sm:$0xff] }
 0x74c   :  { %2169 = vmatprep.subr.mxu0 %v1986_v1  ;;  %2282 = vmatprep.subr.mxu1 %v1988_v2  ;;  %9988 = vst [vmem:[#allocation52_spill] sm:$0xff] %v7872_v62  ;;  %9989 = vst [vmem:[#allocation54_spill] sm:$0xff] %v7879_v0  ;;  %v7884_v1 = vld [vmem:[%s9571_s6 + $0x78] sm:$0xff]  ;;  %v7891_v2 = vld [vmem:[%s9571_s6 + $0x60] sm:$0xff] }
 0x74d   :  { %2170 = vmatpush1.msra.mxu0 %v1985_v7  ;;  %2283 = vmatpush1.msra.mxu1 %v1987_v13  ;;  %9990 = vst [vmem:[#allocation55_spill] sm:$0xff] %v7884_v1  ;;  %9991 = vst [vmem:[#allocation53_spill] sm:$0xff] %v7891_v2  ;;  %v7896_v7 = vld [vmem:[%s9571_s6 + $0x70] sm:$0xff]  ;;  %v7903_v13 = vld [vmem:[%s9571_s6 + $0x48] sm:$0xff] }
 0x74e   :  { %2171 = vmatprep.subr.mxu0 %v1982_v25  ;;  %2284 = vmatprep.subr.mxu1 %v1984_v28  ;;  %9992 = vst [vmem:[#allocation14_spill] sm:$0xff] %v7896_v7  ;;  %9993 = vst [vmem:[#allocation38_spill] sm:$0xff] %v7903_v13  ;;  %v7908_v25 = vld [vmem:[%s9571_s6 + $0x58] sm:$0xff]  ;;  %v7915_v28 = vld [vmem:[%s9571_s6 + $0x40] sm:$0xff] }
 0x74f   :  { %2172 = vmatpush1.msra.mxu0 %v1981_v23  ;;  %2205 = vmatprep.mubr.f32.mxu0 %v9962_v42  ;;  %9994 = vst [vmem:[#allocation39_spill] sm:$0xff] %v7908_v25  ;;  %9995 = vst [vmem:[#allocation37_spill] sm:$0xff] %v7915_v28  ;;  %v7920_v23 = vld [vmem:[%s9571_s6 + $0x50] sm:$0xff] }
 0x750   :  { %2285 = vmatpush1.msra.mxu1 %v1983_v20  ;;  %2318 = vmatprep.mubr.f32.mxu1 %v9962_v42  ;;  %9996 = vst [vmem:[#allocation19_spill] sm:$0xff] %v7920_v23  ;;  %v7927_v20 = vld [vmem:[%s9571_s6 + $0x28] sm:$0xff] }
 0x751   :  { %2206 = vmatmul.mubr.f32.vlgmr.msra.gmra.mxu0 %v2112_v22  ;;  %2319 = vmatmul.mubr.f32.vlgmr.msra.gmra.mxu1 %v2112_v22  ;;  %9997 = vst [vmem:[#allocation20_spill] sm:$0xff] %v7927_v20  ;;  %v7932_v22 = vld [vmem:[%s9571_s6 + $0x38] sm:$0xff] }
 0x752   :  { %2211 = vmatprep.mubr.f32.mxu0 %v9962_v42  ;;  %2324 = vmatprep.mubr.f32.mxu1 %v9962_v42  ;;  %9998 = vst [vmem:[#allocation21_spill] sm:$0xff] %v7932_v22 }
 0x753   :  { %2405 = vmatprep.subr.mxu0 %v7591_v16 }
 0x755   :  { %2212 = vmatmul.mubr.f32.gmra.mxu0 %v2113_v30  ;;  %2325 = vmatmul.mubr.f32.gmra.mxu1 %v2113_v30  ;;  %v7939_v30 = vld [vmem:[%s9571_s6 + $0x20] sm:$0xff] }
 0x756   :  { %2217 = vmatprep.mubr.f32.mxu0 %v9962_v42  ;;  %2330 = vmatprep.mubr.f32.mxu1 %v9962_v42  ;;  %9999 = vst [vmem:[#allocation22_spill] sm:$0xff] %v7939_v30 }
 0x759   :  { %2218 = vmatmul.mubr.f32.gmra.mxu0 %v2114_v24  ;;  %2331 = vmatmul.mubr.f32.gmra.mxu1 %v2114_v24  ;;  %v7944_v24 = vld [vmem:[%s9571_s6 + $0x30] sm:$0xff] }
 0x75a   :  { %2223 = vmatprep.mubr.f32.mxu0 %v9962_v42  ;;  %2336 = vmatprep.mubr.f32.mxu1 %v9962_v42  ;;  %10000 = vst [vmem:[#allocation23_spill] sm:$0xff] %v7944_v24 }
 0x75d   :  { %2224 = vmatmul.mubr.f32.gmra.mxu0 %v9967_v29  ;;  %2337 = vmatmul.mubr.f32.gmra.mxu1 %v9967_v29  ;;  %v7951_v29 = vld [vmem:[%s9571_s6 + $0x8] sm:$0xff] }
 0x75e   :  { %2229 = vmatprep.mubr.f32.mxu0 %v9962_v42  ;;  %2342 = vmatprep.mubr.f32.mxu1 %v9962_v42  ;;  %10001 = vst [vmem:[#allocation24_spill] sm:$0xff] %v7951_v29 }
 0x761   :  { %2230 = vmatmul.mubr.f32.gmra.mxu0 %v9968_v19  ;;  %2343 = vmatmul.mubr.f32.gmra.mxu1 %v9968_v19  ;;  %v7956_v19 = vld [vmem:[%s9571_s6 + $0x18] sm:$0xff] }
 0x762   :  { %2235 = vmatprep.mubr.f32.mxu0 %v9962_v42  ;;  %2348 = vmatprep.mubr.f32.mxu1 %v9962_v42  ;;  %10002 = vst [vmem:[#allocation25_spill] sm:$0xff] %v7956_v19 }
 0x765   :  { %2236 = vmatmul.mubr.f32.gmra.mxu0 %v7290_v14  ;;  %2349 = vmatmul.mubr.f32.gmra.mxu1 %v7290_v14  ;;  %v7596_v14 = vld [vmem:[%s9571_s6 + $0x1f8] sm:$0xff] }
 0x766   :  { %2241 = vmatprep.mubr.f32.mxu0 %v9962_v42  ;;  %2354 = vmatprep.mubr.f32.mxu1 %v9962_v42  ;;  %9970 = vst [vmem:[#allocation34_spill] sm:$0xff] %v7596_v14 }
 0x767   :  { %2476 = vmatprep.subr.mxu1 %v7596_v14 }
 0x768   :  { %2477 = vmatpush1.msra.mxu1 %v7608_v15 }
 0x769   :  { %2242 = vmatmul.mubr.f32.gmra.mxu0 %v7373_v37  ;;  %2355 = vmatmul.mubr.f32.gmra.mxu1 %v7373_v37  ;;  %v7603_v37 = vld [vmem:[%s9571_s6 + $0x1e0] sm:$0xff] }
 0x76a   :  { %2247 = vmatprep.mubr.f32.mxu0 %v9962_v42  ;;  %2360 = vmatprep.mubr.f32.mxu1 %v9962_v42 }
 0x76b   :  { %2406 = vmatpush1.msra.mxu0 %v7603_v37  ;;  %2478 = vmatprep.subr.mxu1 %v7620_v5 }
 0x76c   :  { %2407 = vmatprep.subr.mxu0 %v7615_v39  ;;  %2479 = vmatpush1.msra.mxu1 %v7632_v27 }
 0x76d   :  { %2408 = vmatpush1.msra.mxu0 %v7627_v4  ;;  %2480 = vmatprep.subr.mxu1 %v7644_v54 }
 0x76e   :  { %2409 = vmatprep.subr.mxu0 %v7639_v48  ;;  %2481 = vmatpush1.msra.mxu1 %v7656_v50 }
 0x76f   :  { %2410 = vmatpush1.msra.mxu0 %v7651_v49  ;;  %2482 = vmatprep.subr.mxu1 %v7668_v11 }
 0x770   :  { %2411 = vmatprep.subr.mxu0 %v7663_v51  ;;  %2483 = vmatpush1.msra.mxu1 %v7680_v32 }
 0x771   :  { %2412 = vmatpush1.msra.mxu0 %v7675_v34  ;;  %2484 = vmatprep.subr.mxu1 %v7692_v63 }
 0x772   :  { %2413 = vmatprep.subr.mxu0 %v7687_v17  ;;  %2485 = vmatpush1.msra.mxu1 %v7704_v6 }
 0x773   :  { %2414 = vmatpush1.msra.mxu0 %v7699_v45  ;;  %2486 = vmatprep.subr.mxu1 %v7716_v12 }
 0x774   :  { %2415 = vmatprep.subr.mxu0 %v7711_v18  ;;  %2487 = vmatpush1.msra.mxu1 %v7728_v8 }
 0x775   :  { %2416 = vmatpush1.msra.mxu0 %v7723_v9  ;;  %2488 = vmatprep.subr.mxu1 %v7740_v21 }
 0x776   :  { %2417 = vmatprep.subr.mxu0 %v7735_v10  ;;  %2489 = vmatpush1.msra.mxu1 %v7752_v41 }
 0x777   :  { %2418 = vmatpush1.msra.mxu0 %v7747_v33  ;;  %2490 = vmatprep.subr.mxu1 %v7764_v3 }
 0x778   :  { %2419 = vmatprep.subr.mxu0 %v7759_v26  ;;  %2491 = vmatpush1.msra.mxu1 %v7776_v46 }
 0x779   :  { %2420 = vmatpush1.msra.mxu0 %v7771_v44  ;;  %2492 = vmatprep.subr.mxu1 %v7788_v31  ;;  %v10008_v31 = vld [vmem:[#allocation61_spill] sm:$0xff] }
 0x77a   :  { %2421 = vmatprep.subr.mxu0 %v7783_v47  ;;  %2493 = vmatpush1.msra.mxu1 %v7800_v36 }
 0x77b   :  { %2422 = vmatpush1.msra.mxu0 %v7795_v35  ;;  %2494 = vmatprep.subr.mxu1 %v7812_v43  ;;  %v10007_v43 = vld [vmem:[#allocation63_spill] sm:$0xff] }
 0x77c   :  { %2423 = vmatprep.subr.mxu0 %v7807_v38  ;;  %2495 = vmatpush1.msra.mxu1 %v7824_v53 }
 0x77d   :  { %2424 = vmatpush1.msra.mxu0 %v7819_v52  ;;  %2496 = vmatprep.subr.mxu1 %v7836_v56 }
 0x77e   :  { %2425 = vmatprep.subr.mxu0 %v7831_v55  ;;  %2497 = vmatpush1.msra.mxu1 %v7848_v58 }
 0x77f   :  { %2426 = vmatpush1.msra.mxu0 %v7843_v57  ;;  %2498 = vmatprep.subr.mxu1 %v7860_v60  ;;  %v10006_v60 = vld [vmem:[#allocation62_spill] sm:$0xff] }
 0x780   :  { %2427 = vmatprep.subr.mxu0 %v7855_v59  ;;  %2499 = vmatpush1.msra.mxu1 %v7872_v62 }
 0x781   :  { %2428 = vmatpush1.msra.mxu0 %v7867_v61  ;;  %2500 = vmatprep.subr.mxu1 %v7884_v1 }
 0x782   :  { %2429 = vmatprep.subr.mxu0 %v7879_v0  ;;  %2501 = vmatpush1.msra.mxu1 %v7896_v7 }
 0x783   :  { %2430 = vmatpush1.msra.mxu0 %v7891_v2  ;;  %2502 = vmatprep.subr.mxu1 %v7908_v25  ;;  %v10005_v25 = vld [vmem:[#allocation60_spill] sm:$0xff] }
 0x784   :  { %2431 = vmatprep.subr.mxu0 %v7903_v13  ;;  %2503 = vmatpush1.msra.mxu1 %v7920_v23 }
 0x785   :  { %2432 = vmatpush1.msra.mxu0 %v7915_v28  ;;  %2504 = vmatprep.subr.mxu1 %v7932_v22  ;;  %v7961_v22 = vld [vmem:[%s9571_s6] sm:$0xff] }
 0x786   :  { %2433 = vmatprep.subr.mxu0 %v7927_v20  ;;  %2505 = vmatpush1.msra.mxu1 %v7944_v24  ;;  %10003 = vst [vmem:[#allocation26_spill] sm:$0xff] %v7961_v22  ;;  %v7968_v24 = vld [vmem:[%s9571_s6 + $0x10] sm:$0xff] }
 0x787   :  { %2434 = vmatpush1.msra.mxu0 %v7939_v30  ;;  %2506 = vmatprep.subr.mxu1 %v7956_v19  ;;  %10004 = vst [vmem:[#allocation27_spill] sm:$0xff] %v7968_v24 }
 0x788   :  { %2435 = vmatprep.subr.mxu0 %v7951_v29  ;;  %2507 = vmatpush1.msra.mxu1 %v7968_v24 }
 0x789   :  { %2436 = vmatpush1.msra.mxu0 %v7961_v22  ;;  %2672 = vmatprep.subr.mxu1 %v7591_v16 }
 0x78a   :  { %4907 = vmatprep.subr.mxu0 %v9962_v42 }
 0x7f0   :  { %v1874_v23 = vpop.f32.mrf.mxu0  ;;  %v1945_v58 = vpop.f32.mrf.mxu1 }
 0x7f1   :  { %v1950_v7 = vadd.f32 %v1874_v23, %v10005_v25  ;;  %v1952_v24 = vadd.f32 %v1945_v58, %v10008_v31  ;;  %v2588_v58 = vld [vmem:[%s9573_s8 + $0x50] sm:$0xff] }
 0x7f2   :  { %v1876_v1 = vpop.f32.mrf.mxu0  ;;  %v1947_v53 = vpop.f32.mrf.mxu1 }
 0x7f3   :  { %v4631_v62 = vmul.f32 -1.442695, %v1950_v7  ;;  %v1951_v19 = vadd.f32 %v1876_v1, %v10006_v60  ;;  %v1953_v36 = vadd.f32 %v1947_v53, %v10007_v43  ;;  %v2589_v53 = vld [vmem:[%s9573_s8 + $0x58] sm:$0xff] }
 0x7f5   :  { %5303 = vpow2.f32 %v4631_v62  ;;  %v4632_v56 = vmul.f32 -1.442695, %v1951_v19  ;;  %v4633_v46 = vmul.f32 -1.442695, %v1953_v36 }
 0x7f7   :  { %5305 = vpow2.f32 %v4632_v56 }
 0x7f8   :  { %5307 = vtanh.f32 %v1952_v24  ;;  %v2587_v24 = vld [vmem:[%s9573_s8 + $0x48] sm:$0xff] }
 0x7f9   :  { %5309 = vpow2.f32 %v4633_v46  ;;  %v2590_v46 = vld [vmem:[%s9573_s8 + $0x60] sm:$0xff] }
 0x802   :  { %v5304_v3 = vpop.eup %5303 }
 0x803   :  { %v1957_v41 = vadd.f32 1.0, %v5304_v3 }
 0x804   :  { %v5306_v16 = vpop.eup %5305 }
 0x805   :  { %5311 = vrcp.f32 %v1957_v41  ;;  %v1963_v25 = vadd.f32 1.0, %v5306_v16  ;;  %v5308_v7 = vpop.eup %5307  ;;  %v2592_v16 = vld [vmem:[%s9573_s8 + $0x70] sm:$0xff]  ;;  %v2591_v41 = vld [vmem:[%s9573_s8 + $0x68] sm:$0xff] }
 0x806   :  { %v5310_v60 = vpop.eup %5309 }
 0x807   :  { %5313 = vrcp.f32 %v1963_v25  ;;  %v1970_v56 = vadd.f32 1.0, %v5310_v60  ;;  %v2586_v25 = vld [vmem:[%s9573_s8 + $0x40] sm:$0xff]  ;;  %v2584_v60 = vld [vmem:[%s9573_s8 + $0x30] sm:$0xff] }
 0x809   :  { %5315 = vrcp.f32 %v1970_v56  ;;  %v2580_v56 = vld [vmem:[%s9573_s8 + $0x10] sm:$0xff] }
 0x812   :  { %v5312_v62 = vpop.eup %5311 }
 0x813   :  { %v1974_v1 = vmul.f32 %v5312_v62, %v5308_v7  ;;  %v2585_v7 = vld [vmem:[%s9573_s8 + $0x38] sm:$0xff]  ;;  %v2583_v62 = vld [vmem:[%s9573_s8 + $0x28] sm:$0xff] }
 0x814   :  { %v5314_v23 = vpop.eup %5313 }
 0x815   :  { %v1973_v19 = vmul.f32 %v5314_v23, %v7370_v40  ;;  %v2593_v40 = vld [vmem:[%s9573_s8 + $0x78] sm:$0xff] }
 0x816   :  { %v5316_v31 = vpop.eup %5315  ;;  %v2581_v23 = vld [vmem:[%s9573_s8 + $0x18] sm:$0xff] }
 0x817   :  { %v1975_v43 = vadd.f32 %v1974_v1, %v1973_v19  ;;  %v2582_v1 = vld [vmem:[%s9573_s8 + $0x20] sm:$0xff]  ;;  %v2579_v19 = vld [vmem:[%s9573_s8 + $0x8] sm:$0xff] }
 0x819   :  { %5317 = vtanh.f32 %v1975_v43  ;;  %v2578_v43 = vld [vmem:[%s9573_s8] sm:$0xff] }
 0x826   :  { %v5318_v36 = vpop.eup %5317 }
 0x827   :  { %v1977_v3 = vmul.f32 %v5318_v36, %v5316_v31  ;;  %v2207_v31 = vpop.f32.mrf.mxu0  ;;  %v2320_v36 = vpop.f32.mrf.mxu1 }
 0x829   :  { %1980 = vst [vmem:[#allocation2 + $0x38] sm:$0xff] %v1977_v3  ;;  %2248 = vmatmul.mubr.f32.gmra.mxu0 %v1977_v3  ;;  %2361 = vmatmul.mubr.f32.gmra.mxu1 %v1977_v3  ;;  %v2209_v3 = vpop.f32.mrf.mxu0 }
 0x82a   :  { %2469 = vmatprep.mubr.f32.mxu0 %v9962_v42  ;;  %2540 = vmatprep.mubr.f32.mxu1 %v9962_v42 }
 0x82d   :  { %2470 = vmatmul.mubr.f32.vlgmr.msra.gmra.mxu0 %v9962_v42  ;;  %2541 = vmatmul.mubr.f32.vlgmr.msra.gmra.mxu1 %v9962_v42 }
 0x82e   :  { %2673 = vmatpush1.msra.mxu1 %v7603_v37  ;;  %2736 = vmatprep.mubr.f32.mxu1 %v9962_v42 }
 0x82f   :  { %2674 = vmatprep.subr.mxu1 %v7615_v39  ;;  %4908 = vmatpush3.msra.mxu0 %v2593_v40  ;;  %v2322_v40 = vpop.f32.mrf.mxu1 }
 0x830   :  { %2675 = vmatpush1.msra.mxu1 %v7627_v4  ;;  %4909 = vmatprep.subr.mxu0 %v9962_v42 }
 0x831   :  { %2676 = vmatprep.subr.mxu1 %v7639_v48  ;;  %4910 = vmatpush3.msra.mxu0 %v2592_v16  ;;  %v8082_v16 = vpop.f32.mrf.mxu0 }
 0x832   :  { %2677 = vmatpush1.msra.mxu1 %v7651_v49  ;;  %4911 = vmatprep.subr.mxu0 %v9962_v42  ;;  %10009 = vst [vmem:[#allocation28_spill] sm:$0xff] %v8082_v16 }
 0x833   :  { %2678 = vmatprep.subr.mxu1 %v7663_v51  ;;  %4912 = vmatpush3.msra.mxu0 %v2591_v41  ;;  %v8084_v41 = vpop.f32.mrf.mxu1 }
 0x834   :  { %2679 = vmatpush1.msra.mxu1 %v7675_v34  ;;  %4913 = vmatprep.subr.mxu0 %v9962_v42  ;;  %10010 = vst [vmem:[#allocation29_spill] sm:$0xff] %v8084_v41 }
 0x835   :  { %2680 = vmatprep.subr.mxu1 %v7687_v17  ;;  %4914 = vmatpush3.msra.mxu0 %v2590_v46  ;;  %v8086_v46 = vpop.f32.mrf.mxu0 }
 0x836   :  { %2681 = vmatpush1.msra.mxu1 %v7699_v45  ;;  %4915 = vmatprep.subr.mxu0 %v9962_v42  ;;  %10011 = vst [vmem:[#allocation30_spill] sm:$0xff] %v8086_v46 }
 0x837   :  { %2682 = vmatprep.subr.mxu1 %v7711_v18  ;;  %4916 = vmatpush3.msra.mxu0 %v2589_v53  ;;  %v8088_v53 = vpop.f32.mrf.mxu1 }
 0x838   :  { %2683 = vmatpush1.msra.mxu1 %v7723_v9  ;;  %4917 = vmatprep.subr.mxu0 %v9962_v42  ;;  %10012 = vst [vmem:[#allocation31_spill] sm:$0xff] %v8088_v53 }
 0x839   :  { %2684 = vmatprep.subr.mxu1 %v7735_v10  ;;  %4918 = vmatpush3.msra.mxu0 %v2588_v58  ;;  %v8090_v58 = vpop.f32.mrf.mxu0 }
 0x83a   :  { %2685 = vmatpush1.msra.mxu1 %v7747_v33  ;;  %4919 = vmatprep.subr.mxu0 %v9962_v42  ;;  %10013 = vst [vmem:[#allocation56_spill] sm:$0xff] %v8090_v58 }
 0x83b   :  { %2686 = vmatprep.subr.mxu1 %v7759_v26  ;;  %4920 = vmatpush3.msra.mxu0 %v2587_v24  ;;  %v8092_v24 = vpop.f32.mrf.mxu1 }
 0x83c   :  { %2687 = vmatpush1.msra.mxu1 %v7771_v44  ;;  %4921 = vmatprep.subr.mxu0 %v9962_v42  ;;  %10014 = vst [vmem:[#allocation58_spill] sm:$0xff] %v8092_v24 }
 0x83d   :  { %2688 = vmatprep.subr.mxu1 %v7783_v47  ;;  %4922 = vmatpush3.msra.mxu0 %v2586_v25  ;;  %v8094_v25 = vpop.f32.mrf.mxu0 }
 0x83e   :  { %2689 = vmatpush1.msra.mxu1 %v7795_v35  ;;  %4923 = vmatprep.subr.mxu0 %v9962_v42  ;;  %10015 = vst [vmem:[#allocation59_spill] sm:$0xff] %v8094_v25 }
 0x83f   :  { %2690 = vmatprep.subr.mxu1 %v7807_v38  ;;  %4939 = vmatprep.mubr.msk.f32.mxu0 %vm5654_vm0, %v9962_v42 }
 0x840   :  { %2691 = vmatpush1.msra.mxu1 %v7819_v52  ;;  %4924 = vmatpush3.msra.mxu0 %v2585_v7  ;;  %v8096_v7 = vpop.f32.mrf.mxu1 }
 0x841   :  { %2692 = vmatprep.subr.mxu1 %v7831_v55  ;;  %4925 = vmatprep.subr.mxu0 %v9962_v42  ;;  %10016 = vst [vmem:[#allocation57_spill] sm:$0xff] %v8096_v7 }
 0x842   :  { %2693 = vmatpush1.msra.mxu1 %v7843_v57  ;;  %4926 = vmatpush3.msra.mxu0 %v2584_v60  ;;  %v8098_v60 = vpop.f32.mrf.mxu0 }
 0x843   :  { %2694 = vmatprep.subr.mxu1 %v7855_v59  ;;  %4927 = vmatprep.subr.mxu0 %v9962_v42  ;;  %10017 = vst [vmem:[#allocation13_spill] sm:$0xff] %v8098_v60 }
 0x844   :  { %2695 = vmatpush1.msra.mxu1 %v7867_v61  ;;  %4928 = vmatpush3.msra.mxu0 %v2583_v62  ;;  %v8100_v62 = vpop.f32.mrf.mxu1 }
 0x845   :  { %2696 = vmatprep.subr.mxu1 %v7879_v0  ;;  %4929 = vmatprep.subr.mxu0 %v9962_v42  ;;  %10018 = vst [vmem:[#allocation32_spill] sm:$0xff] %v8100_v62 }
 0x846   :  { %2697 = vmatpush1.msra.mxu1 %v7891_v2  ;;  %4930 = vmatpush3.msra.mxu0 %v2582_v1  ;;  %v8102_v1 = vpop.f32.mrf.mxu0 }
 0x847   :  { %2698 = vmatprep.subr.mxu1 %v7903_v13  ;;  %4931 = vmatprep.subr.mxu0 %v9962_v42  ;;  %10019 = vst [vmem:[#allocation60_spill] sm:$0xff] %v8102_v1 }
 0x848   :  { %2699 = vmatpush1.msra.mxu1 %v7915_v28  ;;  %4932 = vmatpush3.msra.mxu0 %v2581_v23  ;;  %v8104_v23 = vpop.f32.mrf.mxu1 }
 0x849   :  { %2700 = vmatprep.subr.mxu1 %v7927_v20  ;;  %4933 = vmatprep.subr.mxu0 %v9962_v42  ;;  %10020 = vst [vmem:[#allocation62_spill] sm:$0xff] %v8104_v23 }
 0x84a   :  { %2701 = vmatpush1.msra.mxu1 %v7939_v30  ;;  %4934 = vmatpush3.msra.mxu0 %v2580_v56  ;;  %v8106_v56 = vpop.f32.mrf.mxu0 }
 0x84b   :  { %2702 = vmatprep.subr.mxu1 %v7951_v29  ;;  %4935 = vmatprep.subr.mxu0 %v9962_v42  ;;  %10021 = vst [vmem:[#allocation63_spill] sm:$0xff] %v8106_v56 }
 0x84c   :  { %2703 = vmatpush1.msra.mxu1 %v7961_v22  ;;  %4936 = vmatpush3.msra.mxu0 %v2579_v19  ;;  %v8108_v19 = vpop.f32.mrf.mxu1 }
 0x84d   :  { %4942 = vmatprep.subr.mxu1 %v9962_v42  ;;  %4937 = vmatprep.subr.mxu0 %v9962_v42  ;;  %10022 = vst [vmem:[#allocation61_spill] sm:$0xff] %v8108_v19  ;;  %v2109_v19 = vld [vmem:[%s9572_s7] sm:$0xf] }
 0x84e   :  { %4938 = vmatpush3.msra.mxu0 %v2578_v43  ;;  %v8110_v43 = vpop.f32.mrf.mxu0  ;;  %v8112_v58 = vpop.f32.mrf.mxu1 }
 0x84f   :  { %2743 = vmatprep.subr.mxu0 %v7596_v14  ;;  %10023 = vst [vmem:[#allocation64_spill] sm:$0xff] %v8110_v43  ;;  %10024 = vst [vmem:[#allocation65_spill] sm:$0xff] %v8112_v58  ;;  %v10032_v43 = vld [vmem:[#allocation36_spill] sm:$0xff] }
 0x850   :  { %v8114_v24 = vpop.f32.mrf.mxu0  ;;  %v8116_v25 = vpop.f32.mrf.mxu1  ;;  %v10033_v58 = vsub.s32 0, %v10032_v43 }
 0x851   :  { %10025 = vst [vmem:[#allocation66_spill] sm:$0xff] %v8114_v24  ;;  %10026 = vst [vmem:[#allocation67_spill] sm:$0xff] %v8116_v25 }
 0x852   :  { %v8118_v7 = vpop.f32.mrf.mxu0  ;;  %v8120_v60 = vpop.f32.mrf.mxu1  ;;  %v8133_v23 = vrot.slane %v2109_v19, %v10033_v58 }
 0x853   :  { %10027 = vst [vmem:[#allocation68_spill] sm:$0xff] %v8118_v7  ;;  %10028 = vst [vmem:[#allocation69_spill] sm:$0xff] %v8120_v60  ;;  %v10036_v60 = vsub.s32 1, %v10032_v43 }
 0x854   :  { %v8122_v62 = vpop.f32.mrf.mxu0  ;;  %v8124_v1 = vpop.f32.mrf.mxu1  ;;  %v2208_v53 = vadd.f32 %v2207_v31, %v8133_v23 }
 0x855   :  { %10029 = vst [vmem:[#allocation70_spill] sm:$0xff] %v8122_v62  ;;  %10030 = vst [vmem:[#allocation71_spill] sm:$0xff] %v8124_v1  ;;  %v8141_v7 = vrot.slane %v2109_v19, %v10036_v60  ;;  %v10041_v60 = vsub.s32 3, %v10032_v43 }
 0x856   :  { %v8129_v56 = vpop.f32.mrf.mxu0  ;;  %v8135_v24 = vpop.f32.mrf.mxu1 }
 0x857   :  { %10031 = vst [vmem:[#allocation72_spill] sm:$0xff] %v8129_v56  ;;  %10034 = vst [vmem:[#allocation36_spill] sm:$0xff] %v8135_v24  ;;  %v2210_v56 = vadd.f32 %v2209_v3, %v8141_v7  ;;  %v8153_v29 = vrot.slane %v2109_v19, %v10041_v60 }
 0x858   :  { %10037 = vst [vmem:[#allocation74_spill] sm:$0xff] %v8141_v7 }
 0x859   :  { %10042 = vst [vmem:[#allocation78_spill] sm:$0xff] %v8153_v29  ;;  %v2323_v31 = vadd.f32 %v2322_v40, %v8153_v29 }
 0x8e9   :  { %v8137_v25 = vpop.f32.mrf.mxu0  ;;  %v8143_v62 = vpop.f32.mrf.mxu1 }
 0x8ea   :  { %10035 = vst [vmem:[#allocation73_spill] sm:$0xff] %v8137_v25  ;;  %10038 = vst [vmem:[#allocation75_spill] sm:$0xff] %v8143_v62 }
 0x8eb   :  { %v8145_v1 = vpop.f32.mrf.mxu0  ;;  %v8149_v16 = vpop.f32.mrf.mxu1 }
 0x8ec   :  { %10039 = vst [vmem:[#allocation76_spill] sm:$0xff] %v8145_v1  ;;  %10040 = vst [vmem:[#allocation77_spill] sm:$0xff] %v8149_v16  ;;  %v10043_v1 = vsub.s32 2, %v10032_v43 }
 0x8ed   :  { %v2471_v41 = vpop.f32.mrf.mxu0  ;;  %v2542_v25 = vpop.f32.mrf.mxu1 }
 0x8ee   :  { %v2547_v58 = vadd.f32 %v2471_v41, %v2208_v53  ;;  %v8158_v3 = vrot.slane %v2109_v19, %v10043_v1 }
 0x8ef   :  { %v2473_v46 = vpop.f32.mrf.mxu0  ;;  %v2544_v62 = vpop.f32.mrf.mxu1 }
 0x8f0   :  { %v4634_v24 = vmul.f32 -1.442695, %v2547_v58  ;;  %v2548_v14 = vadd.f32 %v2473_v46, %v2210_v56  ;;  %v2550_v16 = vadd.f32 %v2544_v62, %v2323_v31  ;;  %v2321_v41 = vadd.f32 %v2320_v36, %v8158_v3  ;;  %v10045_v31 = vld [vmem:[#allocation40_spill] sm:$0xff] }
 0x8f2   :  { %5319 = vpow2.f32 %v4634_v24  ;;  %v4635_v22 = vmul.f32 -1.442695, %v2548_v14  ;;  %v4636_v53 = vmul.f32 -1.442695, %v2550_v16  ;;  %v2549_v24 = vadd.f32 %v2542_v25, %v2321_v41  ;;  %v10046_v41 = vld [vmem:[#allocation42_spill] sm:$0xff] }
 0x8f4   :  { %5321 = vpow2.f32 %v4635_v22 }
 0x8f5   :  { %5323 = vpow2.f32 %v4636_v53  ;;  %v10047_v53 = vld [vmem:[#allocation43_spill] sm:$0xff] }
 0x8ff   :  { %v5320_v46 = vpop.eup %5319 }
 0x900   :  { %v2554_v56 = vadd.f32 1.0, %v5320_v46  ;;  %v10048_v46 = vld [vmem:[#allocation44_spill] sm:$0xff] }
 0x901   :  { %v5322_v14 = vpop.eup %5321 }
 0x902   :  { %5325 = vrcp.f32 %v2554_v56  ;;  %v2560_v58 = vadd.f32 1.0, %v5322_v14  ;;  %v5324_v22 = vpop.eup %5323  ;;  %v10050_v56 = vld [vmem:[#allocation17_spill] sm:$0xff]  ;;  %v10051_v14 = vld [vmem:[#allocation48_spill] sm:$0xff] }
 0x903   :  { %5327 = vtanh.f32 %v2549_v24  ;;  %v2567_v43 = vadd.f32 1.0, %v5324_v22  ;;  %v10049_v24 = vld [vmem:[#allocation47_spill] sm:$0xff] }
 0x904   :  { %5329 = vrcp.f32 %v2560_v58  ;;  %v10052_v58 = vld [vmem:[#allocation51_spill] sm:$0xff] }
 0x905   :  { %5331 = vrcp.f32 %v2567_v43  ;;  %v10053_v22 = vld [vmem:[#allocation15_spill] sm:$0xff]  ;;  %v10056_v43 = vld [vmem:[#allocation14_spill] sm:$0xff] }
 0x90f   :  { %v5326_v60 = vpop.eup %5325 }
 0x910   :  { %v5328_v40 = vpop.eup %5327 }
 0x911   :  { %v5330_v29 = vpop.eup %5329  ;;  %v2571_v19 = vmul.f32 %v5328_v40, %v5326_v60  ;;  %v10054_v60 = vld [vmem:[#allocation52_spill] sm:$0xff]  ;;  %v10055_v40 = vld [vmem:[#allocation55_spill] sm:$0xff] }
 0x912   :  { %v2570_v1 = vmul.f32 0.0, %v5330_v29  ;;  %v5332_v36 = vpop.eup %5331  ;;  %v10044_v29 = vld [vmem:[#allocation35_spill] sm:$0xff] }
 0x914   :  { %v8161_v62 = vadd.f32 %v2571_v19, %v2570_v1  ;;  %v10057_v1 = vld [vmem:[#allocation39_spill] sm:$0xff] }
 0x915   :  { %v10058_v19 = vld [vmem:[#allocation19_spill] sm:$0xff] }
 0x916   :  { %5333 = vtanh.f32 %v8161_v62 }
 0x923   :  { %v5334_v16 = vpop.eup %5333 }
 0x924   :  { %v2574_v25 = vmul.f32 %v5334_v16, %v5332_v36  ;;  %v10059_v36 = vld [vmem:[#allocation21_spill] sm:$0xff]  ;;  %v10060_v16 = vld [vmem:[#allocation23_spill] sm:$0xff] }
 0x926   :  { %4940 = vmatmul.mubr.f32.vlgmr.msra.gmra.mxu0 %v2574_v25  ;;  %2737 = vmatmul.mubr.f32.vlgmr.msra.gmra.mxu1 %v2574_v25 }
 0x927   :  { %2744 = vmatpush1.msra.mxu0 %v7608_v15  ;;  %2807 = vmatprep.mubr.f32.mxu0 %v9962_v42 }
 0x928   :  { %2745 = vmatprep.subr.mxu0 %v7620_v5  ;;  %4974 = vmatprep.mubr.msk.f32.mxu1 %vm5654_vm0, %v9962_v42 }
 0x929   :  { %2746 = vmatpush1.msra.mxu0 %v7632_v27 }
 0x92a   :  { %2747 = vmatprep.subr.mxu0 %v7644_v54 }
 0x92b   :  { %2748 = vmatpush1.msra.mxu0 %v7656_v50 }
 0x92c   :  { %2749 = vmatprep.subr.mxu0 %v7668_v11 }
 0x92d   :  { %2750 = vmatpush1.msra.mxu0 %v7680_v32 }
 0x92e   :  { %2751 = vmatprep.subr.mxu0 %v7692_v63 }
 0x92f   :  { %2752 = vmatpush1.msra.mxu0 %v7704_v6 }
 0x930   :  { %2753 = vmatprep.subr.mxu0 %v7716_v12 }
 0x931   :  { %2754 = vmatpush1.msra.mxu0 %v7728_v8 }
 0x932   :  { %2755 = vmatprep.subr.mxu0 %v7740_v21 }
 0x933   :  { %2756 = vmatpush1.msra.mxu0 %v10044_v29 }
 0x934   :  { %2757 = vmatprep.subr.mxu0 %v10045_v31 }
 0x935   :  { %2758 = vmatpush1.msra.mxu0 %v10046_v41 }
 0x936   :  { %2759 = vmatprep.subr.mxu0 %v10047_v53 }
 0x937   :  { %2760 = vmatpush1.msra.mxu0 %v10048_v46 }
 0x938   :  { %2761 = vmatprep.subr.mxu0 %v10049_v24 }
 0x939   :  { %2762 = vmatpush1.msra.mxu0 %v10050_v56  ;;  %v10061_v56 = vld [vmem:[#allocation25_spill] sm:$0xff] }
 0x93a   :  { %2763 = vmatprep.subr.mxu0 %v10051_v14  ;;  %v10062_v14 = vld [vmem:[#allocation27_spill] sm:$0xff] }
 0x93b   :  { %2764 = vmatpush1.msra.mxu0 %v10052_v58 }
 0x93c   :  { %2765 = vmatprep.subr.mxu0 %v10053_v22  ;;  %v10063_v22 = vld [vmem:[#allocation33_spill] sm:$0xff] }
 0x93d   :  { %2766 = vmatpush1.msra.mxu0 %v10054_v60 }
 0x93e   :  { %2767 = vmatprep.subr.mxu0 %v10055_v40 }
 0x93f   :  { %2768 = vmatpush1.msra.mxu0 %v10056_v43 }
 0x940   :  { %2769 = vmatprep.subr.mxu0 %v10057_v1 }
 0x941   :  { %2770 = vmatpush1.msra.mxu0 %v10058_v19 }
 0x942   :  { %2771 = vmatprep.subr.mxu0 %v10059_v36 }
 0x943   :  { %2772 = vmatpush1.msra.mxu0 %v10060_v16 }
 0x944   :  { %2773 = vmatprep.subr.mxu0 %v10061_v56 }
 0x945   :  { %2774 = vmatpush1.msra.mxu0 %v10062_v14 }
 0x946   :  { %2808 = vmatmul.mubr.f32.vlgmr.msra.gmra.mxu0 %v2574_v25  ;;  %2940 = vmatprep.subr.mxu0 %v10063_v22  ;;  %v4653_v25 = vld [vmem:[%s9573_s8 + $0xe8] sm:$0xff]  ;;  %v4652_v22 = vld [vmem:[%s9573_s8 + $0xe0] sm:$0xff] }
 0x947   :  { %2941 = vmatpush1.msra.mxu0 %v7603_v37  ;;  %3004 = vmatprep.mubr.f32.mxu0 %v9962_v42  ;;  %v10064_v37 = vld [vmem:[#allocation24_spill] sm:$0xff] }
 0x948   :  { %2942 = vmatprep.subr.mxu0 %v7615_v39  ;;  %v10065_v39 = vld [vmem:[#allocation26_spill] sm:$0xff] }
 0x949   :  { %2943 = vmatpush1.msra.mxu0 %v7627_v4  ;;  %v4655_v4 = vld [vmem:[%s9573_s8 + $0xf8] sm:$0xff] }
 0x94a   :  { %2944 = vmatprep.subr.mxu0 %v7639_v48  ;;  %4943 = vmatpush3.msra.mxu1 %v4655_v4  ;;  %v4654_v48 = vld [vmem:[%s9573_s8 + $0xf0] sm:$0xff]  ;;  %v4651_v4 = vld [vmem:[%s9573_s8 + $0xd8] sm:$0xff] }
 0x94b   :  { %2945 = vmatpush1.msra.mxu0 %v7651_v49  ;;  %4944 = vmatprep.subr.mxu1 %v9962_v42 }
 0x94c   :  { %2946 = vmatprep.subr.mxu0 %v7663_v51  ;;  %4945 = vmatpush3.msra.mxu1 %v4654_v48  ;;  %v4650_v48 = vld [vmem:[%s9573_s8 + $0xd0] sm:$0xff] }
 0x94d   :  { %2947 = vmatpush1.msra.mxu0 %v7675_v34  ;;  %4946 = vmatprep.subr.mxu1 %v9962_v42 }
 0x94e   :  { %2948 = vmatprep.subr.mxu0 %v7687_v17  ;;  %4947 = vmatpush3.msra.mxu1 %v4653_v25  ;;  %v4649_v25 = vld [vmem:[%s9573_s8 + $0xc8] sm:$0xff] }
 0x94f   :  { %2949 = vmatpush1.msra.mxu0 %v7699_v45  ;;  %4948 = vmatprep.subr.mxu1 %v9962_v42 }
 0x950   :  { %2950 = vmatprep.subr.mxu0 %v7711_v18  ;;  %4949 = vmatpush3.msra.mxu1 %v4652_v22  ;;  %v4648_v22 = vld [vmem:[%s9573_s8 + $0xc0] sm:$0xff] }
 0x951   :  { %2951 = vmatpush1.msra.mxu0 %v7723_v9  ;;  %4950 = vmatprep.subr.mxu1 %v9962_v42 }
 0x952   :  { %2952 = vmatprep.subr.mxu0 %v7735_v10  ;;  %4951 = vmatpush3.msra.mxu1 %v4651_v4  ;;  %v4647_v4 = vld [vmem:[%s9573_s8 + $0xb8] sm:$0xff] }
 0x953   :  { %2953 = vmatpush1.msra.mxu0 %v7747_v33  ;;  %4952 = vmatprep.subr.mxu1 %v9962_v42 }
 0x954   :  { %2954 = vmatprep.subr.mxu0 %v7759_v26  ;;  %4953 = vmatpush3.msra.mxu1 %v4650_v48  ;;  %v4646_v48 = vld [vmem:[%s9573_s8 + $0xb0] sm:$0xff] }
 0x955   :  { %2955 = vmatpush1.msra.mxu0 %v7771_v44  ;;  %4954 = vmatprep.subr.mxu1 %v9962_v42 }
 0x956   :  { %2956 = vmatprep.subr.mxu0 %v7783_v47  ;;  %4955 = vmatpush3.msra.mxu1 %v4649_v25  ;;  %v4645_v25 = vld [vmem:[%s9573_s8 + $0xa8] sm:$0xff] }
 0x957   :  { %2957 = vmatpush1.msra.mxu0 %v7795_v35  ;;  %4956 = vmatprep.subr.mxu1 %v9962_v42  ;;  %v10072_v35 = vld [vmem:[#allocation31_spill] sm:$0xff] }
 0x958   :  { %2958 = vmatprep.subr.mxu0 %v7807_v38  ;;  %4957 = vmatpush3.msra.mxu1 %v4648_v22  ;;  %v4644_v22 = vld [vmem:[%s9573_s8 + $0xa0] sm:$0xff]  ;;  %v10071_v38 = vld [vmem:[#allocation78_spill] sm:$0xff] }
 0x959   :  { %2959 = vmatpush1.msra.mxu0 %v7819_v52  ;;  %4958 = vmatprep.subr.mxu1 %v9962_v42 }
 0x95a   :  { %2960 = vmatprep.subr.mxu0 %v7831_v55  ;;  %4959 = vmatpush3.msra.mxu1 %v4647_v4  ;;  %v4643_v4 = vld [vmem:[%s9573_s8 + $0x98] sm:$0xff] }
 0x95b   :  { %2961 = vmatpush1.msra.mxu0 %v7843_v57  ;;  %4960 = vmatprep.subr.mxu1 %v9962_v42 }
 0x95c   :  { %2962 = vmatprep.subr.mxu0 %v7855_v59  ;;  %4961 = vmatpush3.msra.mxu1 %v4646_v48  ;;  %v4642_v48 = vld [vmem:[%s9573_s8 + $0x90] sm:$0xff] }
 0x95d   :  { %2963 = vmatpush1.msra.mxu0 %v7867_v61  ;;  %4962 = vmatprep.subr.mxu1 %v9962_v42 }
 0x95e   :  { %2964 = vmatprep.subr.mxu0 %v7879_v0  ;;  %4963 = vmatpush3.msra.mxu1 %v4645_v25  ;;  %v4641_v25 = vld [vmem:[%s9573_s8 + $0x88] sm:$0xff] }
 0x95f   :  { %2965 = vmatpush1.msra.mxu0 %v7891_v2  ;;  %4964 = vmatprep.subr.mxu1 %v9962_v42 }
 0x960   :  { %2966 = vmatprep.subr.mxu0 %v7903_v13  ;;  %4965 = vmatpush3.msra.mxu1 %v4644_v22  ;;  %v4640_v22 = vld [vmem:[%s9573_s8 + $0x80] sm:$0xff] }
 0x961   :  { %2967 = vmatpush1.msra.mxu0 %v7915_v28  ;;  %4966 = vmatprep.subr.mxu1 %v9962_v42  ;;  %v10068_v28 = vld [vmem:[#allocation30_spill] sm:$0xff]  ;;  %v10069_v13 = vld [vmem:[#allocation28_spill] sm:$0xff] }
 0x962   :  { %2968 = vmatprep.subr.mxu0 %v7927_v20  ;;  %4967 = vmatpush3.msra.mxu1 %v4643_v4  ;;  %v2214_v2 = vadd.f32 %v10069_v13, %v8133_v23 }
 0x963   :  { %2969 = vmatpush1.msra.mxu0 %v7939_v30  ;;  %4968 = vmatprep.subr.mxu1 %v9962_v42 }
 0x964   :  { %2970 = vmatprep.subr.mxu0 %v10064_v37  ;;  %4969 = vmatpush3.msra.mxu1 %v4642_v48  ;;  %v2216_v48 = vadd.f32 %v10068_v28, %v8141_v7  ;;  %v2329_v28 = vadd.f32 %v10072_v35, %v10071_v38 }
 0x965   :  { %2971 = vmatpush1.msra.mxu0 %v10065_v39  ;;  %4970 = vmatprep.subr.mxu1 %v9962_v42  ;;  %v10066_v39 = vld [vmem:[#allocation34_spill] sm:$0xff] }
 0x966   :  { %4977 = vmatprep.subr.mxu0 %v9962_v42  ;;  %4971 = vmatpush3.msra.mxu1 %v4641_v25 }
 0x967   :  { %4972 = vmatprep.subr.mxu1 %v9962_v42 }
 0x968   :  { %4973 = vmatpush3.msra.mxu1 %v4640_v22 }
 0x969   :  { %3011 = vmatprep.subr.mxu1 %v10066_v39 }
 0x9e6   :  { %v8296_v4 = vpop.f32.mrf.mxu0  ;;  %v2738_v37 = vpop.f32.mrf.mxu1 }
 0x9e7   :  { %10067 = vst [vmem:[#allocation35_spill] sm:$0xff] %v8296_v4  ;;  %v2814_v61 = vadd.f32 %v2738_v37, %v2214_v2  ;;  %v10070_v4 = vld [vmem:[#allocation29_spill] sm:$0xff] }
 0x9e8   :  { %v4941_v30 = vpop.f32.mrf.mxu0  ;;  %v2740_v20 = vpop.f32.mrf.mxu1 }
 0x9e9   :  { %v2815_v0 = vadd.f32 %v2740_v20, %v2216_v48  ;;  %v4637_v25 = vmul.f32 -1.442695, %v2814_v61  ;;  %v2327_v30 = vadd.f32 %v10070_v4, %v8158_v3 }
 0x9eb   :  { %v4638_v59 = vmul.f32 -1.442695, %v2815_v0 }
 0x9ed   :  { %5335 = vpow2.f32 %v4638_v59 }
 0x9ee   :  { %5337 = vpow2.f32 %v4637_v25 }
 0x9fa   :  { %v5336_v22 = vpop.eup %5335 }
 0x9fb   :  { %v5338_v57 = vpop.eup %5337  ;;  %v2827_v39 = vadd.f32 1.0, %v5336_v22 }
 0x9fc   :  { %v2821_v55 = vadd.f32 1.0, %v5338_v57 }
 0x9fd   :  { %5339 = vrcp.f32 %v2827_v39 }
 0x9fe   :  { %5341 = vrcp.f32 %v2821_v55 }
 0xa06   :  { %v2809_v52 = vpop.f32.mrf.mxu0 }
 0xa07   :  { %v2816_v7 = vadd.f32 %v2809_v52, %v2327_v30  ;;  %v10092_v30 = vld [vmem:[#allocation74_spill] sm:$0xff] }
 0xa08   :  { %v2811_v13 = vpop.f32.mrf.mxu0 }
 0xa09   :  { %5343 = vtanh.f32 %v2816_v7  ;;  %v2817_v0 = vadd.f32 %v2811_v13, %v2329_v28  ;;  %v4673_v7 = vld [vmem:[%s9573_s8 + $0x170] sm:$0xff] }
 0xa0a   :  { %v5340_v59 = vpop.eup %5339  ;;  %v10093_v28 = vld [vmem:[#allocation59_spill] sm:$0xff] }
 0xa0b   :  { %v4639_v61 = vmul.f32 -1.442695, %v2817_v0  ;;  %v5342_v2 = vpop.eup %5341  ;;  %v2837_v57 = vmul.f32 %v5340_v59, %v8161_v62  ;;  %v4672_v62 = vld [vmem:[%s9573_s8 + $0x168] sm:$0xff]  ;;  %v2222_v13 = vadd.f32 %v10093_v28, %v10092_v30  ;;  %v10094_v0 = vld [vmem:[#allocation56_spill] sm:$0xff]  ;;  %v8616_v28 = vld [vmem:[%s9571_s6 + $0xb0] sm:$0xff] }
 0xa0d   :  { %5345 = vpow2.f32 %v4639_v61  ;;  %v2220_v61 = vadd.f32 %v10094_v0, %v8133_v23  ;;  %v8628_v0 = vld [vmem:[%s9571_s6 + $0x90] sm:$0xff] }
 0xa16   :  { %v5344_v20 = vpop.eup %5343 }
 0xa17   :  { %v2838_v37 = vmul.f32 %v5344_v20, %v5342_v2 }
 0xa19   :  { %v8307_v48 = vadd.f32 %v2838_v37, %v2837_v57 }
 0xa1a   :  { %v5346_v4 = vpop.eup %5345 }
 0xa1b   :  { %v2834_v25 = vadd.f32 1.0, %v5346_v4  ;;  %5347 = vtanh.f32 %v8307_v48 }
 0xa1d   :  { %5349 = vrcp.f32 %v2834_v25 }
 0xa28   :  { %v5348_v35 = vpop.eup %5347 }
 0xa2a   :  { %v5350_v52 = vpop.eup %5349 }
 0xa2b   :  { %v2841_v55 = vmul.f32 %v5350_v52, %v5348_v35  ;;  %v10095_v52 = vld [vmem:[#allocation58_spill] sm:$0xff] }
 0xa2d   :  { %4975 = vmatmul.mubr.f32.vlgmr.msra.gmra.mxu1 %v2841_v55  ;;  %3005 = vmatmul.mubr.f32.vlgmr.msra.gmra.mxu0 %v2841_v55 }
 0xa2e   :  { %3012 = vmatpush1.msra.mxu1 %v7608_v15  ;;  %3075 = vmatprep.mubr.f32.mxu1 %v9962_v42  ;;  %v10073_v15 = vld [vmem:[#allocation17_spill] sm:$0xff] }
 0xa2f   :  { %3013 = vmatprep.subr.mxu1 %v7620_v5  ;;  %5009 = vmatprep.mubr.msk.f32.mxu0 %vm5654_vm0, %v9962_v42  ;;  %v10074_v5 = vld [vmem:[#allocation48_spill] sm:$0xff] }
 0xa30   :  { %3014 = vmatpush1.msra.mxu1 %v7632_v27  ;;  %v10075_v27 = vld [vmem:[#allocation15_spill] sm:$0xff] }
 0xa31   :  { %3015 = vmatprep.subr.mxu1 %v7644_v54  ;;  %v8347_v54 = vld [vmem:[%s9571_s6 + $0x1e8] sm:$0xff] }
 0xa32   :  { %3016 = vmatpush1.msra.mxu1 %v7656_v50  ;;  %v8353_v50 = vld [vmem:[%s9571_s6 + $0x1e0] sm:$0xff] }
 0xa33   :  { %3017 = vmatprep.subr.mxu1 %v7668_v11  ;;  %v8360_v11 = vld [vmem:[%s9571_s6 + $0x1c8] sm:$0xff] }
 0xa34   :  { %3018 = vmatpush1.msra.mxu1 %v7680_v32  ;;  %v8366_v32 = vld [vmem:[%s9571_s6 + $0x1c0] sm:$0xff] }
 0xa35   :  { %3019 = vmatprep.subr.mxu1 %v7692_v63  ;;  %v8372_v63 = vld [vmem:[%s9571_s6 + $0x1a8] sm:$0xff] }
 0xa36   :  { %3020 = vmatpush1.msra.mxu1 %v7704_v6  ;;  %v10081_v6 = vld [vmem:[#allocation49_spill] sm:$0xff] }
 0xa37   :  { %3021 = vmatprep.subr.mxu1 %v7716_v12  ;;  %v10083_v12 = vld [vmem:[#allocation54_spill] sm:$0xff] }
 0xa38   :  { %3022 = vmatpush1.msra.mxu1 %v7728_v8  ;;  %v10085_v8 = vld [vmem:[#allocation38_spill] sm:$0xff] }
 0xa39   :  { %3023 = vmatprep.subr.mxu1 %v7740_v21  ;;  %v10087_v21 = vld [vmem:[#allocation20_spill] sm:$0xff] }
 0xa3a   :  { %3024 = vmatpush1.msra.mxu1 %v10044_v29  ;;  %v4671_v29 = vld [vmem:[%s9573_s8 + $0x160] sm:$0xff] }
 0xa3b   :  { %3025 = vmatprep.subr.mxu1 %v10045_v31  ;;  %v4670_v31 = vld [vmem:[%s9573_s8 + $0x158] sm:$0xff] }
 0xa3c   :  { %3026 = vmatpush1.msra.mxu1 %v10046_v41  ;;  %v4669_v41 = vld [vmem:[%s9573_s8 + $0x150] sm:$0xff] }
 0xa3d   :  { %3027 = vmatprep.subr.mxu1 %v10047_v53  ;;  %v4668_v53 = vld [vmem:[%s9573_s8 + $0x148] sm:$0xff] }
 0xa3e   :  { %3028 = vmatpush1.msra.mxu1 %v10048_v46  ;;  %v4667_v46 = vld [vmem:[%s9573_s8 + $0x140] sm:$0xff] }
 0xa3f   :  { %3029 = vmatprep.subr.mxu1 %v10049_v24  ;;  %v4666_v24 = vld [vmem:[%s9573_s8 + $0x138] sm:$0xff] }
 0xa40   :  { %3030 = vmatpush1.msra.mxu1 %v10073_v15 }
 0xa41   :  { %3031 = vmatprep.subr.mxu1 %v10074_v5  ;;  %v10096_v5 = vld [vmem:[#allocation57_spill] sm:$0xff] }
 0xa42   :  { %3032 = vmatpush1.msra.mxu1 %v10052_v58  ;;  %v4663_v58 = vld [vmem:[%s9573_s8 + $0x120] sm:$0xff] }
 0xa43   :  { %3033 = vmatprep.subr.mxu1 %v10075_v27  ;;  %v2335_v27 = vadd.f32 %v10096_v5, %v10071_v38  ;;  %v8713_v5 = vld [vmem:[%s9571_s6 + $0x160] sm:$0xff] }
 0xa44   :  { %3034 = vmatpush1.msra.mxu1 %v10054_v60  ;;  %v4662_v60 = vld [vmem:[%s9573_s8 + $0x118] sm:$0xff]  ;;  %10097 = vst [vmem:[#allocation42_spill] sm:$0xff] %v8713_v5 }
 0xa45   :  { %3035 = vmatprep.subr.mxu1 %v10055_v40  ;;  %v4661_v40 = vld [vmem:[%s9573_s8 + $0x110] sm:$0xff] }
 0xa46   :  { %3036 = vmatpush1.msra.mxu1 %v10056_v43  ;;  %v4660_v43 = vld [vmem:[%s9573_s8 + $0x108] sm:$0xff] }
 0xa47   :  { %3037 = vmatprep.subr.mxu1 %v10057_v1  ;;  %v4659_v1 = vld [vmem:[%s9573_s8 + $0x100] sm:$0xff] }
 0xa48   :  { %3038 = vmatpush1.msra.mxu1 %v10058_v19  ;;  %v8469_v19 = vld [vmem:[%s9571_s6 + $0x1f8] sm:$0xff] }
 0xa49   :  { %3039 = vmatprep.subr.mxu1 %v10059_v36  ;;  %10091 = vst [vmem:[#allocation40_spill] sm:$0xff] %v8469_v19 }
 0xa4a   :  { %3040 = vmatpush1.msra.mxu1 %v10060_v16 }
 0xa4b   :  { %3041 = vmatprep.subr.mxu1 %v10061_v56  ;;  %v4665_v56 = vld [vmem:[%s9573_s8 + $0x130] sm:$0xff] }
 0xa4c   :  { %3042 = vmatpush1.msra.mxu1 %v10062_v14  ;;  %v4664_v14 = vld [vmem:[%s9573_s8 + $0x128] sm:$0xff] }
 0xa4d   :  { %3076 = vmatmul.mubr.f32.vlgmr.msra.gmra.mxu1 %v2841_v55  ;;  %3208 = vmatprep.subr.mxu1 %v8347_v54  ;;  %v2333_v55 = vadd.f32 %v10095_v52, %v8158_v3  ;;  %v8695_v52 = vld [vmem:[%s9571_s6 + $0x188] sm:$0xff] }
 0xa4e   :  { %3209 = vmatpush1.msra.mxu1 %v8353_v50  ;;  %3272 = vmatprep.mubr.f32.mxu1 %v9962_v42 }
 0xa4f   :  { %3210 = vmatprep.subr.mxu1 %v8360_v11 }
 0xa50   :  { %3211 = vmatpush1.msra.mxu1 %v8366_v32 }
 0xa51   :  { %3212 = vmatprep.subr.mxu1 %v8372_v63 }
 0xa52   :  { %3213 = vmatpush1.msra.mxu1 %v7651_v49  ;;  %v10076_v49 = vld [vmem:[#allocation41_spill] sm:$0xff] }
 0xa53   :  { %3214 = vmatprep.subr.mxu1 %v7663_v51  ;;  %v10077_v51 = vld [vmem:[#allocation46_spill] sm:$0xff] }
 0xa54   :  { %3215 = vmatpush1.msra.mxu1 %v7675_v34  ;;  %v10078_v34 = vld [vmem:[#allocation45_spill] sm:$0xff] }
 0xa55   :  { %3216 = vmatprep.subr.mxu1 %v7687_v17  ;;  %v10079_v17 = vld [vmem:[#allocation18_spill] sm:$0xff] }
 0xa56   :  { %3217 = vmatpush1.msra.mxu1 %v7699_v45  ;;  %v10080_v45 = vld [vmem:[#allocation50_spill] sm:$0xff] }
 0xa57   :  { %3218 = vmatprep.subr.mxu1 %v7711_v18  ;;  %v10082_v18 = vld [vmem:[#allocation16_spill] sm:$0xff] }
 0xa58   :  { %3219 = vmatpush1.msra.mxu1 %v7723_v9  ;;  %v10084_v9 = vld [vmem:[#allocation53_spill] sm:$0xff] }
 0xa59   :  { %3220 = vmatprep.subr.mxu1 %v7735_v10  ;;  %v10086_v10 = vld [vmem:[#allocation37_spill] sm:$0xff] }
 0xa5a   :  { %3221 = vmatpush1.msra.mxu1 %v7747_v33  ;;  %v10088_v33 = vld [vmem:[#allocation22_spill] sm:$0xff] }
 0xa5b   :  { %3222 = vmatprep.subr.mxu1 %v7759_v26  ;;  %v10089_v26 = vld [vmem:[#allocation24_spill] sm:$0xff] }
 0xa5c   :  { %3223 = vmatpush1.msra.mxu1 %v7771_v44  ;;  %v10090_v44 = vld [vmem:[#allocation26_spill] sm:$0xff] }
 0xa5d   :  { %3224 = vmatprep.subr.mxu1 %v7783_v47  ;;  %v4674_v47 = vld [vmem:[%s9573_s8 + $0x178] sm:$0xff] }
 0xa5e   :  { %3225 = vmatpush1.msra.mxu1 %v10076_v49  ;;  %4978 = vmatpush3.msra.mxu0 %v4674_v47  ;;  %v8500_v47 = vld [vmem:[%s9571_s6 + $0x1d8] sm:$0xff] }
 0xa5f   :  { %3226 = vmatprep.subr.mxu1 %v10077_v51  ;;  %4979 = vmatprep.subr.mxu0 %v9962_v42 }
 0xa60   :  { %3227 = vmatpush1.msra.mxu1 %v10078_v34  ;;  %4980 = vmatpush3.msra.mxu0 %v4673_v7  ;;  %v8508_v7 = vld [vmem:[%s9571_s6 + $0x1d0] sm:$0xff] }
 0xa61   :  { %3228 = vmatprep.subr.mxu1 %v10079_v17  ;;  %4981 = vmatprep.subr.mxu0 %v9962_v42 }
 0xa62   :  { %3229 = vmatpush1.msra.mxu1 %v10080_v45  ;;  %4982 = vmatpush3.msra.mxu0 %v4672_v62  ;;  %v8514_v62 = vld [vmem:[%s9571_s6 + $0x1b8] sm:$0xff] }
 0xa63   :  { %3230 = vmatprep.subr.mxu1 %v10081_v6  ;;  %4983 = vmatprep.subr.mxu0 %v9962_v42 }
 0xa64   :  { %3231 = vmatpush1.msra.mxu1 %v10082_v18  ;;  %4984 = vmatpush3.msra.mxu0 %v4671_v29  ;;  %v8520_v29 = vld [vmem:[%s9571_s6 + $0x1b0] sm:$0xff] }
 0xa65   :  { %3232 = vmatprep.subr.mxu1 %v10083_v12  ;;  %4985 = vmatprep.subr.mxu0 %v9962_v42 }
 0xa66   :  { %3233 = vmatpush1.msra.mxu1 %v10084_v9  ;;  %4986 = vmatpush3.msra.mxu0 %v4670_v31  ;;  %v8526_v31 = vld [vmem:[%s9571_s6 + $0x198] sm:$0xff] }
 0xa67   :  { %3234 = vmatprep.subr.mxu1 %v10085_v8  ;;  %4987 = vmatprep.subr.mxu0 %v9962_v42 }
 0xa68   :  { %3235 = vmatpush1.msra.mxu1 %v10086_v10  ;;  %4988 = vmatpush3.msra.mxu0 %v4669_v41  ;;  %v8532_v41 = vld [vmem:[%s9571_s6 + $0x190] sm:$0xff] }
 0xa69   :  { %3236 = vmatprep.subr.mxu1 %v10087_v21  ;;  %4989 = vmatprep.subr.mxu0 %v9962_v42 }
 0xa6a   :  { %3237 = vmatpush1.msra.mxu1 %v10088_v33  ;;  %4990 = vmatpush3.msra.mxu0 %v4668_v53  ;;  %v8538_v53 = vld [vmem:[%s9571_s6 + $0x178] sm:$0xff] }
 0xa6b   :  { %3238 = vmatprep.subr.mxu1 %v10089_v26  ;;  %4991 = vmatprep.subr.mxu0 %v9962_v42 }
 0xa6c   :  { %3239 = vmatpush1.msra.mxu1 %v10090_v44  ;;  %4992 = vmatpush3.msra.mxu0 %v4667_v46  ;;  %v8544_v46 = vld [vmem:[%s9571_s6 + $0x170] sm:$0xff] }
 0xa6d   :  { %5012 = vmatprep.subr.mxu1 %v9962_v42  ;;  %4993 = vmatprep.subr.mxu0 %v9962_v42 }
 0xa6e   :  { %4994 = vmatpush3.msra.mxu0 %v4666_v24  ;;  %v8550_v24 = vld [vmem:[%s9571_s6 + $0x158] sm:$0xff] }
 0xa6f   :  { %4995 = vmatprep.subr.mxu0 %v9962_v42 }
 0xa70   :  { %4996 = vmatpush3.msra.mxu0 %v4665_v56  ;;  %v8556_v56 = vld [vmem:[%s9571_s6 + $0x150] sm:$0xff] }
 0xa71   :  { %4997 = vmatprep.subr.mxu0 %v9962_v42 }
 0xa72   :  { %4998 = vmatpush3.msra.mxu0 %v4664_v14  ;;  %v8562_v14 = vld [vmem:[%s9571_s6 + $0x138] sm:$0xff] }
 0xa73   :  { %4999 = vmatprep.subr.mxu0 %v9962_v42 }
 0xa74   :  { %5000 = vmatpush3.msra.mxu0 %v4663_v58  ;;  %v8568_v58 = vld [vmem:[%s9571_s6 + $0x130] sm:$0xff] }
 0xa75   :  { %5001 = vmatprep.subr.mxu0 %v9962_v42 }
 0xa76   :  { %5002 = vmatpush3.msra.mxu0 %v4662_v60  ;;  %v8574_v60 = vld [vmem:[%s9571_s6 + $0x118] sm:$0xff] }
 0xa77   :  { %5003 = vmatprep.subr.mxu0 %v9962_v42 }
 0xa78   :  { %5004 = vmatpush3.msra.mxu0 %v4661_v40  ;;  %v8580_v40 = vld [vmem:[%s9571_s6 + $0x110] sm:$0xff] }
 0xa79   :  { %5005 = vmatprep.subr.mxu0 %v9962_v42 }
 0xa7a   :  { %5006 = vmatpush3.msra.mxu0 %v4660_v43  ;;  %v8586_v43 = vld [vmem:[%s9571_s6 + $0xf8] sm:$0xff] }
 0xa7b   :  { %5007 = vmatprep.subr.mxu0 %v9962_v42 }
 0xa7c   :  { %5008 = vmatpush3.msra.mxu0 %v4659_v1  ;;  %v8592_v1 = vld [vmem:[%s9571_s6 + $0xf0] sm:$0xff] }
 0xa7d   :  { %3279 = vmatprep.subr.mxu0 %v8469_v19 }
 0xaed   :  { %v8472_v36 = vpop.f32.mrf.mxu1  ;;  %v3006_v16 = vpop.f32.mrf.mxu0 }
 0xaee   :  { %v3082_v2 = vadd.f32 %v3006_v16, %v2220_v61  ;;  %v8598_v16 = vld [vmem:[%s9571_s6 + $0xd8] sm:$0xff] }
 0xaef   :  { %v4976_v22 = vpop.f32.mrf.mxu1  ;;  %v3008_v39 = vpop.f32.mrf.mxu0  ;;  %v8634_v61 = vld [vmem:[%s9571_s6 + $0x78] sm:$0xff] }
 0xaf0   :  { %v3083_v59 = vadd.f32 %v3008_v39, %v2222_v13  ;;  %v4656_v57 = vmul.f32 -1.442695, %v3082_v2  ;;  %v8604_v22 = vld [vmem:[%s9571_s6 + $0xd0] sm:$0xff]  ;;  %v8610_v39 = vld [vmem:[%s9571_s6 + $0xb8] sm:$0xff] }
 0xaf1   :  { %v8622_v13 = vld [vmem:[%s9571_s6 + $0x98] sm:$0xff] }
 0xaf2   :  { %v4657_v20 = vmul.f32 -1.442695, %v3083_v59  ;;  %v8640_v59 = vld [vmem:[%s9571_s6 + $0x70] sm:$0xff]  ;;  %v8646_v2 = vld [vmem:[%s9571_s6 + $0x58] sm:$0xff] }
 0xaf4   :  { %5351 = vpow2.f32 %v4657_v20  ;;  %v8652_v20 = vld [vmem:[%s9571_s6 + $0x50] sm:$0xff] }
 0xaf5   :  { %5353 = vpow2.f32 %v4656_v57  ;;  %v8658_v57 = vld [vmem:[%s9571_s6 + $0x38] sm:$0xff] }
 0xb01   :  { %v5352_v37 = vpop.eup %5351 }
 0xb02   :  { %v5354_v4 = vpop.eup %5353  ;;  %v3095_v25 = vadd.f32 1.0, %v5352_v37  ;;  %v8664_v37 = vld [vmem:[%s9571_s6 + $0x30] sm:$0xff] }
 0xb03   :  { %v3089_v35 = vadd.f32 1.0, %v5354_v4  ;;  %v8670_v4 = vld [vmem:[%s9571_s6 + $0x18] sm:$0xff] }
 0xb04   :  { %5355 = vrcp.f32 %v3095_v25  ;;  %v8676_v25 = vld [vmem:[%s9571_s6 + $0x10] sm:$0xff] }
 0xb05   :  { %5357 = vrcp.f32 %v3089_v35  ;;  %v8689_v35 = vld [vmem:[%s9571_s6 + $0x1a0] sm:$0xff] }
 0xb0d   :  { %v3077_v15 = vpop.f32.mrf.mxu1 }
 0xb0e   :  { %v3084_v49 = vadd.f32 %v3077_v15, %v2333_v55  ;;  %v8701_v55 = vld [vmem:[%s9571_s6 + $0x180] sm:$0xff]  ;;  %v8707_v15 = vld [vmem:[%s9571_s6 + $0x168] sm:$0xff] }
 0xb0f   :  { %v3079_v51 = vpop.f32.mrf.mxu1 }
 0xb10   :  { %5359 = vtanh.f32 %v3084_v49  ;;  %v3085_v34 = vadd.f32 %v3079_v51, %v2335_v27  ;;  %v8719_v27 = vld [vmem:[%s9571_s6 + $0x148] sm:$0xff]  ;;  %v8725_v49 = vld [vmem:[%s9571_s6 + $0x140] sm:$0xff] }
 0xb11   :  { %v5356_v45 = vpop.eup %5355  ;;  %10098 = vst [vmem:[#allocation43_spill] sm:$0xff] %v8719_v27  ;;  %10099 = vst [vmem:[#allocation44_spill] sm:$0xff] %v8725_v49  ;;  %v8731_v51 = vld [vmem:[%s9571_s6 + $0x128] sm:$0xff] }
 0xb12   :  { %v4658_v17 = vmul.f32 -1.442695, %v3085_v34  ;;  %v5358_v6 = vpop.eup %5357  ;;  %v3105_v12 = vmul.f32 %v5356_v45, %v8307_v48  ;;  %v8493_v48 = vld [vmem:[%s9571_s6 + $0x1f0] sm:$0xff]  ;;  %10100 = vst [vmem:[#allocation47_spill] sm:$0xff] %v8731_v51  ;;  %v8737_v34 = vld [vmem:[%s9571_s6 + $0x120] sm:$0xff] }
 0xb13   :  { %10101 = vst [vmem:[#allocation51_spill] sm:$0xff] %v8737_v34  ;;  %v8749_v45 = vld [vmem:[%s9571_s6 + $0x100] sm:$0xff] }
 0xb14   :  { %5361 = vpow2.f32 %v4658_v17  ;;  %v8743_v17 = vld [vmem:[%s9571_s6 + $0x108] sm:$0xff]  ;;  %10103 = vst [vmem:[#allocation55_spill] sm:$0xff] %v8749_v45 }
 0xb15   :  { %10102 = vst [vmem:[#allocation52_spill] sm:$0xff] %v8743_v17 }
 0xb1d   :  { %v5360_v18 = vpop.eup %5359 }
 0xb1e   :  { %v3106_v9 = vmul.f32 %v5360_v18, %v5358_v6  ;;  %v8755_v6 = vld [vmem:[%s9571_s6 + $0xe8] sm:$0xff]  ;;  %v8761_v18 = vld [vmem:[%s9571_s6 + $0xe0] sm:$0xff] }
 0xb1f   :  { %10104 = vst [vmem:[#allocation14_spill] sm:$0xff] %v8755_v6  ;;  %10105 = vst [vmem:[#allocation39_spill] sm:$0xff] %v8761_v18 }
 0xb20   :  { %v8483_v8 = vadd.f32 %v3106_v9, %v3105_v12  ;;  %v8767_v12 = vld [vmem:[%s9571_s6 + $0xc8] sm:$0xff]  ;;  %v8773_v9 = vld [vmem:[%s9571_s6 + $0xc0] sm:$0xff] }
 0xb21   :  { %v5362_v10 = vpop.eup %5361  ;;  %10106 = vst [vmem:[#allocation19_spill] sm:$0xff] %v8767_v12  ;;  %10107 = vst [vmem:[#allocation21_spill] sm:$0xff] %v8773_v9 }
 0xb22   :  { %v3102_v21 = vadd.f32 1.0, %v5362_v10  ;;  %5363 = vtanh.f32 %v8483_v8  ;;  %v8779_v10 = vld [vmem:[%s9571_s6 + $0xa8] sm:$0xff] }
 0xb23   :  { %10108 = vst [vmem:[#allocation23_spill] sm:$0xff] %v8779_v10 }
 0xb24   :  { %5365 = vrcp.f32 %v3102_v21  ;;  %v8785_v21 = vld [vmem:[%s9571_s6 + $0xa0] sm:$0xff] }
 0xb25   :  { %10109 = vst [vmem:[#allocation25_spill] sm:$0xff] %v8785_v21 }
 0xb2f   :  { %v5364_v33 = vpop.eup %5363 }
 0xb31   :  { %v5366_v26 = vpop.eup %5365 }
 0xb32   :  { %v8486_v44 = vmul.f32 %v5366_v26, %v5364_v33  ;;  %v8791_v33 = vld [vmem:[%s9571_s6 + $0x88] sm:$0xff]  ;;  %v8797_v26 = vld [vmem:[%s9571_s6 + $0x80] sm:$0xff] }
 0xb33   :  { %10110 = vst [vmem:[#allocation27_spill] sm:$0xff] %v8791_v33  ;;  %10111 = vst [vmem:[#allocation33_spill] sm:$0xff] %v8797_v26 }
 0xb34   :  { %5010 = vmatmul.mubr.f32.vlgmr.msra.gmra.mxu0 %v8486_v44  ;;  %3273 = vmatmul.mubr.f32.vlgmr.msra.gmra.mxu1 %v8486_v44 }
 0xb35   :  { %3280 = vmatpush1.msra.mxu0 %v8493_v48  ;;  %3343 = vmatprep.mubr.f32.mxu0 %v9962_v42 }
 0xb36   :  { %3281 = vmatprep.subr.mxu0 %v8500_v47  ;;  %5044 = vmatprep.mubr.msk.f32.mxu1 %vm5654_vm0, %v9962_v42 }
 0xb37   :  { %3282 = vmatpush1.msra.mxu0 %v8508_v7 }
 0xb38   :  { %3283 = vmatprep.subr.mxu0 %v8514_v62 }
 0xb39   :  { %3284 = vmatpush1.msra.mxu0 %v8520_v29 }
 0xb3a   :  { %3285 = vmatprep.subr.mxu0 %v8526_v31 }
 0xb3b   :  { %3286 = vmatpush1.msra.mxu0 %v8532_v41 }
 0xb3c   :  { %3287 = vmatprep.subr.mxu0 %v8538_v53 }
 0xb3d   :  { %3288 = vmatpush1.msra.mxu0 %v8544_v46 }
 0xb3e   :  { %3289 = vmatprep.subr.mxu0 %v8550_v24 }
 0xb3f   :  { %3290 = vmatpush1.msra.mxu0 %v8556_v56 }
 0xb40   :  { %3291 = vmatprep.subr.mxu0 %v8562_v14 }
 0xb41   :  { %3292 = vmatpush1.msra.mxu0 %v8568_v58 }
 0xb42   :  { %3293 = vmatprep.subr.mxu0 %v8574_v60 }
 0xb43   :  { %3294 = vmatpush1.msra.mxu0 %v8580_v40 }
 0xb44   :  { %3295 = vmatprep.subr.mxu0 %v8586_v43 }
 0xb45   :  { %3296 = vmatpush1.msra.mxu0 %v8592_v1 }
 0xb46   :  { %3297 = vmatprep.subr.mxu0 %v8598_v16 }
 0xb47   :  { %3298 = vmatpush1.msra.mxu0 %v8604_v22 }
 0xb48   :  { %3299 = vmatprep.subr.mxu0 %v8610_v39 }
 0xb49   :  { %3300 = vmatpush1.msra.mxu0 %v8616_v28 }
 0xb4a   :  { %3301 = vmatprep.subr.mxu0 %v8622_v13 }
 0xb4b   :  { %3302 = vmatpush1.msra.mxu0 %v8628_v0 }
 0xb4c   :  { %3303 = vmatprep.subr.mxu0 %v8634_v61 }
 0xb4d   :  { %3304 = vmatpush1.msra.mxu0 %v8640_v59 }
 0xb4e   :  { %3305 = vmatprep.subr.mxu0 %v8646_v2 }
 0xb4f   :  { %3306 = vmatpush1.msra.mxu0 %v8652_v20 }
 0xb50   :  { %3307 = vmatprep.subr.mxu0 %v8658_v57 }
 0xb51   :  { %3308 = vmatpush1.msra.mxu0 %v8664_v37 }
 0xb52   :  { %3309 = vmatprep.subr.mxu0 %v8670_v4 }
 0xb53   :  { %3310 = vmatpush1.msra.mxu0 %v8676_v25 }
 0xb54   :  { %3344 = vmatmul.mubr.f32.vlgmr.msra.gmra.mxu0 %v8486_v44  ;;  %3476 = vmatprep.subr.mxu0 %v8347_v54  ;;  %v8803_v44 = vld [vmem:[%s9571_s6 + $0x68] sm:$0xff] }
 0xb55   :  { %3477 = vmatpush1.msra.mxu0 %v8353_v50  ;;  %3540 = vmatprep.mubr.f32.mxu0 %v9962_v42  ;;  %10112 = vst [vmem:[#allocation34_spill] sm:$0xff] %v8803_v44 }
 0xb56   :  { %3478 = vmatprep.subr.mxu0 %v8360_v11 }
 0xb57   :  { %3479 = vmatpush1.msra.mxu0 %v8366_v32 }
 0xb58   :  { %3480 = vmatprep.subr.mxu0 %v8372_v63 }
 0xb59   :  { %3481 = vmatpush1.msra.mxu0 %v8689_v35 }
 0xb5a   :  { %3482 = vmatprep.subr.mxu0 %v8695_v52 }
 0xb5b   :  { %3483 = vmatpush1.msra.mxu0 %v8701_v55 }
 0xb5c   :  { %3484 = vmatprep.subr.mxu0 %v8707_v15 }
 0xb5d   :  { %3485 = vmatpush1.msra.mxu0 %v8713_v5 }
 0xb5e   :  { %3486 = vmatprep.subr.mxu0 %v8719_v27 }
 0xb5f   :  { %3487 = vmatpush1.msra.mxu0 %v8725_v49 }
 0xb60   :  { %3488 = vmatprep.subr.mxu0 %v8731_v51 }
 0xb61   :  { %3489 = vmatpush1.msra.mxu0 %v8737_v34  ;;  %v10123_v34 = vld [vmem:[#allocation13_spill] sm:$0xff] }
 0xb62   :  { %3490 = vmatprep.subr.mxu0 %v8743_v17 }
 0xb63   :  { %3491 = vmatpush1.msra.mxu0 %v8749_v45  ;;  %v10122_v45 = vld [vmem:[#allocation60_spill] sm:$0xff] }
 0xb64   :  { %3492 = vmatprep.subr.mxu0 %v8755_v6  ;;  %v2228_v17 = vadd.f32 %v10122_v45, %v10092_v30 }
 0xb65   :  { %3493 = vmatpush1.msra.mxu0 %v8761_v18 }
 0xb66   :  { %3494 = vmatprep.subr.mxu0 %v8767_v12 }
 0xb67   :  { %3495 = vmatpush1.msra.mxu0 %v8773_v9 }
 0xb68   :  { %3496 = vmatprep.subr.mxu0 %v8779_v10 }
 0xb69   :  { %3497 = vmatpush1.msra.mxu0 %v8785_v21  ;;  %v8809_v21 = vld [vmem:[%s9571_s6 + $0x60] sm:$0xff] }
 0xb6a   :  { %3498 = vmatprep.subr.mxu0 %v8791_v33  ;;  %10113 = vst [vmem:[#allocation30_spill] sm:$0xff] %v8809_v21  ;;  %v8815_v33 = vld [vmem:[%s9571_s6 + $0x48] sm:$0xff] }
 0xb6b   :  { %3499 = vmatpush1.msra.mxu0 %v8797_v26  ;;  %10114 = vst [vmem:[#allocation28_spill] sm:$0xff] %v8815_v33  ;;  %v8821_v26 = vld [vmem:[%s9571_s6 + $0x40] sm:$0xff] }
 0xb6c   :  { %3500 = vmatprep.subr.mxu0 %v8803_v44  ;;  %10115 = vst [vmem:[#allocation29_spill] sm:$0xff] %v8821_v26  ;;  %v8827_v44 = vld [vmem:[%s9571_s6 + $0x28] sm:$0xff] }
 0xb6d   :  { %3501 = vmatpush1.msra.mxu0 %v8809_v21  ;;  %10116 = vst [vmem:[#allocation78_spill] sm:$0xff] %v8827_v44  ;;  %v8833_v21 = vld [vmem:[%s9571_s6 + $0x20] sm:$0xff] }
 0xb6e   :  { %3502 = vmatprep.subr.mxu0 %v8815_v33  ;;  %10117 = vst [vmem:[#allocation31_spill] sm:$0xff] %v8833_v21  ;;  %v8839_v33 = vld [vmem:[%s9571_s6 + $0x8] sm:$0xff] }
 0xb6f   :  { %3503 = vmatpush1.msra.mxu0 %v8821_v26  ;;  %10118 = vst [vmem:[#allocation17_spill] sm:$0xff] %v8839_v33  ;;  %v8845_v26 = vld [vmem:[%s9571_s6] sm:$0xff] }
 0xb70   :  { %3504 = vmatprep.subr.mxu0 %v8827_v44  ;;  %10119 = vst [vmem:[#allocation48_spill] sm:$0xff] %v8845_v26  ;;  %v4684_v44 = vld [vmem:[%s9573_s8 + $0x1b0] sm:$0xff] }
 0xb71   :  { %3505 = vmatpush1.msra.mxu0 %v8833_v21  ;;  %v4693_v21 = vld [vmem:[%s9573_s8 + $0x1f8] sm:$0xff] }
 0xb72   :  { %3506 = vmatprep.subr.mxu0 %v8839_v33  ;;  %5013 = vmatpush3.msra.mxu1 %v4693_v21  ;;  %v4692_v33 = vld [vmem:[%s9573_s8 + $0x1f0] sm:$0xff]  ;;  %v4690_v21 = vld [vmem:[%s9573_s8 + $0x1e0] sm:$0xff] }
 0xb73   :  { %3507 = vmatpush1.msra.mxu0 %v8845_v26  ;;  %5014 = vmatprep.subr.mxu1 %v9962_v42  ;;  %v4691_v26 = vld [vmem:[%s9573_s8 + $0x1e8] sm:$0xff] }
 0xb74   :  { %5047 = vmatprep.subr.mxu0 %v9962_v42  ;;  %5015 = vmatpush3.msra.mxu1 %v4692_v33  ;;  %v4689_v33 = vld [vmem:[%s9573_s8 + $0x1d8] sm:$0xff] }
 0xb75   :  { %5016 = vmatprep.subr.mxu1 %v9962_v42 }
 0xb76   :  { %5017 = vmatpush3.msra.mxu1 %v4691_v26  ;;  %v4688_v26 = vld [vmem:[%s9573_s8 + $0x1d0] sm:$0xff] }
 0xb77   :  { %5018 = vmatprep.subr.mxu1 %v9962_v42 }
 0xb78   :  { %5019 = vmatpush3.msra.mxu1 %v4690_v21  ;;  %v4687_v21 = vld [vmem:[%s9573_s8 + $0x1c8] sm:$0xff] }
 0xb79   :  { %5020 = vmatprep.subr.mxu1 %v9962_v42 }
 0xb7a   :  { %5021 = vmatpush3.msra.mxu1 %v4689_v33  ;;  %v4686_v33 = vld [vmem:[%s9573_s8 + $0x1c0] sm:$0xff] }
 0xb7b   :  { %5022 = vmatprep.subr.mxu1 %v9962_v42 }
 0xb7c   :  { %5023 = vmatpush3.msra.mxu1 %v4688_v26  ;;  %v4685_v26 = vld [vmem:[%s9573_s8 + $0x1b8] sm:$0xff] }
 0xb7d   :  { %5024 = vmatprep.subr.mxu1 %v9962_v42 }
 0xb7e   :  { %5025 = vmatpush3.msra.mxu1 %v4687_v21  ;;  %v4683_v21 = vld [vmem:[%s9573_s8 + $0x1a8] sm:$0xff] }
 0xb7f   :  { %5026 = vmatprep.subr.mxu1 %v9962_v42 }
 0xb80   :  { %5027 = vmatpush3.msra.mxu1 %v4686_v33  ;;  %v4682_v33 = vld [vmem:[%s9573_s8 + $0x1a0] sm:$0xff] }
 0xb81   :  { %5028 = vmatprep.subr.mxu1 %v9962_v42 }
 0xb82   :  { %5029 = vmatpush3.msra.mxu1 %v4685_v26  ;;  %v4681_v26 = vld [vmem:[%s9573_s8 + $0x198] sm:$0xff] }
 0xb83   :  { %5030 = vmatprep.subr.mxu1 %v9962_v42 }
 0xb84   :  { %5031 = vmatpush3.msra.mxu1 %v4684_v44  ;;  %v4680_v44 = vld [vmem:[%s9573_s8 + $0x190] sm:$0xff] }
 0xb85   :  { %5032 = vmatprep.subr.mxu1 %v9962_v42 }
 0xb86   :  { %5033 = vmatpush3.msra.mxu1 %v4683_v21  ;;  %v4679_v21 = vld [vmem:[%s9573_s8 + $0x188] sm:$0xff] }
 0xb87   :  { %5034 = vmatprep.subr.mxu1 %v9962_v42 }
 0xb88   :  { %5035 = vmatpush3.msra.mxu1 %v4682_v33  ;;  %v4678_v33 = vld [vmem:[%s9573_s8 + $0x180] sm:$0xff] }
 0xb89   :  { %5036 = vmatprep.subr.mxu1 %v9962_v42 }
 0xb8a   :  { %5037 = vmatpush3.msra.mxu1 %v4681_v26  ;;  %v10120_v26 = vld [vmem:[#allocation35_spill] sm:$0xff] }
 0xb8b   :  { %5038 = vmatprep.subr.mxu1 %v9962_v42  ;;  %v2932_v10 = vadd.f32 %v8472_v36, %v10120_v26 }
 0xb8c   :  { %5039 = vmatpush3.msra.mxu1 %v4680_v44 }
 0xb8d   :  { %5040 = vmatprep.subr.mxu1 %v9962_v42 }
 0xb8e   :  { %5041 = vmatpush3.msra.mxu1 %v4679_v21  ;;  %v2226_v21 = vadd.f32 %v10123_v34, %v8133_v23 }
 0xb8f   :  { %5042 = vmatprep.subr.mxu1 %v9962_v42 }
 0xb90   :  { %5043 = vmatpush3.msra.mxu1 %v4678_v33 }
 0xb91   :  { %3547 = vmatprep.subr.mxu1 %v8469_v19 }
 0xbf4   :  { %v3196_v9 = vpop.f32.mrf.mxu0  ;;  %v3274_v12 = vpop.f32.mrf.mxu1 }
 0xbf5   :  { %v8915_v18 = vadd.f32 %v3196_v9, %v2932_v10  ;;  %v3350_v49 = vadd.f32 %v3274_v12, %v2226_v21  ;;  %v10124_v9 = vld [vmem:[#allocation32_spill] sm:$0xff] }
 0xbf6   :  { %v5011_v44 = vpop.f32.mrf.mxu0  ;;  %v3276_v6 = vpop.f32.mrf.mxu1  ;;  %v2339_v10 = vadd.f32 %v10124_v9, %v8158_v3  ;;  %v10128_v9 = vld [vmem:[#allocation44_spill] sm:$0xff] }
 0xbf7   :  { %10121 = vst [vmem:[#allocation15_spill] sm:$0xff] %v8915_v18  ;;  %v3351_v51 = vadd.f32 %v3276_v6, %v2228_v17  ;;  %v4675_v27 = vmul.f32 -1.442695, %v3350_v49  ;;  %v10125_v18 = vld [vmem:[#allocation62_spill] sm:$0xff] }
 0xbf8   :  { %v2341_v45 = vadd.f32 %v10125_v18, %v10071_v38 }
 0xbf9   :  { %v4676_v33 = vmul.f32 -1.442695, %v3351_v51 }
 0xbfb   :  { %5367 = vpow2.f32 %v4676_v33 }
 0xbfc   :  { %5369 = vpow2.f32 %v4675_v27 }
 0xc08   :  { %v5368_v19 = vpop.eup %5367 }
 0xc09   :  { %v5370_v36 = vpop.eup %5369  ;;  %v3363_v26 = vadd.f32 1.0, %v5368_v19 }
 0xc0a   :  { %v3357_v5 = vadd.f32 1.0, %v5370_v36 }
 0xc0b   :  { %5371 = vrcp.f32 %v3363_v26 }
 0xc0c   :  { %5373 = vrcp.f32 %v3357_v5 }
 0xc14   :  { %v3345_v44 = vpop.f32.mrf.mxu0 }
 0xc15   :  { %v3352_v30 = vadd.f32 %v3345_v44, %v2339_v10  ;;  %v10129_v10 = vld [vmem:[#allocation47_spill] sm:$0xff] }
 0xc16   :  { %v3347_v34 = vpop.f32.mrf.mxu0  ;;  %v10130_v44 = vld [vmem:[#allocation51_spill] sm:$0xff] }
 0xc17   :  { %5375 = vtanh.f32 %v3352_v30  ;;  %v3353_v51 = vadd.f32 %v3347_v34, %v2341_v45  ;;  %v10126_v30 = vld [vmem:[#allocation42_spill] sm:$0xff]  ;;  %v10131_v45 = vld [vmem:[#allocation52_spill] sm:$0xff]  ;;  %v10132_v34 = vld [vmem:[#allocation55_spill] sm:$0xff] }
 0xc18   :  { %v5372_v27 = vpop.eup %5371 }
 0xc19   :  { %v4677_v49 = vmul.f32 -1.442695, %v3353_v51  ;;  %v5374_v17 = vpop.eup %5373  ;;  %v3373_v19 = vmul.f32 %v5372_v27, %v8483_v8  ;;  %v10127_v8 = vld [vmem:[#allocation43_spill] sm:$0xff]  ;;  %v10133_v51 = vld [vmem:[#allocation14_spill] sm:$0xff] }
 0xc1a   :  { %v10135_v27 = vld [vmem:[#allocation19_spill] sm:$0xff] }
 0xc1b   :  { %5377 = vpow2.f32 %v4677_v49  ;;  %v10134_v49 = vld [vmem:[#allocation39_spill] sm:$0xff] }
 0xc24   :  { %v5376_v6 = vpop.eup %5375 }
 0xc25   :  { %v3374_v12 = vmul.f32 %v5376_v6, %v5374_v17  ;;  %v10136_v17 = vld [vmem:[#allocation21_spill] sm:$0xff]  ;;  %v10137_v6 = vld [vmem:[#allocation23_spill] sm:$0xff] }
 0xc27   :  { %v8926_v21 = vadd.f32 %v3374_v12, %v3373_v19  ;;  %v10138_v19 = vld [vmem:[#allocation25_spill] sm:$0xff]  ;;  %v10139_v12 = vld [vmem:[#allocation27_spill] sm:$0xff] }
 0xc28   :  { %v5378_v33 = vpop.eup %5377 }
 0xc29   :  { %v3370_v36 = vadd.f32 1.0, %v5378_v33  ;;  %5379 = vtanh.f32 %v8926_v21  ;;  %v10140_v33 = vld [vmem:[#allocation33_spill] sm:$0xff] }
 0xc2b   :  { %5381 = vrcp.f32 %v3370_v36  ;;  %v10141_v36 = vld [vmem:[#allocation34_spill] sm:$0xff] }
 0xc36   :  { %v5380_v18 = vpop.eup %5379 }
 0xc38   :  { %v5382_v5 = vpop.eup %5381 }
 0xc39   :  { %v3377_v26 = vmul.f32 %v5382_v5, %v5380_v18  ;;  %v10142_v18 = vld [vmem:[#allocation30_spill] sm:$0xff]  ;;  %v10143_v5 = vld [vmem:[#allocation28_spill] sm:$0xff] }
 0xc3b   :  { %5045 = vmatmul.mubr.f32.vlgmr.msra.gmra.mxu1 %v3377_v26  ;;  %3541 = vmatmul.mubr.f32.vlgmr.msra.gmra.mxu0 %v3377_v26 }
 0xc3c   :  { %3548 = vmatpush1.msra.mxu1 %v8493_v48  ;;  %3611 = vmatprep.mubr.f32.mxu1 %v9962_v42 }
 0xc3d   :  { %3549 = vmatprep.subr.mxu1 %v8500_v47  ;;  %5079 = vmatprep.mubr.msk.f32.mxu0 %vm5654_vm0, %v9962_v42 }
 0xc3e   :  { %3550 = vmatpush1.msra.mxu1 %v8508_v7 }
 0xc3f   :  { %3551 = vmatprep.subr.mxu1 %v8514_v62 }
 0xc40   :  { %3552 = vmatpush1.msra.mxu1 %v8520_v29 }
 0xc41   :  { %3553 = vmatprep.subr.mxu1 %v8526_v31 }
 0xc42   :  { %3554 = vmatpush1.msra.mxu1 %v8532_v41 }
 0xc43   :  { %3555 = vmatprep.subr.mxu1 %v8538_v53 }
 0xc44   :  { %3556 = vmatpush1.msra.mxu1 %v8544_v46 }
 0xc45   :  { %3557 = vmatprep.subr.mxu1 %v8550_v24 }
 0xc46   :  { %3558 = vmatpush1.msra.mxu1 %v8556_v56 }
 0xc47   :  { %3559 = vmatprep.subr.mxu1 %v8562_v14 }
 0xc48   :  { %3560 = vmatpush1.msra.mxu1 %v8568_v58 }
 0xc49   :  { %3561 = vmatprep.subr.mxu1 %v8574_v60 }
 0xc4a   :  { %3562 = vmatpush1.msra.mxu1 %v8580_v40 }
 0xc4b   :  { %3563 = vmatprep.subr.mxu1 %v8586_v43 }
 0xc4c   :  { %3564 = vmatpush1.msra.mxu1 %v8592_v1 }
 0xc4d   :  { %3565 = vmatprep.subr.mxu1 %v8598_v16 }
 0xc4e   :  { %3566 = vmatpush1.msra.mxu1 %v8604_v22 }
 0xc4f   :  { %3567 = vmatprep.subr.mxu1 %v8610_v39 }
 0xc50   :  { %3568 = vmatpush1.msra.mxu1 %v8616_v28 }
 0xc51   :  { %3569 = vmatprep.subr.mxu1 %v8622_v13 }
 0xc52   :  { %3570 = vmatpush1.msra.mxu1 %v8628_v0 }
 0xc53   :  { %3571 = vmatprep.subr.mxu1 %v8634_v61 }
 0xc54   :  { %3572 = vmatpush1.msra.mxu1 %v8640_v59 }
 0xc55   :  { %3573 = vmatprep.subr.mxu1 %v8646_v2 }
 0xc56   :  { %3574 = vmatpush1.msra.mxu1 %v8652_v20 }
 0xc57   :  { %3575 = vmatprep.subr.mxu1 %v8658_v57 }
 0xc58   :  { %3576 = vmatpush1.msra.mxu1 %v8664_v37 }
 0xc59   :  { %3577 = vmatprep.subr.mxu1 %v8670_v4 }
 0xc5a   :  { %3578 = vmatpush1.msra.mxu1 %v8676_v25 }
 0xc5b   :  { %3612 = vmatmul.mubr.f32.vlgmr.msra.gmra.mxu1 %v3377_v26  ;;  %3744 = vmatprep.subr.mxu1 %v8347_v54  ;;  %v10144_v26 = vld [vmem:[#allocation29_spill] sm:$0xff] }
 0xc5c   :  { %3745 = vmatpush1.msra.mxu1 %v8353_v50  ;;  %3808 = vmatprep.mubr.f32.mxu1 %v9962_v42 }
 0xc5d   :  { %3746 = vmatprep.subr.mxu1 %v8360_v11 }
 0xc5e   :  { %3747 = vmatpush1.msra.mxu1 %v8366_v32 }
 0xc5f   :  { %3748 = vmatprep.subr.mxu1 %v8372_v63 }
 0xc60   :  { %3749 = vmatpush1.msra.mxu1 %v8689_v35 }
 0xc61   :  { %3750 = vmatprep.subr.mxu1 %v8695_v52 }
 0xc62   :  { %3751 = vmatpush1.msra.mxu1 %v8701_v55 }
 0xc63   :  { %3752 = vmatprep.subr.mxu1 %v8707_v15 }
 0xc64   :  { %3753 = vmatpush1.msra.mxu1 %v10126_v30 }
 0xc65   :  { %3754 = vmatprep.subr.mxu1 %v10127_v8 }
 0xc66   :  { %3755 = vmatpush1.msra.mxu1 %v10128_v9 }
 0xc67   :  { %3756 = vmatprep.subr.mxu1 %v10129_v10 }
 0xc68   :  { %3757 = vmatpush1.msra.mxu1 %v10130_v44 }
 0xc69   :  { %3758 = vmatprep.subr.mxu1 %v10131_v45 }
 0xc6a   :  { %3759 = vmatpush1.msra.mxu1 %v10132_v34  ;;  %v10154_v34 = vld [vmem:[#allocation63_spill] sm:$0xff] }
 0xc6b   :  { %3760 = vmatprep.subr.mxu1 %v10133_v51  ;;  %v2232_v45 = vadd.f32 %v10154_v34, %v8133_v23 }
 0xc6c   :  { %3761 = vmatpush1.msra.mxu1 %v10134_v49  ;;  %v10145_v49 = vld [vmem:[#allocation78_spill] sm:$0xff] }
 0xc6d   :  { %3762 = vmatprep.subr.mxu1 %v10135_v27  ;;  %v10146_v27 = vld [vmem:[#allocation31_spill] sm:$0xff] }
 0xc6e   :  { %3763 = vmatpush1.msra.mxu1 %v10136_v17  ;;  %v10147_v17 = vld [vmem:[#allocation17_spill] sm:$0xff] }
 0xc6f   :  { %3764 = vmatprep.subr.mxu1 %v10137_v6  ;;  %v10148_v6 = vld [vmem:[#allocation48_spill] sm:$0xff] }
 0xc70   :  { %3765 = vmatpush1.msra.mxu1 %v10138_v19  ;;  %v10153_v19 = vld [vmem:[#allocation64_spill] sm:$0xff] }
 0xc71   :  { %3766 = vmatprep.subr.mxu1 %v10139_v12 }
 0xc72   :  { %3767 = vmatpush1.msra.mxu1 %v10140_v33 }
 0xc73   :  { %3768 = vmatprep.subr.mxu1 %v10141_v36  ;;  %v4712_v36 = vld [vmem:[%s9573_s8 + $0x278] sm:$0xff] }
 0xc74   :  { %3769 = vmatpush1.msra.mxu1 %v10142_v18  ;;  %5048 = vmatpush3.msra.mxu0 %v4712_v36  ;;  %v4709_v36 = vld [vmem:[%s9573_s8 + $0x260] sm:$0xff] }
 0xc75   :  { %3770 = vmatprep.subr.mxu1 %v10143_v5  ;;  %5049 = vmatprep.subr.mxu0 %v9962_v42  ;;  %v10150_v5 = vld [vmem:[#allocation15_spill] sm:$0xff] }
 0xc76   :  { %3771 = vmatpush1.msra.mxu1 %v10144_v26  ;;  %v4711_v26 = vld [vmem:[%s9573_s8 + $0x270] sm:$0xff] }
 0xc77   :  { %3772 = vmatprep.subr.mxu1 %v10145_v49  ;;  %5050 = vmatpush3.msra.mxu0 %v4711_v26  ;;  %v4708_v26 = vld [vmem:[%s9573_s8 + $0x258] sm:$0xff] }
 0xc78   :  { %3773 = vmatpush1.msra.mxu1 %v10146_v27  ;;  %5051 = vmatprep.subr.mxu0 %v9962_v42  ;;  %v10149_v27 = vld [vmem:[#allocation40_spill] sm:$0xff] }
 0xc79   :  { %3774 = vmatprep.subr.mxu1 %v10147_v17  ;;  %v4703_v17 = vld [vmem:[%s9573_s8 + $0x230] sm:$0xff] }
 0xc7a   :  { %3775 = vmatpush1.msra.mxu1 %v10148_v6  ;;  %v4710_v6 = vld [vmem:[%s9573_s8 + $0x268] sm:$0xff] }
 0xc7b   :  { %5082 = vmatprep.subr.mxu1 %v9962_v42  ;;  %5052 = vmatpush3.msra.mxu0 %v4710_v6  ;;  %v4707_v6 = vld [vmem:[%s9573_s8 + $0x250] sm:$0xff] }
 0xc7c   :  { %5053 = vmatprep.subr.mxu0 %v9962_v42 }
 0xc7d   :  { %5054 = vmatpush3.msra.mxu0 %v4709_v36  ;;  %v4706_v36 = vld [vmem:[%s9573_s8 + $0x248] sm:$0xff] }
 0xc7e   :  { %5055 = vmatprep.subr.mxu0 %v9962_v42 }
 0xc7f   :  { %5056 = vmatpush3.msra.mxu0 %v4708_v26  ;;  %v4705_v26 = vld [vmem:[%s9573_s8 + $0x240] sm:$0xff] }
 0xc80   :  { %5057 = vmatprep.subr.mxu0 %v9962_v42 }
 0xc81   :  { %5058 = vmatpush3.msra.mxu0 %v4707_v6  ;;  %v4704_v6 = vld [vmem:[%s9573_s8 + $0x238] sm:$0xff] }
 0xc82   :  { %5059 = vmatprep.subr.mxu0 %v9962_v42 }
 0xc83   :  { %5060 = vmatpush3.msra.mxu0 %v4706_v36  ;;  %v4702_v36 = vld [vmem:[%s9573_s8 + $0x228] sm:$0xff] }
 0xc84   :  { %5061 = vmatprep.subr.mxu0 %v9962_v42 }
 0xc85   :  { %5062 = vmatpush3.msra.mxu0 %v4705_v26  ;;  %v4701_v26 = vld [vmem:[%s9573_s8 + $0x220] sm:$0xff] }
 0xc86   :  { %5063 = vmatprep.subr.mxu0 %v9962_v42 }
 0xc87   :  { %5064 = vmatpush3.msra.mxu0 %v4704_v6  ;;  %v4700_v6 = vld [vmem:[%s9573_s8 + $0x218] sm:$0xff] }
 0xc88   :  { %5065 = vmatprep.subr.mxu0 %v9962_v42 }
 0xc89   :  { %5066 = vmatpush3.msra.mxu0 %v4703_v17  ;;  %v4699_v17 = vld [vmem:[%s9573_s8 + $0x210] sm:$0xff] }
 0xc8a   :  { %5067 = vmatprep.subr.mxu0 %v9962_v42 }
 0xc8b   :  { %5068 = vmatpush3.msra.mxu0 %v4702_v36  ;;  %v4698_v36 = vld [vmem:[%s9573_s8 + $0x208] sm:$0xff] }
 0xc8c   :  { %5069 = vmatprep.subr.mxu0 %v9962_v42 }
 0xc8d   :  { %5070 = vmatpush3.msra.mxu0 %v4701_v26  ;;  %v4697_v26 = vld [vmem:[%s9573_s8 + $0x200] sm:$0xff] }
 0xc8e   :  { %5071 = vmatprep.subr.mxu0 %v9962_v42 }
 0xc8f   :  { %5072 = vmatpush3.msra.mxu0 %v4700_v6 }
 0xc90   :  { %5073 = vmatprep.subr.mxu0 %v9962_v42 }
 0xc91   :  { %5074 = vmatpush3.msra.mxu0 %v4699_v17  ;;  %v10152_v17 = vld [vmem:[#allocation74_spill] sm:$0xff] }
 0xc92   :  { %5075 = vmatprep.subr.mxu0 %v9962_v42  ;;  %v2234_v51 = vadd.f32 %v10153_v19, %v10152_v17 }
 0xc93   :  { %5076 = vmatpush3.msra.mxu0 %v4698_v36 }
 0xc94   :  { %5077 = vmatprep.subr.mxu0 %v9962_v42 }
 0xc95   :  { %5078 = vmatpush3.msra.mxu0 %v4697_v26 }
 0xc96   :  { %3815 = vmatprep.subr.mxu0 %v10149_v27 }
 0xcfb   :  { %v3464_v6 = vpop.f32.mrf.mxu1  ;;  %v3542_v49 = vpop.f32.mrf.mxu0 }
 0xcfc   :  { %v9062_v18 = vadd.f32 %v3464_v6, %v10150_v5  ;;  %v3618_v36 = vadd.f32 %v3542_v49, %v2232_v45  ;;  %v10155_v5 = vld [vmem:[#allocation61_spill] sm:$0xff] }
 0xcfd   :  { %v5046_v33 = vpop.f32.mrf.mxu1  ;;  %v3544_v12 = vpop.f32.mrf.mxu0 }
 0xcfe   :  { %10151 = vst [vmem:[#allocation41_spill] sm:$0xff] %v9062_v18  ;;  %v3619_v44 = vadd.f32 %v3544_v12, %v2234_v51  ;;  %v4694_v9 = vmul.f32 -1.442695, %v3618_v36  ;;  %v2345_v33 = vadd.f32 %v10155_v5, %v8158_v3  ;;  %v10156_v18 = vld [vmem:[#allocation65_spill] sm:$0xff]  ;;  %v10164_v5 = vld [vmem:[#allocation14_spill] sm:$0xff] }
 0xcff   :  { %v2347_v19 = vadd.f32 %v10156_v18, %v10071_v38 }
 0xd00   :  { %v4695_v10 = vmul.f32 -1.442695, %v3619_v44 }
 0xd02   :  { %5383 = vpow2.f32 %v4695_v10 }
 0xd03   :  { %5385 = vpow2.f32 %v4694_v9 }
 0xd0f   :  { %v5384_v26 = vpop.eup %5383 }
 0xd10   :  { %v5386_v27 = vpop.eup %5385  ;;  %v3631_v8 = vadd.f32 1.0, %v5384_v26 }
 0xd11   :  { %v3625_v30 = vadd.f32 1.0, %v5386_v27 }
 0xd12   :  { %5387 = vrcp.f32 %v3631_v8 }
 0xd13   :  { %5389 = vrcp.f32 %v3625_v30 }
 0xd1b   :  { %v3613_v6 = vpop.f32.mrf.mxu1 }
 0xd1c   :  { %v3620_v17 = vadd.f32 %v3613_v6, %v2345_v33  ;;  %v10165_v33 = vld [vmem:[#allocation39_spill] sm:$0xff] }
 0xd1d   :  { %v3615_v34 = vpop.f32.mrf.mxu1  ;;  %v10166_v6 = vld [vmem:[#allocation19_spill] sm:$0xff] }
 0xd1e   :  { %5391 = vtanh.f32 %v3620_v17  ;;  %v3621_v44 = vadd.f32 %v3615_v34, %v2347_v19  ;;  %v10160_v17 = vld [vmem:[#allocation47_spill] sm:$0xff]  ;;  %v10167_v19 = vld [vmem:[#allocation21_spill] sm:$0xff] }
 0xd1f   :  { %v5388_v9 = vpop.eup %5387  ;;  %v10168_v34 = vld [vmem:[#allocation23_spill] sm:$0xff] }
 0xd20   :  { %v4696_v45 = vmul.f32 -1.442695, %v3621_v44  ;;  %v5390_v10 = vpop.eup %5389  ;;  %v3641_v49 = vmul.f32 %v5388_v9, %v8926_v21  ;;  %v10157_v21 = vld [vmem:[#allocation42_spill] sm:$0xff]  ;;  %v10169_v44 = vld [vmem:[#allocation25_spill] sm:$0xff] }
 0xd21   :  { %v10171_v9 = vld [vmem:[#allocation33_spill] sm:$0xff] }
 0xd22   :  { %5393 = vpow2.f32 %v4696_v45  ;;  %v10170_v45 = vld [vmem:[#allocation27_spill] sm:$0xff] }
 0xd2b   :  { %v5392_v51 = vpop.eup %5391 }
 0xd2c   :  { %v3642_v27 = vmul.f32 %v5392_v51, %v5390_v10  ;;  %v10172_v10 = vld [vmem:[#allocation34_spill] sm:$0xff] }
 0xd2d   :  { %v10173_v51 = vld [vmem:[#allocation30_spill] sm:$0xff] }
 0xd2e   :  { %v9073_v12 = vadd.f32 %v3642_v27, %v3641_v49  ;;  %v10174_v49 = vld [vmem:[#allocation28_spill] sm:$0xff]  ;;  %v10175_v27 = vld [vmem:[#allocation29_spill] sm:$0xff] }
 0xd2f   :  { %v5394_v36 = vpop.eup %5393 }
 0xd30   :  { %v3638_v26 = vadd.f32 1.0, %v5394_v36  ;;  %5395 = vtanh.f32 %v9073_v12  ;;  %v10176_v36 = vld [vmem:[#allocation78_spill] sm:$0xff] }
 0xd32   :  { %5397 = vrcp.f32 %v3638_v26  ;;  %v10177_v26 = vld [vmem:[#allocation31_spill] sm:$0xff] }
 0xd3d   :  { %v5396_v8 = vpop.eup %5395 }
 0xd3f   :  { %v5398_v30 = vpop.eup %5397 }
 0xd40   :  { %v3645_v18 = vmul.f32 %v5398_v30, %v5396_v8  ;;  %v10178_v8 = vld [vmem:[#allocation17_spill] sm:$0xff]  ;;  %v10179_v30 = vld [vmem:[#allocation48_spill] sm:$0xff] }
 0xd42   :  { %5080 = vmatmul.mubr.f32.vlgmr.msra.gmra.mxu0 %v3645_v18  ;;  %3809 = vmatmul.mubr.f32.vlgmr.msra.gmra.mxu1 %v3645_v18 }
 0xd43   :  { %3816 = vmatpush1.msra.mxu0 %v8493_v48  ;;  %3879 = vmatprep.mubr.f32.mxu0 %v9962_v42 }
 0xd44   :  { %3817 = vmatprep.subr.mxu0 %v8500_v47  ;;  %5114 = vmatprep.mubr.msk.f32.mxu1 %vm5654_vm0, %v9962_v42 }
 0xd45   :  { %3818 = vmatpush1.msra.mxu0 %v8508_v7 }
 0xd46   :  { %3819 = vmatprep.subr.mxu0 %v8514_v62 }
 0xd47   :  { %3820 = vmatpush1.msra.mxu0 %v8520_v29 }
 0xd48   :  { %3821 = vmatprep.subr.mxu0 %v8526_v31 }
 0xd49   :  { %3822 = vmatpush1.msra.mxu0 %v8532_v41 }
 0xd4a   :  { %3823 = vmatprep.subr.mxu0 %v8538_v53 }
 0xd4b   :  { %3824 = vmatpush1.msra.mxu0 %v8544_v46 }
 0xd4c   :  { %3825 = vmatprep.subr.mxu0 %v8550_v24 }
 0xd4d   :  { %3826 = vmatpush1.msra.mxu0 %v8556_v56 }
 0xd4e   :  { %3827 = vmatprep.subr.mxu0 %v8562_v14 }
 0xd4f   :  { %3828 = vmatpush1.msra.mxu0 %v8568_v58 }
 0xd50   :  { %3829 = vmatprep.subr.mxu0 %v8574_v60 }
 0xd51   :  { %3830 = vmatpush1.msra.mxu0 %v8580_v40 }
 0xd52   :  { %3831 = vmatprep.subr.mxu0 %v8586_v43 }
 0xd53   :  { %3832 = vmatpush1.msra.mxu0 %v8592_v1 }
 0xd54   :  { %3833 = vmatprep.subr.mxu0 %v8598_v16 }
 0xd55   :  { %3834 = vmatpush1.msra.mxu0 %v8604_v22 }
 0xd56   :  { %3835 = vmatprep.subr.mxu0 %v8610_v39 }
 0xd57   :  { %3836 = vmatpush1.msra.mxu0 %v8616_v28 }
 0xd58   :  { %3837 = vmatprep.subr.mxu0 %v8622_v13 }
 0xd59   :  { %3838 = vmatpush1.msra.mxu0 %v8628_v0 }
 0xd5a   :  { %3839 = vmatprep.subr.mxu0 %v8634_v61 }
 0xd5b   :  { %3840 = vmatpush1.msra.mxu0 %v8640_v59 }
 0xd5c   :  { %3841 = vmatprep.subr.mxu0 %v8646_v2 }
 0xd5d   :  { %3842 = vmatpush1.msra.mxu0 %v8652_v20 }
 0xd5e   :  { %3843 = vmatprep.subr.mxu0 %v8658_v57 }
 0xd5f   :  { %3844 = vmatpush1.msra.mxu0 %v8664_v37 }
 0xd60   :  { %3845 = vmatprep.subr.mxu0 %v8670_v4 }
 0xd61   :  { %3846 = vmatpush1.msra.mxu0 %v8676_v25 }
 0xd62   :  { %3880 = vmatmul.mubr.f32.vlgmr.msra.gmra.mxu0 %v3645_v18  ;;  %4012 = vmatprep.subr.mxu0 %v8347_v54  ;;  %v10158_v54 = vld [vmem:[#allocation43_spill] sm:$0xff] }
 0xd63   :  { %4013 = vmatpush1.msra.mxu0 %v8353_v50  ;;  %4076 = vmatprep.mubr.f32.mxu0 %v9962_v42  ;;  %v10159_v50 = vld [vmem:[#allocation44_spill] sm:$0xff] }
 0xd64   :  { %4014 = vmatprep.subr.mxu0 %v8360_v11  ;;  %v10161_v11 = vld [vmem:[#allocation51_spill] sm:$0xff] }
 0xd65   :  { %4015 = vmatpush1.msra.mxu0 %v8366_v32  ;;  %v10162_v32 = vld [vmem:[#allocation52_spill] sm:$0xff] }
 0xd66   :  { %4016 = vmatprep.subr.mxu0 %v8372_v63  ;;  %v10163_v63 = vld [vmem:[#allocation55_spill] sm:$0xff] }
 0xd67   :  { %4017 = vmatpush1.msra.mxu0 %v8689_v35  ;;  %v4731_v18 = vld [vmem:[%s9573_s8 + $0x2f8] sm:$0xff] }
 0xd68   :  { %4018 = vmatprep.subr.mxu0 %v8695_v52  ;;  %5083 = vmatpush3.msra.mxu1 %v4731_v18  ;;  %v4728_v18 = vld [vmem:[%s9573_s8 + $0x2e0] sm:$0xff] }
 0xd69   :  { %4019 = vmatpush1.msra.mxu0 %v8701_v55  ;;  %5084 = vmatprep.subr.mxu1 %v9962_v42 }
 0xd6a   :  { %4020 = vmatprep.subr.mxu0 %v8707_v15 }
 0xd6b   :  { %4021 = vmatpush1.msra.mxu0 %v10157_v21 }
 0xd6c   :  { %4022 = vmatprep.subr.mxu0 %v10158_v54 }
 0xd6d   :  { %4023 = vmatpush1.msra.mxu0 %v10159_v50 }
 0xd6e   :  { %4024 = vmatprep.subr.mxu0 %v10160_v17 }
 0xd6f   :  { %4025 = vmatpush1.msra.mxu0 %v10161_v11 }
 0xd70   :  { %4026 = vmatprep.subr.mxu0 %v10162_v32 }
 0xd71   :  { %4027 = vmatpush1.msra.mxu0 %v10163_v63 }
 0xd72   :  { %4028 = vmatprep.subr.mxu0 %v10164_v5 }
 0xd73   :  { %4029 = vmatpush1.msra.mxu0 %v10165_v33 }
 0xd74   :  { %4030 = vmatprep.subr.mxu0 %v10166_v6 }
 0xd75   :  { %4031 = vmatpush1.msra.mxu0 %v10167_v19 }
 0xd76   :  { %4032 = vmatprep.subr.mxu0 %v10168_v34  ;;  %v10185_v34 = vld [vmem:[#allocation66_spill] sm:$0xff] }
 0xd77   :  { %4033 = vmatpush1.msra.mxu0 %v10169_v44  ;;  %v2238_v19 = vadd.f32 %v10185_v34, %v8133_v23 }
 0xd78   :  { %4034 = vmatprep.subr.mxu0 %v10170_v45  ;;  %v10184_v45 = vld [vmem:[#allocation68_spill] sm:$0xff] }
 0xd79   :  { %4035 = vmatpush1.msra.mxu0 %v10171_v9 }
 0xd7a   :  { %4036 = vmatprep.subr.mxu0 %v10172_v10 }
 0xd7b   :  { %4037 = vmatpush1.msra.mxu0 %v10173_v51 }
 0xd7c   :  { %4038 = vmatprep.subr.mxu0 %v10174_v49  ;;  %v10181_v49 = vld [vmem:[#allocation41_spill] sm:$0xff] }
 0xd7d   :  { %4039 = vmatpush1.msra.mxu0 %v10175_v27  ;;  %v4730_v27 = vld [vmem:[%s9573_s8 + $0x2f0] sm:$0xff] }
 0xd7e   :  { %4040 = vmatprep.subr.mxu0 %v10176_v36  ;;  %5085 = vmatpush3.msra.mxu1 %v4730_v27  ;;  %v4727_v27 = vld [vmem:[%s9573_s8 + $0x2d8] sm:$0xff] }
 0xd7f   :  { %4041 = vmatpush1.msra.mxu0 %v10177_v26  ;;  %5086 = vmatprep.subr.mxu1 %v9962_v42  ;;  %v10180_v26 = vld [vmem:[#allocation40_spill] sm:$0xff] }
 0xd80   :  { %4042 = vmatprep.subr.mxu0 %v10178_v8  ;;  %v4722_v8 = vld [vmem:[%s9573_s8 + $0x2b0] sm:$0xff] }
 0xd81   :  { %4043 = vmatpush1.msra.mxu0 %v10179_v30  ;;  %v4729_v30 = vld [vmem:[%s9573_s8 + $0x2e8] sm:$0xff] }
 0xd82   :  { %5117 = vmatprep.subr.mxu0 %v9962_v42  ;;  %5087 = vmatpush3.msra.mxu1 %v4729_v30  ;;  %v4726_v30 = vld [vmem:[%s9573_s8 + $0x2d0] sm:$0xff] }
 0xd83   :  { %5088 = vmatprep.subr.mxu1 %v9962_v42 }
 0xd84   :  { %5089 = vmatpush3.msra.mxu1 %v4728_v18  ;;  %v4725_v18 = vld [vmem:[%s9573_s8 + $0x2c8] sm:$0xff] }
 0xd85   :  { %5090 = vmatprep.subr.mxu1 %v9962_v42 }
 0xd86   :  { %5091 = vmatpush3.msra.mxu1 %v4727_v27  ;;  %v4724_v27 = vld [vmem:[%s9573_s8 + $0x2c0] sm:$0xff] }
 0xd87   :  { %5092 = vmatprep.subr.mxu1 %v9962_v42 }
 0xd88   :  { %5093 = vmatpush3.msra.mxu1 %v4726_v30  ;;  %v4723_v30 = vld [vmem:[%s9573_s8 + $0x2b8] sm:$0xff] }
 0xd89   :  { %5094 = vmatprep.subr.mxu1 %v9962_v42 }
 0xd8a   :  { %5095 = vmatpush3.msra.mxu1 %v4725_v18  ;;  %v4721_v18 = vld [vmem:[%s9573_s8 + $0x2a8] sm:$0xff] }
 0xd8b   :  { %5096 = vmatprep.subr.mxu1 %v9962_v42 }
 0xd8c   :  { %5097 = vmatpush3.msra.mxu1 %v4724_v27  ;;  %v4720_v27 = vld [vmem:[%s9573_s8 + $0x2a0] sm:$0xff] }
 0xd8d   :  { %5098 = vmatprep.subr.mxu1 %v9962_v42 }
 0xd8e   :  { %5099 = vmatpush3.msra.mxu1 %v4723_v30  ;;  %v4719_v30 = vld [vmem:[%s9573_s8 + $0x298] sm:$0xff] }
 0xd8f   :  { %5100 = vmatprep.subr.mxu1 %v9962_v42 }
 0xd90   :  { %5101 = vmatpush3.msra.mxu1 %v4722_v8  ;;  %v4718_v8 = vld [vmem:[%s9573_s8 + $0x290] sm:$0xff] }
 0xd91   :  { %5102 = vmatprep.subr.mxu1 %v9962_v42 }
 0xd92   :  { %5103 = vmatpush3.msra.mxu1 %v4721_v18  ;;  %v4717_v18 = vld [vmem:[%s9573_s8 + $0x288] sm:$0xff] }
 0xd93   :  { %5104 = vmatprep.subr.mxu1 %v9962_v42 }
 0xd94   :  { %5105 = vmatpush3.msra.mxu1 %v4720_v27  ;;  %v4716_v27 = vld [vmem:[%s9573_s8 + $0x280] sm:$0xff] }
 0xd95   :  { %5106 = vmatprep.subr.mxu1 %v9962_v42 }
 0xd96   :  { %5107 = vmatpush3.msra.mxu1 %v4719_v30 }
 0xd97   :  { %5108 = vmatprep.subr.mxu1 %v9962_v42 }
 0xd98   :  { %5109 = vmatpush3.msra.mxu1 %v4718_v8  ;;  %v10183_v8 = vld [vmem:[#allocation74_spill] sm:$0xff] }
 0xd99   :  { %5110 = vmatprep.subr.mxu1 %v9962_v42  ;;  %v2240_v44 = vadd.f32 %v10184_v45, %v10183_v8 }
 0xd9a   :  { %5111 = vmatpush3.msra.mxu1 %v4717_v18 }
 0xd9b   :  { %5112 = vmatprep.subr.mxu1 %v9962_v42 }
 0xd9c   :  { %5113 = vmatpush3.msra.mxu1 %v4716_v27 }
 0xd9d   :  { %4083 = vmatprep.subr.mxu1 %v10180_v26 }
 0xe02   :  { %v3732_v30 = vpop.f32.mrf.mxu0  ;;  %v3810_v36 = vpop.f32.mrf.mxu1 }
 0xe03   :  { %v9209_v51 = vadd.f32 %v3732_v30, %v10181_v49  ;;  %v3886_v18 = vadd.f32 %v3810_v36, %v2238_v19  ;;  %v10186_v49 = vld [vmem:[#allocation67_spill] sm:$0xff] }
 0xe04   :  { %v5081_v10 = vpop.f32.mrf.mxu0  ;;  %v3812_v9 = vpop.f32.mrf.mxu1 }
 0xe05   :  { %10182 = vst [vmem:[#allocation46_spill] sm:$0xff] %v9209_v51  ;;  %v3887_v6 = vadd.f32 %v3812_v9, %v2240_v44  ;;  %v4713_v5 = vmul.f32 -1.442695, %v3886_v18  ;;  %v2351_v10 = vadd.f32 %v10186_v49, %v8158_v3  ;;  %v10187_v51 = vld [vmem:[#allocation69_spill] sm:$0xff] }
 0xe06   :  { %v2353_v45 = vadd.f32 %v10187_v51, %v10071_v38 }
 0xe07   :  { %v4714_v33 = vmul.f32 -1.442695, %v3887_v6 }
 0xe09   :  { %5399 = vpow2.f32 %v4714_v33 }
 0xe0a   :  { %5401 = vpow2.f32 %v4713_v5 }
 0xe0c   :  { %v10206_v49 = vld [vmem:[#allocation46_spill] sm:$0xff] }
 0xe16   :  { %v5400_v26 = vpop.eup %5399 }
 0xe17   :  { %v5402_v27 = vpop.eup %5401  ;;  %v3899_v63 = vadd.f32 1.0, %v5400_v26 }
 0xe18   :  { %v3893_v32 = vadd.f32 1.0, %v5402_v27 }
 0xe19   :  { %5403 = vrcp.f32 %v3899_v63 }
 0xe1a   :  { %5405 = vrcp.f32 %v3893_v32 }
 0xe22   :  { %v3881_v30 = vpop.f32.mrf.mxu0 }
 0xe23   :  { %v3888_v8 = vadd.f32 %v3881_v30, %v2351_v10 }
 0xe24   :  { %v3883_v34 = vpop.f32.mrf.mxu0 }
 0xe25   :  { %5407 = vtanh.f32 %v3888_v8  ;;  %v3889_v6 = vadd.f32 %v3883_v34, %v2353_v45  ;;  %v10207_v34 = vld [vmem:[#allocation74_spill] sm:$0xff] }
 0xe26   :  { %v5404_v5 = vpop.eup %5403 }
 0xe27   :  { %v4715_v19 = vmul.f32 -1.442695, %v3889_v6  ;;  %v5406_v33 = vpop.eup %5405  ;;  %v3909_v9 = vmul.f32 %v5404_v5, %v9073_v12  ;;  %v4738_v12 = vld [vmem:[%s9573_s8 + $0x318] sm:$0xff]  ;;  %v10209_v5 = vld [vmem:[#allocation70_spill] sm:$0xff] }
 0xe28   :  { %v10208_v6 = vld [vmem:[#allocation72_spill] sm:$0xff] }
 0xe29   :  { %5409 = vpow2.f32 %v4715_v19  ;;  %v2246_v19 = vadd.f32 %v10208_v6, %v10207_v34  ;;  %v5611_v6 = vld [vmem:[%s9571_s6 + $0x50] sm:$0xff] }
 0xe32   :  { %v5408_v44 = vpop.eup %5407 }
 0xe33   :  { %v3910_v36 = vmul.f32 %v5408_v44, %v5406_v33  ;;  %v2244_v33 = vadd.f32 %v10209_v5, %v8133_v23  ;;  %v5613_v5 = vld [vmem:[%s9571_s6 + $0x30] sm:$0xff] }
 0xe35   :  { %v9220_v18 = vadd.f32 %v3910_v36, %v3909_v9 }
 0xe36   :  { %v5410_v26 = vpop.eup %5409 }
 0xe37   :  { %v3906_v27 = vadd.f32 1.0, %v5410_v26  ;;  %5411 = vtanh.f32 %v9220_v18 }
 0xe39   :  { %5413 = vrcp.f32 %v3906_v27 }
 0xe44   :  { %v5412_v63 = vpop.eup %5411 }
 0xe46   :  { %v5414_v32 = vpop.eup %5413 }
 0xe47   :  { %v3913_v51 = vmul.f32 %v5414_v32, %v5412_v63 }
 0xe49   :  { %5115 = vmatmul.mubr.f32.vlgmr.msra.gmra.mxu1 %v3913_v51  ;;  %4077 = vmatmul.mubr.f32.vlgmr.msra.gmra.mxu0 %v3913_v51 }
 0xe4a   :  { %4084 = vmatpush1.msra.mxu1 %v8493_v48  ;;  %4147 = vmatprep.mubr.f32.mxu1 %v9962_v42  ;;  %v5579_v48 = vld [vmem:[%s9571_s6 + $0x1e8] sm:$0xff] }
 0xe4b   :  { %4085 = vmatprep.subr.mxu1 %v8500_v47  ;;  %5149 = vmatprep.mubr.msk.f32.mxu0 %vm5654_vm0, %v9962_v42  ;;  %v5580_v47 = vld [vmem:[%s9571_s6 + $0x1e0] sm:$0xff] }
 0xe4c   :  { %4086 = vmatpush1.msra.mxu1 %v8508_v7  ;;  %v5581_v7 = vld [vmem:[%s9571_s6 + $0x1c8] sm:$0xff] }
 0xe4d   :  { %4087 = vmatprep.subr.mxu1 %v8514_v62  ;;  %v5582_v62 = vld [vmem:[%s9571_s6 + $0x1c0] sm:$0xff] }
 0xe4e   :  { %4088 = vmatpush1.msra.mxu1 %v8520_v29  ;;  %v5583_v29 = vld [vmem:[%s9571_s6 + $0x1a8] sm:$0xff] }
 0xe4f   :  { %4089 = vmatprep.subr.mxu1 %v8526_v31  ;;  %v10188_v31 = vld [vmem:[#allocation52_spill] sm:$0xff] }
 0xe50   :  { %4090 = vmatpush1.msra.mxu1 %v8532_v41  ;;  %v10189_v41 = vld [vmem:[#allocation55_spill] sm:$0xff] }
 0xe51   :  { %4091 = vmatprep.subr.mxu1 %v8538_v53  ;;  %v10190_v53 = vld [vmem:[#allocation14_spill] sm:$0xff] }
 0xe52   :  { %4092 = vmatpush1.msra.mxu1 %v8544_v46  ;;  %v10191_v46 = vld [vmem:[#allocation39_spill] sm:$0xff] }
 0xe53   :  { %4093 = vmatprep.subr.mxu1 %v8550_v24  ;;  %v10192_v24 = vld [vmem:[#allocation19_spill] sm:$0xff] }
 0xe54   :  { %4094 = vmatpush1.msra.mxu1 %v8556_v56  ;;  %v10193_v56 = vld [vmem:[#allocation21_spill] sm:$0xff] }
 0xe55   :  { %4095 = vmatprep.subr.mxu1 %v8562_v14  ;;  %v10194_v14 = vld [vmem:[#allocation23_spill] sm:$0xff] }
 0xe56   :  { %4096 = vmatpush1.msra.mxu1 %v8568_v58  ;;  %v10195_v58 = vld [vmem:[#allocation25_spill] sm:$0xff] }
 0xe57   :  { %4097 = vmatprep.subr.mxu1 %v8574_v60  ;;  %v10196_v60 = vld [vmem:[#allocation27_spill] sm:$0xff] }
 0xe58   :  { %4098 = vmatpush1.msra.mxu1 %v8580_v40  ;;  %v10197_v40 = vld [vmem:[#allocation33_spill] sm:$0xff] }
 0xe59   :  { %4099 = vmatprep.subr.mxu1 %v8586_v43  ;;  %v10198_v43 = vld [vmem:[#allocation34_spill] sm:$0xff] }
 0xe5a   :  { %4100 = vmatpush1.msra.mxu1 %v8592_v1  ;;  %v10199_v1 = vld [vmem:[#allocation30_spill] sm:$0xff] }
 0xe5b   :  { %4101 = vmatprep.subr.mxu1 %v8598_v16  ;;  %v10200_v16 = vld [vmem:[#allocation28_spill] sm:$0xff] }
 0xe5c   :  { %4102 = vmatpush1.msra.mxu1 %v8604_v22  ;;  %v10201_v22 = vld [vmem:[#allocation29_spill] sm:$0xff] }
 0xe5d   :  { %4103 = vmatprep.subr.mxu1 %v8610_v39  ;;  %v10202_v39 = vld [vmem:[#allocation78_spill] sm:$0xff] }
 0xe5e   :  { %4104 = vmatpush1.msra.mxu1 %v8616_v28  ;;  %v10203_v28 = vld [vmem:[#allocation31_spill] sm:$0xff] }
 0xe5f   :  { %4105 = vmatprep.subr.mxu1 %v8622_v13  ;;  %v10204_v13 = vld [vmem:[#allocation17_spill] sm:$0xff] }
 0xe60   :  { %4106 = vmatpush1.msra.mxu1 %v8628_v0  ;;  %v10205_v0 = vld [vmem:[#allocation48_spill] sm:$0xff] }
 0xe61   :  { %4107 = vmatprep.subr.mxu1 %v8634_v61  ;;  %v4750_v61 = vld [vmem:[%s9573_s8 + $0x378] sm:$0xff] }
 0xe62   :  { %4108 = vmatpush1.msra.mxu1 %v8640_v59  ;;  %5118 = vmatpush3.msra.mxu0 %v4750_v61  ;;  %v4749_v59 = vld [vmem:[%s9573_s8 + $0x370] sm:$0xff] }
 0xe63   :  { %4109 = vmatprep.subr.mxu1 %v8646_v2  ;;  %5119 = vmatprep.subr.mxu0 %v9962_v42  ;;  %v4748_v2 = vld [vmem:[%s9573_s8 + $0x368] sm:$0xff]  ;;  %v5589_v61 = vld [vmem:[%s9571_s6 + $0x1b0] sm:$0xff] }
 0xe64   :  { %4110 = vmatpush1.msra.mxu1 %v8652_v20  ;;  %5120 = vmatpush3.msra.mxu0 %v4749_v59  ;;  %v4747_v20 = vld [vmem:[%s9573_s8 + $0x360] sm:$0xff]  ;;  %v5590_v59 = vld [vmem:[%s9571_s6 + $0x198] sm:$0xff] }
 0xe65   :  { %4111 = vmatprep.subr.mxu1 %v8658_v57  ;;  %5121 = vmatprep.subr.mxu0 %v9962_v42  ;;  %v4746_v57 = vld [vmem:[%s9573_s8 + $0x358] sm:$0xff] }
 0xe66   :  { %4112 = vmatpush1.msra.mxu1 %v8664_v37  ;;  %5122 = vmatpush3.msra.mxu0 %v4748_v2  ;;  %v4745_v37 = vld [vmem:[%s9573_s8 + $0x350] sm:$0xff] }
 0xe67   :  { %4113 = vmatprep.subr.mxu1 %v8670_v4  ;;  %5123 = vmatprep.subr.mxu0 %v9962_v42  ;;  %v4744_v4 = vld [vmem:[%s9573_s8 + $0x348] sm:$0xff]  ;;  %v5591_v2 = vld [vmem:[%s9571_s6 + $0x190] sm:$0xff] }
 0xe68   :  { %4114 = vmatpush1.msra.mxu1 %v8676_v25  ;;  %5124 = vmatpush3.msra.mxu0 %v4747_v20  ;;  %v4743_v25 = vld [vmem:[%s9573_s8 + $0x340] sm:$0xff]  ;;  %v5592_v20 = vld [vmem:[%s9571_s6 + $0x178] sm:$0xff] }
 0xe69   :  { %4148 = vmatmul.mubr.f32.vlgmr.msra.gmra.mxu1 %v3913_v51  ;;  %4280 = vmatprep.subr.mxu1 %v5579_v48  ;;  %v10210_v48 = vld [vmem:[#allocation71_spill] sm:$0xff] }
 0xe6a   :  { %4281 = vmatpush1.msra.mxu1 %v5580_v47  ;;  %4344 = vmatprep.mubr.f32.mxu1 %v9962_v42  ;;  %v2357_v47 = vadd.f32 %v10210_v48, %v8158_v3  ;;  %v4762_v48 = vld [vmem:[%s9573_s8 + $0x3c0] sm:$0xff] }
 0xe6b   :  { %4282 = vmatprep.subr.mxu1 %v5581_v7  ;;  %5125 = vmatprep.subr.mxu0 %v9962_v42 }
 0xe6c   :  { %4283 = vmatpush1.msra.mxu1 %v5582_v62  ;;  %5126 = vmatpush3.msra.mxu0 %v4746_v57  ;;  %v10211_v62 = vld [vmem:[#allocation36_spill] sm:$0xff]  ;;  %v5593_v57 = vld [vmem:[%s9571_s6 + $0x170] sm:$0xff] }
 0xe6d   :  { %4284 = vmatprep.subr.mxu1 %v5583_v29  ;;  %5127 = vmatprep.subr.mxu0 %v9962_v42  ;;  %v2359_v29 = vadd.f32 %v10211_v62, %v10071_v38  ;;  %v4759_v62 = vld [vmem:[%s9573_s8 + $0x3a8] sm:$0xff] }
 0xe6e   :  { %4285 = vmatpush1.msra.mxu1 %v8689_v35  ;;  %5128 = vmatpush3.msra.mxu0 %v4745_v37  ;;  %v4742_v35 = vld [vmem:[%s9573_s8 + $0x338] sm:$0xff] }
 0xe6f   :  { %4286 = vmatprep.subr.mxu1 %v8695_v52  ;;  %5129 = vmatprep.subr.mxu0 %v9962_v42  ;;  %v4741_v52 = vld [vmem:[%s9573_s8 + $0x330] sm:$0xff]  ;;  %v5594_v37 = vld [vmem:[%s9571_s6 + $0x158] sm:$0xff] }
 0xe70   :  { %4287 = vmatpush1.msra.mxu1 %v8701_v55  ;;  %5130 = vmatpush3.msra.mxu0 %v4744_v4  ;;  %v4740_v55 = vld [vmem:[%s9573_s8 + $0x328] sm:$0xff]  ;;  %v5595_v4 = vld [vmem:[%s9571_s6 + $0x150] sm:$0xff] }
 0xe71   :  { %4288 = vmatprep.subr.mxu1 %v8707_v15  ;;  %5131 = vmatprep.subr.mxu0 %v9962_v42  ;;  %v4739_v15 = vld [vmem:[%s9573_s8 + $0x320] sm:$0xff] }
 0xe72   :  { %4289 = vmatpush1.msra.mxu1 %v10157_v21  ;;  %5132 = vmatpush3.msra.mxu0 %v4743_v25  ;;  %v4737_v21 = vld [vmem:[%s9573_s8 + $0x310] sm:$0xff]  ;;  %v5596_v25 = vld [vmem:[%s9571_s6 + $0x138] sm:$0xff] }
 0xe73   :  { %4290 = vmatprep.subr.mxu1 %v10158_v54  ;;  %5133 = vmatprep.subr.mxu0 %v9962_v42  ;;  %v4736_v54 = vld [vmem:[%s9573_s8 + $0x308] sm:$0xff] }
 0xe74   :  { %4291 = vmatpush1.msra.mxu1 %v10159_v50  ;;  %5134 = vmatpush3.msra.mxu0 %v4742_v35  ;;  %v4735_v50 = vld [vmem:[%s9573_s8 + $0x300] sm:$0xff]  ;;  %v5597_v35 = vld [vmem:[%s9571_s6 + $0x130] sm:$0xff] }
 0xe75   :  { %4292 = vmatprep.subr.mxu1 %v10160_v17  ;;  %5135 = vmatprep.subr.mxu0 %v9962_v42  ;;  %v5584_v17 = vld [vmem:[%s9571_s6 + $0x1f8] sm:$0xff] }
 0xe76   :  { %4293 = vmatpush1.msra.mxu1 %v10161_v11  ;;  %5136 = vmatpush3.msra.mxu0 %v4741_v52  ;;  %v5598_v52 = vld [vmem:[%s9571_s6 + $0x118] sm:$0xff] }
 0xe77   :  { %4294 = vmatprep.subr.mxu1 %v10188_v31  ;;  %5137 = vmatprep.subr.mxu0 %v9962_v42 }
 0xe78   :  { %4295 = vmatpush1.msra.mxu1 %v10189_v41  ;;  %5138 = vmatpush3.msra.mxu0 %v4740_v55  ;;  %v5599_v55 = vld [vmem:[%s9571_s6 + $0x110] sm:$0xff] }
 0xe79   :  { %4296 = vmatprep.subr.mxu1 %v10190_v53  ;;  %5139 = vmatprep.subr.mxu0 %v9962_v42 }
 0xe7a   :  { %4297 = vmatpush1.msra.mxu1 %v10191_v46  ;;  %5140 = vmatpush3.msra.mxu0 %v4739_v15  ;;  %v5600_v15 = vld [vmem:[%s9571_s6 + $0xf8] sm:$0xff] }
 0xe7b   :  { %4298 = vmatprep.subr.mxu1 %v10192_v24  ;;  %5141 = vmatprep.subr.mxu0 %v9962_v42 }
 0xe7c   :  { %4299 = vmatpush1.msra.mxu1 %v10193_v56  ;;  %5142 = vmatpush3.msra.mxu0 %v4738_v12  ;;  %v5601_v12 = vld [vmem:[%s9571_s6 + $0xf0] sm:$0xff] }
 0xe7d   :  { %4300 = vmatprep.subr.mxu1 %v10194_v14  ;;  %5143 = vmatprep.subr.mxu0 %v9962_v42 }
 0xe7e   :  { %4301 = vmatpush1.msra.mxu1 %v10195_v58  ;;  %5144 = vmatpush3.msra.mxu0 %v4737_v21  ;;  %v5602_v21 = vld [vmem:[%s9571_s6 + $0xd8] sm:$0xff] }
 0xe7f   :  { %4302 = vmatprep.subr.mxu1 %v10196_v60  ;;  %5145 = vmatprep.subr.mxu0 %v9962_v42 }
 0xe80   :  { %4303 = vmatpush1.msra.mxu1 %v10197_v40  ;;  %5146 = vmatpush3.msra.mxu0 %v4736_v54  ;;  %v5603_v54 = vld [vmem:[%s9571_s6 + $0xd0] sm:$0xff] }
 0xe81   :  { %4304 = vmatprep.subr.mxu1 %v10198_v43  ;;  %5147 = vmatprep.subr.mxu0 %v9962_v42 }
 0xe82   :  { %4305 = vmatpush1.msra.mxu1 %v10199_v1  ;;  %5148 = vmatpush3.msra.mxu0 %v4735_v50  ;;  %v5604_v50 = vld [vmem:[%s9571_s6 + $0xb8] sm:$0xff] }
 0xe83   :  { %4306 = vmatprep.subr.mxu1 %v10200_v16  ;;  %4351 = vmatprep.subr.mxu0 %v5584_v17  ;;  %v5605_v17 = vld [vmem:[%s9571_s6 + $0xb0] sm:$0xff] }
 0xe84   :  { %4307 = vmatpush1.msra.mxu1 %v10201_v22 }
 0xe85   :  { %4308 = vmatprep.subr.mxu1 %v10202_v39 }
 0xe86   :  { %4309 = vmatpush1.msra.mxu1 %v10203_v28  ;;  %v5586_v28 = vld [vmem:[%s9571_s6 + $0x1d8] sm:$0xff] }
 0xe87   :  { %4310 = vmatprep.subr.mxu1 %v10204_v13  ;;  %v5587_v13 = vld [vmem:[%s9571_s6 + $0x1d0] sm:$0xff] }
 0xe88   :  { %4311 = vmatpush1.msra.mxu1 %v10205_v0  ;;  %v5588_v0 = vld [vmem:[%s9571_s6 + $0x1b8] sm:$0xff] }
 0xe89   :  { %5152 = vmatprep.subr.mxu1 %v9962_v42 }
 0xf09   :  { %v4000_v11 = vpop.f32.mrf.mxu1  ;;  %v4078_v8 = vpop.f32.mrf.mxu0 }
 0xf0a   :  { %v9368_v10 = vadd.f32 %v4000_v11, %v10206_v49  ;;  %v4154_v9 = vadd.f32 %v4078_v8, %v2244_v33  ;;  %v5606_v11 = vld [vmem:[%s9571_s6 + $0x98] sm:$0xff]  ;;  %v5607_v8 = vld [vmem:[%s9571_s6 + $0x90] sm:$0xff] }
 0xf0b   :  { %v5116_v30 = vpop.f32.mrf.mxu1  ;;  %v4080_v45 = vpop.f32.mrf.mxu0  ;;  %v5608_v49 = vld [vmem:[%s9571_s6 + $0x78] sm:$0xff] }
 0xf0c   :  { %v4155_v44 = vadd.f32 %v4080_v45, %v2246_v19  ;;  %v4732_v26 = vmul.f32 -1.442695, %v4154_v9  ;;  %v5609_v30 = vld [vmem:[%s9571_s6 + $0x70] sm:$0xff]  ;;  %v5610_v45 = vld [vmem:[%s9571_s6 + $0x58] sm:$0xff] }
 0xf0d   :  { %v5612_v19 = vld [vmem:[%s9571_s6 + $0x38] sm:$0xff] }
 0xf0e   :  { %v4733_v36 = vmul.f32 -1.442695, %v4155_v44  ;;  %v5614_v33 = vld [vmem:[%s9571_s6 + $0x18] sm:$0xff]  ;;  %v5615_v44 = vld [vmem:[%s9571_s6 + $0x10] sm:$0xff] }
 0xf0f   :  { %v4769_v9 = vld [vmem:[%s9573_s8 + $0x3f8] sm:$0xff] }
 0xf10   :  { %5415 = vpow2.f32 %v4733_v36  ;;  %v4768_v36 = vld [vmem:[%s9573_s8 + $0x3f0] sm:$0xff] }
 0xf11   :  { %5417 = vpow2.f32 %v4732_v26  ;;  %v4767_v26 = vld [vmem:[%s9573_s8 + $0x3e8] sm:$0xff] }
 0xf1d   :  { %v5416_v27 = vpop.eup %5415 }
 0xf1e   :  { %v5418_v63 = vpop.eup %5417  ;;  %v4167_v32 = vadd.f32 1.0, %v5416_v27  ;;  %v4766_v27 = vld [vmem:[%s9573_s8 + $0x3e0] sm:$0xff] }
 0xf1f   :  { %v4161_v51 = vadd.f32 1.0, %v5418_v63  ;;  %v4765_v63 = vld [vmem:[%s9573_s8 + $0x3d8] sm:$0xff] }
 0xf20   :  { %5419 = vrcp.f32 %v4167_v32  ;;  %v4764_v32 = vld [vmem:[%s9573_s8 + $0x3d0] sm:$0xff] }
 0xf21   :  { %5421 = vrcp.f32 %v4161_v51  ;;  %v4763_v51 = vld [vmem:[%s9573_s8 + $0x3c8] sm:$0xff] }
 0xf29   :  { %v4149_v7 = vpop.f32.mrf.mxu1 }
 0xf2a   :  { %v4156_v31 = vadd.f32 %v4149_v7, %v2357_v47  ;;  %v4761_v47 = vld [vmem:[%s9573_s8 + $0x3b8] sm:$0xff]  ;;  %v4760_v7 = vld [vmem:[%s9573_s8 + $0x3b0] sm:$0xff] }
 0xf2b   :  { %v4151_v41 = vpop.f32.mrf.mxu1 }
 0xf2c   :  { %5423 = vtanh.f32 %v4156_v31  ;;  %v4157_v53 = vadd.f32 %v4151_v41, %v2359_v29  ;;  %v4758_v29 = vld [vmem:[%s9573_s8 + $0x3a0] sm:$0xff]  ;;  %v4757_v31 = vld [vmem:[%s9573_s8 + $0x398] sm:$0xff]  ;;  %v4756_v41 = vld [vmem:[%s9573_s8 + $0x390] sm:$0xff] }
 0xf2d   :  { %v5420_v24 = vpop.eup %5419 }
 0xf2e   :  { %v4734_v46 = vmul.f32 -1.442695, %v4157_v53  ;;  %v5422_v56 = vpop.eup %5421  ;;  %v4177_v58 = vmul.f32 %v5420_v24, %v9220_v18  ;;  %v5585_v18 = vld [vmem:[%s9571_s6 + $0x1f0] sm:$0xff]  ;;  %v4755_v53 = vld [vmem:[%s9573_s8 + $0x388] sm:$0xff] }
 0xf30   :  { %5425 = vpow2.f32 %v4734_v46  ;;  %v4754_v46 = vld [vmem:[%s9573_s8 + $0x380] sm:$0xff] }
 0xf39   :  { %v5424_v14 = vpop.eup %5423 }
 0xf3a   :  { %v4178_v60 = vmul.f32 %v5424_v14, %v5422_v56 }
 0xf3c   :  { %v9379_v40 = vadd.f32 %v4178_v60, %v4177_v58 }
 0xf3d   :  { %v5426_v43 = vpop.eup %5425 }
 0xf3e   :  { %v4174_v1 = vadd.f32 1.0, %v5426_v43  ;;  %5427 = vtanh.f32 %v9379_v40  ;;  %v10212_v43 = vld [vmem:[#allocation76_spill] sm:$0xff] }
 0xf40   :  { %5429 = vrcp.f32 %v4174_v1  ;;  %v2252_v1 = vadd.f32 %v10212_v43, %v10207_v34 }
 0xf4b   :  { %v5428_v16 = vpop.eup %5427 }
 0xf4d   :  { %v5430_v22 = vpop.eup %5429 }
 0xf4e   :  { %v9382_v39 = vmul.f32 %v5430_v22, %v5428_v16  ;;  %v10213_v16 = vld [vmem:[#allocation73_spill] sm:$0xff] }
 0xf4f   :  { %v2250_v22 = vadd.f32 %v10213_v16, %v8133_v23 }
 0xf50   :  { %5150 = vmatmul.mubr.f32.vlgmr.msra.gmra.mxu0 %v9382_v39  ;;  %4345 = vmatmul.mubr.f32.vlgmr.msra.gmra.mxu1 %v9382_v39 }
 0xf51   :  { %4352 = vmatpush1.msra.mxu0 %v5585_v18  ;;  %4415 = vmatprep.mubr.f32.mxu0 %v9962_v42 }
 0xf52   :  { %4353 = vmatprep.subr.mxu0 %v5586_v28  ;;  %5184 = vmatprep.mubr.msk.f32.mxu1 %vm5654_vm0, %v9962_v42 }
 0xf53   :  { %4354 = vmatpush1.msra.mxu0 %v5587_v13  ;;  %5153 = vmatpush3.msra.mxu1 %v4769_v9 }
 0xf54   :  { %4355 = vmatprep.subr.mxu0 %v5588_v0  ;;  %5154 = vmatprep.subr.mxu1 %v9962_v42 }
 0xf55   :  { %4356 = vmatpush1.msra.mxu0 %v5589_v61  ;;  %5155 = vmatpush3.msra.mxu1 %v4768_v36 }
 0xf56   :  { %4357 = vmatprep.subr.mxu0 %v5590_v59  ;;  %5156 = vmatprep.subr.mxu1 %v9962_v42 }
 0xf57   :  { %4358 = vmatpush1.msra.mxu0 %v5591_v2  ;;  %5157 = vmatpush3.msra.mxu1 %v4767_v26 }
 0xf58   :  { %4359 = vmatprep.subr.mxu0 %v5592_v20  ;;  %5158 = vmatprep.subr.mxu1 %v9962_v42 }
 0xf59   :  { %4360 = vmatpush1.msra.mxu0 %v5593_v57  ;;  %5159 = vmatpush3.msra.mxu1 %v4766_v27  ;;  %v10215_v57 = vld [vmem:[#allocation77_spill] sm:$0xff] }
 0xf5a   :  { %4361 = vmatprep.subr.mxu0 %v5594_v37  ;;  %5160 = vmatprep.subr.mxu1 %v9962_v42  ;;  %v2365_v34 = vadd.f32 %v10215_v57, %v10071_v38 }
 0xf5b   :  { %4362 = vmatpush1.msra.mxu0 %v5595_v4  ;;  %5161 = vmatpush3.msra.mxu1 %v4765_v63 }
 0xf5c   :  { %4363 = vmatprep.subr.mxu0 %v5596_v25  ;;  %5162 = vmatprep.subr.mxu1 %v9962_v42 }
 0xf5d   :  { %4364 = vmatpush1.msra.mxu0 %v5597_v35  ;;  %5163 = vmatpush3.msra.mxu1 %v4764_v32 }
 0xf5e   :  { %4365 = vmatprep.subr.mxu0 %v5598_v52  ;;  %5164 = vmatprep.subr.mxu1 %v9962_v42 }
 0xf5f   :  { %4366 = vmatpush1.msra.mxu0 %v5599_v55  ;;  %5165 = vmatpush3.msra.mxu1 %v4763_v51 }
 0xf60   :  { %4367 = vmatprep.subr.mxu0 %v5600_v15  ;;  %5166 = vmatprep.subr.mxu1 %v9962_v42 }
 0xf61   :  { %4368 = vmatpush1.msra.mxu0 %v5601_v12  ;;  %5167 = vmatpush3.msra.mxu1 %v4762_v48 }
 0xf62   :  { %4369 = vmatprep.subr.mxu0 %v5602_v21  ;;  %5168 = vmatprep.subr.mxu1 %v9962_v42 }
 0xf63   :  { %4370 = vmatpush1.msra.mxu0 %v5603_v54  ;;  %5169 = vmatpush3.msra.mxu1 %v4761_v47 }
 0xf64   :  { %4371 = vmatprep.subr.mxu0 %v5604_v50  ;;  %5170 = vmatprep.subr.mxu1 %v9962_v42 }
 0xf65   :  { %4372 = vmatpush1.msra.mxu0 %v5605_v17  ;;  %5171 = vmatpush3.msra.mxu1 %v4760_v7 }
 0xf66   :  { %4373 = vmatprep.subr.mxu0 %v5606_v11  ;;  %5172 = vmatprep.subr.mxu1 %v9962_v42 }
 0xf67   :  { %4374 = vmatpush1.msra.mxu0 %v5607_v8  ;;  %5173 = vmatpush3.msra.mxu1 %v4759_v62  ;;  %v4770_v8 = vld [vmem:[%s9574_s9] ss:$0 sm:$0xff]  ;;  %s4571_s9 = sshll.u32 %s5655_s5, 4  ;;  %s4572_s9 = int_to_ptr.vmem [resolvable:$true] %s4571_s9 }
 0xf68   :  { %4375 = vmatprep.subr.mxu0 %v5608_v49  ;;  %5174 = vmatprep.subr.mxu1 %v9962_v42  ;;  %s5628_s6 = scalar_lea.vmem %s4572_s9, 32  ;;  %p5633_p6 = scmp.lt.s32.totalorder %s4572_s9, %s4572_s9 }
 0xf69   :  { %4376 = vmatpush1.msra.mxu0 %v5609_v30  ;;  %5175 = vmatpush3.msra.mxu1 %v4758_v29  ;;  %p5629_p5 = scmp.ne.s32.totalorder %s4572_s9, %s5628_s6  ;;  %p5634_p7 = scmp.lt.s32.totalorder %s5628_s6, %s5628_s6 }
 0xf6a   :  { %4377 = vmatprep.subr.mxu0 %v5610_v45  ;;  %5176 = vmatprep.subr.mxu1 %v9962_v42 }
 0xf6b   :  { %4378 = vmatpush1.msra.mxu0 %v5611_v6  ;;  %5177 = vmatpush3.msra.mxu1 %v4757_v31  ;;  %p5635_p8 = por %p5634_p7, %p5633_p6 }
 0xf6c   :  { %4379 = vmatprep.subr.mxu0 %v5612_v19  ;;  %5178 = vmatprep.subr.mxu1 %v9962_v42 }
 0xf6d   :  { %4380 = vmatpush1.msra.mxu0 %v5613_v5  ;;  %5179 = vmatpush3.msra.mxu1 %v4756_v41  ;;  %p5636_p9 = pnand %p5635_p8, %p5629_p5 }
 0xf6e   :  { %4381 = vmatprep.subr.mxu0 %v5614_v33  ;;  %5180 = vmatprep.subr.mxu1 %v9962_v42 }
 0xf6f   :  { %4382 = vmatpush1.msra.mxu0 %v5615_v44  ;;  %5181 = vmatpush3.msra.mxu1 %v4755_v53 }
 0xf70   :  { %4416 = vmatmul.mubr.f32.vlgmr.msra.gmra.mxu0 %v9382_v39  ;;  %5182 = vmatprep.subr.mxu1 %v9962_v42 }
 0xf71   :  { %5183 = vmatpush3.msra.mxu1 %v4754_v46 }
0x1010   :  { %v4268_v24 = vpop.f32.mrf.mxu0  ;;  %v4346_v56 = vpop.f32.mrf.mxu1 }
0x1011   :  { %v4272_v14 = vadd.f32 %v4268_v24, %v9368_v10  ;;  %v4422_v18 = vadd.f32 %v4346_v56, %v2250_v22  ;;  %v10214_v10 = vld [vmem:[#allocation75_spill] sm:$0xff] }
0x1012   :  { %v5151_v58 = vpop.f32.mrf.mxu0  ;;  %v4348_v60 = vpop.f32.mrf.mxu1  ;;  %v2363_v2 = vadd.f32 %v10214_v10, %v8158_v3 }
0x1013   :  { %v4423_v39 = vadd.f32 %v4348_v60, %v2252_v1  ;;  %v4751_v13 = vmul.f32 -1.442695, %v4422_v18 }
0x1015   :  { %v4752_v28 = vmul.f32 -1.442695, %v4423_v39 }
0x1017   :  { %5431 = vpow2.f32 %v4752_v28 }
0x1018   :  { %5433 = vpow2.f32 %v4751_v13 }
0x1024   :  { %v5432_v42 = vpop.eup %5431 }
0x1025   :  { %v5434_v0 = vpop.eup %5433  ;;  %v4435_v61 = vadd.f32 1.0, %v5432_v42 }
0x1026   :  { %v4429_v59 = vadd.f32 1.0, %v5434_v0 }
0x1027   :  { %5435 = vrcp.f32 %v4435_v61 }
0x1028   :  { %5437 = vrcp.f32 %v4429_v59 }
0x1030   :  { %v4417_v20 = vpop.f32.mrf.mxu0 }
0x1031   :  { %v4424_v37 = vadd.f32 %v4417_v20, %v2363_v2 }
0x1032   :  { %v4419_v23 = vpop.f32.mrf.mxu0 }
0x1033   :  { %5439 = vtanh.f32 %v4424_v37  ;;  %v4425_v4 = vadd.f32 %v4419_v23, %v2365_v34 }
0x1034   :  { %v5436_v35 = vpop.eup %5435 }
0x1035   :  { %v4753_v25 = vmul.f32 -1.442695, %v4425_v4  ;;  %v5438_v52 = vpop.eup %5437  ;;  %v4445_v15 = vmul.f32 %v5436_v35, %v9379_v40 }
0x1037   :  { %5441 = vpow2.f32 %v4753_v25 }
0x1040   :  { %v5440_v55 = vpop.eup %5439 }
0x1041   :  { %v4446_v12 = vmul.f32 %v5440_v55, %v5438_v52 }
0x1043   :  { %v4447_v21 = vadd.f32 %v4446_v12, %v4445_v15 }
0x1044   :  { %v5442_v3 = vpop.eup %5441 }
0x1045   :  { %v4442_v54 = vadd.f32 1.0, %v5442_v3  ;;  %5443 = vtanh.f32 %v4447_v21 }
0x1047   :  { %5445 = vrcp.f32 %v4442_v54 }
0x1052   :  { %v5444_v38 = vpop.eup %5443 }
0x1054   :  { %v5446_v50 = vpop.eup %5445 }
0x1055   :  { %v4449_v17 = vmul.f32 %v5446_v50, %v5444_v38 }
0x1057   :  { %5185 = vmatmul.mubr.f32.vlgmr.msra.gmra.mxu1 %v4449_v17 }
0x1117   :  { %v4536_v11 = vpop.f32.mrf.mxu1 }
0x1118   :  { %v4540_v49 = vadd.f32 %v4536_v11, %v4272_v14 }
0x1119   :  { %v5186_v30 = vpop.f32.mrf.mxu1 }
0x111a   :  { %v4550_v45 = vadd.f32 %v4770_v8, %v4540_v49 }
0x111c   :  { %v4552_v40 = vsel %vm4551_vm1, %v4550_v45, -inf }
0x111d   :  { %4553 = vmax.xlane.f32.xlu0 %v4552_v40 }
0x11a6   :  { %v4554_v6 = vpop.xlane.xlu0 %4553 }
0x11a7   :  { %v4555_v19 = vsub.f32 %v4550_v45, %v4554_v6 }
0x11a9   :  { %v4556_v5 = vmul.f32 1.442695, %v4555_v19 }
0x11ab   :  { %5447 = vpow2.f32 %v4556_v5 }
0x11b8   :  { %v5448_v33 = vpop.eup %5447 }
0x11b9   :  { %v4558_v44 = vsel %vm4551_vm1, %v5448_v33, 0.0 }
0x11ba   :  { %4559 = vadd.xlane.f32.xlu0 %v4558_v44 }
0x1243   :  { %v4560_v9 = vpop.xlane.xlu0 %4559 }
0x1244   :  { %5449 = vlog2.f32 %v4560_v9 }
0x1251   :  { %v5450_v36 = vpop.eup %5449 }
0x1252   :  { %v4562_v26 = vmul.f32 0.6931472, %v5450_v36 }
0x1254   :  { %v4563_v27 = vsub.f32 %v4555_v19, %v4562_v26 }
0x1256   :  { %4564 = vst.msk [vmem:[#allocation9] sm:$0x3] %vm4551_vm1, %v4563_v27 }
0x1257   :  { %5639 = shalt.err (!%p5636_p9)
}
0x1258   :  { %4574 = dma.vmem_to_hbm [thread:$0]  %s4572_s9, 32, %s9575_s10, [#allocation10]  }
0x1259   :  { %5650 = dma.done.wait [#allocation10], 32  }
0x125a   :  { %5651 = vsyncadd [#allocation10], 4294967264 }
0x125b   :  { %4578 = vsyncpa [#allocation10], 1 }

</bundles_post_ra>
